<compile_context>
chip_gen: v5e
topology: v5e:2x2
jax: 0.10.0
libtpu: 0.0.40
codegen_flags: <defaults>
</compile_context>

<pallas_src>
import functools

import numpy as np
import jax
import jax.numpy as jnp
from jax import lax
from jax.experimental import pallas as pl
from jax.experimental.pallas import tpu as pltpu

# ----------------------------- configuration --------------------------------
BATCH = 2
IN_CH = 3
IMG = 128                 # input spatial size (H = W); backbone stride = 32
BACKBONE_CH = 256         # stand-in for ResNet50's 2048 output channels
ASPP_CH = 256             # ASPPModule out_channels
FEAT_DIM = 128            # self.featDim
KEY_DIM = 128             # key / query projection dim (hard-coded 128)
NUM_CLASSES = 6           # small num_classes for the synthetic run
ATROUS = (6, 12, 18)
PROTOTYPE_N = 1           # prototypes.size(2) in the DomainLabel==0 path


# ------------------------------ fused kernel ---------------------------------
def _fused_forward_kernel(
    xs_ref,            # [1, hw4, IN_CH*1024]  bf16  spatial-major space-to-depth input
    bb_w_ref,          # [IN_CH*1024, 256]     bf16  stand-in stem weight (transposed)
    aspp_w_ref,        # [256, 3*256]          bf16  3 dilated center taps stacked, BN scale folded
    aspp_pool_w_ref,   # [256, 256]            bf16  BN scale folded
    proj_w_ref,        # [3*256, 256]          bf16  projection rows for the 3 branches
    proj_pool_w_ref,   # [256, 256]            bf16  projection rows for the pool branch
    dec_w_ref,         # [256, 9*128]          bf16  transposed-conv taps stacked
    dec_b_ref,         # [1, 128]              f32
    dec_s_ref,         # [9, hwf, hw4]         bf16  static 0/1 scatter (transposed)
    cls_w_ref,         # [K, 128]              bf16
    cls_b_ref,         # [K, 1]                f32
    key_w_ref,         # [128, 128]            bf16  (in, out)
    key_b_ref,         # [1, 128]              f32
    query_w_ref,       # [K*128, 128]          bf16  per-class query weights stacked
    query_b_ref,       # [K, 128]              f32
    up_m_ref,          # [hwf, hwup]           bf16  align_corners bilinear matrix
    # outputs (one block per batch element)
    out_ref,           # [1, K, hwf]           f32
    outup_ref,         # [1, K, hwup]          f32
    q_ref,             # [1, K, KEY_DIM]       f32
    proto_ref,         # [1, K, FEAT_DIM]      f32
    asspf_ref,         # [1, hwf, FEAT_DIM]    f32   spatial-major (lane-dense)
    asspfw_ref,        # [1, hwf, FEAT_DIM]    f32
    wmax_ref,          # [1, hwf, 1]           f32
    wmean_ref,         # [1, hwf, 1]           f32
    sim_ref,           # [1, hwf, K]           f32
    *, cluster_factor):
    f32 = jnp.float32
    bf16 = jnp.bfloat16

    hw4 = xs_ref.shape[1]
    n_taps = dec_s_ref.shape[0]
    hwf = dec_s_ref.shape[1]
    feat = dec_b_ref.shape[1]
    n_cls = cls_w_ref.shape[0]

    # ---- stand-in stride-32 backbone stem: 1x1 conv on space-to-depth + ReLU
    x4 = jnp.maximum(
        jnp.dot(xs_ref[0], bb_w_ref[...], preferred_element_type=f32), 0.0)   # [hw4, 256]
    x4_b = x4.astype(bf16)

    # ---- ASPP: 3 dilated branches collapse to their center taps (dilation >=
    #      feature extent) and run as ONE stacked matmul; BN scale pre-folded.
    br = jnp.maximum(
        jnp.dot(x4_b, aspp_w_ref[...], preferred_element_type=f32), 0.0)      # [hw4, 768]
    pooled = jnp.mean(x4, axis=0, keepdims=True).astype(bf16)                 # [1, 256]
    pf = jnp.maximum(
        jnp.dot(pooled, aspp_pool_w_ref[...], preferred_element_type=f32), 0.0)  # [1, 256]
    # 1x1 projection: branch chunk + (spatially constant) pool chunk broadcast
    proj = jnp.maximum(
        jnp.dot(br.astype(bf16), proj_w_ref[...], preferred_element_type=f32)
        + jnp.dot(pf.astype(bf16), proj_pool_w_ref[...], preferred_element_type=f32),
        0.0).astype(bf16)                                                     # [hw4, 256]

    # ---- ConvTranspose2d(256->128, k3, s2, p1, op1) + ReLU:
    #      one stacked tap matmul, then 9 static 0/1 row-scatter matmuls.
    y_all = jnp.dot(proj, dec_w_ref[...], preferred_element_type=f32).astype(bf16)  # [hw4, 1152]
    dec = jnp.zeros((hwf, feat), f32)
    for t in range(n_taps):
        dec = dec + jnp.dot(dec_s_ref[t], y_all[:, t * feat:(t + 1) * feat],
                            preferred_element_type=f32)                       # [hwf, 128]
    assp = jnp.maximum(dec + dec_b_ref[...], 0.0)                             # [hwf, 128]
    assp_b = assp.astype(bf16)
    asspf_ref[0] = assp

    # ---- pseudo labels -> per-class masked-mean prototypes (class-major)
    cls_w = cls_w_ref[...]
    pseudo = lax.dot_general(cls_w, assp_b, (((1,), (1,)), ((), ())),
                             preferred_element_type=f32) + cls_b_ref[...]     # [K, hwf]
    kio = lax.broadcasted_iota(jnp.int32, pseudo.shape, 0)
    maxv = jnp.max(pseudo, axis=0, keepdims=True)
    argmax = jnp.min(jnp.where(pseudo == maxv, kio, n_cls),
                     axis=0, keepdims=True)            # first-occurrence argmax
    onehot = (kio == argmax).astype(f32)                                      # [K, hwf]
    counts = jnp.sum(onehot, axis=1, keepdims=True)                           # [K, 1]
    sums = jnp.dot(onehot, assp, preferred_element_type=f32)                  # [K, 128] (f32)
    proto = sums / (counts + 1e-5)       # absent classes -> zero prototype
    proto_ref[0] = proto

    # ---- SingleKeyAttention: key conv + ALL per-class query convs as one
    #      block-masked [K, K*128] @ [K*128, 128] matmul.
    key = jnp.dot(assp_b, key_w_ref[...],
                  preferred_element_type=f32) + key_b_ref[...]                # [hwf, 128]
    proto_b = proto.astype(bf16)
    row = lax.broadcasted_iota(jnp.int32, proto_b.shape, 0)
    zerop = jnp.zeros_like(proto_b)
    masked = jnp.concatenate(
        [jnp.where(row == r, proto_b, zerop) for r in range(n_cls)], axis=1)  # [K, K*128]
    q = jnp.dot(masked, query_w_ref[...],
                preferred_element_type=f32) + query_b_ref[...]                # [K, 128]
    q_ref[0] = q

    sim = lax.dot_general(key.astype(bf16), q.astype(bf16),
                          (((1,), (1,)), ((), ())),
                          preferred_element_type=f32)                         # [hwf, K]
    sim_ref[0] = sim
    # softmax(sim / similarityCat.size(1) * prototypes.size(2), dim=classes)
    scaled = sim * (cluster_factor / n_cls)
    m = jnp.max(scaled, axis=1, keepdims=True)
    e = jnp.exp(scaled - m)
    sm = e / jnp.sum(e, axis=1, keepdims=True)
    wmax = jnp.max(sm, axis=1, keepdims=True)                                 # [hwf, 1]
    wmean = jnp.mean(sm, axis=1, keepdims=True)                               # [hwf, 1]
    wmax_ref[0] = wmax
    wmean_ref[0] = wmean
    asspw = assp * wmax                                                       # [hwf, 128]
    asspfw_ref[0] = asspw

    # ---- classifier on weighted features + bilinear upsample (one matmul)
    x_out = lax.dot_general(cls_w, asspw.astype(bf16), (((1,), (1,)), ((), ())),
                            preferred_element_type=f32) + cls_b_ref[...]      # [K, hwf]
    out_ref[0] = x_out
    outup_ref[0] = jnp.dot(x_out.astype(bf16), up_m_ref[...],
                           preferred_element_type=f32)                        # [K, hwup]


# ------------------------------- JAX glue ------------------------------------
def _bilinear_matrix(n_out, n_in):
    """Row-interpolation matrix for align_corners=True bilinear resize."""
    src = np.arange(n_out, dtype=np.float64) * (n_in - 1) / (n_out - 1)
    i0 = np.floor(src).astype(np.int64)
    i1 = np.minimum(i0 + 1, n_in - 1)
    frac = src - i0
    A = np.zeros((n_out, n_in), np.float32)
    A[np.arange(n_out), i0] += (1.0 - frac).astype(np.float32)
    A[np.arange(n_out), i1] += frac.astype(np.float32)
    return A


def _deconv_scatter(hi, wi, k=3, stride=2, pad=1):
    """Static 0/1 scatter matrices mapping input positions to output positions
    of ConvTranspose2d(k=3, s=2, p=1, output_padding=1): one [hi*wi, ho*wo]
    matrix per kernel tap."""
    ho, wo = stride * hi, stride * wi
    S = np.zeros((k * k, hi * wi, ho * wo), np.float32)
    for kh in range(k):
        for kw in range(k):
            for ih in range(hi):
                for iw in range(wi):
                    oh = stride * ih - pad + kh
                    ow = stride * iw - pad + kw
                    if 0 <= oh < ho and 0 <= ow < wo:
                        S[kh * k + kw, ih * wi + iw, oh * wo + ow] = 1.0
    return S


def init_params(key):
    keys = jax.random.split(key, 16)

    def norm(k, shape, s):
        return jax.random.normal(k, shape, jnp.float32) * s

    p = {}
    # stand-in backbone stem (stride-32 conv as space-to-depth + 1x1)
    p['bb_w'] = norm(keys[0], (BACKBONE_CH, IN_CH * 32 * 32), 0.02)
    # ASPP dilated 3x3 branches (full 3x3 weights; conv bias=False)
    p['aspp_w'] = norm(keys[1], (3, ASPP_CH, BACKBONE_CH, 3, 3), 0.02)
    p['aspp_pool_w'] = norm(keys[2], (ASPP_CH, BACKBONE_CH), 0.05)
    p['aspp_proj_w'] = norm(keys[3], (ASPP_CH, 4 * ASPP_CH), 0.05)
    # ConvTranspose2d(256 -> 128, k=3, s=2, p=1, op=1), PyTorch layout [Cin, Cout, kh, kw]
    p['deconv_w'] = norm(keys[4], (ASPP_CH, FEAT_DIM, 3, 3), 0.05)
    p['deconv_b'] = norm(keys[5], (FEAT_DIM,), 0.05)
    # classifier Conv2d(featDim -> num_classes, 1)
    p['cls_w'] = norm(keys[6], (NUM_CLASSES, FEAT_DIM), 0.05)
    p['cls_b'] = norm(keys[7], (NUM_CLASSES,), 0.05)
    # SingleKeyAttention: key conv + per-class query convs (all 1x1, with bias)
    p['key_w'] = norm(keys[8], (KEY_DIM, FEAT_DIM), 0.05)
    p['key_b'] = norm(keys[9], (KEY_DIM,), 0.05)
    p['query_w'] = norm(keys[10], (NUM_CLASSES, KEY_DIM, FEAT_DIM), 0.05)
    p['query_b'] = norm(keys[11], (NUM_CLASSES, KEY_DIM), 0.05)
    # BatchNorm (eval-mode PyTorch defaults): scale = 1/sqrt(var+eps), shift = 0
    p['bn_scale'] = jnp.full((ASPP_CH,), 1.0 / np.sqrt(1.0 + 1e-5), jnp.float32)
    return p


def forward(params, x):
    B, _, H, W = x.shape
    bf16 = jnp.bfloat16
    Hb, Wb = H // 32, W // 32
    hw4 = Hb * Wb
    Ht, Wt = 2 * Hb, 2 * Wb
    hwf = Ht * Wt
    Hu, Wu = H // 4, W // 4
    hwup = Hu * Wu
    s2d = IN_CH * 32 * 32

    # space-to-depth input, spatial-major (lane dim = 3072) for a contiguous DMA
    xs = (x.reshape(B, IN_CH, Hb, 32, Wb, 32)
           .transpose(0, 2, 4, 1, 3, 5)
           .reshape(B, hw4, s2d)).astype(bf16)

    # Dilated 3x3 ASPP convs reduce exactly to their center tap when
    # dilation >= feature-map extent (padding == dilation); guard the shortcut.
    assert min(ATROUS) >= max(Hb, Wb)
    scale = params['bn_scale']
    # NOTE: eval-mode BN shift with default running stats is exactly zero, so
    #       only the per-channel scale is folded into the conv weights.
    bb_w = params['bb_w'].T.astype(bf16)                                       # [3072, 256]
    ctr = params['aspp_w'][:, :, :, 1, 1]                                      # [3, out, in]
    aspp_cat_w = ((jnp.transpose(ctr, (2, 0, 1)) * scale)
                  .reshape(BACKBONE_CH, 3 * ASPP_CH).astype(bf16))             # [256, 768]
    aspp_pool_w = (params['aspp_pool_w'].T * scale).astype(bf16)               # [256, 256]
    proj_t = params['aspp_proj_w'].T * scale                                   # [1024, 256]
    proj_w = proj_t[:3 * ASPP_CH].astype(bf16)                                 # [768, 256]
    proj_pool_w = proj_t[3 * ASPP_CH:].astype(bf16)                            # [256, 256]
    dec_w = (params['deconv_w'].transpose(0, 2, 3, 1)
             .reshape(ASPP_CH, 9 * FEAT_DIM).astype(bf16))                     # [256, 1152]
    dec_b = params['deconv_b'].reshape(1, FEAT_DIM)
    dec_s = jnp.asarray(_deconv_scatter(Hb, Wb).transpose(0, 2, 1), bf16)      # [9, hwf, hw4]
    cls_w = params['cls_w'].astype(bf16)                                       # [K, 128]
    cls_b = params['cls_b'].reshape(NUM_CLASSES, 1)
    key_w = params['key_w'].T.astype(bf16)                                     # [in, out]
    key_b = params['key_b'].reshape(1, KEY_DIM)
    query_w = (params['query_w'].transpose(0, 2, 1)
               .reshape(NUM_CLASSES * FEAT_DIM, KEY_DIM).astype(bf16))         # [K*128, 128]
    query_b = params['query_b']                                                # [K, 128]
    # separable align_corners=True bilinear upsample folded into one bf16 matrix
    up_m = jnp.asarray(np.einsum('oi,pj->ijop', _bilinear_matrix(Hu, Ht),
                                 _bilinear_matrix(Wu, Wt)).reshape(hwf, hwup), bf16)

    def wspec(shape):
        nd = len(shape)
        return pl.BlockSpec(shape, lambda b: (0,) * nd)

    kern = functools.partial(_fused_forward_kernel,
                             cluster_factor=float(PROTOTYPE_N))
    (out_flat, outup_flat, q_out, proto, asspf, asspfw,
     wmax, wmean, sim) = pl.pallas_call(
        kern,
        out_shape=(
            jax.ShapeDtypeStruct((B, NUM_CLASSES, hwf), jnp.float32),   # out
            jax.ShapeDtypeStruct((B, NUM_CLASSES, hwup), jnp.float32),  # outUp (flat)
            jax.ShapeDtypeStruct((B, NUM_CLASSES, KEY_DIM), jnp.float32),
            jax.ShapeDtypeStruct((B, NUM_CLASSES, FEAT_DIM), jnp.float32),
            jax.ShapeDtypeStruct((B, hwf, FEAT_DIM), jnp.float32),      # asspF (spatial-major)
            jax.ShapeDtypeStruct((B, hwf, FEAT_DIM), jnp.float32),      # asspFW
            jax.ShapeDtypeStruct((B, hwf, 1), jnp.float32),             # weight max
            jax.ShapeDtypeStruct((B, hwf, 1), jnp.float32),             # weight mean
            jax.ShapeDtypeStruct((B, hwf, NUM_CLASSES), jnp.float32),   # similarityCat
        ),
        grid=(B,),
        in_specs=[
            pl.BlockSpec((1, hw4, s2d), lambda b: (b, 0, 0)),
            wspec((s2d, BACKBONE_CH)),
            wspec((BACKBONE_CH, 3 * ASPP_CH)),
            wspec((BACKBONE_CH, ASPP_CH)),
            wspec((3 * ASPP_CH, ASPP_CH)),
            wspec((ASPP_CH, ASPP_CH)),
            wspec((ASPP_CH, 9 * FEAT_DIM)),
            wspec((1, FEAT_DIM)),
            wspec((9, hwf, hw4)),
            wspec((NUM_CLASSES, FEAT_DIM)),
            wspec((NUM_CLASSES, 1)),
            wspec((FEAT_DIM, KEY_DIM)),
            wspec((1, KEY_DIM)),
            wspec((NUM_CLASSES * FEAT_DIM, KEY_DIM)),
            wspec((NUM_CLASSES, KEY_DIM)),
            wspec((hwf, hwup)),
        ],
        out_specs=(
            pl.BlockSpec((1, NUM_CLASSES, hwf), lambda b: (b, 0, 0)),
            pl.BlockSpec((1, NUM_CLASSES, hwup), lambda b: (b, 0, 0)),
            pl.BlockSpec((1, NUM_CLASSES, KEY_DIM), lambda b: (b, 0, 0)),
            pl.BlockSpec((1, NUM_CLASSES, FEAT_DIM), lambda b: (b, 0, 0)),
            pl.BlockSpec((1, hwf, FEAT_DIM), lambda b: (b, 0, 0)),
            pl.BlockSpec((1, hwf, FEAT_DIM), lambda b: (b, 0, 0)),
            pl.BlockSpec((1, hwf, 1), lambda b: (b, 0, 0)),
            pl.BlockSpec((1, hwf, 1), lambda b: (b, 0, 0)),
            pl.BlockSpec((1, hwf, NUM_CLASSES), lambda b: (b, 0, 0)),
        ),
        compiler_params=pltpu.CompilerParams(
            dimension_semantics=("parallel",),
            vmem_limit_bytes=32 * 1024 * 1024),
    )(xs, bb_w, aspp_cat_w, aspp_pool_w, proj_w, proj_pool_w,
      dec_w, dec_b, dec_s, cls_w, cls_b, key_w, key_b, query_w, query_b, up_m)

    x_out = out_flat.reshape(B, NUM_CLASSES, Ht, Wt)
    xup = outup_flat.reshape(B, NUM_CLASSES, Hu, Wu)
    asspf_nchw = asspf.transpose(0, 2, 1).reshape(B, FEAT_DIM, Ht, Wt)
    asspfw_nchw = asspfw.transpose(0, 2, 1).reshape(B, FEAT_DIM, Ht, Wt)
    sim_nchw = sim.transpose(0, 2, 1).reshape(B, NUM_CLASSES, Ht, Wt)
    wmax_nchw = wmax.reshape(B, Ht, Wt)
    wmean_nchw = wmean.reshape(B, Ht, Wt)

    outputs = {'out': x_out, 'outUp': xup}
    proto_dict = {'CurrentPorotype': q_out,                       # [B, K, 128]
                  'GetProto': None,                               # GetProto=False path
                  'query': proto.reshape(B, NUM_CLASSES, 1, FEAT_DIM)}
    weight_dict = {'asspF': asspf_nchw,
                   'asspFW': asspfw_nchw,
                   'weight': wmax_nchw,
                   'Wsoftmax': sim_nchw,
                   'Weight': [sim_nchw, wmean_nchw, wmax_nchw]}
    return outputs, proto_dict, weight_dict


if __name__ == "__main__":
    root = jax.random.PRNGKey(0)
    pkey, xkey = jax.random.split(root)
    params = init_params(pkey)
    x = jax.random.normal(xkey, (BATCH, IN_CH, IMG, IMG), jnp.float32)

    fwd = jax.jit(forward)
    result = fwd(params, x)
    jax.block_until_ready(result)

    outputs, proto_dict, weight_dict = result
    assert outputs['out'].shape == (BATCH, NUM_CLASSES, IMG // 16, IMG // 16)
    assert outputs['outUp'].shape == (BATCH, NUM_CLASSES, IMG // 4, IMG // 4)
    assert proto_dict['CurrentPorotype'].shape == (BATCH, NUM_CLASSES, KEY_DIM)
    assert proto_dict['query'].shape == (BATCH, NUM_CLASSES, 1, FEAT_DIM)
    assert weight_dict['asspFW'].shape == (BATCH, FEAT_DIM, IMG // 16, IMG // 16)
    assert weight_dict['weight'].shape == (BATCH, IMG // 16, IMG // 16)
    print("KERNEL_OK")
</pallas_src>

<mosaic_0001>
module attributes {stable_mosaic.version = 11 : i64} {
  func.func @_fused_forward_kernel(%arg0: i32, %arg1: memref<1x16x3072xbf16, #tpu.memory_space<vmem>>, %arg2: memref<3072x256xbf16, #tpu.memory_space<vmem>>, %arg3: memref<256x768xbf16, #tpu.memory_space<vmem>>, %arg4: memref<256x256xbf16, #tpu.memory_space<vmem>>, %arg5: memref<768x256xbf16, #tpu.memory_space<vmem>>, %arg6: memref<256x256xbf16, #tpu.memory_space<vmem>>, %arg7: memref<256x1152xbf16, #tpu.memory_space<vmem>>, %arg8: memref<1x128xf32, #tpu.memory_space<vmem>>, %arg9: memref<9x64x16xbf16, #tpu.memory_space<vmem>>, %arg10: memref<6x128xbf16, #tpu.memory_space<vmem>>, %arg11: memref<6x1xf32, #tpu.memory_space<vmem>>, %arg12: memref<128x128xbf16, #tpu.memory_space<vmem>>, %arg13: memref<1x128xf32, #tpu.memory_space<vmem>>, %arg14: memref<768x128xbf16, #tpu.memory_space<vmem>>, %arg15: memref<6x128xf32, #tpu.memory_space<vmem>>, %arg16: memref<64x1024xbf16, #tpu.memory_space<vmem>>, %arg17: memref<1x6x64xf32, #tpu.memory_space<vmem>>, %arg18: memref<1x6x1024xf32, #tpu.memory_space<vmem>>, %arg19: memref<1x6x128xf32, #tpu.memory_space<vmem>>, %arg20: memref<1x6x128xf32, #tpu.memory_space<vmem>>, %arg21: memref<1x64x128xf32, #tpu.memory_space<vmem>>, %arg22: memref<1x64x128xf32, #tpu.memory_space<vmem>>, %arg23: memref<1x64x1xf32, #tpu.memory_space<vmem>>, %arg24: memref<1x64x1xf32, #tpu.memory_space<vmem>>, %arg25: memref<1x64x6xf32, #tpu.memory_space<vmem>>) attributes {dimension_semantics = [#tpu.dimension_semantics<parallel>], iteration_bounds = array<i64: 2>, scalar_prefetch = 0 : i64, scratch_operands = 0 : i64, tpu.core_type = #tpu.core_type<tc>, window_params = [{transform_indices = @transform_0, window_bounds = array<i64: 1, 16, 3072>}, {pipeline_mode = #tpu.pipeline_mode<synchronous>, transform_indices = @transform_1, window_bounds = array<i64: 3072, 256>}, {pipeline_mode = #tpu.pipeline_mode<synchronous>, transform_indices = @transform_2, window_bounds = array<i64: 256, 768>}, {pipeline_mode = #tpu.pipeline_mode<synchronous>, transform_indices = @transform_3, window_bounds = array<i64: 256, 256>}, {pipeline_mode = #tpu.pipeline_mode<synchronous>, transform_indices = @transform_4, window_bounds = array<i64: 768, 256>}, {pipeline_mode = #tpu.pipeline_mode<synchronous>, transform_indices = @transform_5, window_bounds = array<i64: 256, 256>}, {pipeline_mode = #tpu.pipeline_mode<synchronous>, transform_indices = @transform_6, window_bounds = array<i64: 256, 1152>}, {pipeline_mode = #tpu.pipeline_mode<synchronous>, transform_indices = @transform_7, window_bounds = array<i64: 1, 128>}, {pipeline_mode = #tpu.pipeline_mode<synchronous>, transform_indices = @transform_8, window_bounds = array<i64: 9, 64, 16>}, {pipeline_mode = #tpu.pipeline_mode<synchronous>, transform_indices = @transform_9, window_bounds = array<i64: 6, 128>}, {pipeline_mode = #tpu.pipeline_mode<synchronous>, transform_indices = @transform_10, window_bounds = array<i64: 6, 1>}, {pipeline_mode = #tpu.pipeline_mode<synchronous>, transform_indices = @transform_11, window_bounds = array<i64: 128, 128>}, {pipeline_mode = #tpu.pipeline_mode<synchronous>, transform_indices = @transform_12, window_bounds = array<i64: 1, 128>}, {pipeline_mode = #tpu.pipeline_mode<synchronous>, transform_indices = @transform_13, window_bounds = array<i64: 768, 128>}, {pipeline_mode = #tpu.pipeline_mode<synchronous>, transform_indices = @transform_14, window_bounds = array<i64: 6, 128>}, {pipeline_mode = #tpu.pipeline_mode<synchronous>, transform_indices = @transform_15, window_bounds = array<i64: 64, 1024>}, {transform_indices = @transform_16, window_bounds = array<i64: 1, 6, 64>}, {transform_indices = @transform_17, window_bounds = array<i64: 1, 6, 1024>}, {transform_indices = @transform_18, window_bounds = array<i64: 1, 6, 128>}, {transform_indices = @transform_19, window_bounds = array<i64: 1, 6, 128>}, {transform_indices = @transform_20, window_bounds = array<i64: 1, 64, 128>}, {transform_indices = @transform_21, window_bounds = array<i64: 1, 64, 128>}, {transform_indices = @transform_22, window_bounds = array<i64: 1, 64, 1>}, {transform_indices = @transform_23, window_bounds = array<i64: 1, 64, 1>}, {transform_indices = @transform_24, window_bounds = array<i64: 1, 64, 6>}]} {
    %c0 = arith.constant 0 : index
    %c0_0 = arith.constant 0 : index
    %c0_1 = arith.constant 0 : index
    %0 = vector.load %arg1[%c0, %c0_0, %c0_1] : memref<1x16x3072xbf16, #tpu.memory_space<vmem>>, vector<1x16x3072xbf16>
    %1 = vector.shape_cast %0 : vector<1x16x3072xbf16> to vector<16x3072xbf16>
    %c0_2 = arith.constant 0 : index
    %c0_3 = arith.constant 0 : index
    %2 = vector.load %arg2[%c0_2, %c0_3] : memref<3072x256xbf16, #tpu.memory_space<vmem>>, vector<3072x256xbf16>
    %cst = arith.constant dense<0.000000e+00> : vector<16x256xf32>
    %3 = tpu.matmul %1, %2, %cst {dimension_numbers = #tpu.dot_dimension_numbers<[1], [0], [0], [1], [0, 0, 1, 1], [], []>} : vector<16x3072xbf16>, vector<3072x256xbf16>, vector<16x256xf32> -> vector<16x256xf32>
    %cst_4 = arith.constant 0.000000e+00 : f32
    %4 = vector.broadcast %cst_4 : f32 to vector<16x256xf32>
    %5 = arith.maximumf %3, %4 : vector<16x256xf32>
    %6 = arith.truncf %5 : vector<16x256xf32> to vector<16x256xbf16>
    %c0_5 = arith.constant 0 : index
    %c0_6 = arith.constant 0 : index
    %7 = vector.load %arg3[%c0_5, %c0_6] : memref<256x768xbf16, #tpu.memory_space<vmem>>, vector<256x768xbf16>
    %cst_7 = arith.constant dense<0.000000e+00> : vector<16x768xf32>
    %8 = tpu.matmul %6, %7, %cst_7 {dimension_numbers = #tpu.dot_dimension_numbers<[1], [0], [0], [1], [0, 0, 1, 1], [], []>} : vector<16x256xbf16>, vector<256x768xbf16>, vector<16x768xf32> -> vector<16x768xf32>
    %cst_8 = arith.constant 0.000000e+00 : f32
    %9 = vector.broadcast %cst_8 : f32 to vector<16x768xf32>
    %10 = arith.maximumf %8, %9 : vector<16x768xf32>
    %cst_9 = arith.constant dense<0.000000e+00> : vector<256xf32>
    %11 = vector.multi_reduction <add>, %5, %cst_9 [0] : vector<16x256xf32> to vector<256xf32>
    %12 = vector.shape_cast %11 : vector<256xf32> to vector<1x256xf32>
    %cst_10 = arith.constant 1.600000e+01 : f32
    %13 = vector.broadcast %cst_10 : f32 to vector<1x256xf32>
    %14 = arith.divf %12, %13 : vector<1x256xf32>
    %15 = arith.truncf %14 : vector<1x256xf32> to vector<1x256xbf16>
    %c0_11 = arith.constant 0 : index
    %c0_12 = arith.constant 0 : index
    %16 = vector.load %arg4[%c0_11, %c0_12] : memref<256x256xbf16, #tpu.memory_space<vmem>>, vector<256x256xbf16>
    %cst_13 = arith.constant dense<0.000000e+00> : vector<1x256xf32>
    %17 = tpu.matmul %15, %16, %cst_13 {dimension_numbers = #tpu.dot_dimension_numbers<[1], [0], [0], [1], [0, 0, 1, 1], [], []>} : vector<1x256xbf16>, vector<256x256xbf16>, vector<1x256xf32> -> vector<1x256xf32>
    %cst_14 = arith.constant 0.000000e+00 : f32
    %18 = vector.broadcast %cst_14 : f32 to vector<1x256xf32>
    %19 = arith.maximumf %17, %18 : vector<1x256xf32>
    %20 = arith.truncf %10 : vector<16x768xf32> to vector<16x768xbf16>
    %c0_15 = arith.constant 0 : index
    %c0_16 = arith.constant 0 : index
    %21 = vector.load %arg5[%c0_15, %c0_16] : memref<768x256xbf16, #tpu.memory_space<vmem>>, vector<768x256xbf16>
    %cst_17 = arith.constant dense<0.000000e+00> : vector<16x256xf32>
    %22 = tpu.matmul %20, %21, %cst_17 {dimension_numbers = #tpu.dot_dimension_numbers<[1], [0], [0], [1], [0, 0, 1, 1], [], []>} : vector<16x768xbf16>, vector<768x256xbf16>, vector<16x256xf32> -> vector<16x256xf32>
    %23 = arith.truncf %19 : vector<1x256xf32> to vector<1x256xbf16>
    %c0_18 = arith.constant 0 : index
    %c0_19 = arith.constant 0 : index
    %24 = vector.load %arg6[%c0_18, %c0_19] : memref<256x256xbf16, #tpu.memory_space<vmem>>, vector<256x256xbf16>
    %cst_20 = arith.constant dense<0.000000e+00> : vector<1x256xf32>
    %25 = tpu.matmul %23, %24, %cst_20 {dimension_numbers = #tpu.dot_dimension_numbers<[1], [0], [0], [1], [0, 0, 1, 1], [], []>} : vector<1x256xbf16>, vector<256x256xbf16>, vector<1x256xf32> -> vector<1x256xf32>
    %26 = vector.broadcast %25 : vector<1x256xf32> to vector<16x256xf32>
    %27 = arith.addf %22, %26 : vector<16x256xf32>
    %cst_21 = arith.constant 0.000000e+00 : f32
    %28 = vector.broadcast %cst_21 : f32 to vector<16x256xf32>
    %29 = arith.maximumf %27, %28 : vector<16x256xf32>
    %30 = arith.truncf %29 : vector<16x256xf32> to vector<16x256xbf16>
    %c0_22 = arith.constant 0 : index
    %c0_23 = arith.constant 0 : index
    %31 = vector.load %arg7[%c0_22, %c0_23] : memref<256x1152xbf16, #tpu.memory_space<vmem>>, vector<256x1152xbf16>
    %cst_24 = arith.constant dense<0.000000e+00> : vector<16x1152xf32>
    %32 = tpu.matmul %30, %31, %cst_24 {dimension_numbers = #tpu.dot_dimension_numbers<[1], [0], [0], [1], [0, 0, 1, 1], [], []>} : vector<16x256xbf16>, vector<256x1152xbf16>, vector<16x1152xf32> -> vector<16x1152xf32>
    %33 = arith.truncf %32 : vector<16x1152xf32> to vector<16x1152xbf16>
    %cst_25 = arith.constant 0.000000e+00 : f32
    %34 = vector.broadcast %cst_25 : f32 to vector<64x128xf32>
    %c0_26 = arith.constant 0 : index
    %c0_27 = arith.constant 0 : index
    %c0_28 = arith.constant 0 : index
    %35 = vector.load %arg9[%c0_26, %c0_27, %c0_28] : memref<9x64x16xbf16, #tpu.memory_space<vmem>>, vector<1x64x16xbf16>
    %36 = vector.shape_cast %35 : vector<1x64x16xbf16> to vector<64x16xbf16>
    %37 = vector.extract_strided_slice %33 {offsets = [0, 0], sizes = [16, 128], strides = [1, 1]} : vector<16x1152xbf16> to vector<16x128xbf16>
    %cst_29 = arith.constant dense<0.000000e+00> : vector<64x128xf32>
    %38 = tpu.matmul %36, %37, %cst_29 {dimension_numbers = #tpu.dot_dimension_numbers<[1], [0], [0], [1], [0, 0, 1, 1], [], []>} : vector<64x16xbf16>, vector<16x128xbf16>, vector<64x128xf32> -> vector<64x128xf32>
    %39 = arith.addf %34, %38 : vector<64x128xf32>
    %c1 = arith.constant 1 : index
    %c0_30 = arith.constant 0 : index
    %c0_31 = arith.constant 0 : index
    %40 = vector.load %arg9[%c1, %c0_30, %c0_31] : memref<9x64x16xbf16, #tpu.memory_space<vmem>>, vector<1x64x16xbf16>
    %41 = vector.shape_cast %40 : vector<1x64x16xbf16> to vector<64x16xbf16>
    %42 = vector.extract_strided_slice %33 {offsets = [0, 128], sizes = [16, 128], strides = [1, 1]} : vector<16x1152xbf16> to vector<16x128xbf16>
    %cst_32 = arith.constant dense<0.000000e+00> : vector<64x128xf32>
    %43 = tpu.matmul %41, %42, %cst_32 {dimension_numbers = #tpu.dot_dimension_numbers<[1], [0], [0], [1], [0, 0, 1, 1], [], []>} : vector<64x16xbf16>, vector<16x128xbf16>, vector<64x128xf32> -> vector<64x128xf32>
    %44 = arith.addf %39, %43 : vector<64x128xf32>
    %c2 = arith.constant 2 : index
    %c0_33 = arith.constant 0 : index
    %c0_34 = arith.constant 0 : index
    %45 = vector.load %arg9[%c2, %c0_33, %c0_34] : memref<9x64x16xbf16, #tpu.memory_space<vmem>>, vector<1x64x16xbf16>
    %46 = vector.shape_cast %45 : vector<1x64x16xbf16> to vector<64x16xbf16>
    %47 = vector.extract_strided_slice %33 {offsets = [0, 256], sizes = [16, 128], strides = [1, 1]} : vector<16x1152xbf16> to vector<16x128xbf16>
    %cst_35 = arith.constant dense<0.000000e+00> : vector<64x128xf32>
    %48 = tpu.matmul %46, %47, %cst_35 {dimension_numbers = #tpu.dot_dimension_numbers<[1], [0], [0], [1], [0, 0, 1, 1], [], []>} : vector<64x16xbf16>, vector<16x128xbf16>, vector<64x128xf32> -> vector<64x128xf32>
    %49 = arith.addf %44, %48 : vector<64x128xf32>
    %c3 = arith.constant 3 : index
    %c0_36 = arith.constant 0 : index
    %c0_37 = arith.constant 0 : index
    %50 = vector.load %arg9[%c3, %c0_36, %c0_37] : memref<9x64x16xbf16, #tpu.memory_space<vmem>>, vector<1x64x16xbf16>
    %51 = vector.shape_cast %50 : vector<1x64x16xbf16> to vector<64x16xbf16>
    %52 = vector.extract_strided_slice %33 {offsets = [0, 384], sizes = [16, 128], strides = [1, 1]} : vector<16x1152xbf16> to vector<16x128xbf16>
    %cst_38 = arith.constant dense<0.000000e+00> : vector<64x128xf32>
    %53 = tpu.matmul %51, %52, %cst_38 {dimension_numbers = #tpu.dot_dimension_numbers<[1], [0], [0], [1], [0, 0, 1, 1], [], []>} : vector<64x16xbf16>, vector<16x128xbf16>, vector<64x128xf32> -> vector<64x128xf32>
    %54 = arith.addf %49, %53 : vector<64x128xf32>
    %c4 = arith.constant 4 : index
    %c0_39 = arith.constant 0 : index
    %c0_40 = arith.constant 0 : index
    %55 = vector.load %arg9[%c4, %c0_39, %c0_40] : memref<9x64x16xbf16, #tpu.memory_space<vmem>>, vector<1x64x16xbf16>
    %56 = vector.shape_cast %55 : vector<1x64x16xbf16> to vector<64x16xbf16>
    %57 = vector.extract_strided_slice %33 {offsets = [0, 512], sizes = [16, 128], strides = [1, 1]} : vector<16x1152xbf16> to vector<16x128xbf16>
    %cst_41 = arith.constant dense<0.000000e+00> : vector<64x128xf32>
    %58 = tpu.matmul %56, %57, %cst_41 {dimension_numbers = #tpu.dot_dimension_numbers<[1], [0], [0], [1], [0, 0, 1, 1], [], []>} : vector<64x16xbf16>, vector<16x128xbf16>, vector<64x128xf32> -> vector<64x128xf32>
    %59 = arith.addf %54, %58 : vector<64x128xf32>
    %c5 = arith.constant 5 : index
    %c0_42 = arith.constant 0 : index
    %c0_43 = arith.constant 0 : index
    %60 = vector.load %arg9[%c5, %c0_42, %c0_43] : memref<9x64x16xbf16, #tpu.memory_space<vmem>>, vector<1x64x16xbf16>
    %61 = vector.shape_cast %60 : vector<1x64x16xbf16> to vector<64x16xbf16>
    %62 = vector.extract_strided_slice %33 {offsets = [0, 640], sizes = [16, 128], strides = [1, 1]} : vector<16x1152xbf16> to vector<16x128xbf16>
    %cst_44 = arith.constant dense<0.000000e+00> : vector<64x128xf32>
    %63 = tpu.matmul %61, %62, %cst_44 {dimension_numbers = #tpu.dot_dimension_numbers<[1], [0], [0], [1], [0, 0, 1, 1], [], []>} : vector<64x16xbf16>, vector<16x128xbf16>, vector<64x128xf32> -> vector<64x128xf32>
    %64 = arith.addf %59, %63 : vector<64x128xf32>
    %c6 = arith.constant 6 : index
    %c0_45 = arith.constant 0 : index
    %c0_46 = arith.constant 0 : index
    %65 = vector.load %arg9[%c6, %c0_45, %c0_46] : memref<9x64x16xbf16, #tpu.memory_space<vmem>>, vector<1x64x16xbf16>
    %66 = vector.shape_cast %65 : vector<1x64x16xbf16> to vector<64x16xbf16>
    %67 = vector.extract_strided_slice %33 {offsets = [0, 768], sizes = [16, 128], strides = [1, 1]} : vector<16x1152xbf16> to vector<16x128xbf16>
    %cst_47 = arith.constant dense<0.000000e+00> : vector<64x128xf32>
    %68 = tpu.matmul %66, %67, %cst_47 {dimension_numbers = #tpu.dot_dimension_numbers<[1], [0], [0], [1], [0, 0, 1, 1], [], []>} : vector<64x16xbf16>, vector<16x128xbf16>, vector<64x128xf32> -> vector<64x128xf32>
    %69 = arith.addf %64, %68 : vector<64x128xf32>
    %c7 = arith.constant 7 : index
    %c0_48 = arith.constant 0 : index
    %c0_49 = arith.constant 0 : index
    %70 = vector.load %arg9[%c7, %c0_48, %c0_49] : memref<9x64x16xbf16, #tpu.memory_space<vmem>>, vector<1x64x16xbf16>
    %71 = vector.shape_cast %70 : vector<1x64x16xbf16> to vector<64x16xbf16>
    %72 = vector.extract_strided_slice %33 {offsets = [0, 896], sizes = [16, 128], strides = [1, 1]} : vector<16x1152xbf16> to vector<16x128xbf16>
    %cst_50 = arith.constant dense<0.000000e+00> : vector<64x128xf32>
    %73 = tpu.matmul %71, %72, %cst_50 {dimension_numbers = #tpu.dot_dimension_numbers<[1], [0], [0], [1], [0, 0, 1, 1], [], []>} : vector<64x16xbf16>, vector<16x128xbf16>, vector<64x128xf32> -> vector<64x128xf32>
    %74 = arith.addf %69, %73 : vector<64x128xf32>
    %c8 = arith.constant 8 : index
    %c0_51 = arith.constant 0 : index
    %c0_52 = arith.constant 0 : index
    %75 = vector.load %arg9[%c8, %c0_51, %c0_52] : memref<9x64x16xbf16, #tpu.memory_space<vmem>>, vector<1x64x16xbf16>
    %76 = vector.shape_cast %75 : vector<1x64x16xbf16> to vector<64x16xbf16>
    %77 = vector.extract_strided_slice %33 {offsets = [0, 1024], sizes = [16, 128], strides = [1, 1]} : vector<16x1152xbf16> to vector<16x128xbf16>
    %cst_53 = arith.constant dense<0.000000e+00> : vector<64x128xf32>
    %78 = tpu.matmul %76, %77, %cst_53 {dimension_numbers = #tpu.dot_dimension_numbers<[1], [0], [0], [1], [0, 0, 1, 1], [], []>} : vector<64x16xbf16>, vector<16x128xbf16>, vector<64x128xf32> -> vector<64x128xf32>
    %79 = arith.addf %74, %78 : vector<64x128xf32>
    %c0_54 = arith.constant 0 : index
    %c0_55 = arith.constant 0 : index
    %80 = vector.load %arg8[%c0_54, %c0_55] : memref<1x128xf32, #tpu.memory_space<vmem>>, vector<1x128xf32>
    %81 = vector.broadcast %80 : vector<1x128xf32> to vector<64x128xf32>
    %82 = arith.addf %79, %81 : vector<64x128xf32>
    %cst_56 = arith.constant 0.000000e+00 : f32
    %83 = vector.broadcast %cst_56 : f32 to vector<64x128xf32>
    %84 = arith.maximumf %82, %83 : vector<64x128xf32>
    %85 = arith.truncf %84 : vector<64x128xf32> to vector<64x128xbf16>
    %c0_57 = arith.constant 0 : index
    %c0_58 = arith.constant 0 : index
    %c0_59 = arith.constant 0 : index
    %86 = vector.load %arg21[%c0_57, %c0_58, %c0_59] : memref<1x64x128xf32, #tpu.memory_space<vmem>>, vector<1x64x128xf32>
    %87 = vector.shape_cast %86 : vector<1x64x128xf32> to vector<64x128xf32>
    %88 = vector.shape_cast %84 : vector<64x128xf32> to vector<1x64x128xf32>
    tpu.vector_store %arg21[%c0_57, %c0_58, %c0_59], %88 {strides = array<i32>} : memref<1x64x128xf32, #tpu.memory_space<vmem>>, vector<1x64x128xf32>,
    %c0_60 = arith.constant 0 : index
    %c0_61 = arith.constant 0 : index
    %89 = vector.load %arg10[%c0_60, %c0_61] : memref<6x128xbf16, #tpu.memory_space<vmem>>, vector<6x128xbf16>
    %cst_62 = arith.constant dense<0.000000e+00> : vector<6x64xf32>
    %90 = tpu.matmul %89, %85, %cst_62 {dimension_numbers = #tpu.dot_dimension_numbers<[1], [1], [0], [0], [0, 0, 1, 0], [], []>} : vector<6x128xbf16>, vector<64x128xbf16>, vector<6x64xf32> -> vector<6x64xf32>
    %c0_63 = arith.constant 0 : index
    %c0_64 = arith.constant 0 : index
    %91 = vector.load %arg11[%c0_63, %c0_64] : memref<6x1xf32, #tpu.memory_space<vmem>>, vector<6x1xf32>
    %92 = vector.broadcast %91 : vector<6x1xf32> to vector<6x64xf32>
    %93 = arith.addf %90, %92 : vector<6x64xf32>
    %94 = tpu.iota {dimensions = array<i32: 0>} : vector<6x64xi32>
    %cst_65 = arith.constant dense<0xFF800000> : vector<64xf32>
    %95 = vector.multi_reduction <maximumf>, %93, %cst_65 [0] : vector<6x64xf32> to vector<64xf32>
    %96 = vector.shape_cast %95 : vector<64xf32> to vector<1x64xf32>
    %97 = vector.broadcast %96 : vector<1x64xf32> to vector<6x64xf32>
    %98 = arith.cmpf oeq, %93, %97 : vector<6x64xf32>
    %c6_i32 = arith.constant 6 : i32
    %99 = vector.broadcast %c6_i32 : i32 to vector<6x64xi32>
    %100 = arith.select %98, %94, %99 : vector<6x64xi1>, vector<6x64xi32>
    %cst_66 = arith.constant dense<2147483647> : vector<64xi32>
    %101 = vector.multi_reduction <minsi>, %100, %cst_66 [0] : vector<6x64xi32> to vector<64xi32>
    %102 = vector.shape_cast %101 : vector<64xi32> to vector<1x64xi32>
    %103 = vector.broadcast %102 : vector<1x64xi32> to vector<6x64xi32>
    %104 = arith.cmpi eq, %94, %103 : vector<6x64xi32>
    %105 = arith.extui %104 : vector<6x64xi1> to vector<6x64xi32>
    %106 = arith.sitofp %105 : vector<6x64xi32> to vector<6x64xf32>
    %cst_67 = arith.constant dense<0.000000e+00> : vector<6xf32>
    %107 = vector.multi_reduction <add>, %106, %cst_67 [1] : vector<6x64xf32> to vector<6xf32>
    %108 = vector.shape_cast %107 : vector<6xf32> to vector<6x1xf32>
    %cst_68 = arith.constant dense<0.000000e+00> : vector<6x128xf32>
    %109 = tpu.matmul %106, %84, %cst_68 {dimension_numbers = #tpu.dot_dimension_numbers<[1], [0], [0], [1], [0, 0, 1, 1], [], []>} : vector<6x64xf32>, vector<64x128xf32>, vector<6x128xf32> -> vector<6x128xf32>
    %cst_69 = arith.constant 9.99999974E-6 : f32
    %110 = vector.broadcast %cst_69 : f32 to vector<6x1xf32>
    %111 = arith.addf %108, %110 : vector<6x1xf32>
    %112 = vector.broadcast %111 : vector<6x1xf32> to vector<6x128xf32>
    %113 = arith.divf %109, %112 : vector<6x128xf32>
    %c0_70 = arith.constant 0 : index
    %c0_71 = arith.constant 0 : index
    %c0_72 = arith.constant 0 : index
    %114 = vector.load %arg20[%c0_70, %c0_71, %c0_72] : memref<1x6x128xf32, #tpu.memory_space<vmem>>, vector<1x6x128xf32>
    %115 = vector.shape_cast %114 : vector<1x6x128xf32> to vector<6x128xf32>
    %116 = vector.shape_cast %113 : vector<6x128xf32> to vector<1x6x128xf32>
    tpu.vector_store %arg20[%c0_70, %c0_71, %c0_72], %116 {strides = array<i32>} : memref<1x6x128xf32, #tpu.memory_space<vmem>>, vector<1x6x128xf32>,
    %c0_73 = arith.constant 0 : index
    %c0_74 = arith.constant 0 : index
    %117 = vector.load %arg12[%c0_73, %c0_74] : memref<128x128xbf16, #tpu.memory_space<vmem>>, vector<128x128xbf16>
    %cst_75 = arith.constant dense<0.000000e+00> : vector<64x128xf32>
    %118 = tpu.matmul %85, %117, %cst_75 {dimension_numbers = #tpu.dot_dimension_numbers<[1], [0], [0], [1], [0, 0, 1, 1], [], []>} : vector<64x128xbf16>, vector<128x128xbf16>, vector<64x128xf32> -> vector<64x128xf32>
    %c0_76 = arith.constant 0 : index
    %c0_77 = arith.constant 0 : index
    %119 = vector.load %arg13[%c0_76, %c0_77] : memref<1x128xf32, #tpu.memory_space<vmem>>, vector<1x128xf32>
    %120 = vector.broadcast %119 : vector<1x128xf32> to vector<64x128xf32>
    %121 = arith.addf %118, %120 : vector<64x128xf32>
    %122 = arith.truncf %113 : vector<6x128xf32> to vector<6x128xbf16>
    %123 = tpu.iota {dimensions = array<i32: 0>} : vector<6x128xi32>
    %cst_78 = arith.constant 0.000000e+00 : bf16
    %124 = vector.broadcast %cst_78 : bf16 to vector<6x128xbf16>
    %c0_i32 = arith.constant 0 : i32
    %125 = vector.broadcast %c0_i32 : i32 to vector<6x128xi32>
    %126 = arith.cmpi eq, %123, %125 : vector<6x128xi32>
    %127 = arith.select %126, %122, %124 : vector<6x128xi1>, vector<6x128xbf16>
    %c1_i32 = arith.constant 1 : i32
    %128 = vector.broadcast %c1_i32 : i32 to vector<6x128xi32>
    %129 = arith.cmpi eq, %123, %128 : vector<6x128xi32>
    %130 = arith.select %129, %122, %124 : vector<6x128xi1>, vector<6x128xbf16>
    %c2_i32 = arith.constant 2 : i32
    %131 = vector.broadcast %c2_i32 : i32 to vector<6x128xi32>
    %132 = arith.cmpi eq, %123, %131 : vector<6x128xi32>
    %133 = arith.select %132, %122, %124 : vector<6x128xi1>, vector<6x128xbf16>
    %c3_i32 = arith.constant 3 : i32
    %134 = vector.broadcast %c3_i32 : i32 to vector<6x128xi32>
    %135 = arith.cmpi eq, %123, %134 : vector<6x128xi32>
    %136 = arith.select %135, %122, %124 : vector<6x128xi1>, vector<6x128xbf16>
    %c4_i32 = arith.constant 4 : i32
    %137 = vector.broadcast %c4_i32 : i32 to vector<6x128xi32>
    %138 = arith.cmpi eq, %123, %137 : vector<6x128xi32>
    %139 = arith.select %138, %122, %124 : vector<6x128xi1>, vector<6x128xbf16>
    %c5_i32 = arith.constant 5 : i32
    %140 = vector.broadcast %c5_i32 : i32 to vector<6x128xi32>
    %141 = arith.cmpi eq, %123, %140 : vector<6x128xi32>
    %142 = arith.select %141, %122, %124 : vector<6x128xi1>, vector<6x128xbf16>
    %143 = tpu.concatenate %127, %130, %133, %136, %139, %142 in 1 : vector<6x128xbf16>, vector<6x128xbf16>, vector<6x128xbf16>, vector<6x128xbf16>, vector<6x128xbf16>, vector<6x128xbf16> -> vector<6x768xbf16>
    %c0_79 = arith.constant 0 : index
    %c0_80 = arith.constant 0 : index
    %144 = vector.load %arg14[%c0_79, %c0_80] : memref<768x128xbf16, #tpu.memory_space<vmem>>, vector<768x128xbf16>
    %cst_81 = arith.constant dense<0.000000e+00> : vector<6x128xf32>
    %145 = tpu.matmul %143, %144, %cst_81 {dimension_numbers = #tpu.dot_dimension_numbers<[1], [0], [0], [1], [0, 0, 1, 1], [], []>} : vector<6x768xbf16>, vector<768x128xbf16>, vector<6x128xf32> -> vector<6x128xf32>
    %c0_82 = arith.constant 0 : index
    %c0_83 = arith.constant 0 : index
    %146 = vector.load %arg15[%c0_82, %c0_83] : memref<6x128xf32, #tpu.memory_space<vmem>>, vector<6x128xf32>
    %147 = arith.addf %145, %146 : vector<6x128xf32>
    %c0_84 = arith.constant 0 : index
    %c0_85 = arith.constant 0 : index
    %c0_86 = arith.constant 0 : index
    %148 = vector.load %arg19[%c0_84, %c0_85, %c0_86] : memref<1x6x128xf32, #tpu.memory_space<vmem>>, vector<1x6x128xf32>
    %149 = vector.shape_cast %148 : vector<1x6x128xf32> to vector<6x128xf32>
    %150 = vector.shape_cast %147 : vector<6x128xf32> to vector<1x6x128xf32>
    tpu.vector_store %arg19[%c0_84, %c0_85, %c0_86], %150 {strides = array<i32>} : memref<1x6x128xf32, #tpu.memory_space<vmem>>, vector<1x6x128xf32>,
    %151 = arith.truncf %121 : vector<64x128xf32> to vector<64x128xbf16>
    %152 = arith.truncf %147 : vector<6x128xf32> to vector<6x128xbf16>
    %cst_87 = arith.constant dense<0.000000e+00> : vector<64x6xf32>
    %153 = tpu.matmul %151, %152, %cst_87 {dimension_numbers = #tpu.dot_dimension_numbers<[1], [1], [0], [0], [0, 0, 1, 0], [], []>} : vector<64x128xbf16>, vector<6x128xbf16>, vector<64x6xf32> -> vector<64x6xf32>
    %c0_88 = arith.constant 0 : index
    %c0_89 = arith.constant 0 : index
    %c0_90 = arith.constant 0 : index
    %154 = vector.load %arg25[%c0_88, %c0_89, %c0_90] : memref<1x64x6xf32, #tpu.memory_space<vmem>>, vector<1x64x6xf32>
    %155 = vector.shape_cast %154 : vector<1x64x6xf32> to vector<64x6xf32>
    %156 = vector.shape_cast %153 : vector<64x6xf32> to vector<1x64x6xf32>
    tpu.vector_store %arg25[%c0_88, %c0_89, %c0_90], %156 {strides = array<i32>} : memref<1x64x6xf32, #tpu.memory_space<vmem>>, vector<1x64x6xf32>,
    %cst_91 = arith.constant 0.166666672 : f32
    %157 = vector.broadcast %cst_91 : f32 to vector<64x6xf32>
    %158 = arith.mulf %153, %157 : vector<64x6xf32>
    %cst_92 = arith.constant dense<0xFF800000> : vector<64xf32>
    %159 = vector.multi_reduction <maximumf>, %158, %cst_92 [1] : vector<64x6xf32> to vector<64xf32>
    %160 = vector.shape_cast %159 : vector<64xf32> to vector<64x1xf32>
    %161 = vector.broadcast %160 : vector<64x1xf32> to vector<64x6xf32>
    %162 = arith.subf %158, %161 : vector<64x6xf32>
    %163 = math.exp %162 : vector<64x6xf32>
    %cst_93 = arith.constant dense<0.000000e+00> : vector<64xf32>
    %164 = vector.multi_reduction <add>, %163, %cst_93 [1] : vector<64x6xf32> to vector<64xf32>
    %165 = vector.shape_cast %164 : vector<64xf32> to vector<64x1xf32>
    %166 = vector.broadcast %165 : vector<64x1xf32> to vector<64x6xf32>
    %167 = arith.divf %163, %166 : vector<64x6xf32>
    %cst_94 = arith.constant dense<0xFF800000> : vector<64xf32>
    %168 = vector.multi_reduction <maximumf>, %167, %cst_94 [1] : vector<64x6xf32> to vector<64xf32>
    %169 = vector.shape_cast %168 : vector<64xf32> to vector<64x1xf32>
    %cst_95 = arith.constant dense<0.000000e+00> : vector<64xf32>
    %170 = vector.multi_reduction <add>, %167, %cst_95 [1] : vector<64x6xf32> to vector<64xf32>
    %171 = vector.shape_cast %170 : vector<64xf32> to vector<64x1xf32>
    %cst_96 = arith.constant 6.000000e+00 : f32
    %172 = vector.broadcast %cst_96 : f32 to vector<64x1xf32>
    %173 = arith.divf %171, %172 : vector<64x1xf32>
    %c0_97 = arith.constant 0 : index
    %c0_98 = arith.constant 0 : index
    %c0_99 = arith.constant 0 : index
    %174 = vector.load %arg23[%c0_97, %c0_98, %c0_99] : memref<1x64x1xf32, #tpu.memory_space<vmem>>, vector<1x64x1xf32>
    %175 = vector.shape_cast %174 : vector<1x64x1xf32> to vector<64x1xf32>
    %176 = vector.shape_cast %169 : vector<64x1xf32> to vector<1x64x1xf32>
    tpu.vector_store %arg23[%c0_97, %c0_98, %c0_99], %176 {strides = array<i32>} : memref<1x64x1xf32, #tpu.memory_space<vmem>>, vector<1x64x1xf32>,
    %c0_100 = arith.constant 0 : index
    %c0_101 = arith.constant 0 : index
    %c0_102 = arith.constant 0 : index
    %177 = vector.load %arg24[%c0_100, %c0_101, %c0_102] : memref<1x64x1xf32, #tpu.memory_space<vmem>>, vector<1x64x1xf32>
    %178 = vector.shape_cast %177 : vector<1x64x1xf32> to vector<64x1xf32>
    %179 = vector.shape_cast %173 : vector<64x1xf32> to vector<1x64x1xf32>
    tpu.vector_store %arg24[%c0_100, %c0_101, %c0_102], %179 {strides = array<i32>} : memref<1x64x1xf32, #tpu.memory_space<vmem>>, vector<1x64x1xf32>,
    %180 = vector.broadcast %169 : vector<64x1xf32> to vector<64x128xf32>
    %181 = arith.mulf %84, %180 : vector<64x128xf32>
    %c0_103 = arith.constant 0 : index
    %c0_104 = arith.constant 0 : index
    %c0_105 = arith.constant 0 : index
    %182 = vector.load %arg22[%c0_103, %c0_104, %c0_105] : memref<1x64x128xf32, #tpu.memory_space<vmem>>, vector<1x64x128xf32>
    %183 = vector.shape_cast %182 : vector<1x64x128xf32> to vector<64x128xf32>
    %184 = vector.shape_cast %181 : vector<64x128xf32> to vector<1x64x128xf32>
    tpu.vector_store %arg22[%c0_103, %c0_104, %c0_105], %184 {strides = array<i32>} : memref<1x64x128xf32, #tpu.memory_space<vmem>>, vector<1x64x128xf32>,
    %185 = arith.truncf %181 : vector<64x128xf32> to vector<64x128xbf16>
    %cst_106 = arith.constant dense<0.000000e+00> : vector<6x64xf32>
    %186 = tpu.matmul %89, %185, %cst_106 {dimension_numbers = #tpu.dot_dimension_numbers<[1], [1], [0], [0], [0, 0, 1, 0], [], []>} : vector<6x128xbf16>, vector<64x128xbf16>, vector<6x64xf32> -> vector<6x64xf32>
    %c0_107 = arith.constant 0 : index
    %c0_108 = arith.constant 0 : index
    %187 = vector.load %arg11[%c0_107, %c0_108] : memref<6x1xf32, #tpu.memory_space<vmem>>, vector<6x1xf32>
    %188 = vector.broadcast %187 : vector<6x1xf32> to vector<6x64xf32>
    %189 = arith.addf %186, %188 : vector<6x64xf32>
    %c0_109 = arith.constant 0 : index
    %c0_110 = arith.constant 0 : index
    %c0_111 = arith.constant 0 : index
    %190 = vector.load %arg17[%c0_109, %c0_110, %c0_111] : memref<1x6x64xf32, #tpu.memory_space<vmem>>, vector<1x6x64xf32>
    %191 = vector.shape_cast %190 : vector<1x6x64xf32> to vector<6x64xf32>
    %192 = vector.shape_cast %189 : vector<6x64xf32> to vector<1x6x64xf32>
    tpu.vector_store %arg17[%c0_109, %c0_110, %c0_111], %192 {strides = array<i32>} : memref<1x6x64xf32, #tpu.memory_space<vmem>>, vector<1x6x64xf32>,
    %193 = arith.truncf %189 : vector<6x64xf32> to vector<6x64xbf16>
    %c0_112 = arith.constant 0 : index
    %c0_113 = arith.constant 0 : index
    %194 = vector.load %arg16[%c0_112, %c0_113] : memref<64x1024xbf16, #tpu.memory_space<vmem>>, vector<64x1024xbf16>
    %cst_114 = arith.constant dense<0.000000e+00> : vector<6x1024xf32>
    %195 = tpu.matmul %193, %194, %cst_114 {dimension_numbers = #tpu.dot_dimension_numbers<[1], [0], [0], [1], [0, 0, 1, 1], [], []>} : vector<6x64xbf16>, vector<64x1024xbf16>, vector<6x1024xf32> -> vector<6x1024xf32>
    %c0_115 = arith.constant 0 : index
    %c0_116 = arith.constant 0 : index
    %c0_117 = arith.constant 0 : index
    %196 = vector.load %arg18[%c0_115, %c0_116, %c0_117] : memref<1x6x1024xf32, #tpu.memory_space<vmem>>, vector<1x6x1024xf32>
    %197 = vector.shape_cast %196 : vector<1x6x1024xf32> to vector<6x1024xf32>
    %198 = vector.shape_cast %195 : vector<6x1024xf32> to vector<1x6x1024xf32>
    tpu.vector_store %arg18[%c0_115, %c0_116, %c0_117], %198 {strides = array<i32>} : memref<1x6x1024xf32, #tpu.memory_space<vmem>>, vector<1x6x1024xf32>,
    return
  }
  func.func @transform_0(%arg0: i32) -> (i32, i32, i32) {
    %c0_i32 = arith.constant 0 : i32
    %c0_i32_0 = arith.constant 0 : i32
    %c0_i32_1 = arith.constant 0 : i32
    return %arg0, %c0_i32, %c0_i32_0 : i32, i32, i32
  }
  func.func @transform_1(%arg0: i32) -> (i32, i32) {
    %c0_i32 = arith.constant 0 : i32
    %c0_i32_0 = arith.constant 0 : i32
    %c0_i32_1 = arith.constant 0 : i32
    return %c0_i32, %c0_i32_0 : i32, i32
  }
  func.func @transform_2(%arg0: i32) -> (i32, i32) {
    %c0_i32 = arith.constant 0 : i32
    %c0_i32_0 = arith.constant 0 : i32
    %c0_i32_1 = arith.constant 0 : i32
    return %c0_i32, %c0_i32_0 : i32, i32
  }
  func.func @transform_3(%arg0: i32) -> (i32, i32) {
    %c0_i32 = arith.constant 0 : i32
    %c0_i32_0 = arith.constant 0 : i32
    %c0_i32_1 = arith.constant 0 : i32
    return %c0_i32, %c0_i32_0 : i32, i32
  }
  func.func @transform_4(%arg0: i32) -> (i32, i32) {
    %c0_i32 = arith.constant 0 : i32
    %c0_i32_0 = arith.constant 0 : i32
    %c0_i32_1 = arith.constant 0 : i32
    return %c0_i32, %c0_i32_0 : i32, i32
  }
  func.func @transform_5(%arg0: i32) -> (i32, i32) {
    %c0_i32 = arith.constant 0 : i32
    %c0_i32_0 = arith.constant 0 : i32
    %c0_i32_1 = arith.constant 0 : i32
    return %c0_i32, %c0_i32_0 : i32, i32
  }
  func.func @transform_6(%arg0: i32) -> (i32, i32) {
    %c0_i32 = arith.constant 0 : i32
    %c0_i32_0 = arith.constant 0 : i32
    %c0_i32_1 = arith.constant 0 : i32
    return %c0_i32, %c0_i32_0 : i32, i32
  }
  func.func @transform_7(%arg0: i32) -> (i32, i32) {
    %c0_i32 = arith.constant 0 : i32
    %c0_i32_0 = arith.constant 0 : i32
    %c0_i32_1 = arith.constant 0 : i32
    return %c0_i32, %c0_i32_0 : i32, i32
  }
  func.func @transform_8(%arg0: i32) -> (i32, i32, i32) {
    %c0_i32 = arith.constant 0 : i32
    %c0_i32_0 = arith.constant 0 : i32
    %c0_i32_1 = arith.constant 0 : i32
    %c0_i32_2 = arith.constant 0 : i32
    return %c0_i32, %c0_i32_0, %c0_i32_1 : i32, i32, i32
  }
  func.func @transform_9(%arg0: i32) -> (i32, i32) {
    %c0_i32 = arith.constant 0 : i32
    %c0_i32_0 = arith.constant 0 : i32
    %c0_i32_1 = arith.constant 0 : i32
    return %c0_i32, %c0_i32_0 : i32, i32
  }
  func.func @transform_10(%arg0: i32) -> (i32, i32) {
    %c0_i32 = arith.constant 0 : i32
    %c0_i32_0 = arith.constant 0 : i32
    %c0_i32_1 = arith.constant 0 : i32
    return %c0_i32, %c0_i32_0 : i32, i32
  }
  func.func @transform_11(%arg0: i32) -> (i32, i32) {
    %c0_i32 = arith.constant 0 : i32
    %c0_i32_0 = arith.constant 0 : i32
    %c0_i32_1 = arith.constant 0 : i32
    return %c0_i32, %c0_i32_0 : i32, i32
  }
  func.func @transform_12(%arg0: i32) -> (i32, i32) {
    %c0_i32 = arith.constant 0 : i32
    %c0_i32_0 = arith.constant 0 : i32
    %c0_i32_1 = arith.constant 0 : i32
    return %c0_i32, %c0_i32_0 : i32, i32
  }
  func.func @transform_13(%arg0: i32) -> (i32, i32) {
    %c0_i32 = arith.constant 0 : i32
    %c0_i32_0 = arith.constant 0 : i32
    %c0_i32_1 = arith.constant 0 : i32
    return %c0_i32, %c0_i32_0 : i32, i32
  }
  func.func @transform_14(%arg0: i32) -> (i32, i32) {
    %c0_i32 = arith.constant 0 : i32
    %c0_i32_0 = arith.constant 0 : i32
    %c0_i32_1 = arith.constant 0 : i32
    return %c0_i32, %c0_i32_0 : i32, i32
  }
  func.func @transform_15(%arg0: i32) -> (i32, i32) {
    %c0_i32 = arith.constant 0 : i32
    %c0_i32_0 = arith.constant 0 : i32
    %c0_i32_1 = arith.constant 0 : i32
    return %c0_i32, %c0_i32_0 : i32, i32
  }
  func.func @transform_16(%arg0: i32) -> (i32, i32, i32) {
    %c0_i32 = arith.constant 0 : i32
    %c0_i32_0 = arith.constant 0 : i32
    %c0_i32_1 = arith.constant 0 : i32
    return %arg0, %c0_i32, %c0_i32_0 : i32, i32, i32
  }
  func.func @transform_17(%arg0: i32) -> (i32, i32, i32) {
    %c0_i32 = arith.constant 0 : i32
    %c0_i32_0 = arith.constant 0 : i32
    %c0_i32_1 = arith.constant 0 : i32
    return %arg0, %c0_i32, %c0_i32_0 : i32, i32, i32
  }
  func.func @transform_18(%arg0: i32) -> (i32, i32, i32) {
    %c0_i32 = arith.constant 0 : i32
    %c0_i32_0 = arith.constant 0 : i32
    %c0_i32_1 = arith.constant 0 : i32
    return %arg0, %c0_i32, %c0_i32_0 : i32, i32, i32
  }
  func.func @transform_19(%arg0: i32) -> (i32, i32, i32) {
    %c0_i32 = arith.constant 0 : i32
    %c0_i32_0 = arith.constant 0 : i32
    %c0_i32_1 = arith.constant 0 : i32
    return %arg0, %c0_i32, %c0_i32_0 : i32, i32, i32
  }
  func.func @transform_20(%arg0: i32) -> (i32, i32, i32) {
    %c0_i32 = arith.constant 0 : i32
    %c0_i32_0 = arith.constant 0 : i32
    %c0_i32_1 = arith.constant 0 : i32
    return %arg0, %c0_i32, %c0_i32_0 : i32, i32, i32
  }
  func.func @transform_21(%arg0: i32) -> (i32, i32, i32) {
    %c0_i32 = arith.constant 0 : i32
    %c0_i32_0 = arith.constant 0 : i32
    %c0_i32_1 = arith.constant 0 : i32
    return %arg0, %c0_i32, %c0_i32_0 : i32, i32, i32
  }
  func.func @transform_22(%arg0: i32) -> (i32, i32, i32) {
    %c0_i32 = arith.constant 0 : i32
    %c0_i32_0 = arith.constant 0 : i32
    %c0_i32_1 = arith.constant 0 : i32
    return %arg0, %c0_i32, %c0_i32_0 : i32, i32, i32
  }
  func.func @transform_23(%arg0: i32) -> (i32, i32, i32) {
    %c0_i32 = arith.constant 0 : i32
    %c0_i32_0 = arith.constant 0 : i32
    %c0_i32_1 = arith.constant 0 : i32
    return %arg0, %c0_i32, %c0_i32_0 : i32, i32, i32
  }
  func.func @transform_24(%arg0: i32) -> (i32, i32, i32) {
    %c0_i32 = arith.constant 0 : i32
    %c0_i32_0 = arith.constant 0 : i32
    %c0_i32_1 = arith.constant 0 : i32
    return %arg0, %c0_i32, %c0_i32_0 : i32, i32, i32
  }
}

</mosaic_0001>

<bundles_post_ra>
// kernel: forward.1
= control target key start
LH: loop header
LB: loop body
LE: loop exit
PB: predicated region body
PF: predicated region fallthrough
CT: control target
= control target key end

     0   :  { %s21068_s0 = inlined_call_operand.vmem [shape: bf16[2,16,3072], index: 0, kind: input, shape index: {}]   ;;  %s21069_s1 = inlined_call_operand.vmem [shape: bf16[3072,256], index: 1, kind: input, shape index: {}]   ;;  %s21070_s2 = inlined_call_operand.vmem [shape: bf16[256,768], index: 2, kind: input, shape index: {}]   ;;  %s21071_s3 = inlined_call_operand.vmem [shape: bf16[256,256], index: 3, kind: input, shape index: {}]   ;;  %s21072_s4 = inlined_call_operand.vmem [shape: bf16[768,256], index: 4, kind: input, shape index: {}]   ;;  %s21073_s5 = inlined_call_operand.vmem [shape: bf16[256,256], index: 5, kind: input, shape index: {}]   ;;  %s21074_s6 = inlined_call_operand.vmem [shape: bf16[256,1152], index: 6, kind: input, shape index: {}]   ;;  %s21075_s7 = inlined_call_operand.vmem [shape: f32[1,128], index: 7, kind: input, shape index: {}]   ;;  %s21076_s8 = inlined_call_operand.vmem [shape: bf16[9,64,16], index: 8, kind: input, shape index: {}]   ;;  %s21077_s9 = inlined_call_operand.vmem [shape: bf16[6,128], index: 9, kind: input, shape index: {}]   ;;  %s21078_s10 = inlined_call_operand.vmem [shape: f32[6,1], index: 10, kind: input, shape index: {}]   ;;  %s21079_s11 = inlined_call_operand.vmem [shape: bf16[128,128], index: 11, kind: input, shape index: {}]   ;;  %s21080_s12 = inlined_call_operand.vmem [shape: f32[1,128], index: 12, kind: input, shape index: {}]   ;;  %s21081_s13 = inlined_call_operand.vmem [shape: bf16[768,128], index: 13, kind: input, shape index: {}]   ;;  %s21082_s14 = inlined_call_operand.vmem [shape: f32[6,128], index: 14, kind: input, shape index: {}]   ;;  %s21083_s15 = inlined_call_operand.vmem [shape: bf16[64,1024], index: 15, kind: input, shape index: {}]   ;;  %s21084_s16 = inlined_call_operand.vmem [shape: f32[2,6,64], index: 16, kind: output, shape index: {0}]   ;;  %s21085_s17 = inlined_call_operand.vmem [shape: f32[2,6,1024], index: 17, kind: output, shape index: {1}]   ;;  %s21086_s18 = inlined_call_operand.vmem [shape: f32[2,6,128], index: 18, kind: output, shape index: {2}]   ;;  %s21087_s19 = inlined_call_operand.vmem [shape: f32[2,6,128], index: 19, kind: output, shape index: {3}]   ;;  %s21088_s20 = inlined_call_operand.hbm [shape: f32[2,64,128], index: 20, kind: output, shape index: {4}]   ;;  %s21089_s21 = inlined_call_operand.hbm [shape: f32[2,64,128], index: 21, kind: output, shape index: {5}]   ;;  %s21090_s22 = inlined_call_operand.vmem [shape: f32[2,64,1], index: 22, kind: output, shape index: {6}]   ;;  %s21091_s23 = inlined_call_operand.vmem [shape: f32[2,64,1], index: 23, kind: output, shape index: {7}]   ;;  %s21092_s24 = inlined_call_operand.vmem [shape: f32[2,64,6], index: 24, kind: output, shape index: {8}]  }
   0x1   :  { %21115 = sst [smem:[#allocation14_spill]] %s21068_s0 }
   0x2   :  { %21116 = sst [smem:[#allocation15_spill]] %s21069_s1 }
   0x3   :  { %21117 = sst [smem:[#allocation16_spill]] %s21070_s2 }
   0x4   :  { %21118 = sst [smem:[#allocation17_spill]] %s21071_s3 }
   0x5   :  { %21119 = sst [smem:[#allocation18_spill]] %s21072_s4 }
   0x6   :  { %21120 = sst [smem:[#allocation19_spill]] %s21073_s5 }
   0x7   :  { %21121 = sst [smem:[#allocation20_spill]] %s21074_s6 }
   0x8   :  { %21122 = sst [smem:[#allocation21_spill]] %s21075_s7 }
   0x9   :  { %21123 = sst [smem:[#allocation22_spill]] %s21076_s8 }
   0xa   :  { %21124 = sst [smem:[#allocation23_spill]] %s21077_s9 }
   0xb   :  { %21125 = sst [smem:[#allocation24_spill]] %s21078_s10 }
   0xc   :  { %21126 = sst [smem:[#allocation25_spill]] %s21079_s11 }
   0xd   :  { %21127 = sst [smem:[#allocation26_spill]] %s21080_s12 }
   0xe   :  { %21128 = sst [smem:[#allocation27_spill]] %s21081_s13 }
   0xf   :  { %21129 = sst [smem:[#allocation28_spill]] %s21082_s14 }
  0x10   :  { %21130 = sst [smem:[#allocation29_spill]] %s21085_s17 }
  0x11   :  { %21131 = sst [smem:[#allocation30_spill]] %s21088_s20 }
  0x12   :  { %21132 = sst [smem:[#allocation31_spill]] %s21089_s21 }
  0x13   :  { %30 = vsyncpa [#allocation3], 0 }
  0x14   :  { %32 = vsyncpa [#allocation3 + $0x1], 0 }
  0x15   :  { %33 = vsyncpa [#allocation5], 0 }
  0x16   :  { %35 = vsyncpa [#allocation5 + $0x1], 0  ;;  %s14734_s5 = smov 0   ;;  %s14736_s26 = smov 0  }
  0x17   :  { %s14738_s27 = smov 0   ;;  %s14740_s28 = smov 0  }
  0x18 LB: > { %21133 = sst [smem:[#allocation8_spill]] %s14589_s5  ;;  %s14755_s6 = sadd.s32 4294967295, %s14601_s28   ;;  %s14601_s28 = sphi %s14740_s28, %s21176_s28   ;;  %s14597_s27 = sphi %s14738_s27, %s21178_s27   ;;  %s14593_s26 = sphi %s14736_s26, %s21180_s26   ;;  %s14589_s5 = sphi %s14734_s5, %s21179_s5  }
  0x19   : > { %21134 = sst [smem:[#allocation9_spill]] %s14597_s27  ;;  %s9603_s2 = sadd.s32 4294967294, %s14601_s28  }
  0x1a   : > { %21135 = sst [smem:[#allocation10_spill]] %s14601_s28  ;;  %s14759_s29 = sadd.s32 1, %s14601_s28  }
  0x1b   : > { %21136 = sst [smem:[#allocation11_spill]] %s14759_s29  ;;  %s493_s0 = sadd.s32 1, %s14597_s27 }
  0x1c   : > { %s490_s7 = ssub.s32 %s14601_s28, %s14759_s29  ;;  %p503_p0 = scmp.ne.s32.totalorder %s14597_s27, %s14593_s26 }
  0x1d   : > { %p491_p1 = scmp.eq.s32.totalorder %s490_s7, 0  ;;  %p504_p2 = scmp.eq.s32.totalorder %s14755_s6, 1 }
  0x1e   : > { %p509_p3 = scmp.ne.s32.totalorder %s14593_s26, %s14589_s5  ;;  %p510_p4 = scmp.eq.s32.totalorder %s9603_s2, 1 }
  0x1f   : > { %s14770_s30 = scalar_select %p491_p1, %s14597_s27, %s493_s0  }
  0x20   : > { %p14772_p5 = por %p504_p2, %p503_p0  ;;  %p14776_p6 = por %p510_p4, %p509_p3 }
  0x21   : > { %21137 = sst [smem:[#allocation12_spill]] %s14770_s30  ;;  %p9606_p7 = scmp.ge.s32.totalorder %s14601_s28, 1 }
  0x22   : > { %s21139_s25 = scalar_select %p14776_p6, 1, 0 }
  0x23   : > { %p685_p8 = scmp.lt.s32.totalorder %s14601_s28, 3 }
  0x24   : > { %21140 = sst [smem:[#allocation13_spill]] %s21139_s25 }
  0x25   : > { %p686_p9 = pnand %p9606_p7, %p685_p8 }
  0x26   : > { %s21141_s1 = sld [smem:[#allocation15_spill]] (!%p686_p9)  ;;  %p788_p10 = scmp.lt.s32.totalorder (!%p686_p9), %s14755_s6, 1 }
  0x27   : > { %689 = sbr.rel (%p686_p9) target bundleno = 2873 (0xb39), region = 84  ;;  %s21142_s29 = sld [smem:[#allocation14_spill]] (!%p686_p9) }
  0x28   : > { %s21144_s5 = sld [smem:[#allocation17_spill]] (!%p686_p9)  ;;  %s14403_s20 = sshll.u32 (!%p686_p9), %s14755_s6, 6 }
  0x29   : > { %s21146_s7 = sld [smem:[#allocation19_spill]] (!%p686_p9) }
  0x2a   : > { %s21149_s0 = sld [smem:[#allocation22_spill]] (!%p686_p9) }
  0x2b   : > { %s21150_s11 = sld [smem:[#allocation25_spill]] (!%p686_p9) }
  0x2c   : > { %v9775_v0 = vld [vmem:[%s21141_s1 + $0x70] sm:$0xf]  ;;  %v13510_v1 = vld [vmem:[%s21141_s1 + $0x74] sm:$0xf0]  ;;  %v9767_v11 = vld [vmem:[%s21141_s1 + $0x60] sm:$0xf] }
  0x2d   : > { %v9839_v2 = vld [vmem:[%s21141_s1 + $0xf0] sm:$0xf]  ;;  %v9776_v3 = vor.u32 %v13510_v1, %v9775_v0  ;;  %v13526_v4 = vld [vmem:[%s21141_s1 + $0xf4] sm:$0xf0]  ;;  %v13508_v13 = vld [vmem:[%s21141_s1 + $0x64] sm:$0xf0] }
  0x2e   : > { %v9903_v5 = vld [vmem:[%s21141_s1 + $0x170] sm:$0xf]  ;;  %v13542_v6 = vld [vmem:[%s21141_s1 + $0x174] sm:$0xf0]  ;;  %v9840_v7 = vor.u32 %v13526_v4, %v9839_v2  ;;  %v9831_v14 = vld [vmem:[%s21141_s1 + $0xe0] sm:$0xf]  ;;  %v9768_v16 = vor.u32 %v13508_v13, %v9767_v11  ;;  %s21145_s25 = smov %s21144_s5 }
  0x2f   : > { %v9904_v8 = vor.u32 %v13542_v6, %v9903_v5  ;;  %v9967_v9 = vld [vmem:[%s21141_s1 + $0x1f0] sm:$0xf]  ;;  %v13558_v10 = vld [vmem:[%s21141_s1 + $0x1f4] sm:$0xf0]  ;;  %3274 = vmatpush.bf16.msra.mxu0 %v9776_v3  ;;  %v13524_v15 = vld [vmem:[%s21141_s1 + $0xe4] sm:$0xf0] }
  0x30   : > { %v9968_v12 = vor.u32 %v13558_v10, %v9967_v9  ;;  %3288 = vmatpush.bf16.msra.mxu1 %v9840_v7  ;;  %v9832_v17 = vor.u32 %v13524_v15, %v9831_v14  ;;  %v9895_v18 = vld [vmem:[%s21141_s1 + $0x160] sm:$0xf]  ;;  %v13540_v19 = vld [vmem:[%s21141_s1 + $0x164] sm:$0xf0]  ;;  %v9759_v23 = vld [vmem:[%s21141_s1 + $0x50] sm:$0xf] }
  0x31   : > { %3302 = vmatpush.bf16.msra.mxu2 %v9904_v8  ;;  %v9959_v20 = vld [vmem:[%s21141_s1 + $0x1e0] sm:$0xf]  ;;  %v9896_v21 = vor.u32 %v13540_v19, %v9895_v18  ;;  %v13556_v22 = vld [vmem:[%s21141_s1 + $0x1e4] sm:$0xf0]  ;;  %v13506_v24 = vld [vmem:[%s21141_s1 + $0x54] sm:$0xf0] }
  0x32   : > { %3316 = vmatpush.bf16.msra.mxu3 %v9968_v12  ;;  %v9960_v25 = vor.u32 %v13556_v22, %v9959_v20  ;;  %v9823_v26 = vld [vmem:[%s21141_s1 + $0xd0] sm:$0xf]  ;;  %v13522_v27 = vld [vmem:[%s21141_s1 + $0xd4] sm:$0xf0]  ;;  %v9760_v29 = vor.u32 %v13506_v24, %v9759_v23  ;;  %v9751_v35 = vld [vmem:[%s21141_s1 + $0x40] sm:$0xf] }
  0x33   : > { %v9887_v28 = vld [vmem:[%s21141_s1 + $0x150] sm:$0xf]  ;;  %3275 = vmatpush.bf16.msra.mxu0 %v9768_v16  ;;  %v13538_v30 = vld [vmem:[%s21141_s1 + $0x154] sm:$0xf0]  ;;  %v9824_v33 = vor.u32 %v13522_v27, %v9823_v26  ;;  %v13504_v36 = vld [vmem:[%s21141_s1 + $0x44] sm:$0xf0] }
  0x34   : > { %v9951_v31 = vld [vmem:[%s21141_s1 + $0x1d0] sm:$0xf]  ;;  %v13554_v32 = vld [vmem:[%s21141_s1 + $0x1d4] sm:$0xf0]  ;;  %3289 = vmatpush.bf16.msra.mxu1 %v9832_v17  ;;  %v9888_v34 = vor.u32 %v13538_v30, %v9887_v28  ;;  %v9815_v37 = vld [vmem:[%s21141_s1 + $0xc0] sm:$0xf]  ;;  %v9752_v44 = vor.u32 %v13504_v36, %v9751_v35 }
  0x35   : > { %3303 = vmatpush.bf16.msra.mxu2 %v9896_v21  ;;  %v9952_v38 = vor.u32 %v13554_v32, %v9951_v31  ;;  %v13520_v39 = vld [vmem:[%s21141_s1 + $0xc4] sm:$0xf0]  ;;  %v9879_v40 = vld [vmem:[%s21141_s1 + $0x140] sm:$0xf]  ;;  %v9743_v47 = vld [vmem:[%s21141_s1 + $0x30] sm:$0xf] }
  0x36   : > { %3317 = vmatpush.bf16.msra.mxu3 %v9960_v25  ;;  %v13536_v41 = vld [vmem:[%s21141_s1 + $0x144] sm:$0xf0]  ;;  %v9943_v42 = vld [vmem:[%s21141_s1 + $0x1c0] sm:$0xf]  ;;  %v9816_v45 = vor.u32 %v13520_v39, %v9815_v37  ;;  %v13502_v48 = vld [vmem:[%s21141_s1 + $0x34] sm:$0xf0] }
  0x37   : > { %v13552_v43 = vld [vmem:[%s21141_s1 + $0x1c4] sm:$0xf0]  ;;  %3276 = vmatpush.bf16.msra.mxu0 %v9760_v29  ;;  %v9880_v46 = vor.u32 %v13536_v41, %v9879_v40  ;;  %v9807_v49 = vld [vmem:[%s21141_s1 + $0xb0] sm:$0xf]  ;;  %v13518_v51 = vld [vmem:[%s21141_s1 + $0xb4] sm:$0xf0]  ;;  %v9744_v56 = vor.u32 %v13502_v48, %v9743_v47 }
  0x38   : > { %3290 = vmatpush.bf16.msra.mxu1 %v9824_v33  ;;  %v9944_v50 = vor.u32 %v13552_v43, %v9943_v42  ;;  %v9871_v52 = vld [vmem:[%s21141_s1 + $0x130] sm:$0xf]  ;;  %v13534_v53 = vld [vmem:[%s21141_s1 + $0x134] sm:$0xf0]  ;;  %v9808_v57 = vor.u32 %v13518_v51, %v9807_v49  ;;  %v9735_v59 = vld [vmem:[%s21141_s1 + $0x20] sm:$0xf] }
  0x39   : > { %3304 = vmatpush.bf16.msra.mxu2 %v9888_v34  ;;  %v9935_v54 = vld [vmem:[%s21141_s1 + $0x1b0] sm:$0xf]  ;;  %v13550_v55 = vld [vmem:[%s21141_s1 + $0x1b4] sm:$0xf0]  ;;  %v9872_v58 = vor.u32 %v13534_v53, %v9871_v52  ;;  %v13500_v60 = vld [vmem:[%s21141_s1 + $0x24] sm:$0xf0] }
  0x3a   : > { %3318 = vmatpush.bf16.msra.mxu3 %v9952_v38  ;;  %v9799_v61 = vld [vmem:[%s21141_s1 + $0xa0] sm:$0xf]  ;;  %v9936_v62 = vor.u32 %v13550_v55, %v9935_v54  ;;  %v13516_v63 = vld [vmem:[%s21141_s1 + $0xa4] sm:$0xf0]  ;;  %v9736_v4 = vor.u32 %v13500_v60, %v9735_v59  ;;  %v9727_v7 = vld [vmem:[%s21141_s1 + $0x10] sm:$0xf] }
  0x3b   : > { %3277 = vmatpush.bf16.msra.mxu0 %v9752_v44  ;;  %v9863_v0 = vld [vmem:[%s21141_s1 + $0x120] sm:$0xf]  ;;  %v13532_v1 = vld [vmem:[%s21141_s1 + $0x124] sm:$0xf0]  ;;  %v9800_v5 = vor.u32 %v13516_v63, %v9799_v61  ;;  %v13498_v8 = vld [vmem:[%s21141_s1 + $0x14] sm:$0xf0] }
  0x3c   : > { %3291 = vmatpush.bf16.msra.mxu1 %v9816_v45  ;;  %v9927_v2 = vld [vmem:[%s21141_s1 + $0x1a0] sm:$0xf]  ;;  %v13548_v3 = vld [vmem:[%s21141_s1 + $0x1a4] sm:$0xf0]  ;;  %v9864_v6 = vor.u32 %v13532_v1, %v9863_v0  ;;  %v9791_v9 = vld [vmem:[%s21141_s1 + $0x90] sm:$0xf]  ;;  %v9728_v16 = vor.u32 %v13498_v8, %v9727_v7 }
  0x3d   : > { %3305 = vmatpush.bf16.msra.mxu2 %v9880_v46  ;;  %v9928_v10 = vor.u32 %v13548_v3, %v9927_v2  ;;  %v13514_v11 = vld [vmem:[%s21141_s1 + $0x94] sm:$0xf0]  ;;  %v9855_v12 = vld [vmem:[%s21141_s1 + $0x110] sm:$0xf]  ;;  %v9719_v17 = vld [vmem:[%s21141_s1] sm:$0xf] }
  0x3e   : > { %3319 = vmatpush.bf16.msra.mxu3 %v9944_v50  ;;  %v13530_v13 = vld [vmem:[%s21141_s1 + $0x114] sm:$0xf0]  ;;  %v9919_v14 = vld [vmem:[%s21141_s1 + $0x190] sm:$0xf]  ;;  %v13496_v18 = vld [vmem:[%s21141_s1 + $0x4] sm:$0xf0]  ;;  %v9792_v19 = vor.u32 %v13514_v11, %v9791_v9 }
  0x3f   : > { %3278 = vmatpush.bf16.msra.mxu0 %v9744_v56  ;;  %v13546_v15 = vld [vmem:[%s21141_s1 + $0x194] sm:$0xf0]  ;;  %v9856_v20 = vor.u32 %v13530_v13, %v9855_v12  ;;  %v9783_v21 = vld [vmem:[%s21141_s1 + $0x80] sm:$0xf]  ;;  %v13512_v22 = vld [vmem:[%s21141_s1 + $0x84] sm:$0xf0]  ;;  %v9720_v31 = vor.u32 %v13496_v18, %v9719_v17 }
  0x40   : > { %3292 = vmatpush.bf16.msra.mxu1 %v9808_v57  ;;  %v9847_v23 = vld [vmem:[%s21141_s1 + $0x100] sm:$0xf]  ;;  %v9920_v24 = vor.u32 %v13546_v15, %v9919_v14  ;;  %v13528_v25 = vld [vmem:[%s21141_s1 + $0x104] sm:$0xf0]  ;;  %v10031_v28 = vld [vmem:[%s21141_s1 + $0x270] sm:$0xf]  ;;  %v9784_v35 = vor.u32 %v13512_v22, %v9783_v21 }
  0x41   : > { %3306 = vmatpush.bf16.msra.mxu2 %v9872_v58  ;;  %v9911_v26 = vld [vmem:[%s21141_s1 + $0x180] sm:$0xf]  ;;  %v13544_v27 = vld [vmem:[%s21141_s1 + $0x184] sm:$0xf0]  ;;  %v13574_v29 = vld [vmem:[%s21141_s1 + $0x274] sm:$0xf0]  ;;  %v9848_v36 = vor.u32 %v13528_v25, %v9847_v23 }
  0x42   : > { %3320 = vmatpush.bf16.msra.mxu3 %v9936_v62  ;;  %v10095_v30 = vld [vmem:[%s21141_s1 + $0x2f0] sm:$0xf]  ;;  %v13590_v32 = vld [vmem:[%s21141_s1 + $0x2f4] sm:$0xf0]  ;;  %v9912_v39 = vor.u32 %v13544_v27, %v9911_v26  ;;  %v10032_v40 = vor.u32 %v13574_v29, %v10031_v28  ;;  %v10023_v43 = vld [vmem:[%s21141_s1 + $0x260] sm:$0xf] }
  0x43   : > { %3279 = vmatpush.bf16.msra.mxu0 %v9736_v4  ;;  %v10159_v33 = vld [vmem:[%s21141_s1 + $0x370] sm:$0xf]  ;;  %v13606_v34 = vld [vmem:[%s21141_s1 + $0x374] sm:$0xf0]  ;;  %v10096_v41 = vor.u32 %v13590_v32, %v10095_v30  ;;  %v13572_v44 = vld [vmem:[%s21141_s1 + $0x264] sm:$0xf0] }
  0x44   : > { %3293 = vmatpush.bf16.msra.mxu1 %v9800_v5  ;;  %v10223_v37 = vld [vmem:[%s21141_s1 + $0x3f0] sm:$0xf]  ;;  %v13622_v38 = vld [vmem:[%s21141_s1 + $0x3f4] sm:$0xf0]  ;;  %v10160_v42 = vor.u32 %v13606_v34, %v10159_v33  ;;  %v10087_v45 = vld [vmem:[%s21141_s1 + $0x2e0] sm:$0xf]  ;;  %v10024_v52 = vor.u32 %v13572_v44, %v10023_v43 }
  0x45   : > { %3307 = vmatpush.bf16.msra.mxu2 %v9864_v6  ;;  %v10224_v46 = vor.u32 %v13622_v38, %v10223_v37  ;;  %v13588_v47 = vld [vmem:[%s21141_s1 + $0x2e4] sm:$0xf0]  ;;  %v10151_v48 = vld [vmem:[%s21141_s1 + $0x360] sm:$0xf]  ;;  %v10015_v53 = vld [vmem:[%s21141_s1 + $0x250] sm:$0xf] }
  0x46   : > { %3321 = vmatpush.bf16.msra.mxu3 %v9928_v10  ;;  %v13604_v49 = vld [vmem:[%s21141_s1 + $0x364] sm:$0xf0]  ;;  %v10215_v50 = vld [vmem:[%s21141_s1 + $0x3e0] sm:$0xf]  ;;  %v13570_v54 = vld [vmem:[%s21141_s1 + $0x254] sm:$0xf0]  ;;  %v10088_v56 = vor.u32 %v13588_v47, %v10087_v45 }
  0x47   : > { %3280 = vmatpush.bf16.msra.mxu0 %v9728_v16  ;;  %v13620_v51 = vld [vmem:[%s21141_s1 + $0x3e4] sm:$0xf0]  ;;  %v10079_v55 = vld [vmem:[%s21141_s1 + $0x2d0] sm:$0xf]  ;;  %v10152_v57 = vor.u32 %v13604_v49, %v10151_v48  ;;  %v13586_v58 = vld [vmem:[%s21141_s1 + $0x2d4] sm:$0xf0]  ;;  %v10016_v2 = vor.u32 %v13570_v54, %v10015_v53 }
  0x48   : > { %3294 = vmatpush.bf16.msra.mxu1 %v9792_v19  ;;  %v10143_v59 = vld [vmem:[%s21141_s1 + $0x350] sm:$0xf]  ;;  %s15039_s4 = scalar_select %p788_p10, %s14755_s6, 1  ;;  %v10216_v60 = vor.u32 %v13620_v51, %v10215_v50  ;;  %v13602_v61 = vld [vmem:[%s21141_s1 + $0x354] sm:$0xf0]  ;;  %v10080_v6 = vor.u32 %v13586_v58, %v10079_v55  ;;  %vm7184_vm1 = vcmask 130048  }
  0x49   : > { %3308 = vmatpush.bf16.msra.mxu2 %v9856_v20  ;;  %v10207_v62 = vld [vmem:[%s21141_s1 + $0x3d0] sm:$0xf]  ;;  %v13618_v63 = vld [vmem:[%s21141_s1 + $0x3d4] sm:$0xf0]  ;;  %v10007_v0 = vld [vmem:[%s21141_s1 + $0x240] sm:$0xf]  ;;  %v10144_v7 = vor.u32 %v13602_v61, %v10143_v59 }
  0x4a   : > { %3322 = vmatpush.bf16.msra.mxu3 %v9920_v24  ;;  %v13568_v1 = vld [vmem:[%s21141_s1 + $0x244] sm:$0xf0]  ;;  %s14405_s8 = smul.u32 192, %s15039_s4  ;;  %v10071_v3 = vld [vmem:[%s21141_s1 + $0x2c0] sm:$0xf]  ;;  %v10208_v11 = vor.u32 %v13618_v63, %v10207_v62  ;;  %s21152_s10 = sld [smem:[#allocation24_spill]] }
  0x4b   : > { %3281 = vmatpush.bf16.msra.mxu0 %v9720_v31  ;;  %v13584_v4 = vld [vmem:[%s21141_s1 + $0x2c4] sm:$0xf0]  ;;  %v10135_v5 = vld [vmem:[%s21141_s1 + $0x340] sm:$0xf]  ;;  %v10008_v19 = vor.u32 %v13568_v1, %v10007_v0  ;;  %v9999_v26 = vld [vmem:[%s21141_s1 + $0x230] sm:$0xf] }
  0x4c   : > { %3295 = vmatpush.bf16.msra.mxu1 %v9784_v35  ;;  %v13600_v8 = vld [vmem:[%s21141_s1 + $0x344] sm:$0xf0]  ;;  %v10199_v9 = vld [vmem:[%s21141_s1 + $0x3c0] sm:$0xf]  ;;  %s15078_s17 = scalar_lea.vmem %s21142_s29, %s14405_s8  ;;  %v10072_v24 = vor.u32 %v13584_v4, %v10071_v3  ;;  %v13566_v27 = vld [vmem:[%s21141_s1 + $0x234] sm:$0xf0] }
  0x4d   : > { %3309 = vmatpush.bf16.msra.mxu2 %v9848_v36  ;;  %v13616_v10 = vld [vmem:[%s21141_s1 + $0x3c4] sm:$0xf0]  ;;  %v9623_v12 = vld [vmem:[%s15078_s17] sm:$0xf]  ;;  %v13471_v17 = vld [vmem:[%s15078_s17 + $0x4] sm:$0xf]  ;;  %v10136_v25 = vor.u32 %v13600_v8, %v10135_v5  ;;  %v10000_v36 = vor.u32 %v13566_v27, %v9999_v26 }
  0x4e   : > { %3323 = vmatpush.bf16.msra.mxu3 %v9912_v39  ;;  %v13483_v13 = vld [vmem:[%s15078_s17 + $0x5c] sm:$0xf0]  ;;  %v9631_v14 = vld [vmem:[%s15078_s17 + $0x8] sm:$0xf]  ;;  %v9625_v18 = vld [vmem:[%s15078_s17 + $0x60] sm:$0xf0]  ;;  %v10200_v30 = vor.u32 %v13616_v10, %v10199_v9 }
  0x4f   : > { %3330 = vmatpush.bf16.msrb.mxu0 %v10032_v40  ;;  %v15083_v15 = vor.u32 %v13483_v13, %v9623_v12  ;;  %v13484_v16 = vld [vmem:[%s15078_s17 + $0x64] sm:$0xf0]  ;;  %v15090_v21 = vor.u32 %v13471_v17, %v9625_v18  ;;  %v13472_v22 = vld [vmem:[%s15078_s17 + $0xc] sm:$0xf]  ;;  %v10063_v28 = vld [vmem:[%s21141_s1 + $0x2b0] sm:$0xf] }
  0x50   : > { %3344 = vmatpush.bf16.msrb.mxu1 %v10096_v41  ;;  %v15088_v20 = vor.u32 %v13484_v16, %v9631_v14  ;;  %v9633_v23 = vld [vmem:[%s15078_s17 + $0x68] sm:$0xf0]  ;;  %v13582_v31 = vld [vmem:[%s21141_s1 + $0x2b4] sm:$0xf0]  ;;  %v10127_v32 = vld [vmem:[%s21141_s1 + $0x330] sm:$0xf] }
  0x51   : > { %3358 = vmatpush.bf16.msrb.mxu2 %v10160_v42  ;;  %v15103_v29 = vor.u32 %v13472_v22, %v9633_v23  ;;  %3282 = vmatmul.bf16.vlgmr.msra.gmra.mxu0 %v15083_v15  ;;  %v13598_v33 = vld [vmem:[%s21141_s1 + $0x334] sm:$0xf0]  ;;  %v10191_v34 = vld [vmem:[%s21141_s1 + $0x3b0] sm:$0xf]  ;;  %v10064_v37 = vor.u32 %v13582_v31, %v10063_v28  ;;  %v9991_v39 = vld [vmem:[%s21141_s1 + $0x220] sm:$0xf] }
  0x52   : > { %3372 = vmatpush.bf16.msrb.mxu3 %v10224_v46  ;;  %3310 = vmatmul.bf16.vlgmr.msra.gmra.mxu2 %v15088_v20  ;;  %v13614_v35 = vld [vmem:[%s21141_s1 + $0x3b4] sm:$0xf0]  ;;  %v10128_v38 = vor.u32 %v13598_v33, %v10127_v32  ;;  %v13564_v40 = vld [vmem:[%s21141_s1 + $0x224] sm:$0xf0]  ;;  %v10055_v41 = vld [vmem:[%s21141_s1 + $0x2a0] sm:$0xf] }
  0x53   : > { %3331 = vmatpush.bf16.msrb.mxu0 %v10024_v52  ;;  %3296 = vmatmul.bf16.vlgmr.msra.gmra.mxu1 %v15090_v21  ;;  %v10192_v42 = vor.u32 %v13614_v35, %v10191_v34  ;;  %v13580_v43 = vld [vmem:[%s21141_s1 + $0x2a4] sm:$0xf0]  ;;  %v10119_v44 = vld [vmem:[%s21141_s1 + $0x320] sm:$0xf]  ;;  %v9992_v48 = vor.u32 %v13564_v40, %v9991_v39  ;;  %v9983_v49 = vld [vmem:[%s21141_s1 + $0x210] sm:$0xf] }
  0x54   : > { %3345 = vmatpush.bf16.msrb.mxu1 %v10088_v56  ;;  %3324 = vmatmul.bf16.vlgmr.msra.gmra.mxu3 %v15103_v29  ;;  %v13596_v45 = vld [vmem:[%s21141_s1 + $0x324] sm:$0xf0]  ;;  %v10183_v46 = vld [vmem:[%s21141_s1 + $0x3a0] sm:$0xf]  ;;  %v10056_v50 = vor.u32 %v13580_v43, %v10055_v41  ;;  %v13562_v52 = vld [vmem:[%s21141_s1 + $0x214] sm:$0xf0] }
  0x55   : > { %3359 = vmatpush.bf16.msrb.mxu2 %v10152_v57  ;;  %v13612_v47 = vld [vmem:[%s21141_s1 + $0x3a4] sm:$0xf0]  ;;  %v10120_v51 = vor.u32 %v13596_v45, %v10119_v44  ;;  %v10047_v53 = vld [vmem:[%s21141_s1 + $0x290] sm:$0xf]  ;;  %v13578_v54 = vld [vmem:[%s21141_s1 + $0x294] sm:$0xf0]  ;;  %v9984_v62 = vor.u32 %v13562_v52, %v9983_v49 }
  0x56   : > { %3373 = vmatpush.bf16.msrb.mxu3 %v10216_v60  ;;  %v10184_v55 = vor.u32 %v13612_v47, %v10183_v46  ;;  %v10111_v56 = vld [vmem:[%s21141_s1 + $0x310] sm:$0xf]  ;;  %v13594_v57 = vld [vmem:[%s21141_s1 + $0x314] sm:$0xf0]  ;;  %v9975_v60 = vld [vmem:[%s21141_s1 + $0x200] sm:$0xf]  ;;  %v10048_v3 = vor.u32 %v13578_v54, %v10047_v53 }
  0x57   : > { %3332 = vmatpush.bf16.msrb.mxu0 %v10016_v2  ;;  %v10175_v58 = vld [vmem:[%s21141_s1 + $0x390] sm:$0xf]  ;;  %v13610_v59 = vld [vmem:[%s21141_s1 + $0x394] sm:$0xf0]  ;;  %v13560_v61 = vld [vmem:[%s21141_s1 + $0x204] sm:$0xf0]  ;;  %v10112_v4 = vor.u32 %v13594_v57, %v10111_v56 }
  0x58   : > { %3346 = vmatpush.bf16.msrb.mxu1 %v10080_v6  ;;  %v10039_v63 = vld [vmem:[%s21141_s1 + $0x280] sm:$0xf]  ;;  %v13576_v0 = vld [vmem:[%s21141_s1 + $0x284] sm:$0xf0]  ;;  %v10176_v8 = vor.u32 %v13610_v59, %v10175_v58  ;;  %v13638_v9 = vld [vmem:[%s21141_s1 + $0x474] sm:$0xf0]  ;;  %v9976_v16 = vor.u32 %v13560_v61, %v9975_v60 }
  0x59   : > { %3360 = vmatpush.bf16.msrb.mxu2 %v10144_v7  ;;  %v10103_v1 = vld [vmem:[%s21141_s1 + $0x300] sm:$0xf]  ;;  %v13592_v2 = vld [vmem:[%s21141_s1 + $0x304] sm:$0xf0]  ;;  %v10287_v7 = vld [vmem:[%s21141_s1 + $0x470] sm:$0xf]  ;;  %v10040_v22 = vor.u32 %v13576_v0, %v10039_v63 }
  0x5a   : > { %3374 = vmatpush.bf16.msrb.mxu3 %v10208_v11  ;;  %v10167_v5 = vld [vmem:[%s21141_s1 + $0x380] sm:$0xf]  ;;  %v13608_v6 = vld [vmem:[%s21141_s1 + $0x384] sm:$0xf0]  ;;  %v10351_v10 = vld [vmem:[%s21141_s1 + $0x4f0] sm:$0xf]  ;;  %v10104_v23 = vor.u32 %v13592_v2, %v10103_v1  ;;  %v10288_v28 = vor.u32 %v13638_v9, %v10287_v7 }
  0x5b   : > { %3333 = vmatpush.bf16.msrb.mxu0 %v10008_v19  ;;  %v13654_v11 = vld [vmem:[%s21141_s1 + $0x4f4] sm:$0xf0]  ;;  %v10415_v12 = vld [vmem:[%s21141_s1 + $0x570] sm:$0xf]  ;;  %v13473_v26 = vld [vmem:[%s15078_s17 + $0x14] sm:$0xf]  ;;  %v10168_v27 = vor.u32 %v13608_v6, %v10167_v5 }
  0x5c   : > { %3347 = vmatpush.bf16.msrb.mxu1 %v10072_v24  ;;  %v13670_v13 = vld [vmem:[%s21141_s1 + $0x574] sm:$0xf0]  ;;  %v10479_v14 = vld [vmem:[%s21141_s1 + $0x5f0] sm:$0xf]  ;;  %v13474_v31 = vld [vmem:[%s15078_s17 + $0x1c] sm:$0xf]  ;;  %v10352_v33 = vor.u32 %v13654_v11, %v10351_v10 }
  0x5d   : > { %3361 = vmatpush.bf16.msrb.mxu2 %v10136_v25  ;;  %v13686_v17 = vld [vmem:[%s21141_s1 + $0x5f4] sm:$0xf0]  ;;  %v9639_v18 = vld [vmem:[%s15078_s17 + $0x10] sm:$0xf]  ;;  %v9649_v32 = vld [vmem:[%s15078_s17 + $0x78] sm:$0xf0]  ;;  %v10416_v34 = vor.u32 %v13670_v13, %v10415_v12 }
  0x5e   : > { %3375 = vmatpush.bf16.msrb.mxu3 %v10200_v30  ;;  %v13485_v19 = vld [vmem:[%s15078_s17 + $0x6c] sm:$0xf0]  ;;  %v9647_v24 = vld [vmem:[%s15078_s17 + $0x18] sm:$0xf]  ;;  %v9641_v30 = vld [vmem:[%s15078_s17 + $0x70] sm:$0xf0]  ;;  %v15258_v47 = vor.u32 %v13474_v31, %v9649_v32 }
  0x5f   : > { %3334 = vmatpush.bf16.msrb.mxu0 %v10000_v36  ;;  %v13486_v25 = vld [vmem:[%s15078_s17 + $0x74] sm:$0xf0]  ;;  %v10279_v35 = vld [vmem:[%s21141_s1 + $0x460] sm:$0xf]  ;;  %v13636_v36 = vld [vmem:[%s21141_s1 + $0x464] sm:$0xf0]  ;;  %v15237_v39 = vor.u32 %v13485_v19, %v9639_v18  ;;  %v15250_v44 = vor.u32 %v13473_v26, %v9641_v30 }
  0x60   : > { %3348 = vmatpush.bf16.msrb.mxu1 %v10064_v37  ;;  %v10343_v37 = vld [vmem:[%s21141_s1 + $0x4e0] sm:$0xf]  ;;  %v13652_v40 = vld [vmem:[%s21141_s1 + $0x4e4] sm:$0xf0]  ;;  %v15248_v43 = vor.u32 %v13486_v25, %v9647_v24  ;;  %v13634_v52 = vld [vmem:[%s21141_s1 + $0x454] sm:$0xf0] }
  0x61   : > { %3362 = vmatpush.bf16.msrb.mxu2 %v10128_v38  ;;  %v10480_v38 = vor.u32 %v13686_v17, %v10479_v14  ;;  %v10407_v41 = vld [vmem:[%s21141_s1 + $0x560] sm:$0xf]  ;;  %v13684_v46 = vld [vmem:[%s21141_s1 + $0x5e4] sm:$0xf0]  ;;  %v10344_v49 = vor.u32 %v13652_v40, %v10343_v37  ;;  %v10335_v53 = vld [vmem:[%s21141_s1 + $0x4d0] sm:$0xf] }
  0x62   : > { %3376 = vmatpush.bf16.msrb.mxu3 %v10192_v42  ;;  %v13668_v42 = vld [vmem:[%s21141_s1 + $0x564] sm:$0xf0]  ;;  %v10471_v45 = vld [vmem:[%s21141_s1 + $0x5e0] sm:$0xf]  ;;  %v10399_v56 = vld [vmem:[%s21141_s1 + $0x550] sm:$0xf] }
  0x63   : > { %3335 = vmatpush.bf16.msrb.mxu0 %v9992_v48  ;;  %v10280_v48 = vor.u32 %v13636_v36, %v10279_v35  ;;  %v10472_v54 = vor.u32 %v13684_v46, %v10471_v45  ;;  %v13666_v57 = vld [vmem:[%s21141_s1 + $0x554] sm:$0xf0]  ;;  %v10463_v58 = vld [vmem:[%s21141_s1 + $0x5d0] sm:$0xf]  ;;  %v10263_v63 = vld [vmem:[%s21141_s1 + $0x440] sm:$0xf] }
  0x64   : > { %3349 = vmatpush.bf16.msrb.mxu1 %v10056_v50  ;;  %v10408_v50 = vor.u32 %v13668_v42, %v10407_v41  ;;  %v13682_v59 = vld [vmem:[%s21141_s1 + $0x5d4] sm:$0xf0]  ;;  %v13632_v0 = vld [vmem:[%s21141_s1 + $0x444] sm:$0xf0]  ;;  %v10327_v1 = vld [vmem:[%s21141_s1 + $0x4c0] sm:$0xf] }
  0x65   : > { %3363 = vmatpush.bf16.msrb.mxu2 %v10120_v51  ;;  %v10271_v51 = vld [vmem:[%s21141_s1 + $0x450] sm:$0xf]  ;;  %v10464_v2 = vor.u32 %v13682_v59, %v10463_v58  ;;  %v13664_v5 = vld [vmem:[%s21141_s1 + $0x544] sm:$0xf0]  ;;  %v10455_v6 = vld [vmem:[%s21141_s1 + $0x5c0] sm:$0xf] }
  0x66   : > { %3377 = vmatpush.bf16.msrb.mxu3 %v10184_v55  ;;  %v13650_v55 = vld [vmem:[%s21141_s1 + $0x4d4] sm:$0xf0]  ;;  %v10272_v60 = vor.u32 %v13634_v52, %v10271_v51  ;;  %v13680_v7 = vld [vmem:[%s21141_s1 + $0x5c4] sm:$0xf0]  ;;  %v10255_v11 = vld [vmem:[%s21141_s1 + $0x430] sm:$0xf] }
  0x67   : > { %3336 = vmatpush.bf16.msrb.mxu0 %v9984_v62  ;;  %v10336_v61 = vor.u32 %v13650_v55, %v10335_v53  ;;  %v10400_v62 = vor.u32 %v13666_v57, %v10399_v56  ;;  %v13630_v12 = vld [vmem:[%s21141_s1 + $0x434] sm:$0xf0]  ;;  %v10319_v13 = vld [vmem:[%s21141_s1 + $0x4b0] sm:$0xf]  ;;  %v10456_v14 = vor.u32 %v13680_v7, %v10455_v6  ;;  %v10247_v26 = vld [vmem:[%s21141_s1 + $0x420] sm:$0xf] }
  0x68   : > { %3350 = vmatpush.bf16.msrb.mxu1 %v10048_v3  ;;  %v13648_v3 = vld [vmem:[%s21141_s1 + $0x4c4] sm:$0xf0]  ;;  %v10383_v17 = vld [vmem:[%s21141_s1 + $0x530] sm:$0xf]  ;;  %v13662_v18 = vld [vmem:[%s21141_s1 + $0x534] sm:$0xf0] }
  0x69   : > { %3364 = vmatpush.bf16.msrb.mxu2 %v10112_v4  ;;  %v10391_v4 = vld [vmem:[%s21141_s1 + $0x540] sm:$0xf]  ;;  %v10328_v9 = vor.u32 %v13648_v3, %v10327_v1  ;;  %v10447_v19 = vld [vmem:[%s21141_s1 + $0x5b0] sm:$0xf]  ;;  %v10384_v25 = vor.u32 %v13662_v18, %v10383_v17  ;;  %v13644_v31 = vld [vmem:[%s21141_s1 + $0x4a4] sm:$0xf0] }
  0x6a   : > { %3378 = vmatpush.bf16.msrb.mxu3 %v10176_v8  ;;  %v10264_v8 = vor.u32 %v13632_v0, %v10263_v63  ;;  %v10392_v10 = vor.u32 %v13664_v5, %v10391_v4  ;;  %v10375_v32 = vld [vmem:[%s21141_s1 + $0x520] sm:$0xf]  ;;  %v13676_v35 = vld [vmem:[%s21141_s1 + $0x5a4] sm:$0xf0]  ;;  %v10239_v37 = vld [vmem:[%s21141_s1 + $0x410] sm:$0xf] }
  0x6b   : > { %3337 = vmatpush.bf16.msrb.mxu0 %v9976_v16  ;;  %v13646_v16 = vld [vmem:[%s21141_s1 + $0x4b4] sm:$0xf0]  ;;  %v10303_v42 = vld [vmem:[%s21141_s1 + $0x490] sm:$0xf]  ;;  %v10231_v52 = vld [vmem:[%s21141_s1 + $0x400] sm:$0xf] }
  0x6c   : > { %3351 = vmatpush.bf16.msrb.mxu1 %v10040_v22  ;;  %v13678_v22 = vld [vmem:[%s21141_s1 + $0x5b4] sm:$0xf0]  ;;  %v10320_v24 = vor.u32 %v13646_v16, %v10319_v13  ;;  %v13624_v53 = vld [vmem:[%s21141_s1 + $0x404] sm:$0xf0]  ;;  %v10295_v55 = vld [vmem:[%s21141_s1 + $0x480] sm:$0xf] }
  0x6d   : > { %3365 = vmatpush.bf16.msrb.mxu2 %v10104_v23  ;;  %v10256_v23 = vor.u32 %v13630_v12, %v10255_v11  ;;  %v10448_v30 = vor.u32 %v13678_v22, %v10447_v19  ;;  %v13626_v41 = vld [vmem:[%s21141_s1 + $0x414] sm:$0xf0]  ;;  %v13640_v56 = vld [vmem:[%s21141_s1 + $0x484] sm:$0xf0]  ;;  %v10359_v57 = vld [vmem:[%s21141_s1 + $0x500] sm:$0xf]  ;;  %v10232_v7 = vor.u32 %v13624_v53, %v10231_v52 }
  0x6e   : > { %3379 = vmatpush.bf16.msrb.mxu3 %v10168_v27  ;;  %3338 = vmatmul.bf16.vlgmr.msrb.gmra.mxu0 %v15237_v39  ;;  %v13628_v27 = vld [vmem:[%s21141_s1 + $0x424] sm:$0xf0]  ;;  %v13642_v45 = vld [vmem:[%s21141_s1 + $0x494] sm:$0xf0]  ;;  %v10543_v63 = vld [vmem:[%s21141_s1 + $0x670] sm:$0xf]  ;;  %v10296_v11 = vor.u32 %v13640_v56, %v10295_v55 }
  0x6f   : > { %3386 = vmatpush.bf16.msra.mxu0 %v10288_v28  ;;  %3352 = vmatmul.bf16.vlgmr.msrb.gmra.mxu1 %v15250_v44  ;;  %v10311_v28 = vld [vmem:[%s21141_s1 + $0x4a0] sm:$0xf]  ;;  %v10248_v36 = vor.u32 %v13628_v27, %v10247_v26  ;;  %v13674_v51 = vld [vmem:[%s21141_s1 + $0x594] sm:$0xf0]  ;;  %v13656_v58 = vld [vmem:[%s21141_s1 + $0x504] sm:$0xf0]  ;;  %v10304_v59 = vor.u32 %v13642_v45, %v10303_v42 }
  0x70   : > { %3400 = vmatpush.bf16.msra.mxu1 %v10352_v33  ;;  %3366 = vmatmul.bf16.vlgmr.msrb.gmra.mxu2 %v15248_v43  ;;  %v13660_v33 = vld [vmem:[%s21141_s1 + $0x524] sm:$0xf0]  ;;  %v13702_v1 = vld [vmem:[%s21141_s1 + $0x674] sm:$0xf0]  ;;  %v10671_v4 = vld [vmem:[%s21141_s1 + $0x770] sm:$0xf]  ;;  %v10360_v12 = vor.u32 %v13656_v58, %v10359_v57 }
  0x71   : > { %3414 = vmatpush.bf16.msra.mxu2 %v10416_v34  ;;  %3380 = vmatmul.bf16.vlgmr.msrb.gmra.mxu3 %v15258_v47  ;;  %v10439_v34 = vld [vmem:[%s21141_s1 + $0x5a0] sm:$0xf]  ;;  %v10376_v40 = vor.u32 %v13660_v33, %v10375_v32  ;;  %v13718_v3 = vld [vmem:[%s21141_s1 + $0x6f4] sm:$0xf0]  ;;  %v10735_v6 = vld [vmem:[%s21141_s1 + $0x7f0] sm:$0xf]  ;;  %v10544_v18 = vor.u32 %v13702_v1, %v10543_v63 }
  0x72   : > { %3428 = vmatpush.bf16.msra.mxu3 %v10480_v38  ;;  %v10312_v38 = vor.u32 %v13644_v31, %v10311_v28  ;;  %v10440_v46 = vor.u32 %v13676_v35, %v10439_v34  ;;  %v13734_v5 = vld [vmem:[%s21141_s1 + $0x774] sm:$0xf0]  ;;  %v9663_v13 = vld [vmem:[%s15078_s17 + $0x28] sm:$0xf]  ;;  %v13475_v16 = vld [vmem:[%s15078_s17 + $0x24] sm:$0xf] }
  0x73   : > { %3387 = vmatpush.bf16.msra.mxu0 %v10280_v48  ;;  %v10367_v48 = vld [vmem:[%s21141_s1 + $0x510] sm:$0xf]  ;;  %v9657_v19 = vld [vmem:[%s15078_s17 + $0x80] sm:$0xf0]  ;;  %v13476_v22 = vld [vmem:[%s15078_s17 + $0x2c] sm:$0xf] }
  0x74   : > { %3401 = vmatpush.bf16.msra.mxu1 %v10344_v49  ;;  %v13658_v49 = vld [vmem:[%s21141_s1 + $0x514] sm:$0xf0]  ;;  %v10535_v26 = vld [vmem:[%s21141_s1 + $0x660] sm:$0xf]  ;;  %v13700_v27 = vld [vmem:[%s21141_s1 + $0x664] sm:$0xf0] }
  0x75   : > { %3415 = vmatpush.bf16.msra.mxu2 %v10408_v50  ;;  %v10431_v50 = vld [vmem:[%s21141_s1 + $0x590] sm:$0xf]  ;;  %v10599_v28 = vld [vmem:[%s21141_s1 + $0x6e0] sm:$0xf]  ;;  %v13716_v32 = vld [vmem:[%s21141_s1 + $0x6e4] sm:$0xf0] }
  0x76   : > { %3429 = vmatpush.bf16.msra.mxu3 %v10472_v54  ;;  %v10240_v54 = vor.u32 %v13626_v41, %v10239_v37  ;;  %v10432_v0 = vor.u32 %v13674_v51, %v10431_v50  ;;  %v10663_v33 = vld [vmem:[%s21141_s1 + $0x760] sm:$0xf]  ;;  %v13732_v34 = vld [vmem:[%s21141_s1 + $0x764] sm:$0xf0]  ;;  %v10536_v41 = vor.u32 %v13700_v27, %v10535_v26  ;;  %v10600_v42 = vor.u32 %v13716_v32, %v10599_v28  ;;  %v13714_v51 = vld [vmem:[%s21141_s1 + $0x6d4] sm:$0xf0] }
  0x77   : > { %3388 = vmatpush.bf16.msra.mxu0 %v10272_v60  ;;  %v10368_v60 = vor.u32 %v13658_v49, %v10367_v48  ;;  %v10727_v37 = vld [vmem:[%s21141_s1 + $0x7e0] sm:$0xf]  ;;  %v10664_v45 = vor.u32 %v13732_v34, %v10663_v33  ;;  %v13698_v48 = vld [vmem:[%s21141_s1 + $0x654] sm:$0xf0]  ;;  %v10591_v49 = vld [vmem:[%s21141_s1 + $0x6d0] sm:$0xf] }
  0x78   : > { %3402 = vmatpush.bf16.msra.mxu1 %v10336_v61  ;;  %v10423_v61 = vld [vmem:[%s21141_s1 + $0x580] sm:$0xf]  ;;  %v10655_v52 = vld [vmem:[%s21141_s1 + $0x750] sm:$0xf]  ;;  %v13730_v53 = vld [vmem:[%s21141_s1 + $0x754] sm:$0xf0]  ;;  %v10592_v57 = vor.u32 %v13714_v51, %v10591_v49 }
  0x79   : > { %3416 = vmatpush.bf16.msra.mxu2 %v10400_v62  ;;  %v13672_v62 = vld [vmem:[%s21141_s1 + $0x584] sm:$0xf0]  ;;  %v13746_v55 = vld [vmem:[%s21141_s1 + $0x7d4] sm:$0xf0]  ;;  %v10656_v58 = vor.u32 %v13730_v53, %v10655_v52  ;;  %v10631_v27 = vld [vmem:[%s21141_s1 + $0x720] sm:$0xf] }
  0x7a   : > { %3430 = vmatpush.bf16.msra.mxu3 %v10464_v2  ;;  %v10607_v2 = vld [vmem:[%s21141_s1 + $0x6f0] sm:$0xf]  ;;  %v10424_v17 = vor.u32 %v13672_v62, %v10423_v61  ;;  %v10583_v61 = vld [vmem:[%s21141_s1 + $0x6c0] sm:$0xf]  ;;  %v13712_v63 = vld [vmem:[%s21141_s1 + $0x6c4] sm:$0xf0] }
  0x7b   : > { %3389 = vmatpush.bf16.msra.mxu0 %v10264_v8  ;;  %v13750_v8 = vld [vmem:[%s21141_s1 + $0x7f4] sm:$0xf0]  ;;  %v13728_v1 = vld [vmem:[%s21141_s1 + $0x744] sm:$0xf0]  ;;  %v10495_v34 = vld [vmem:[%s21141_s1 + $0x610] sm:$0xf] }
  0x7c   : > { %3403 = vmatpush.bf16.msra.mxu1 %v10328_v9  ;;  %v9655_v9 = vld [vmem:[%s15078_s17 + $0x20] sm:$0xf]  ;;  %v13708_v26 = vld [vmem:[%s21141_s1 + $0x6a4] sm:$0xf0]  ;;  %v13722_v49 = vld [vmem:[%s21141_s1 + $0x714] sm:$0xf0] }
  0x7d   : > { %3417 = vmatpush.bf16.msra.mxu2 %v10392_v10  ;;  %v13487_v10 = vld [vmem:[%s15078_s17 + $0x7c] sm:$0xf0]  ;;  %v13724_v28 = vld [vmem:[%s21141_s1 + $0x724] sm:$0xf0]  ;;  %v13738_v51 = vld [vmem:[%s21141_s1 + $0x794] sm:$0xf0] }
  0x7e   : > { %3431 = vmatpush.bf16.msra.mxu3 %v10456_v14  ;;  %v13488_v14 = vld [vmem:[%s15078_s17 + $0x84] sm:$0xf0]  ;;  %v15449_v31 = vor.u32 %v13487_v10, %v9655_v9  ;;  %v10575_v9 = vld [vmem:[%s21141_s1 + $0x6b0] sm:$0xf]  ;;  %v10487_v52 = vld [vmem:[%s21141_s1 + $0x600] sm:$0xf] }
  0x7f   : > { %3390 = vmatpush.bf16.msra.mxu0 %v10256_v23  ;;  %v9665_v23 = vld [vmem:[%s15078_s17 + $0x88] sm:$0xf0]  ;;  %v15460_v35 = vor.u32 %v13488_v14, %v9663_v13  ;;  %v13726_v13 = vld [vmem:[%s21141_s1 + $0x734] sm:$0xf0]  ;;  %v10703_v14 = vld [vmem:[%s21141_s1 + $0x7b0] sm:$0xf] }
  0x80   : > { %3404 = vmatpush.bf16.msra.mxu1 %v10320_v24  ;;  %v10608_v24 = vor.u32 %v13718_v3, %v10607_v2  ;;  %v10711_v2 = vld [vmem:[%s21141_s1 + $0x7c0] sm:$0xf]  ;;  %v13744_v3 = vld [vmem:[%s21141_s1 + $0x7c4] sm:$0xf0]  ;;  %s21143_s8 = sld [smem:[#allocation16_spill]]  ;;  %vm7927_vm2 = vcmask 521216  }
  0x81   : > { %3418 = vmatpush.bf16.msra.mxu2 %v10384_v25  ;;  %v10672_v25 = vor.u32 %v13734_v5, %v10671_v4  ;;  %v10584_v5 = vor.u32 %v13712_v63, %v10583_v61  ;;  %v10712_v10 = vor.u32 %v13744_v3, %v10711_v2  ;;  %v13740_v32 = vld [vmem:[%s21141_s1 + $0x7a4] sm:$0xf0]  ;;  %v10679_v61 = vld [vmem:[%s21141_s1 + $0x780] sm:$0xf]  ;;  %v10799_v63 = vld [vmem:[%s21141_s1 + $0x870] sm:$0xf] }
  0x82   : > { %3432 = vmatpush.bf16.msra.mxu3 %v10448_v30  ;;  %v10736_v30 = vor.u32 %v13750_v8, %v10735_v6  ;;  %v13694_v8 = vld [vmem:[%s21141_s1 + $0x634] sm:$0xf0]  ;;  %v13688_v53 = vld [vmem:[%s21141_s1 + $0x604] sm:$0xf0]  ;;  %v10863_v2 = vld [vmem:[%s21141_s1 + $0x8f0] sm:$0xf] }
  0x83   : > { %3391 = vmatpush.bf16.msra.mxu0 %v10248_v36  ;;  %v15462_v36 = vor.u32 %v13475_v16, %v9657_v19  ;;  %v13742_v16 = vld [vmem:[%s21141_s1 + $0x7b4] sm:$0xf0]  ;;  %s21148_s29 = sld [smem:[#allocation20_spill]]  ;;  %vm7953_vm7 = vcmask 523264  }
  0x84   : > { %3405 = vmatpush.bf16.msra.mxu1 %v10312_v38  ;;  %v13748_v38 = vld [vmem:[%s21141_s1 + $0x7e4] sm:$0xf0]  ;;  %v13782_v3 = vld [vmem:[%s21141_s1 + $0x8f4] sm:$0xf0]  ;;  %s21153_s9 = sld [smem:[#allocation23_spill]] }
  0x85   : > { %3419 = vmatpush.bf16.msra.mxu2 %v10376_v40  ;;  %v15470_v40 = vor.u32 %v13476_v22, %v9665_v23  ;;  %v10728_v50 = vor.u32 %v13748_v38, %v10727_v37  ;;  %v10503_v22 = vld [vmem:[%s21141_s1 + $0x620] sm:$0xf]  ;;  %v13692_v23 = vld [vmem:[%s21141_s1 + $0x624] sm:$0xf0]  ;;  %v10632_v38 = vor.u32 %v13724_v28, %v10631_v27  ;;  %s21154_s12 = sld [smem:[#allocation26_spill]] }
  0x86   : > { %3433 = vmatpush.bf16.msra.mxu3 %v10440_v46  ;;  %v10527_v46 = vld [vmem:[%s21141_s1 + $0x650] sm:$0xf]  ;;  %v10504_v33 = vor.u32 %v13692_v23, %v10503_v22  ;;  %v13478_v22 = vld [vmem:[%s15078_s17 + $0x3c] sm:$0xf]  ;;  %v13764_v27 = vld [vmem:[%s21141_s1 + $0x864] sm:$0xf0] }
  0x87   : > { %3392 = vmatpush.bf16.msra.mxu0 %v10240_v54  ;;  %v10719_v54 = vld [vmem:[%s21141_s1 + $0x7d0] sm:$0xf]  ;;  %v10528_v56 = vor.u32 %v13698_v48, %v10527_v46  ;;  %v9681_v23 = vld [vmem:[%s15078_s17 + $0x98] sm:$0xf0]  ;;  %v10855_v28 = vld [vmem:[%s21141_s1 + $0x8e0] sm:$0xf] }
  0x88   : > { %3406 = vmatpush.bf16.msra.mxu1 %v10304_v59  ;;  %v10519_v59 = vld [vmem:[%s21141_s1 + $0x640] sm:$0xf]  ;;  %v10720_v62 = vor.u32 %v13746_v55, %v10719_v54  ;;  %v10623_v48 = vld [vmem:[%s21141_s1 + $0x710] sm:$0xf]  ;;  %s21155_s13 = sld [smem:[#allocation27_spill]] }
  0x89   : > { %3420 = vmatpush.bf16.msra.mxu2 %v10368_v60  ;;  %v13696_v60 = vld [vmem:[%s21141_s1 + $0x644] sm:$0xf0]  ;;  %v10551_v55 = vld [vmem:[%s21141_s1 + $0x680] sm:$0xf]  ;;  %s21156_s14 = sld [smem:[#allocation28_spill]] }
  0x8a   : > { %3434 = vmatpush.bf16.msra.mxu3 %v10432_v0  ;;  %v10647_v0 = vld [vmem:[%s21141_s1 + $0x740] sm:$0xf]  ;;  %v10520_v4 = vor.u32 %v13696_v60, %v10519_v59  ;;  %v10624_v60 = vor.u32 %v13722_v49, %v10623_v48 }
  0x8b   : > { %3393 = vmatpush.bf16.msra.mxu0 %v10232_v7  ;;  %v10648_v6 = vor.u32 %v13728_v1, %v10647_v0  ;;  %v10511_v7 = vld [vmem:[%s21141_s1 + $0x630] sm:$0xf]  ;;  %v13766_v0 = vld [vmem:[%s21141_s1 + $0x874] sm:$0xf0] }
  0x8c   : > { %3407 = vmatpush.bf16.msra.mxu1 %v10296_v11  ;;  %v13710_v11 = vld [vmem:[%s21141_s1 + $0x6b4] sm:$0xf0] }
  0x8d   : > { %3421 = vmatpush.bf16.msra.mxu2 %v10360_v12  ;;  %v10639_v12 = vld [vmem:[%s21141_s1 + $0x730] sm:$0xf] }
  0x8e   : > { %3435 = vmatpush.bf16.msra.mxu3 %v10424_v17  ;;  %3394 = vmatmul.bf16.vlgmr.msra.gmra.mxu0 %v15449_v31  ;;  %v10512_v17 = vor.u32 %v13694_v8, %v10511_v7  ;;  %v10640_v19 = vor.u32 %v13726_v13, %v10639_v12  ;;  %v10488_v7 = vor.u32 %v13688_v53, %v10487_v52  ;;  %v13814_v8 = vld [vmem:[%s21141_s1 + $0x9f4] sm:$0xf0]  ;;  %v10847_v53 = vld [vmem:[%s21141_s1 + $0x8d0] sm:$0xf] }
  0x8f   : > { %3442 = vmatpush.bf16.msrb.mxu0 %v10544_v18  ;;  %3408 = vmatmul.bf16.vlgmr.msra.gmra.mxu1 %v15462_v36  ;;  %v10576_v18 = vor.u32 %v13710_v11, %v10575_v9  ;;  %v9671_v9 = vld [vmem:[%s15078_s17 + $0x30] sm:$0xf]  ;;  %v9679_v13 = vld [vmem:[%s15078_s17 + $0x38] sm:$0xf] }
  0x90   : > { %3456 = vmatpush.bf16.msrb.mxu1 %v10608_v24  ;;  %3422 = vmatmul.bf16.vlgmr.msra.gmra.mxu2 %v15460_v35  ;;  %v10567_v24 = vld [vmem:[%s21141_s1 + $0x6a0] sm:$0xf]  ;;  %v13762_v52 = vld [vmem:[%s21141_s1 + $0x854] sm:$0xf0] }
  0x91   : > { %3470 = vmatpush.bf16.msrb.mxu2 %v10672_v25  ;;  %3436 = vmatmul.bf16.vlgmr.msra.gmra.mxu3 %v15470_v40  ;;  %v10704_v25 = vor.u32 %v13742_v16, %v10703_v14  ;;  %v10568_v37 = vor.u32 %v13708_v26, %v10567_v24  ;;  %v13490_v14 = vld [vmem:[%s15078_s17 + $0x94] sm:$0xf0]  ;;  %v13477_v16 = vld [vmem:[%s15078_s17 + $0x34] sm:$0xf]  ;;  %v10864_v24 = vor.u32 %v13782_v3, %v10863_v2  ;;  %v10791_v26 = vld [vmem:[%s21141_s1 + $0x860] sm:$0xf] }
  0x92   : > { %3484 = vmatpush.bf16.msrb.mxu3 %v10736_v30  ;;  %v10695_v30 = vld [vmem:[%s21141_s1 + $0x7a0] sm:$0xf]  ;;  %v10792_v48 = vor.u32 %v13764_v27, %v10791_v26  ;;  %v13776_v3 = vld [vmem:[%s21141_s1 + $0x8c4] sm:$0xf0] }
  0x93   : > { %3443 = vmatpush.bf16.msrb.mxu0 %v10536_v41  ;;  %v13690_v41 = vld [vmem:[%s21141_s1 + $0x614] sm:$0xf0]  ;;  %v10696_v46 = vor.u32 %v13740_v32, %v10695_v30  ;;  %v10759_v26 = vld [vmem:[%s21141_s1 + $0x820] sm:$0xf]  ;;  %v13756_v27 = vld [vmem:[%s21141_s1 + $0x824] sm:$0xf0] }
  0x94   : > { %3457 = vmatpush.bf16.msrb.mxu1 %v10600_v42  ;;  %v10559_v42 = vld [vmem:[%s21141_s1 + $0x690] sm:$0xf]  ;;  %v10496_v54 = vor.u32 %v13690_v41, %v10495_v34  ;;  %v10919_v34 = vld [vmem:[%s21141_s1 + $0x960] sm:$0xf] }
  0x95   : > { %3471 = vmatpush.bf16.msrb.mxu2 %v10664_v45  ;;  %v13706_v45 = vld [vmem:[%s21141_s1 + $0x694] sm:$0xf0] }
  0x96   : > { %3485 = vmatpush.bf16.msrb.mxu3 %v10728_v50  ;;  %v10687_v50 = vld [vmem:[%s21141_s1 + $0x790] sm:$0xf]  ;;  %v10560_v59 = vor.u32 %v13706_v45, %v10559_v42  ;;  %v10983_v42 = vld [vmem:[%s21141_s1 + $0x9e0] sm:$0xf]  ;;  %v13812_v45 = vld [vmem:[%s21141_s1 + $0x9e4] sm:$0xf0] }
  0x97   : > { %3444 = vmatpush.bf16.msrb.mxu0 %v10528_v56  ;;  %v13704_v56 = vld [vmem:[%s21141_s1 + $0x684] sm:$0xf0]  ;;  %v10688_v1 = vor.u32 %v13738_v51, %v10687_v50  ;;  %v10783_v51 = vld [vmem:[%s21141_s1 + $0x850] sm:$0xf] }
  0x98   : > { %3458 = vmatpush.bf16.msrb.mxu1 %v10592_v57  ;;  %v10615_v57 = vld [vmem:[%s21141_s1 + $0x700] sm:$0xf]  ;;  %v10552_v11 = vor.u32 %v13704_v56, %v10551_v55  ;;  %v13778_v55 = vld [vmem:[%s21141_s1 + $0x8d4] sm:$0xf0]  ;;  %v10911_v56 = vld [vmem:[%s21141_s1 + $0x950] sm:$0xf] }
  0x99   : > { %3472 = vmatpush.bf16.msrb.mxu2 %v10656_v58  ;;  %v13720_v58 = vld [vmem:[%s21141_s1 + $0x704] sm:$0xf0] }
  0x9a   : > { %3486 = vmatpush.bf16.msrb.mxu3 %v10720_v62  ;;  %v13736_v62 = vld [vmem:[%s21141_s1 + $0x784] sm:$0xf0]  ;;  %v10616_v12 = vor.u32 %v13720_v58, %v10615_v57  ;;  %v13794_v57 = vld [vmem:[%s21141_s1 + $0x954] sm:$0xf0]  ;;  %v10975_v58 = vld [vmem:[%s21141_s1 + $0x9d0] sm:$0xf] }
  0x9b   : > { %3445 = vmatpush.bf16.msrb.mxu0 %v10520_v4  ;;  %v10927_v4 = vld [vmem:[%s21141_s1 + $0x970] sm:$0xf] }
  0x9c   : > { %3459 = vmatpush.bf16.msrb.mxu1 %v10584_v5  ;;  %v13798_v5 = vld [vmem:[%s21141_s1 + $0x974] sm:$0xf0] }
  0x9d   : > { %3473 = vmatpush.bf16.msrb.mxu2 %v10648_v6  ;;  %v10991_v6 = vld [vmem:[%s21141_s1 + $0x9f0] sm:$0xf] }
  0x9e   : > { %3487 = vmatpush.bf16.msrb.mxu3 %v10712_v10  ;;  %v13489_v10 = vld [vmem:[%s15078_s17 + $0x8c] sm:$0xf0]  ;;  %v10992_v30 = vor.u32 %v13814_v8, %v10991_v6  ;;  %v10967_v6 = vld [vmem:[%s21141_s1 + $0x9c0] sm:$0xf] }
  0x9f   : > { %3446 = vmatpush.bf16.msrb.mxu0 %v10512_v17  ;;  %v10680_v17 = vor.u32 %v13736_v62, %v10679_v61  ;;  %v15661_v32 = vor.u32 %v13489_v10, %v9671_v9  ;;  %v10848_v61 = vor.u32 %v13778_v55, %v10847_v53  ;;  %v10912_v62 = vor.u32 %v13794_v57, %v10911_v56  ;;  %v10815_v53 = vld [vmem:[%s21141_s1 + $0x890] sm:$0xf]  ;;  %v13786_v57 = vld [vmem:[%s21141_s1 + $0x914] sm:$0xf0] }
  0xa0   : > { %3460 = vmatpush.bf16.msrb.mxu1 %v10576_v18  ;;  %v10800_v18 = vor.u32 %v13766_v0, %v10799_v63  ;;  %v10775_v63 = vld [vmem:[%s21141_s1 + $0x840] sm:$0xf]  ;;  %v13760_v0 = vld [vmem:[%s21141_s1 + $0x844] sm:$0xf0]  ;;  %v10879_v56 = vld [vmem:[%s21141_s1 + $0x910] sm:$0xf] }
  0xa1   : > { %3474 = vmatpush.bf16.msrb.mxu2 %v10640_v19  ;;  %v9673_v19 = vld [vmem:[%s15078_s17 + $0x90] sm:$0xf0]  ;;  %v10776_v8 = vor.u32 %v13760_v0, %v10775_v63  ;;  %v10807_v63 = vld [vmem:[%s21141_s1 + $0x880] sm:$0xf]  ;;  %v13768_v0 = vld [vmem:[%s21141_s1 + $0x884] sm:$0xf0] }
  0xa2   : > { %3488 = vmatpush.bf16.msrb.mxu3 %v10704_v25  ;;  %v10928_v25 = vor.u32 %v13798_v5, %v10927_v4  ;;  %v15674_v41 = vor.u32 %v13477_v16, %v9673_v19  ;;  %v10903_v4 = vld [vmem:[%s21141_s1 + $0x940] sm:$0xf]  ;;  %v13792_v5 = vld [vmem:[%s21141_s1 + $0x944] sm:$0xf0]  ;;  %v13774_v16 = vld [vmem:[%s21141_s1 + $0x8b4] sm:$0xf0] }
  0xa3   : > { %3447 = vmatpush.bf16.msrb.mxu0 %v10504_v33  ;;  %v13780_v33 = vld [vmem:[%s21141_s1 + $0x8e4] sm:$0xf0]  ;;  %v10904_v10 = vor.u32 %v13792_v5, %v10903_v4  ;;  %v10959_v19 = vld [vmem:[%s21141_s1 + $0x9b0] sm:$0xf]  ;;  %v10880_v4 = vor.u32 %v13786_v57, %v10879_v56  ;;  %v10935_v5 = vld [vmem:[%s21141_s1 + $0x980] sm:$0xf] }
  0xa4   : > { %3461 = vmatpush.bf16.msrb.mxu1 %v10568_v37  ;;  %v13796_v37 = vld [vmem:[%s21141_s1 + $0x964] sm:$0xf0]  ;;  %v10856_v49 = vor.u32 %v13780_v33, %v10855_v28  ;;  %v10823_v28 = vld [vmem:[%s21141_s1 + $0x8a0] sm:$0xf] }
  0xa5   : > { %3475 = vmatpush.bf16.msrb.mxu2 %v10632_v38  ;;  %v15672_v38 = vor.u32 %v13490_v14, %v9679_v13  ;;  %v10920_v50 = vor.u32 %v13796_v37, %v10919_v34  ;;  %v10831_v13 = vld [vmem:[%s21141_s1 + $0x8b0] sm:$0xf]  ;;  %v13772_v33 = vld [vmem:[%s21141_s1 + $0x8a4] sm:$0xf0]  ;;  %v10887_v34 = vld [vmem:[%s21141_s1 + $0x920] sm:$0xf] }
  0xa6   : > { %3489 = vmatpush.bf16.msrb.mxu3 %v10696_v46  ;;  %v15682_v46 = vor.u32 %v13478_v22, %v9681_v23  ;;  %v13806_v22 = vld [vmem:[%s21141_s1 + $0x9b4] sm:$0xf0]  ;;  %v13788_v37 = vld [vmem:[%s21141_s1 + $0x924] sm:$0xf0]  ;;  %v11239_v57 = vld [vmem:[%s21141_s1 + $0xbe0] sm:$0xf] }
  0xa7   : > { %3448 = vmatpush.bf16.msrb.mxu0 %v10496_v54  ;;  %v10984_v54 = vor.u32 %v13812_v45, %v10983_v42  ;;  %v10951_v42 = vld [vmem:[%s21141_s1 + $0x9a0] sm:$0xf]  ;;  %v13804_v45 = vld [vmem:[%s21141_s1 + $0x9a4] sm:$0xf0] }
  0xa8   : > { %3462 = vmatpush.bf16.msrb.mxu1 %v10560_v59  ;;  %v13810_v59 = vld [vmem:[%s21141_s1 + $0x9d4] sm:$0xf0]  ;;  %v10952_v55 = vor.u32 %v13804_v45, %v10951_v42  ;;  %v11047_v45 = vld [vmem:[%s21141_s1 + $0xa60] sm:$0xf] }
  0xa9   : > { %3476 = vmatpush.bf16.msrb.mxu2 %v10624_v60  ;;  %v10784_v60 = vor.u32 %v13762_v52, %v10783_v51  ;;  %v10976_v2 = vor.u32 %v13810_v59, %v10975_v58  ;;  %v10888_v51 = vor.u32 %v13788_v37, %v10887_v34  ;;  %v13754_v52 = vld [vmem:[%s21141_s1 + $0x814] sm:$0xf0]  ;;  %v10943_v58 = vld [vmem:[%s21141_s1 + $0x990] sm:$0xf]  ;;  %v9697_v34 = vld [vmem:[%s15078_s17 + $0xa8] sm:$0xf0] }
  0xaa   : > { %3490 = vmatpush.bf16.msrb.mxu3 %v10688_v1  ;;  %v10839_v1 = vld [vmem:[%s21141_s1 + $0x8c0] sm:$0xf]  ;;  %v13802_v59 = vld [vmem:[%s21141_s1 + $0x994] sm:$0xf0] }
  0xab   : > { %3449 = vmatpush.bf16.msrb.mxu0 %v10488_v7  ;;  %v13808_v7 = vld [vmem:[%s21141_s1 + $0x9c4] sm:$0xf0]  ;;  %v10840_v9 = vor.u32 %v13776_v3, %v10839_v1  ;;  %v10871_v1 = vld [vmem:[%s21141_s1 + $0x900] sm:$0xf] }
  0xac   : > { %3463 = vmatpush.bf16.msrb.mxu1 %v10552_v11  ;;  %v10767_v11 = vld [vmem:[%s21141_s1 + $0x830] sm:$0xf]  ;;  %v10968_v14 = vor.u32 %v13808_v7, %v10967_v6  ;;  %v13800_v6 = vld [vmem:[%s21141_s1 + $0x984] sm:$0xf0] }
  0xad   : > { %3477 = vmatpush.bf16.msrb.mxu2 %v10616_v12  ;;  %v13758_v12 = vld [vmem:[%s21141_s1 + $0x834] sm:$0xf0]  ;;  %v11055_v7 = vld [vmem:[%s21141_s1 + $0xa70] sm:$0xf] }
  0xae   : > { %3491 = vmatpush.bf16.msrb.mxu3 %v10680_v17  ;;  %3450 = vmatmul.bf16.vlgmr.msrb.gmra.mxu0 %v15661_v32  ;;  %v10895_v17 = vld [vmem:[%s21141_s1 + $0x930] sm:$0xf]  ;;  %v10768_v23 = vor.u32 %v13758_v12, %v10767_v11  ;;  %v13846_v11 = vld [vmem:[%s21141_s1 + $0xaf4] sm:$0xf0] }
  0xaf   : > { %3498 = vmatpush.bf16.msra.mxu0 %v10800_v18  ;;  %3464 = vmatmul.bf16.vlgmr.msrb.gmra.mxu1 %v15674_v41  ;;  %v13790_v18 = vld [vmem:[%s21141_s1 + $0x934] sm:$0xf0]  ;;  %v11183_v12 = vld [vmem:[%s21141_s1 + $0xb70] sm:$0xf] }
  0xb0   : > { %3512 = vmatpush.bf16.msra.mxu1 %v10864_v24  ;;  %3478 = vmatmul.bf16.vlgmr.msrb.gmra.mxu2 %v15672_v38  ;;  %v10832_v24 = vor.u32 %v13774_v16, %v10831_v13  ;;  %v13862_v13 = vld [vmem:[%s21141_s1 + $0xb74] sm:$0xf0] }
  0xb1   : > { %3526 = vmatpush.bf16.msra.mxu2 %v10928_v25  ;;  %3492 = vmatmul.bf16.vlgmr.msrb.gmra.mxu3 %v15682_v46  ;;  %v10896_v25 = vor.u32 %v13790_v18, %v10895_v17  ;;  %v13878_v17 = vld [vmem:[%s21141_s1 + $0xbf4] sm:$0xf0]  ;;  %v9687_v18 = vld [vmem:[%s15078_s17 + $0x40] sm:$0xf]  ;;  %v11184_v42 = vor.u32 %v13862_v13, %v11183_v12  ;;  %v13824_v12 = vld [vmem:[%s21141_s1 + $0xa44] sm:$0xf0] }
  0xb2   : > { %3540 = vmatpush.bf16.msra.mxu3 %v10992_v30  ;;  %v10960_v30 = vor.u32 %v13806_v22, %v10959_v19  ;;  %v13491_v19 = vld [vmem:[%s15078_s17 + $0x9c] sm:$0xf0]  ;;  %v10808_v22 = vor.u32 %v13768_v0, %v10807_v63  ;;  %v11039_v63 = vld [vmem:[%s21141_s1 + $0xa50] sm:$0xf]  ;;  %v13826_v0 = vld [vmem:[%s21141_s1 + $0xa54] sm:$0xf0] }
  0xb3   : > { %3499 = vmatpush.bf16.msra.mxu0 %v10792_v48  ;;  %v10760_v48 = vor.u32 %v13756_v27, %v10759_v26  ;;  %v13479_v26 = vld [vmem:[%s15078_s17 + $0x44] sm:$0xf]  ;;  %v10936_v27 = vor.u32 %v13800_v6, %v10935_v5  ;;  %v13858_v5 = vld [vmem:[%s21141_s1 + $0xb54] sm:$0xf0]  ;;  %v11231_v6 = vld [vmem:[%s21141_s1 + $0xbd0] sm:$0xf] }
  0xb4   : > { %3513 = vmatpush.bf16.msra.mxu1 %v10856_v49  ;;  %v10751_v49 = vld [vmem:[%s21141_s1 + $0x810] sm:$0xf]  ;;  %v11095_v13 = vld [vmem:[%s21141_s1 + $0xac0] sm:$0xf] }
  0xb5   : > { %3527 = vmatpush.bf16.msra.mxu2 %v10920_v50  ;;  %v10824_v50 = vor.u32 %v13772_v33, %v10823_v28  ;;  %v13480_v33 = vld [vmem:[%s15078_s17 + $0x4c] sm:$0xf] }
  0xb6   : > { %3541 = vmatpush.bf16.msra.mxu3 %v10984_v54  ;;  %v13770_v54 = vld [vmem:[%s21141_s1 + $0x894] sm:$0xf0] }
  0xb7   : > { %3500 = vmatpush.bf16.msra.mxu0 %v10784_v60  ;;  %v10743_v60 = vld [vmem:[%s21141_s1 + $0x800] sm:$0xf]  ;;  %v10816_v3 = vor.u32 %v13770_v54, %v10815_v53  ;;  %v13860_v54 = vld [vmem:[%s21141_s1 + $0xb64] sm:$0xf0] }
  0xb8   : > { %3514 = vmatpush.bf16.msra.mxu1 %v10848_v61  ;;  %v13752_v61 = vld [vmem:[%s21141_s1 + $0x804] sm:$0xf0]  ;;  %v11175_v53 = vld [vmem:[%s21141_s1 + $0xb60] sm:$0xf] }
  0xb9   : > { %3528 = vmatpush.bf16.msra.mxu2 %v10912_v62  ;;  %v10752_v62 = vor.u32 %v13754_v52, %v10751_v49  ;;  %v10744_v16 = vor.u32 %v13752_v61, %v10743_v60  ;;  %v11111_v49 = vld [vmem:[%s21141_s1 + $0xae0] sm:$0xf]  ;;  %v13844_v52 = vld [vmem:[%s21141_s1 + $0xae4] sm:$0xf0] }
  0xba   : > { %3542 = vmatpush.bf16.msra.mxu3 %v10976_v2  ;;  %v13784_v2 = vld [vmem:[%s21141_s1 + $0x904] sm:$0xf0]  ;;  %v11112_v61 = vor.u32 %v13844_v52, %v11111_v49  ;;  %v11015_v52 = vld [vmem:[%s21141_s1 + $0xa20] sm:$0xf] }
  0xbb   : > { %3501 = vmatpush.bf16.msra.mxu0 %v10776_v8  ;;  %v10944_v8 = vor.u32 %v13802_v59, %v10943_v58  ;;  %v13876_v58 = vld [vmem:[%s21141_s1 + $0xbe4] sm:$0xf0]  ;;  %v15894_v59 = vor.u32 %v13480_v33, %v9697_v34  ;;  %v13838_v33 = vld [vmem:[%s21141_s1 + $0xab4] sm:$0xf0]  ;;  %v11151_v34 = vld [vmem:[%s21141_s1 + $0xb30] sm:$0xf] }
  0xbc   : > { %3515 = vmatpush.bf16.msra.mxu1 %v10840_v9  ;;  %v13830_v9 = vld [vmem:[%s21141_s1 + $0xa74] sm:$0xf0] }
  0xbd   : > { %3529 = vmatpush.bf16.msra.mxu2 %v10904_v10  ;;  %v11119_v10 = vld [vmem:[%s21141_s1 + $0xaf0] sm:$0xf]  ;;  %v11056_v28 = vor.u32 %v13830_v9, %v11055_v7  ;;  %v13874_v7 = vld [vmem:[%s21141_s1 + $0xbd4] sm:$0xf0] }
  0xbe   : > { %3543 = vmatpush.bf16.msra.mxu3 %v10968_v14  ;;  %v11247_v14 = vld [vmem:[%s21141_s1 + $0xbf0] sm:$0xf]  ;;  %v11120_v37 = vor.u32 %v13846_v11, %v11119_v10  ;;  %v11031_v11 = vld [vmem:[%s21141_s1 + $0xa40] sm:$0xf] }
  0xbf   : > { %3502 = vmatpush.bf16.msra.mxu0 %v10768_v23  ;;  %v10872_v23 = vor.u32 %v13784_v2, %v10871_v1  ;;  %v11103_v1 = vld [vmem:[%s21141_s1 + $0xad0] sm:$0xf]  ;;  %v11240_v2 = vor.u32 %v13876_v58, %v11239_v57  ;;  %v13836_v58 = vld [vmem:[%s21141_s1 + $0xaa4] sm:$0xf0] }
  0xc0   : > { %3516 = vmatpush.bf16.msra.mxu1 %v10832_v24  ;;  %v9695_v24 = vld [vmem:[%s15078_s17 + $0x48] sm:$0xf] }
  0xc1   : > { %3530 = vmatpush.bf16.msra.mxu2 %v10896_v25  ;;  %v13492_v25 = vld [vmem:[%s15078_s17 + $0xa4] sm:$0xf0] }
  0xc2   : > { %3544 = vmatpush.bf16.msra.mxu3 %v10960_v30  ;;  %v9689_v30 = vld [vmem:[%s15078_s17 + $0xa0] sm:$0xf0] }
  0xc3   : > { %3503 = vmatpush.bf16.msra.mxu0 %v10760_v48  ;;  %v13828_v48 = vld [vmem:[%s21141_s1 + $0xa64] sm:$0xf0]  ;;  %v15886_v56 = vor.u32 %v13479_v26, %v9689_v30  ;;  %v11023_v26 = vld [vmem:[%s21141_s1 + $0xa30] sm:$0xf] }
  0xc4   : > { %3517 = vmatpush.bf16.msra.mxu1 %v10824_v50  ;;  %v11248_v50 = vor.u32 %v13878_v17, %v11247_v14  ;;  %v11048_v60 = vor.u32 %v13828_v48, %v11047_v45  ;;  %v11232_v14 = vor.u32 %v13874_v7, %v11231_v6  ;;  %v11159_v17 = vld [vmem:[%s21141_s1 + $0xb40] sm:$0xf]  ;;  %v13870_v45 = vld [vmem:[%s21141_s1 + $0xbb4] sm:$0xf0] }
  0xc5   : > { %3531 = vmatpush.bf16.msra.mxu2 %v10888_v51  ;;  %v15873_v51 = vor.u32 %v13491_v19, %v9687_v18  ;;  %v13856_v18 = vld [vmem:[%s21141_s1 + $0xb44] sm:$0xf0]  ;;  %v11223_v19 = vld [vmem:[%s21141_s1 + $0xbc0] sm:$0xf]  ;;  %v13834_v6 = vld [vmem:[%s21141_s1 + $0xa94] sm:$0xf0] }
  0xc6   : > { %3545 = vmatpush.bf16.msra.mxu3 %v10952_v55  ;;  %v15884_v55 = vor.u32 %v13492_v25, %v9695_v24  ;;  %v11160_v25 = vor.u32 %v13856_v18, %v11159_v17  ;;  %v13832_v17 = vld [vmem:[%s21141_s1 + $0xa84] sm:$0xf0]  ;;  %v11127_v18 = vld [vmem:[%s21141_s1 + $0xb00] sm:$0xf] }
  0xc7   : > { %3504 = vmatpush.bf16.msra.mxu0 %v10752_v62  ;;  %v11176_v62 = vor.u32 %v13860_v54, %v11175_v53  ;;  %v13820_v53 = vld [vmem:[%s21141_s1 + $0xa24] sm:$0xf0]  ;;  %v11079_v54 = vld [vmem:[%s21141_s1 + $0xaa0] sm:$0xf] }
  0xc8   : > { %3518 = vmatpush.bf16.msra.mxu1 %v10816_v3  ;;  %v13842_v3 = vld [vmem:[%s21141_s1 + $0xad4] sm:$0xf0] }
  0xc9   : > { %3532 = vmatpush.bf16.msra.mxu2 %v10880_v4  ;;  %v11167_v4 = vld [vmem:[%s21141_s1 + $0xb50] sm:$0xf]  ;;  %v11104_v9 = vor.u32 %v13842_v3, %v11103_v1 }
  0xca   : > { %3546 = vmatpush.bf16.msra.mxu3 %v10944_v8  ;;  %v11040_v8 = vor.u32 %v13826_v0, %v11039_v63  ;;  %v11168_v10 = vor.u32 %v13858_v5, %v11167_v4  ;;  %v13868_v63 = vld [vmem:[%s21141_s1 + $0xba4] sm:$0xf0]  ;;  %v11016_v0 = vor.u32 %v13820_v53, %v11015_v52  ;;  %v11007_v1 = vld [vmem:[%s21141_s1 + $0xa10] sm:$0xf]  ;;  %v13818_v4 = vld [vmem:[%s21141_s1 + $0xa14] sm:$0xf0] }
  0xcb   : > { %3505 = vmatpush.bf16.msra.mxu0 %v10744_v16  ;;  %v13840_v16 = vld [vmem:[%s21141_s1 + $0xac4] sm:$0xf0]  ;;  %v11071_v5 = vld [vmem:[%s21141_s1 + $0xa90] sm:$0xf] }
  0xcc   : > { %3519 = vmatpush.bf16.msra.mxu1 %v10808_v22  ;;  %v13872_v22 = vld [vmem:[%s21141_s1 + $0xbc4] sm:$0xf0]  ;;  %v11096_v24 = vor.u32 %v13840_v16, %v11095_v13  ;;  %v11063_v16 = vld [vmem:[%s21141_s1 + $0xa80] sm:$0xf] }
  0xcd   : > { %3533 = vmatpush.bf16.msra.mxu2 %v10872_v23  ;;  %v11032_v23 = vor.u32 %v13824_v12, %v11031_v11  ;;  %v11224_v30 = vor.u32 %v13872_v22, %v11223_v19  ;;  %v13866_v11 = vld [vmem:[%s21141_s1 + $0xb94] sm:$0xf0]  ;;  %v10999_v12 = vld [vmem:[%s21141_s1 + $0xa00] sm:$0xf]  ;;  %v13816_v13 = vld [vmem:[%s21141_s1 + $0xa04] sm:$0xf0]  ;;  %v11072_v22 = vor.u32 %v13834_v6, %v11071_v5  ;;  %v11064_v52 = vor.u32 %v13832_v17, %v11063_v16 }
  0xce   : > { %3547 = vmatpush.bf16.msra.mxu3 %v10936_v27  ;;  %3506 = vmatmul.bf16.vlgmr.msra.gmra.mxu0 %v15873_v51  ;;  %v13822_v27 = vld [vmem:[%s21141_s1 + $0xa34] sm:$0xf0]  ;;  %v13848_v19 = vld [vmem:[%s21141_s1 + $0xb04] sm:$0xf0]  ;;  %v13523_v5 = vld [vmem:[%s21141_s1 + $0xe4] sm:$0xf] }
  0xcf   : > { %3554 = vmatpush.bf16.msrb.mxu0 %v11056_v28  ;;  %3520 = vmatmul.bf16.vlgmr.msra.gmra.mxu1 %v15886_v56  ;;  %v11087_v28 = vld [vmem:[%s21141_s1 + $0xab0] sm:$0xf]  ;;  %v11024_v48 = vor.u32 %v13822_v27, %v11023_v26  ;;  %v13509_v26 = vld [vmem:[%s21141_s1 + $0x74] sm:$0xf]  ;;  %v11128_v53 = vor.u32 %v13848_v19, %v11127_v18 }
  0xd0   : > { %3568 = vmatpush.bf16.msrb.mxu1 %v11120_v37  ;;  %3534 = vmatmul.bf16.vlgmr.msra.gmra.mxu2 %v15884_v55  ;;  %v13854_v37 = vld [vmem:[%s21141_s1 + $0xb34] sm:$0xf0]  ;;  %v11088_v49 = vor.u32 %v13838_v33, %v11087_v28  ;;  %v9777_v28 = vld [vmem:[%s21141_s1 + $0x78] sm:$0xf0] }
  0xd1   : > { %3582 = vmatpush.bf16.msrb.mxu2 %v11184_v42  ;;  %3548 = vmatmul.bf16.vlgmr.msra.gmra.mxu3 %v15894_v59  ;;  %v11215_v42 = vld [vmem:[%s21141_s1 + $0xbb0] sm:$0xf]  ;;  %v9841_v33 = vld [vmem:[%s21141_s1 + $0xf8] sm:$0xf0] }
  0xd2   : > { %3596 = vmatpush.bf16.msrb.mxu3 %v11248_v50  ;;  %v11152_v50 = vor.u32 %v13854_v37, %v11151_v34  ;;  %v11216_v57 = vor.u32 %v13870_v45, %v11215_v42  ;;  %v13541_v34 = vld [vmem:[%s21141_s1 + $0x174] sm:$0xf]  ;;  %v9905_v37 = vld [vmem:[%s21141_s1 + $0x178] sm:$0xf0]  ;;  %v11000_v45 = vor.u32 %v13816_v13, %v10999_v12  ;;  %v13555_v13 = vld [vmem:[%s21141_s1 + $0x1e4] sm:$0xf] }
  0xd3   : > { %3555 = vmatpush.bf16.msrb.mxu0 %v11048_v60  ;;  %v11143_v60 = vld [vmem:[%s21141_s1 + $0xb20] sm:$0xf]  ;;  %v13557_v42 = vld [vmem:[%s21141_s1 + $0x1f4] sm:$0xf] }
  0xd4   : > { %3569 = vmatpush.bf16.msrb.mxu1 %v11112_v61  ;;  %v13852_v61 = vld [vmem:[%s21141_s1 + $0xb24] sm:$0xf0] }
  0xd5   : > { %3583 = vmatpush.bf16.msrb.mxu2 %v11176_v62  ;;  %v11207_v62 = vld [vmem:[%s21141_s1 + $0xba0] sm:$0xf]  ;;  %v11144_v3 = vor.u32 %v13852_v61, %v11143_v60  ;;  %v9780_v61 = vor.u32 %v13509_v26, %v9777_v28  ;;  %v9825_v26 = vld [vmem:[%s21141_s1 + $0xd8] sm:$0xf0] }
  0xd6   : > { %3597 = vmatpush.bf16.msrb.mxu3 %v11240_v2  ;;  %v11080_v2 = vor.u32 %v13836_v58, %v11079_v54  ;;  %v11208_v7 = vor.u32 %v13868_v63, %v11207_v62  ;;  %v9711_v54 = vld [vmem:[%s15078_s17 + $0x58] sm:$0xf]  ;;  %v13481_v58 = vld [vmem:[%s15078_s17 + $0x54] sm:$0xf]  ;;  %v13482_v63 = vld [vmem:[%s15078_s17 + $0x5c] sm:$0xf] }
  0xd7   : > { %3556 = vmatpush.bf16.msrb.mxu0 %v11040_v8  ;;  %v11135_v8 = vld [vmem:[%s21141_s1 + $0xb10] sm:$0xf]  ;;  %v9705_v62 = vld [vmem:[%s15078_s17 + $0xb0] sm:$0xf0]  ;;  %v9889_v28 = vld [vmem:[%s21141_s1 + $0x158] sm:$0xf0] }
  0xd8   : > { %3570 = vmatpush.bf16.msrb.mxu1 %v11104_v9  ;;  %v13850_v9 = vld [vmem:[%s21141_s1 + $0xb14] sm:$0xf0]  ;;  %v16098_v12 = vor.u32 %v13481_v58, %v9705_v62  ;;  %v9945_v58 = vld [vmem:[%s21141_s1 + $0x1c8] sm:$0xf0] }
  0xd9   : > { %3584 = vmatpush.bf16.msrb.mxu2 %v11168_v10  ;;  %v11199_v10 = vld [vmem:[%s21141_s1 + $0xb90] sm:$0xf] }
  0xda   : > { %3598 = vmatpush.bf16.msrb.mxu3 %v11232_v14  ;;  %v11008_v14 = vor.u32 %v13818_v4, %v11007_v1  ;;  %v11200_v27 = vor.u32 %v13866_v11, %v11199_v10  ;;  %v9769_v4 = vld [vmem:[%s21141_s1 + $0x68] sm:$0xf0] }
  0xdb   : > { %3557 = vmatpush.bf16.msrb.mxu0 %v11032_v23  ;;  %v11136_v23 = vor.u32 %v13850_v9, %v11135_v8  ;;  %v9833_v8 = vld [vmem:[%s21141_s1 + $0xe8] sm:$0xf0]  ;;  %v13539_v9 = vld [vmem:[%s21141_s1 + $0x164] sm:$0xf] }
  0xdc   : > { %3571 = vmatpush.bf16.msrb.mxu1 %v11096_v24  ;;  %v11191_v24 = vld [vmem:[%s21141_s1 + $0xb80] sm:$0xf]  ;;  %v9897_v10 = vld [vmem:[%s21141_s1 + $0x168] sm:$0xf0]  ;;  %v9836_v18 = vor.u32 %v13523_v5, %v9833_v8  ;;  %v9873_v5 = vld [vmem:[%s21141_s1 + $0x138] sm:$0xf0] }
  0xdd   : > { %3585 = vmatpush.bf16.msrb.mxu2 %v11160_v25  ;;  %v13864_v25 = vld [vmem:[%s21141_s1 + $0xb84] sm:$0xf0]  ;;  %v9900_v19 = vor.u32 %v13539_v9, %v9897_v10  ;;  %v9937_v8 = vld [vmem:[%s21141_s1 + $0x1b8] sm:$0xf0] }
  0xde   : > { %3599 = vmatpush.bf16.msrb.mxu3 %v11224_v30  ;;  %v13525_v30 = vld [vmem:[%s21141_s1 + $0xf4] sm:$0xf]  ;;  %v11192_v60 = vor.u32 %v13864_v25, %v11191_v24 }
  0xdf   : > { %3558 = vmatpush.bf16.msrb.mxu0 %v11024_v48  ;;  %v9969_v48 = vld [vmem:[%s21141_s1 + $0x1f8] sm:$0xf0]  ;;  %v9844_v1 = vor.u32 %v13525_v30, %v9841_v33  ;;  %v13521_v24 = vld [vmem:[%s21141_s1 + $0xd4] sm:$0xf] }
  0xe0   : > { %3572 = vmatpush.bf16.msrb.mxu1 %v11088_v49  ;;  %v9703_v49 = vld [vmem:[%s15078_s17 + $0x50] sm:$0xf]  ;;  %v9972_v6 = vor.u32 %v13557_v42, %v9969_v48  ;;  %v13553_v30 = vld [vmem:[%s21141_s1 + $0x1d4] sm:$0xf]  ;;  %v9953_v33 = vld [vmem:[%s21141_s1 + $0x1d8] sm:$0xf0] }
  0xe1   : > { %3586 = vmatpush.bf16.msrb.mxu2 %v11152_v50  ;;  %v13493_v50 = vld [vmem:[%s15078_s17 + $0xac] sm:$0xf0]  ;;  %v9753_v48 = vld [vmem:[%s21141_s1 + $0x48] sm:$0xf0] }
  0xe2   : > { %3600 = vmatpush.bf16.msrb.mxu3 %v11216_v57  ;;  %v13494_v57 = vld [vmem:[%s15078_s17 + $0xb4] sm:$0xf0] }
  0xe3   : > { %3559 = vmatpush.bf16.msrb.mxu0 %v11016_v0  ;;  %v9713_v0 = vld [vmem:[%s15078_s17 + $0xb8] sm:$0xf0]  ;;  %v16096_v11 = vor.u32 %v13494_v57, %v9711_v54  ;;  %v9881_v54 = vld [vmem:[%s21141_s1 + $0x148] sm:$0xf0]  ;;  %v13551_v57 = vld [vmem:[%s21141_s1 + $0x1c4] sm:$0xf] }
  0xe4   : > { %3573 = vmatpush.bf16.msrb.mxu1 %v11080_v2  ;;  %v9908_v2 = vor.u32 %v13541_v34, %v9905_v37  ;;  %v16106_v16 = vor.u32 %v13482_v63, %v9713_v0  ;;  %v9828_v37 = vor.u32 %v13521_v24, %v9825_v26  ;;  %v13501_v63 = vld [vmem:[%s21141_s1 + $0x34] sm:$0xf]  ;;  %v9745_v0 = vld [vmem:[%s21141_s1 + $0x38] sm:$0xf0]  ;;  %v9865_v24 = vld [vmem:[%s21141_s1 + $0x128] sm:$0xf0] }
  0xe5   : > { %3587 = vmatpush.bf16.msrb.mxu2 %v11144_v3  ;;  %v13507_v3 = vld [vmem:[%s21141_s1 + $0x64] sm:$0xf]  ;;  %v9748_v9 = vor.u32 %v13501_v63, %v9745_v0  ;;  %v9929_v26 = vld [vmem:[%s21141_s1 + $0x1a8] sm:$0xf0]  ;;  %s21147_s17 = sld [smem:[#allocation18_spill]] }
  0xe6   : > { %3601 = vmatpush.bf16.msrb.mxu3 %v11208_v7  ;;  %v16085_v7 = vor.u32 %v13493_v50, %v9703_v49  ;;  %v9772_v17 = vor.u32 %v13507_v3, %v9769_v4  ;;  %v13519_v49 = vld [vmem:[%s21141_s1 + $0xc4] sm:$0xf]  ;;  %v9956_v50 = vor.u32 %v13553_v30, %v9953_v33  ;;  %v9809_v3 = vld [vmem:[%s21141_s1 + $0xb8] sm:$0xf0]  ;;  %v13533_v4 = vld [vmem:[%s21141_s1 + $0x134] sm:$0xf] }
  0xe7   : > { %3560 = vmatpush.bf16.msrb.mxu0 %v11008_v14  ;;  %v9961_v14 = vld [vmem:[%s21141_s1 + $0x1e8] sm:$0xf0]  ;;  %v13497_v33 = vld [vmem:[%s21141_s1 + $0x14] sm:$0xf]  ;;  %v13527_v63 = vld [vmem:[%s21141_s1 + $0x104] sm:$0xf] }
  0xe8   : > { %3574 = vmatpush.bf16.msrb.mxu1 %v11072_v22  ;;  %v13505_v22 = vld [vmem:[%s21141_s1 + $0x54] sm:$0xf]  ;;  %v9964_v25 = vor.u32 %v13555_v13, %v9961_v14  ;;  %v9876_v13 = vor.u32 %v13533_v4, %v9873_v5  ;;  %v13499_v14 = vld [vmem:[%s21141_s1 + $0x24] sm:$0xf]  ;;  %v10033_v5 = vld [vmem:[%s21141_s1 + $0x278] sm:$0xf0] }
  0xe9   : > { %3588 = vmatpush.bf16.msrb.mxu2 %v11136_v23  ;;  %v9761_v23 = vld [vmem:[%s21141_s1 + $0x58] sm:$0xf0]  ;;  %v13573_v4 = vld [vmem:[%s21141_s1 + $0x274] sm:$0xf] }
  0xea   : > { %3602 = vmatpush.bf16.msrb.mxu3 %v11200_v27  ;;  %v13537_v27 = vld [vmem:[%s21141_s1 + $0x154] sm:$0xf]  ;;  %v9764_v34 = vor.u32 %v13505_v22, %v9761_v23  ;;  %v9801_v22 = vld [vmem:[%s21141_s1 + $0xa8] sm:$0xf0]  ;;  %v13531_v23 = vld [vmem:[%s21141_s1 + $0x124] sm:$0xf] }
  0xeb   : > { %3561 = vmatpush.bf16.msrb.mxu0 %v11000_v45  ;;  %v9892_v42 = vor.u32 %v13537_v27, %v9889_v28  ;;  %v13503_v45 = vld [vmem:[%s21141_s1 + $0x44] sm:$0xf]  ;;  %v9868_v30 = vor.u32 %v13531_v23, %v9865_v24  ;;  %v10036_v23 = vor.u32 %v13573_v4, %v10033_v5  ;;  %v16343_v4 = vpop.f32.mrf.mxu1  ;;  %v10073_v5 = vld [vmem:[%s21141_s1 + $0x2c8] sm:$0xf0] }
  0xec   : > { %3575 = vmatpush.bf16.msrb.mxu1 %v11064_v52  ;;  %v9817_v52 = vld [vmem:[%s21141_s1 + $0xc8] sm:$0xf0] }
  0xed   : > { %3589 = vmatpush.bf16.msrb.mxu2 %v11128_v53  ;;  %v13535_v53 = vld [vmem:[%s21141_s1 + $0x144] sm:$0xf] }
  0xee   : > { %3603 = vmatpush.bf16.msrb.mxu3 %v11192_v60  ;;  %3562 = vmatmul.bf16.vlgmr.msrb.gmra.mxu0 %v16085_v7  ;;  %v9756_v60 = vor.u32 %v13503_v45, %v9753_v48  ;;  %v9884_v62 = vor.u32 %v13535_v53, %v9881_v54  ;;  %v9793_v45 = vld [vmem:[%s21141_s1 + $0x98] sm:$0xf0]  ;;  %v13529_v48 = vld [vmem:[%s21141_s1 + $0x114] sm:$0xf]  ;;  %v13495_v54 = vld [vmem:[%s21141_s1 + $0x4] sm:$0xf] }
  0xef   : > { %3610 = vmatpush.bf16.msra.mxu0 %v9780_v61  ;;  %3576 = vmatmul.bf16.vlgmr.msrb.gmra.mxu1 %v16098_v12  ;;  %v9820_v61 = vor.u32 %v13519_v49, %v9817_v52  ;;  %v9857_v49 = vld [vmem:[%s21141_s1 + $0x118] sm:$0xf0] }
  0xf0   : > { %3624 = vmatpush.bf16.msra.mxu1 %v9844_v1  ;;  %3590 = vmatmul.bf16.vlgmr.msrb.gmra.mxu2 %v16096_v11  ;;  %v13517_v1 = vld [vmem:[%s21141_s1 + $0xb4] sm:$0xf]  ;;  %v9921_v52 = vld [vmem:[%s21141_s1 + $0x198] sm:$0xf0] }
  0xf1   : > { %3638 = vmatpush.bf16.msra.mxu2 %v9908_v2  ;;  %3604 = vmatmul.bf16.vlgmr.msrb.gmra.mxu3 %v16106_v16  ;;  %v9948_v2 = vor.u32 %v13551_v57, %v9945_v58  ;;  %v9812_v10 = vor.u32 %v13517_v1, %v9809_v3  ;;  %v9721_v57 = vld [vmem:[%s21141_s1 + $0x8] sm:$0xf0] }
  0xf2   : > { %3652 = vmatpush.bf16.msra.mxu3 %v9972_v6  ;;  %v13549_v6 = vld [vmem:[%s21141_s1 + $0x1b4] sm:$0xf]  ;;  %v9849_v1 = vld [vmem:[%s21141_s1 + $0x108] sm:$0xf0] }
  0xf3   : > { %3611 = vmatpush.bf16.msra.mxu0 %v9772_v17  ;;  %v9737_v17 = vld [vmem:[%s21141_s1 + $0x28] sm:$0xf0] }
  0xf4   : > { %3625 = vmatpush.bf16.msra.mxu1 %v9836_v18  ;;  %v13515_v18 = vld [vmem:[%s21141_s1 + $0xa4] sm:$0xf]  ;;  %v9740_v27 = vor.u32 %v13499_v14, %v9737_v17  ;;  %v9913_v3 = vld [vmem:[%s21141_s1 + $0x188] sm:$0xf0]  ;;  %v9852_v17 = vor.u32 %v13527_v63, %v9849_v1  ;;  %v10209_v63 = vld [vmem:[%s21141_s1 + $0x3d8] sm:$0xf0]  ;;  %v16332_v1 = vpop.f32.mrf.mxu0 }
  0xf5   : > { %3639 = vmatpush.bf16.msra.mxu2 %v9900_v19  ;;  %v9940_v19 = vor.u32 %v13549_v6, %v9937_v8  ;;  %v9804_v28 = vor.u32 %v13515_v18, %v9801_v22  ;;  %v13589_v6 = vld [vmem:[%s21141_s1 + $0x2f4] sm:$0xf]  ;;  %v9724_v8 = vor.u32 %v13495_v54, %v9721_v57 }
  0xf6   : > { %3653 = vmatpush.bf16.msra.mxu3 %v9964_v25  ;;  %v13547_v25 = vld [vmem:[%s21141_s1 + $0x1a4] sm:$0xf]  ;;  %v13621_v18 = vld [vmem:[%s21141_s1 + $0x3f4] sm:$0xf] }
  0xf7   : > { %3612 = vmatpush.bf16.msra.mxu0 %v9764_v34  ;;  %v9729_v34 = vld [vmem:[%s21141_s1 + $0x18] sm:$0xf0]  ;;  %v13585_v54 = vld [vmem:[%s21141_s1 + $0x2d4] sm:$0xf] }
  0xf8   : > { %3626 = vmatpush.bf16.msra.mxu1 %v9828_v37  ;;  %v13513_v37 = vld [vmem:[%s21141_s1 + $0x94] sm:$0xf]  ;;  %v9732_v53 = vor.u32 %v13497_v33, %v9729_v34  ;;  %v10089_v33 = vld [vmem:[%s21141_s1 + $0x2e8] sm:$0xf0]  ;;  %v13603_v34 = vld [vmem:[%s21141_s1 + $0x364] sm:$0xf] }
  0xf9   : > { %3640 = vmatpush.bf16.msra.mxu2 %v9892_v42  ;;  %v9932_v42 = vor.u32 %v13547_v25, %v9929_v26  ;;  %v9796_v58 = vor.u32 %v13513_v37, %v9793_v45  ;;  %v13571_v26 = vld [vmem:[%s21141_s1 + $0x264] sm:$0xf]  ;;  %v10153_v37 = vld [vmem:[%s21141_s1 + $0x368] sm:$0xf0] }
  0xfa   : > { %3654 = vmatpush.bf16.msra.mxu3 %v9956_v50  ;;  %v13545_v50 = vld [vmem:[%s21141_s1 + $0x194] sm:$0xf]  ;;  %v10217_v45 = vld [vmem:[%s21141_s1 + $0x3e8] sm:$0xf0] }
  0xfb   : > { %3613 = vmatpush.bf16.msra.mxu0 %v9756_v60  ;;  %v9860_v60 = vor.u32 %v13529_v48, %v9857_v49  ;;  %v9924_v0 = vor.u32 %v13545_v50, %v9921_v52  ;;  %v10156_v50 = vor.u32 %v13603_v34, %v10153_v37  ;;  %v13569_v52 = vld [vmem:[%s21141_s1 + $0x254] sm:$0xf]  ;;  %v16386_v34 = vpop.f32.mrf.mxu3 }
  0xfc   : > { %3627 = vmatpush.bf16.msra.mxu1 %v9820_v61  ;;  %v13511_v61 = vld [vmem:[%s21141_s1 + $0x84] sm:$0xf] }
  0xfd   : > { %3641 = vmatpush.bf16.msra.mxu2 %v9884_v62  ;;  %v9785_v62 = vld [vmem:[%s21141_s1 + $0x88] sm:$0xf0] }
  0xfe   : > { %3655 = vmatpush.bf16.msra.mxu3 %v9948_v2  ;;  %v13543_v2 = vld [vmem:[%s21141_s1 + $0x184] sm:$0xf]  ;;  %v9788_v14 = vor.u32 %v13511_v61, %v9785_v62  ;;  %v10145_v61 = vld [vmem:[%s21141_s1 + $0x358] sm:$0xf0]  ;;  %v13617_v62 = vld [vmem:[%s21141_s1 + $0x3d4] sm:$0xf] }
  0xff   : > { %3614 = vmatpush.bf16.msra.mxu0 %v9748_v9  ;;  %v10097_v9 = vld [vmem:[%s21141_s1 + $0x2f8] sm:$0xf0]  ;;  %v9916_v22 = vor.u32 %v13543_v2, %v9913_v3  ;;  %v13567_v3 = vld [vmem:[%s21141_s1 + $0x244] sm:$0xf] }
 0x100   : > { %3628 = vmatpush.bf16.msra.mxu1 %v9812_v10  ;;  %v13605_v10 = vld [vmem:[%s21141_s1 + $0x374] sm:$0xf]  ;;  %v10100_v24 = vor.u32 %v13589_v6, %v10097_v9  ;;  %v13599_v6 = vld [vmem:[%s21141_s1 + $0x344] sm:$0xf] }
 0x101   : > { %3642 = vmatpush.bf16.msra.mxu2 %v9876_v13  ;;  %v10161_v13 = vld [vmem:[%s21141_s1 + $0x378] sm:$0xf0]  ;;  %v13615_v9 = vld [vmem:[%s21141_s1 + $0x3c4] sm:$0xf] }
 0x102   : > { %3656 = vmatpush.bf16.msra.mxu3 %v9940_v19  ;;  %v10225_v19 = vld [vmem:[%s21141_s1 + $0x3f8] sm:$0xf0]  ;;  %v10164_v25 = vor.u32 %v13605_v10, %v10161_v13  ;;  %v10201_v10 = vld [vmem:[%s21141_s1 + $0x3c8] sm:$0xf0] }
 0x103   : > { %3615 = vmatpush.bf16.msra.mxu0 %v9740_v27  ;;  %v10025_v27 = vld [vmem:[%s21141_s1 + $0x268] sm:$0xf0] }
 0x104   : > { %3629 = vmatpush.bf16.msra.mxu1 %v9804_v28  ;;  %v13587_v28 = vld [vmem:[%s21141_s1 + $0x2e4] sm:$0xf]  ;;  %v10028_v48 = vor.u32 %v13571_v26, %v10025_v27  ;;  %v10129_v26 = vld [vmem:[%s21141_s1 + $0x338] sm:$0xf0]  ;;  %v13613_v27 = vld [vmem:[%s21141_s1 + $0x3b4] sm:$0xf] }
 0x105   : > { %3643 = vmatpush.bf16.msra.mxu2 %v9868_v30  ;;  %v10228_v30 = vor.u32 %v13621_v18, %v10225_v19  ;;  %v10092_v49 = vor.u32 %v13587_v28, %v10089_v33  ;;  %v13565_v18 = vld [vmem:[%s21141_s1 + $0x234] sm:$0xf]  ;;  %v10001_v19 = vld [vmem:[%s21141_s1 + $0x238] sm:$0xf0] }
 0x106   : > { %3657 = vmatpush.bf16.msra.mxu3 %v9932_v42  ;;  %v13619_v42 = vld [vmem:[%s21141_s1 + $0x3e4] sm:$0xf]  ;;  %v10193_v28 = vld [vmem:[%s21141_s1 + $0x3b8] sm:$0xf0]  ;;  %v10004_v33 = vor.u32 %v13565_v18, %v10001_v19  ;;  %v10041_v19 = vld [vmem:[%s21141_s1 + $0x288] sm:$0xf0] }
 0x107   : > { %3616 = vmatpush.bf16.msra.mxu0 %v9732_v53  ;;  %v10017_v53 = vld [vmem:[%s21141_s1 + $0x258] sm:$0xf0]  ;;  %v10220_v57 = vor.u32 %v13619_v42, %v10217_v45  ;;  %v13563_v45 = vld [vmem:[%s21141_s1 + $0x224] sm:$0xf] }
 0x108   : > { %3630 = vmatpush.bf16.msra.mxu1 %v9796_v58  ;;  %v10081_v58 = vld [vmem:[%s21141_s1 + $0x2d8] sm:$0xf0]  ;;  %v13575_v18 = vld [vmem:[%s21141_s1 + $0x284] sm:$0xf] }
 0x109   : > { %3644 = vmatpush.bf16.msra.mxu2 %v9860_v60  ;;  %v13601_v60 = vld [vmem:[%s21141_s1 + $0x354] sm:$0xf] }
 0x10a   : > { %3658 = vmatpush.bf16.msra.mxu3 %v9924_v0  ;;  %v10020_v0 = vor.u32 %v13569_v52, %v10017_v53  ;;  %v10148_v2 = vor.u32 %v13601_v60, %v10145_v61  ;;  %v10057_v52 = vld [vmem:[%s21141_s1 + $0x2a8] sm:$0xf0]  ;;  %v13595_v53 = vld [vmem:[%s21141_s1 + $0x324] sm:$0xf]  ;;  %v16414_v61 = vpop.f32.mrf.mxu1 }
 0x10b   : > { %3617 = vmatpush.bf16.msra.mxu0 %v9724_v8  ;;  %v10137_v8 = vld [vmem:[%s21141_s1 + $0x348] sm:$0xf0] }
 0x10c   : > { %3631 = vmatpush.bf16.msra.mxu1 %v9788_v14  ;;  %v10185_v60 = vld [vmem:[%s21141_s1 + $0x3a8] sm:$0xf0] }
 0x10d   : > { %3645 = vmatpush.bf16.msra.mxu2 %v9852_v17  ;;  %v10140_v17 = vor.u32 %v13599_v6, %v10137_v8  ;;  %v13609_v6 = vld [vmem:[%s21141_s1 + $0x394] sm:$0xf]  ;;  %v10177_v8 = vld [vmem:[%s21141_s1 + $0x398] sm:$0xf0] }
 0x10e   : > { %3659 = vmatpush.bf16.msra.mxu3 %v9916_v22  ;;  %3618 = vmatmul.bf16.vlgmr.msra.gmra.mxu0 %v15083_v15  ;;  %v10084_v15 = vor.u32 %v13585_v54, %v10081_v58  ;;  %v13581_v22 = vld [vmem:[%s21141_s1 + $0x2b4] sm:$0xf]  ;;  %v10121_v54 = vld [vmem:[%s21141_s1 + $0x328] sm:$0xf0]  ;;  %v13611_v58 = vld [vmem:[%s21141_s1 + $0x3a4] sm:$0xf] }
 0x10f   : > { %3666 = vmatpush.bf16.msrb.mxu0 %v10036_v23  ;;  %3632 = vmatmul.bf16.vlgmr.msra.gmra.mxu1 %v15090_v21  ;;  %v13583_v21 = vld [vmem:[%s21141_s1 + $0x2c4] sm:$0xf]  ;;  %v10204_v23 = vor.u32 %v13615_v9, %v10201_v10 }
 0x110   : > { %3680 = vmatpush.bf16.msrb.mxu1 %v10100_v24  ;;  %3646 = vmatmul.bf16.vlgmr.msra.gmra.mxu2 %v15088_v20  ;;  %v10009_v20 = vld [vmem:[%s21141_s1 + $0x248] sm:$0xf0]  ;;  %v10076_v14 = vor.u32 %v13583_v21, %v10073_v5  ;;  %v10065_v24 = vld [vmem:[%s21141_s1 + $0x2b8] sm:$0xf0]  ;;  %v13559_v10 = vld [vmem:[%s21141_s1 + $0x204] sm:$0xf] }
 0x111   : > { %3694 = vmatpush.bf16.msrb.mxu2 %v10164_v25  ;;  %3660 = vmatmul.bf16.vlgmr.msra.gmra.mxu3 %v15103_v29  ;;  %v10212_v29 = vor.u32 %v13617_v62, %v10209_v63  ;;  %v10012_v13 = vor.u32 %v13567_v3, %v10009_v20  ;;  %v13597_v25 = vld [vmem:[%s21141_s1 + $0x334] sm:$0xf]  ;;  %v10068_v37 = vor.u32 %v13581_v22, %v10065_v24  ;;  %v10049_v21 = vld [vmem:[%s21141_s1 + $0x298] sm:$0xf0]  ;;  %v13591_v22 = vld [vmem:[%s21141_s1 + $0x304] sm:$0xf] }
 0x112   : > { %3708 = vmatpush.bf16.msrb.mxu3 %v10228_v30  ;;  %v16384_v30 = vpop.f32.mrf.mxu2  ;;  %v10132_v42 = vor.u32 %v13597_v25, %v10129_v26  ;;  %v13577_v3 = vld [vmem:[%s21141_s1 + $0x294] sm:$0xf]  ;;  %v10188_v20 = vor.u32 %v13611_v58, %v10185_v60  ;;  %v10113_v5 = vld [vmem:[%s21141_s1 + $0x318] sm:$0xf0]  ;;  %v10180_v24 = vor.u32 %v13609_v6, %v10177_v8  ;;  %v10105_v25 = vld [vmem:[%s21141_s1 + $0x308] sm:$0xf0] }
 0x113   : > { %3667 = vmatpush.bf16.msrb.mxu0 %v10028_v48  ;;  %v9993_v48 = vld [vmem:[%s21141_s1 + $0x228] sm:$0xf0]  ;;  %v13607_v26 = vld [vmem:[%s21141_s1 + $0x384] sm:$0xf]  ;;  %v13685_v58 = vld [vmem:[%s21141_s1 + $0x5f4] sm:$0xf] }
 0x114   : > { %3681 = vmatpush.bf16.msrb.mxu1 %v10092_v49  ;;  %v13579_v49 = vld [vmem:[%s21141_s1 + $0x2a4] sm:$0xf]  ;;  %v9996_v62 = vor.u32 %v13563_v45, %v9993_v48  ;;  %v10353_v48 = vld [vmem:[%s21141_s1 + $0x4f8] sm:$0xf0]  ;;  %v10409_v8 = vld [vmem:[%s21141_s1 + $0x568] sm:$0xf0] }
 0x115   : > { %3695 = vmatpush.bf16.msrb.mxu2 %v10156_v50  ;;  %v10196_v50 = vor.u32 %v13613_v27, %v10193_v28  ;;  %v10060_v63 = vor.u32 %v13579_v49, %v10057_v52  ;;  %v10169_v27 = vld [vmem:[%s21141_s1 + $0x388] sm:$0xf0]  ;;  %v16466_v28 = vpop.f32.mrf.mxu3  ;;  %v13669_v49 = vld [vmem:[%s21141_s1 + $0x574] sm:$0xf]  ;;  %v10481_v60 = vld [vmem:[%s21141_s1 + $0x5f8] sm:$0xf0] }
 0x116   : > { %3709 = vmatpush.bf16.msrb.mxu3 %v10220_v57  ;;  %v16406_v57 = vpop.f32.mrf.mxu0  ;;  %v13667_v6 = vld [vmem:[%s21141_s1 + $0x564] sm:$0xf] }
 0x117   : > { %3668 = vmatpush.bf16.msrb.mxu0 %v10020_v0  ;;  %v10124_v0 = vor.u32 %v13595_v53, %v10121_v54  ;;  %v10044_v53 = vor.u32 %v13575_v18, %v10041_v19  ;;  %v10108_v54 = vor.u32 %v13591_v22, %v10105_v25  ;;  %v13633_v18 = vld [vmem:[%s21141_s1 + $0x454] sm:$0xf]  ;;  %v10273_v19 = vld [vmem:[%s21141_s1 + $0x458] sm:$0xf0] }
 0x118   : > { %3682 = vmatpush.bf16.msrb.mxu1 %v10084_v15  ;;  %v13561_v15 = vld [vmem:[%s21141_s1 + $0x214] sm:$0xf] }
 0x119   : > { %3696 = vmatpush.bf16.msrb.mxu2 %v10148_v2  ;;  %v9985_v2 = vld [vmem:[%s21141_s1 + $0x218] sm:$0xf0]  ;;  %v13649_v22 = vld [vmem:[%s21141_s1 + $0x4d4] sm:$0xf] }
 0x11a   : > { %3710 = vmatpush.bf16.msrb.mxu3 %v10212_v29  ;;  %v13593_v29 = vld [vmem:[%s21141_s1 + $0x314] sm:$0xf]  ;;  %v9988_v9 = vor.u32 %v13561_v15, %v9985_v2 }
 0x11b   : > { %3669 = vmatpush.bf16.msrb.mxu0 %v10012_v13  ;;  %v9977_v13 = vld [vmem:[%s21141_s1 + $0x208] sm:$0xf0] }
 0x11c   : > { %3683 = vmatpush.bf16.msrb.mxu1 %v10076_v14  ;;  %v10052_v14 = vor.u32 %v13577_v3, %v10049_v21  ;;  %v9980_v45 = vor.u32 %v13559_v10, %v9977_v13  ;;  %v13635_v3 = vld [vmem:[%s21141_s1 + $0x464] sm:$0xf]  ;;  %v10473_v10 = vld [vmem:[%s21141_s1 + $0x5e8] sm:$0xf0] }
 0x11d   : > { %3697 = vmatpush.bf16.msrb.mxu2 %v10140_v17  ;;  %v10116_v17 = vor.u32 %v13593_v29, %v10113_v5  ;;  %v13651_v21 = vld [vmem:[%s21141_s1 + $0x4e4] sm:$0xf]  ;;  %v10484_v29 = vor.u32 %v13685_v58, %v10481_v60  ;;  %v10345_v5 = vld [vmem:[%s21141_s1 + $0x4e8] sm:$0xf0] }
 0x11e   : > { %3711 = vmatpush.bf16.msrb.mxu3 %v10204_v23  ;;  %v16455_v23 = vpop.f32.mrf.mxu2  ;;  %v16486_v52 = vpop.f32.mrf.mxu0  ;;  %v10329_v58 = vld [vmem:[%s21141_s1 + $0x4c8] sm:$0xf0]  ;;  %v13663_v60 = vld [vmem:[%s21141_s1 + $0x544] sm:$0xf] }
 0x11f   : > { %3670 = vmatpush.bf16.msrb.mxu0 %v10004_v33  ;;  %v13637_v33 = vld [vmem:[%s21141_s1 + $0x474] sm:$0xf] }
 0x120   : > { %3684 = vmatpush.bf16.msrb.mxu1 %v10068_v37  ;;  %v10289_v37 = vld [vmem:[%s21141_s1 + $0x478] sm:$0xf0] }
 0x121   : > { %3698 = vmatpush.bf16.msrb.mxu2 %v10132_v42  ;;  %v13653_v42 = vld [vmem:[%s21141_s1 + $0x4f4] sm:$0xf] }
 0x122   : > { %3712 = vmatpush.bf16.msrb.mxu3 %v10196_v50  ;;  %v10417_v50 = vld [vmem:[%s21141_s1 + $0x578] sm:$0xf0]  ;;  %v10356_v15 = vor.u32 %v13653_v42, %v10353_v48 }
 0x123   : > { %3671 = vmatpush.bf16.msrb.mxu0 %v9996_v62  ;;  %v16494_v62 = vpop.f32.mrf.mxu1  ;;  %v10420_v2 = vor.u32 %v13669_v49, %v10417_v50  ;;  %v10465_v42 = vld [vmem:[%s21141_s1 + $0x5d8] sm:$0xf0]  ;;  %v10265_v50 = vld [vmem:[%s21141_s1 + $0x448] sm:$0xf0] }
 0x124   : > { %3685 = vmatpush.bf16.msrb.mxu1 %v10060_v63  ;;  %v10172_v63 = vor.u32 %v13607_v26, %v10169_v27  ;;  %v10337_v26 = vld [vmem:[%s21141_s1 + $0x4d8] sm:$0xf0]  ;;  %v13665_v27 = vld [vmem:[%s21141_s1 + $0x554] sm:$0xf] }
 0x125   : > { %3699 = vmatpush.bf16.msrb.mxu2 %v10124_v0  ;;  %v10292_v0 = vor.u32 %v13637_v33, %v10289_v37  ;;  %v10401_v33 = vld [vmem:[%s21141_s1 + $0x558] sm:$0xf0]  ;;  %v16541_v37 = vpop.f32.mrf.mxu3  ;;  %v10340_v49 = vor.u32 %v13649_v22, %v10337_v26  ;;  %v13627_v26 = vld [vmem:[%s21141_s1 + $0x424] sm:$0xf] }
 0x126   : > { %3713 = vmatpush.bf16.msrb.mxu3 %v10188_v20  ;;  %v10281_v20 = vld [vmem:[%s21141_s1 + $0x468] sm:$0xf0]  ;;  %v16552_v48 = vpop.f32.mrf.mxu0 }
 0x127   : > { %3672 = vmatpush.bf16.msrb.mxu0 %v9988_v9  ;;  %v13683_v9 = vld [vmem:[%s21141_s1 + $0x5e4] sm:$0xf]  ;;  %v10284_v13 = vor.u32 %v13635_v3, %v10281_v20 }
 0x128   : > { %3686 = vmatpush.bf16.msrb.mxu1 %v10052_v14  ;;  %v10348_v14 = vor.u32 %v13651_v21, %v10345_v5  ;;  %v10476_v25 = vor.u32 %v13683_v9, %v10473_v10  ;;  %v13629_v21 = vld [vmem:[%s21141_s1 + $0x434] sm:$0xf]  ;;  %v10321_v9 = vld [vmem:[%s21141_s1 + $0x4b8] sm:$0xf0] }
 0x129   : > { %3700 = vmatpush.bf16.msrb.mxu2 %v10116_v17  ;;  %v10412_v17 = vor.u32 %v13667_v6, %v10409_v8  ;;  %v13645_v5 = vld [vmem:[%s21141_s1 + $0x4b4] sm:$0xf]  ;;  %v3298_v6 = vadd.f32 %v16343_v4, %v16332_v1  ;;  %v10449_v1 = vld [vmem:[%s21141_s1 + $0x5b8] sm:$0xf0] }
 0x12a   : > { %3714 = vmatpush.bf16.msrb.mxu3 %v10180_v24  ;;  %v16529_v24 = vpop.f32.mrf.mxu2  ;;  %v13661_v10 = vld [vmem:[%s21141_s1 + $0x534] sm:$0xf]  ;;  %v10324_v22 = vor.u32 %v13645_v5, %v10321_v9  ;;  %v10433_v5 = vld [vmem:[%s21141_s1 + $0x598] sm:$0xf0]  ;;  %v13623_v9 = vld [vmem:[%s21141_s1 + $0x404] sm:$0xf] }
 0x12b   : > { %3673 = vmatpush.bf16.msrb.mxu0 %v9980_v45  ;;  %v10276_v45 = vor.u32 %v13633_v18, %v10273_v19 }
 0x12c   : > { %3687 = vmatpush.bf16.msrb.mxu1 %v10044_v53  ;;  %v16563_v53 = vpop.f32.mrf.mxu1 }
 0x12d   : > { %3701 = vmatpush.bf16.msrb.mxu2 %v10108_v54  ;;  %v16608_v18 = vpop.f32.mrf.mxu3 }
 0x12e   : > { %3715 = vmatpush.bf16.msrb.mxu3 %v10172_v63  ;;  %3674 = vmatmul.bf16.vlgmr.msrb.gmra.mxu0 %v15237_v39  ;;  %v13681_v39 = vld [vmem:[%s21141_s1 + $0x5d4] sm:$0xf]  ;;  %v10393_v63 = vld [vmem:[%s21141_s1 + $0x548] sm:$0xf0]  ;;  %v16610_v19 = vpop.f32.mrf.mxu0 }
 0x12f   : > { %3722 = vmatpush.bf16.msra.mxu0 %v10292_v0  ;;  %3688 = vmatmul.bf16.vlgmr.msrb.gmra.mxu1 %v15250_v44  ;;  %v13631_v44 = vld [vmem:[%s21141_s1 + $0x444] sm:$0xf]  ;;  %v10468_v54 = vor.u32 %v13681_v39, %v10465_v42  ;;  %v10396_v20 = vor.u32 %v13663_v60, %v10393_v63  ;;  %v3312_v39 = vadd.f32 %v16384_v30, %v3298_v6  ;;  %v13625_v60 = vld [vmem:[%s21141_s1 + $0x414] sm:$0xf]  ;;  %v10241_v63 = vld [vmem:[%s21141_s1 + $0x418] sm:$0xf0] }
 0x130   : > { %3736 = vmatpush.bf16.msra.mxu1 %v10356_v15  ;;  %3702 = vmatmul.bf16.vlgmr.msrb.gmra.mxu2 %v15248_v43  ;;  %v10404_v43 = vor.u32 %v13665_v27, %v10401_v33  ;;  %v13679_v0 = vld [vmem:[%s21141_s1 + $0x5c4] sm:$0xf]  ;;  %v10457_v15 = vld [vmem:[%s21141_s1 + $0x5c8] sm:$0xf0] }
 0x131   : > { %3750 = vmatpush.bf16.msra.mxu2 %v10420_v2  ;;  %3716 = vmatmul.bf16.vlgmr.msrb.gmra.mxu3 %v15258_v47  ;;  %v13647_v47 = vld [vmem:[%s21141_s1 + $0x4c4] sm:$0xf]  ;;  %v10268_v2 = vor.u32 %v13631_v44, %v10265_v50  ;;  %v10460_v8 = vor.u32 %v13679_v0, %v10457_v15  ;;  %v10249_v27 = vld [vmem:[%s21141_s1 + $0x428] sm:$0xf0]  ;;  %v13641_v0 = vld [vmem:[%s21141_s1 + $0x494] sm:$0xf]  ;;  %v3326_v15 = vadd.f32 %v16386_v34, %v3312_v39 }
 0x132   : > { %3764 = vmatpush.bf16.msra.mxu3 %v10484_v29  ;;  %v10332_v3 = vor.u32 %v13647_v47, %v10329_v58  ;;  %v10257_v29 = vld [vmem:[%s21141_s1 + $0x438] sm:$0xf0]  ;;  %v16606_v4 = vpop.f32.mrf.mxu2  ;;  %v13643_v33 = vld [vmem:[%s21141_s1 + $0x4a4] sm:$0xf]  ;;  %v10377_v44 = vld [vmem:[%s21141_s1 + $0x528] sm:$0xf0]  ;;  %v10252_v47 = vor.u32 %v13627_v26, %v10249_v27 }
 0x133   : > { %3723 = vmatpush.bf16.msra.mxu0 %v10284_v13  ;;  %v10385_v13 = vld [vmem:[%s21141_s1 + $0x538] sm:$0xf0]  ;;  %v13675_v30 = vld [vmem:[%s21141_s1 + $0x5a4] sm:$0xf]  ;;  %v10441_v50 = vld [vmem:[%s21141_s1 + $0x5a8] sm:$0xf0] }
 0x134   : > { %3737 = vmatpush.bf16.msra.mxu1 %v10348_v14  ;;  %v13677_v14 = vld [vmem:[%s21141_s1 + $0x5b4] sm:$0xf]  ;;  %v16622_v42 = vpop.f32.mrf.mxu1  ;;  %v10361_v26 = vld [vmem:[%s21141_s1 + $0x508] sm:$0xf0]  ;;  %v13671_v27 = vld [vmem:[%s21141_s1 + $0x584] sm:$0xf] }
 0x135   : > { %3751 = vmatpush.bf16.msra.mxu2 %v10412_v17  ;;  %v10260_v17 = vor.u32 %v13629_v21, %v10257_v29  ;;  %v10369_v21 = vld [vmem:[%s21141_s1 + $0x518] sm:$0xf0]  ;;  %v3300_v29 = vadd.f32 %v16414_v61, %v16406_v57  ;;  %v13673_v34 = vld [vmem:[%s21141_s1 + $0x594] sm:$0xf]  ;;  %v10233_v57 = vld [vmem:[%s21141_s1 + $0x408] sm:$0xf0]  ;;  %v16674_v61 = vpop.f32.mrf.mxu3 }
 0x136   : > { %3765 = vmatpush.bf16.msra.mxu3 %v10476_v25  ;;  %v10388_v25 = vor.u32 %v13661_v10, %v10385_v13 }
 0x137   : > { %3724 = vmatpush.bf16.msra.mxu0 %v10276_v45  ;;  %v10452_v45 = vor.u32 %v13677_v14, %v10449_v1  ;;  %v13639_v14 = vld [vmem:[%s21141_s1 + $0x484] sm:$0xf]  ;;  %v10297_v1 = vld [vmem:[%s21141_s1 + $0x488] sm:$0xf0]  ;;  %v3314_v39 = vadd.f32 %v16455_v23, %v3300_v29  ;;  %v10609_v23 = vld [vmem:[%s21141_s1 + $0x6f8] sm:$0xf0] }
 0x138   : > { %3738 = vmatpush.bf16.msra.mxu1 %v10340_v49  ;;  %v10313_v49 = vld [vmem:[%s21141_s1 + $0x4a8] sm:$0xf0]  ;;  %v13699_v29 = vld [vmem:[%s21141_s1 + $0x664] sm:$0xf] }
 0x139   : > { %3752 = vmatpush.bf16.msra.mxu2 %v10404_v43  ;;  %v13659_v43 = vld [vmem:[%s21141_s1 + $0x524] sm:$0xf] }
 0x13a   : > { %3766 = vmatpush.bf16.msra.mxu3 %v10468_v54  ;;  %v10316_v54 = vor.u32 %v13643_v33, %v10313_v49  ;;  %v10380_v58 = vor.u32 %v13659_v43, %v10377_v44  ;;  %v16666_v6 = vpop.f32.mrf.mxu2  ;;  %v10425_v33 = vld [vmem:[%s21141_s1 + $0x588] sm:$0xf0]  ;;  %v10545_v49 = vld [vmem:[%s21141_s1 + $0x678] sm:$0xf0]  ;;  %v13717_v43 = vld [vmem:[%s21141_s1 + $0x6f4] sm:$0xf] }
 0x13b   : > { %3725 = vmatpush.bf16.msra.mxu0 %v10268_v2  ;;  %v10444_v2 = vor.u32 %v13675_v30, %v10441_v50  ;;  %v10236_v30 = vor.u32 %v13623_v9, %v10233_v57  ;;  %v13733_v50 = vld [vmem:[%s21141_s1 + $0x774] sm:$0xf]  ;;  %v10665_v9 = vld [vmem:[%s21141_s1 + $0x768] sm:$0xf0] }
 0x13c   : > { %3739 = vmatpush.bf16.msra.mxu1 %v10332_v3  ;;  %v10305_v3 = vld [vmem:[%s21141_s1 + $0x498] sm:$0xf0]  ;;  %v16707_v44 = vpop.f32.mrf.mxu1 }
 0x13d   : > { %3753 = vmatpush.bf16.msra.mxu2 %v10396_v20  ;;  %v13657_v20 = vld [vmem:[%s21141_s1 + $0x514] sm:$0xf]  ;;  %v10308_v10 = vor.u32 %v13641_v0, %v10305_v3  ;;  %v3328_v3 = vadd.f32 %v16466_v28, %v3314_v39  ;;  %v10601_v28 = vld [vmem:[%s21141_s1 + $0x6e8] sm:$0xf0] }
 0x13e   : > { %3767 = vmatpush.bf16.msra.mxu3 %v10460_v8  ;;  %v10244_v8 = vor.u32 %v13625_v60, %v10241_v63  ;;  %v10372_v13 = vor.u32 %v13657_v20, %v10369_v21  ;;  %v13749_v60 = vld [vmem:[%s21141_s1 + $0x7f4] sm:$0xf]  ;;  %v10737_v63 = vld [vmem:[%s21141_s1 + $0x7f8] sm:$0xf0]  ;;  %v10612_v20 = vor.u32 %v13717_v43, %v10609_v23 }
 0x13f   : > { %3726 = vmatpush.bf16.msra.mxu0 %v10260_v17  ;;  %v13655_v17 = vld [vmem:[%s21141_s1 + $0x504] sm:$0xf]  ;;  %v3342_v57 = vadd.f32 %v16552_v48, %v3328_v3  ;;  %v13729_v43 = vld [vmem:[%s21141_s1 + $0x754] sm:$0xf] }
 0x140   : > { %3740 = vmatpush.bf16.msra.mxu1 %v10324_v22  ;;  %v3340_v22 = vadd.f32 %v16486_v52, %v3326_v15  ;;  %v13701_v52 = vld [vmem:[%s21141_s1 + $0x674] sm:$0xf]  ;;  %v10428_v15 = vor.u32 %v13671_v27, %v10425_v33 }
 0x141   : > { %3754 = vmatpush.bf16.msra.mxu2 %v10388_v25  ;;  %v10436_v25 = vor.u32 %v13673_v34, %v10433_v5  ;;  %v10537_v34 = vld [vmem:[%s21141_s1 + $0x668] sm:$0xf0]  ;;  %v13715_v5 = vld [vmem:[%s21141_s1 + $0x6e4] sm:$0xf]  ;;  %v13697_v27 = vld [vmem:[%s21141_s1 + $0x654] sm:$0xf]  ;;  %v3356_v23 = vadd.f32 %v16563_v53, %v3342_v57 }
 0x142   : > { %3768 = vmatpush.bf16.msra.mxu3 %v10452_v45  ;;  %v16696_v45 = vpop.f32.mrf.mxu0  ;;  %v3354_v0 = vadd.f32 %v16494_v62, %v3340_v22  ;;  %v10740_v62 = vor.u32 %v13749_v60, %v10737_v63  ;;  %v16754_v22 = vpop.f32.mrf.mxu3  ;;  %v13713_v33 = vld [vmem:[%s21141_s1 + $0x6d4] sm:$0xf]  ;;  %v10521_v60 = vld [vmem:[%s21141_s1 + $0x648] sm:$0xf0]  ;;  %v10577_v57 = vld [vmem:[%s21141_s1 + $0x6b8] sm:$0xf0] }
 0x143   : > { %3727 = vmatpush.bf16.msra.mxu0 %v10252_v47  ;;  %v10673_v47 = vld [vmem:[%s21141_s1 + $0x778] sm:$0xf0]  ;;  %v3370_v53 = vadd.f32 %v16606_v4, %v3356_v23  ;;  %v10585_v63 = vld [vmem:[%s21141_s1 + $0x6c8] sm:$0xf0]  ;;  %v13723_v23 = vld [vmem:[%s21141_s1 + $0x724] sm:$0xf] }
 0x144   : > { %3741 = vmatpush.bf16.msra.mxu1 %v10316_v54  ;;  %v10300_v54 = vor.u32 %v13639_v14, %v10297_v1  ;;  %v10676_v21 = vor.u32 %v13733_v50, %v10673_v47  ;;  %v3368_v14 = vadd.f32 %v16529_v24, %v3354_v0  ;;  %v16752_v1 = vpop.f32.mrf.mxu2  ;;  %v10529_v24 = vld [vmem:[%s21141_s1 + $0x658] sm:$0xf0]  ;;  %v16767_v39 = vpop.f32.mrf.mxu1  ;;  %v13727_v0 = vld [vmem:[%s21141_s1 + $0x744] sm:$0xf] }
 0x145   : > { %3755 = vmatpush.bf16.msra.mxu2 %v10380_v58  ;;  %v10364_v58 = vor.u32 %v13655_v17, %v10361_v26  ;;  %v10540_v17 = vor.u32 %v13699_v29, %v10537_v34  ;;  %v10721_v50 = vld [vmem:[%s21141_s1 + $0x7d8] sm:$0xf0] }
 0x146   : > { %3769 = vmatpush.bf16.msra.mxu3 %v10444_v2  ;;  %v10548_v2 = vor.u32 %v13701_v52, %v10545_v49  ;;  %v10593_v49 = vld [vmem:[%s21141_s1 + $0x6d8] sm:$0xf0]  ;;  %v3382_v47 = vadd.f32 %v16541_v37, %v3368_v14 }
 0x147   : > { %3728 = vmatpush.bf16.msra.mxu0 %v10244_v8  ;;  %v13731_v8 = vld [vmem:[%s21141_s1 + $0x764] sm:$0xf] }
 0x148   : > { %3742 = vmatpush.bf16.msra.mxu1 %v10308_v10  ;;  %v13747_v10 = vld [vmem:[%s21141_s1 + $0x7e4] sm:$0xf]  ;;  %v10668_v26 = vor.u32 %v13731_v8, %v10665_v9  ;;  %v3396_v37 = vadd.f32 %v16610_v19, %v3382_v47  ;;  %v10713_v19 = vld [vmem:[%s21141_s1 + $0x7c8] sm:$0xf0]  ;;  %v13709_v8 = vld [vmem:[%s21141_s1 + $0x6b4] sm:$0xf] }
 0x149   : > { %3756 = vmatpush.bf16.msra.mxu2 %v10372_v13  ;;  %v10729_v13 = vld [vmem:[%s21141_s1 + $0x7e8] sm:$0xf0]  ;;  %v13739_v47 = vld [vmem:[%s21141_s1 + $0x7a4] sm:$0xf] }
 0x14a   : > { %3770 = vmatpush.bf16.msra.mxu3 %v10436_v25  ;;  %v16756_v48 = vpop.f32.mrf.mxu0  ;;  %v10604_v25 = vor.u32 %v13715_v5, %v10601_v28  ;;  %v10732_v52 = vor.u32 %v13747_v10, %v10729_v13  ;;  %v16819_v29 = vpop.f32.mrf.mxu3  ;;  %v10513_v28 = vld [vmem:[%s21141_s1 + $0x638] sm:$0xf0]  ;;  %v13725_v10 = vld [vmem:[%s21141_s1 + $0x734] sm:$0xf] }
 0x14b   : > { %3729 = vmatpush.bf16.msra.mxu0 %v10236_v30  ;;  %v10657_v30 = vld [vmem:[%s21141_s1 + $0x758] sm:$0xf0] }
 0x14c   : > { %3743 = vmatpush.bf16.msra.mxu1 %v10300_v54  ;;  %v10532_v54 = vor.u32 %v13697_v27, %v10529_v24  ;;  %v16816_v3 = vpop.f32.mrf.mxu2  ;;  %v10641_v13 = vld [vmem:[%s21141_s1 + $0x738] sm:$0xf0]  ;;  %v16850_v27 = vpop.f32.mrf.mxu1 }
 0x14d   : > { %3757 = vmatpush.bf16.msra.mxu2 %v10364_v58  ;;  %v13695_v58 = vld [vmem:[%s21141_s1 + $0x644] sm:$0xf] }
 0x14e   : > { %3771 = vmatpush.bf16.msra.mxu3 %v10428_v15  ;;  %3730 = vmatmul.bf16.vlgmr.msra.gmra.mxu0 %v15449_v31  ;;  %v13745_v31 = vld [vmem:[%s21141_s1 + $0x7d4] sm:$0xf]  ;;  %v10649_v15 = vld [vmem:[%s21141_s1 + $0x748] sm:$0xf0] }
 0x14f   : > { %3778 = vmatpush.bf16.msrb.mxu0 %v10548_v2  ;;  %3744 = vmatmul.bf16.vlgmr.msra.gmra.mxu1 %v15462_v36  ;;  %v10660_v36 = vor.u32 %v13729_v43, %v10657_v30  ;;  %v10724_v4 = vor.u32 %v13745_v31, %v10721_v50  ;;  %v13743_v2 = vld [vmem:[%s21141_s1 + $0x7c4] sm:$0xf]  ;;  %v10652_v5 = vor.u32 %v13727_v0, %v10649_v15  ;;  %v10569_v30 = vld [vmem:[%s21141_s1 + $0x6a8] sm:$0xf0]  ;;  %v10625_v0 = vld [vmem:[%s21141_s1 + $0x718] sm:$0xf0] }
 0x150   : > { %3792 = vmatpush.bf16.msrb.mxu1 %v10612_v20  ;;  %3758 = vmatmul.bf16.vlgmr.msra.gmra.mxu2 %v15460_v35  ;;  %v10596_v35 = vor.u32 %v13713_v33, %v10593_v49  ;;  %v10524_v20 = vor.u32 %v13695_v58, %v10521_v60  ;;  %v10716_v9 = vor.u32 %v13743_v2, %v10713_v19  ;;  %v10505_v49 = vld [vmem:[%s21141_s1 + $0x628] sm:$0xf0] }
 0x151   : > { %3806 = vmatpush.bf16.msrb.mxu2 %v10676_v21  ;;  %3772 = vmatmul.bf16.vlgmr.msra.gmra.mxu3 %v15470_v40  ;;  %v13711_v40 = vld [vmem:[%s21141_s1 + $0x6c4] sm:$0xf]  ;;  %v3384_v21 = vadd.f32 %v16608_v18, %v3370_v53  ;;  %v3410_v18 = vadd.f32 %v16622_v42, %v3396_v37  ;;  %v13741_v42 = vld [vmem:[%s21141_s1 + $0x7b4] sm:$0xf]  ;;  %v10580_v33 = vor.u32 %v13709_v8, %v10577_v57  ;;  %v10633_v31 = vld [vmem:[%s21141_s1 + $0x728] sm:$0xf0] }
 0x152   : > { %3820 = vmatpush.bf16.msrb.mxu3 %v10740_v62  ;;  %v10588_v34 = vor.u32 %v13711_v40, %v10585_v63  ;;  %v13693_v62 = vld [vmem:[%s21141_s1 + $0x634] sm:$0xf]  ;;  %v10636_v60 = vor.u32 %v13723_v23, %v10633_v31  ;;  %v10497_v40 = vld [vmem:[%s21141_s1 + $0x618] sm:$0xf0]  ;;  %v16900_v2 = vpop.f32.mrf.mxu3  ;;  %v10553_v57 = vld [vmem:[%s21141_s1 + $0x688] sm:$0xf0] }
 0x153   : > { %3779 = vmatpush.bf16.msrb.mxu0 %v10540_v17  ;;  %v3398_v14 = vadd.f32 %v16696_v45, %v3384_v21  ;;  %v16841_v17 = vpop.f32.mrf.mxu0  ;;  %v10516_v24 = vor.u32 %v13693_v62, %v10513_v28  ;;  %v10644_v45 = vor.u32 %v13725_v10, %v10641_v13  ;;  %v13721_v63 = vld [vmem:[%s21141_s1 + $0x714] sm:$0xf]  ;;  %v10689_v21 = vld [vmem:[%s21141_s1 + $0x798] sm:$0xf0]  ;;  %v10489_v62 = vld [vmem:[%s21141_s1 + $0x608] sm:$0xf0] }
 0x154   : > { %3793 = vmatpush.bf16.msrb.mxu1 %v10604_v25  ;;  %v10705_v25 = vld [vmem:[%s21141_s1 + $0x7b8] sm:$0xf0]  ;;  %v16888_v37 = vpop.f32.mrf.mxu2  ;;  %v13719_v10 = vld [vmem:[%s21141_s1 + $0x704] sm:$0xf]  ;;  %v13813_v23 = vld [vmem:[%s21141_s1 + $0x9f4] sm:$0xf] }
 0x155   : > { %3807 = vmatpush.bf16.msrb.mxu2 %v10668_v26  ;;  %v3424_v26 = vadd.f32 %v16666_v6, %v3410_v18  ;;  %v13707_v6 = vld [vmem:[%s21141_s1 + $0x6a4] sm:$0xf]  ;;  %v10708_v43 = vor.u32 %v13741_v42, %v10705_v25  ;;  %v3412_v50 = vadd.f32 %v16707_v44, %v3398_v14  ;;  %v13689_v44 = vld [vmem:[%s21141_s1 + $0x614] sm:$0xf]  ;;  %v10628_v18 = vor.u32 %v13721_v63, %v10625_v0  ;;  %v10681_v42 = vld [vmem:[%s21141_s1 + $0x788] sm:$0xf0] }
 0x156   : > { %3821 = vmatpush.bf16.msrb.mxu3 %v10732_v52  ;;  %v13691_v52 = vld [vmem:[%s21141_s1 + $0x624] sm:$0xf]  ;;  %v10572_v58 = vor.u32 %v13707_v6, %v10569_v30  ;;  %v10993_v31 = vld [vmem:[%s21141_s1 + $0x9f8] sm:$0xf0] }
 0x157   : > { %3780 = vmatpush.bf16.msrb.mxu0 %v10532_v54  ;;  %v10697_v54 = vld [vmem:[%s21141_s1 + $0x7a8] sm:$0xf0]  ;;  %v3438_v53 = vadd.f32 %v16674_v61, %v3424_v26  ;;  %v13705_v61 = vld [vmem:[%s21141_s1 + $0x694] sm:$0xf]  ;;  %v13735_v14 = vld [vmem:[%s21141_s1 + $0x784] sm:$0xf] }
 0x158   : > { %3794 = vmatpush.bf16.msrb.mxu1 %v10596_v35  ;;  %v10508_v35 = vor.u32 %v13691_v52, %v10505_v49  ;;  %v10929_v49 = vld [vmem:[%s21141_s1 + $0x978] sm:$0xf0] }
 0x159   : > { %3808 = vmatpush.bf16.msrb.mxu2 %v10660_v36  ;;  %v3426_v36 = vadd.f32 %v16752_v1, %v3412_v50  ;;  %v10700_v1 = vor.u32 %v13739_v47, %v10697_v54  ;;  %v3452_v15 = vadd.f32 %v16756_v48, %v3438_v53  ;;  %v13687_v48 = vld [vmem:[%s21141_s1 + $0x604] sm:$0xf]  ;;  %v10684_v47 = vor.u32 %v13735_v14, %v10681_v42 }
 0x15a   : > { %3822 = vmatpush.bf16.msrb.mxu3 %v10724_v4  ;;  %v10561_v4 = vld [vmem:[%s21141_s1 + $0x698] sm:$0xf0]  ;;  %v10492_v52 = vor.u32 %v13687_v48, %v10489_v62 }
 0x15b   : > { %3781 = vmatpush.bf16.msrb.mxu0 %v10524_v20  ;;  %v16902_v19 = vpop.f32.mrf.mxu0  ;;  %v13737_v20 = vld [vmem:[%s21141_s1 + $0x794] sm:$0xf]  ;;  %v3440_v28 = vadd.f32 %v16754_v22, %v3426_v36  ;;  %v10564_v8 = vor.u32 %v13705_v61, %v10561_v4  ;;  %v10617_v22 = vld [vmem:[%s21141_s1 + $0x708] sm:$0xf0]  ;;  %v3466_v25 = vadd.f32 %v16767_v39, %v3452_v15  ;;  %v10865_v39 = vld [vmem:[%s21141_s1 + $0x8f8] sm:$0xf0] }
 0x15c   : > { %3795 = vmatpush.bf16.msrb.mxu1 %v10588_v34  ;;  %v16910_v34 = vpop.f32.mrf.mxu1  ;;  %v10692_v13 = vor.u32 %v13737_v20, %v10689_v21  ;;  %v10620_v30 = vor.u32 %v13719_v10, %v10617_v22  ;;  %v16964_v50 = vpop.f32.mrf.mxu2  ;;  %v13795_v61 = vld [vmem:[%s21141_s1 + $0x964] sm:$0xf]  ;;  %v10985_v20 = vld [vmem:[%s21141_s1 + $0x9e8] sm:$0xf0] }
 0x15d   : > { %3809 = vmatpush.bf16.msrb.mxu2 %v10652_v5  ;;  %v10500_v5 = vor.u32 %v13689_v44, %v10497_v40  ;;  %v3454_v26 = vadd.f32 %v16841_v17, %v3440_v28  ;;  %v13797_v17 = vld [vmem:[%s21141_s1 + $0x974] sm:$0xf]  ;;  %v3480_v6 = vadd.f32 %v16816_v3, %v3466_v25  ;;  %v16967_v3 = vpop.f32.mrf.mxu3  ;;  %v13779_v44 = vld [vmem:[%s21141_s1 + $0x8e4] sm:$0xf]  ;;  %v10996_v40 = vor.u32 %v13813_v23, %v10993_v31  ;;  %v10785_v28 = vld [vmem:[%s21141_s1 + $0x858] sm:$0xf0] }
 0x15e   : > { %3823 = vmatpush.bf16.msrb.mxu3 %v10716_v9  ;;  %v13703_v9 = vld [vmem:[%s21141_s1 + $0x684] sm:$0xf]  ;;  %v10932_v36 = vor.u32 %v13797_v17, %v10929_v49  ;;  %v10777_v25 = vld [vmem:[%s21141_s1 + $0x848] sm:$0xf0] }
 0x15f   : > { %3782 = vmatpush.bf16.msrb.mxu0 %v10516_v24  ;;  %v13765_v24 = vld [vmem:[%s21141_s1 + $0x874] sm:$0xf]  ;;  %v3468_v53 = vadd.f32 %v16850_v27, %v3454_v26  ;;  %v10857_v27 = vld [vmem:[%s21141_s1 + $0x8e8] sm:$0xf0]  ;;  %v3494_v4 = vadd.f32 %v16819_v29, %v3480_v6  ;;  %v13811_v15 = vld [vmem:[%s21141_s1 + $0x9e4] sm:$0xf] }
 0x160   : > { %3796 = vmatpush.bf16.msrb.mxu1 %v10580_v33  ;;  %v10801_v33 = vld [vmem:[%s21141_s1 + $0x878] sm:$0xf0]  ;;  %v13761_v29 = vld [vmem:[%s21141_s1 + $0x854] sm:$0xf]  ;;  %v10860_v48 = vor.u32 %v13779_v44, %v10857_v27  ;;  %v13807_v49 = vld [vmem:[%s21141_s1 + $0x9c4] sm:$0xf] }
 0x161   : > { %3810 = vmatpush.bf16.msrb.mxu2 %v10644_v45  ;;  %v13781_v45 = vld [vmem:[%s21141_s1 + $0x8f4] sm:$0xf]  ;;  %v10804_v54 = vor.u32 %v13765_v24, %v10801_v33  ;;  %v3482_v63 = vadd.f32 %v16888_v37, %v3468_v53  ;;  %v3508_v37 = vadd.f32 %v16902_v19, %v3494_v4  ;;  %v10988_v19 = vor.u32 %v13811_v15, %v10985_v20  ;;  %v13791_v33 = vld [vmem:[%s21141_s1 + $0x944] sm:$0xf]  ;;  %v10969_v6 = vld [vmem:[%s21141_s1 + $0x9c8] sm:$0xf0] }
 0x162   : > { %3824 = vmatpush.bf16.msrb.mxu3 %v10708_v43  ;;  %v10556_v43 = vor.u32 %v13703_v9, %v10553_v57  ;;  %v13793_v9 = vld [vmem:[%s21141_s1 + $0x954] sm:$0xf]  ;;  %v10913_v57 = vld [vmem:[%s21141_s1 + $0x958] sm:$0xf0]  ;;  %v10788_v22 = vor.u32 %v13761_v29, %v10785_v28  ;;  %v13755_v4 = vld [vmem:[%s21141_s1 + $0x824] sm:$0xf] }
 0x163   : > { %3783 = vmatpush.bf16.msrb.mxu0 %v10508_v35  ;;  %v10868_v35 = vor.u32 %v13781_v45, %v10865_v39  ;;  %v3509_v0 = vpop.f32.mrf.mxu0  ;;  %v3496_v10 = vadd.f32 %v16900_v2, %v3482_v63  ;;  %v3522_v42 = vadd.f32 %v16910_v34, %v3508_v37  ;;  %v10841_v34 = vld [vmem:[%s21141_s1 + $0x8c8] sm:$0xf0]  ;;  %v13773_v53 = vld [vmem:[%s21141_s1 + $0x8b4] sm:$0xf]  ;;  %v13771_v20 = vld [vmem:[%s21141_s1 + $0x8a4] sm:$0xf] }
 0x164   : > { %3797 = vmatpush.bf16.msrb.mxu1 %v10572_v58  ;;  %v13763_v58 = vld [vmem:[%s21141_s1 + $0x864] sm:$0xf]  ;;  %v3523_v21 = vpop.f32.mrf.mxu1  ;;  %v3537_v26 = vpop.f32.mrf.mxu2  ;;  %v10905_v45 = vld [vmem:[%s21141_s1 + $0x948] sm:$0xf0]  ;;  %v13805_v27 = vld [vmem:[%s21141_s1 + $0x9b4] sm:$0xf] }
 0x165   : > { %3811 = vmatpush.bf16.msrb.mxu2 %v10636_v60  ;;  %v10793_v60 = vld [vmem:[%s21141_s1 + $0x868] sm:$0xf0]  ;;  %v3510_v2 = vadd.f32 %v3509_v0, %v3496_v10  ;;  %v3551_v39 = vpop.f32.mrf.mxu3  ;;  %v13787_v37 = vld [vmem:[%s21141_s1 + $0x924] sm:$0xf] }
 0x166   : > { %3825 = vmatpush.bf16.msrb.mxu3 %v10700_v1  ;;  %v10921_v1 = vld [vmem:[%s21141_s1 + $0x968] sm:$0xf0] }
 0x167   : > { %3784 = vmatpush.bf16.msrb.mxu0 %v10500_v5  ;;  %v10796_v5 = vor.u32 %v13763_v58, %v10793_v60  ;;  %v10924_v62 = vor.u32 %v13795_v61, %v10921_v1  ;;  %v3524_v23 = vadd.f32 %v3523_v21, %v3510_v2  ;;  %v13789_v58 = vld [vmem:[%s21141_s1 + $0x934] sm:$0xf]  ;;  %v10897_v60 = vld [vmem:[%s21141_s1 + $0x938] sm:$0xf0]  ;;  %v10761_v15 = vld [vmem:[%s21141_s1 + $0x828] sm:$0xf0] }
 0x168   : > { %3798 = vmatpush.bf16.msrb.mxu1 %v10564_v8  ;;  %v13777_v8 = vld [vmem:[%s21141_s1 + $0x8d4] sm:$0xf]  ;;  %v10961_v61 = vld [vmem:[%s21141_s1 + $0x9b8] sm:$0xf0]  ;;  %v10825_v21 = vld [vmem:[%s21141_s1 + $0x8a8] sm:$0xf0] }
 0x169   : > { %3812 = vmatpush.bf16.msrb.mxu2 %v10628_v18  ;;  %v10849_v18 = vld [vmem:[%s21141_s1 + $0x8d8] sm:$0xf0] }
 0x16a   : > { %3826 = vmatpush.bf16.msrb.mxu3 %v10692_v13  ;;  %v13809_v13 = vld [vmem:[%s21141_s1 + $0x9d4] sm:$0xf]  ;;  %v10852_v14 = vor.u32 %v13777_v8, %v10849_v18  ;;  %v13803_v18 = vld [vmem:[%s21141_s1 + $0x9a4] sm:$0xf] }
 0x16b   : > { %3785 = vmatpush.bf16.msrb.mxu0 %v10492_v52  ;;  %v3536_v52 = vadd.f32 %v16964_v50, %v3522_v42  ;;  %v3563_v17 = vpop.f32.mrf.mxu0  ;;  %v13757_v50 = vld [vmem:[%s21141_s1 + $0x834] sm:$0xf] }
 0x16c   : > { %3799 = vmatpush.bf16.msrb.mxu1 %v10556_v43  ;;  %v13769_v42 = vld [vmem:[%s21141_s1 + $0x894] sm:$0xf] }
 0x16d   : > { %3813 = vmatpush.bf16.msrb.mxu2 %v10620_v30  ;;  %v3577_v30 = vpop.f32.mrf.mxu1  ;;  %v3550_v44 = vadd.f32 %v16967_v3, %v3536_v52  ;;  %v10900_v3 = vor.u32 %v13789_v58, %v10897_v60  ;;  %v10745_v52 = vld [vmem:[%s21141_s1 + $0x808] sm:$0xf0]  ;;  %v13829_v58 = vld [vmem:[%s21141_s1 + $0xa74] sm:$0xf]  ;;  %v11057_v60 = vld [vmem:[%s21141_s1 + $0xa78] sm:$0xf0] }
 0x16e   : > { %3827 = vmatpush.bf16.msrb.mxu3 %v10684_v47  ;;  %3786 = vmatmul.bf16.vlgmr.msrb.gmra.mxu0 %v15661_v32  ;;  %v10977_v32 = vld [vmem:[%s21141_s1 + $0x9d8] sm:$0xf0]  ;;  %v10908_v47 = vor.u32 %v13791_v33, %v10905_v45  ;;  %v13751_v45 = vld [vmem:[%s21141_s1 + $0x804] sm:$0xf] }
 0x16f   : > { %3834 = vmatpush.bf16.msra.mxu0 %v10804_v54  ;;  %3800 = vmatmul.bf16.vlgmr.msrb.gmra.mxu1 %v15674_v41  ;;  %v13759_v41 = vld [vmem:[%s21141_s1 + $0x844] sm:$0xf]  ;;  %v10980_v24 = vor.u32 %v13809_v13, %v10977_v32  ;;  %v10769_v54 = vld [vmem:[%s21141_s1 + $0x838] sm:$0xf0]  ;;  %v3564_v63 = vadd.f32 %v3563_v17, %v3550_v44  ;;  %v13845_v44 = vld [vmem:[%s21141_s1 + $0xaf4] sm:$0xf] }
 0x170   : > { %3848 = vmatpush.bf16.msra.mxu1 %v10868_v35  ;;  %3814 = vmatmul.bf16.vlgmr.msrb.gmra.mxu2 %v15672_v38  ;;  %v10916_v38 = vor.u32 %v13793_v9, %v10913_v57  ;;  %v10780_v43 = vor.u32 %v13759_v41, %v10777_v25  ;;  %v10972_v35 = vor.u32 %v13807_v49, %v10969_v6  ;;  %v10817_v41 = vld [vmem:[%s21141_s1 + $0x898] sm:$0xf0]  ;;  %v13785_v25 = vld [vmem:[%s21141_s1 + $0x914] sm:$0xf]  ;;  %v13767_v6 = vld [vmem:[%s21141_s1 + $0x884] sm:$0xf] }
 0x171   : > { %3862 = vmatpush.bf16.msra.mxu2 %v10932_v36  ;;  %3828 = vmatmul.bf16.vlgmr.msrb.gmra.mxu3 %v15682_v46  ;;  %v13775_v46 = vld [vmem:[%s21141_s1 + $0x8c4] sm:$0xf]  ;;  %v10833_v36 = vld [vmem:[%s21141_s1 + $0x8b8] sm:$0xf0]  ;;  %v10772_v1 = vor.u32 %v13757_v50, %v10769_v54  ;;  %v10764_v9 = vor.u32 %v13755_v4, %v10761_v15  ;;  %v10828_v57 = vor.u32 %v13771_v20, %v10825_v21  ;;  %v10937_v54 = vld [vmem:[%s21141_s1 + $0x988] sm:$0xf0] }
 0x172   : > { %3876 = vmatpush.bf16.msra.mxu3 %v10996_v40  ;;  %v10844_v31 = vor.u32 %v13775_v46, %v10841_v34  ;;  %v3538_v40 = vadd.f32 %v3537_v26, %v3524_v23  ;;  %v10836_v0 = vor.u32 %v13773_v53, %v10833_v36  ;;  %v3578_v10 = vadd.f32 %v3577_v30, %v3564_v63  ;;  %v10881_v46 = vld [vmem:[%s21141_s1 + $0x918] sm:$0xf0]  ;;  %v13783_v30 = vld [vmem:[%s21141_s1 + $0x904] sm:$0xf] }
 0x173   : > { %3835 = vmatpush.bf16.msra.mxu0 %v10796_v5  ;;  %v10964_v5 = vor.u32 %v13805_v27, %v10961_v61  ;;  %v3591_v29 = vpop.f32.mrf.mxu2  ;;  %v3565_v28 = vpop.f32.mrf.mxu0  ;;  %v10945_v34 = vld [vmem:[%s21141_s1 + $0x998] sm:$0xf0]  ;;  %v10820_v17 = vor.u32 %v13769_v42, %v10817_v41  ;;  %v10884_v49 = vor.u32 %v13785_v25, %v10881_v46  ;;  %v13799_v50 = vld [vmem:[%s21141_s1 + $0x984] sm:$0xf]  ;;  %v13861_v61 = vld [vmem:[%s21141_s1 + $0xb74] sm:$0xf]  ;;  %v11060_v21 = vor.u32 %v13829_v58, %v11057_v60 }
 0x174   : > { %3849 = vmatpush.bf16.msra.mxu1 %v10860_v48  ;;  %v10889_v48 = vld [vmem:[%s21141_s1 + $0x928] sm:$0xf0]  ;;  %v3605_v8 = vpop.f32.mrf.mxu3  ;;  %v3592_v26 = vadd.f32 %v3591_v29, %v3578_v10  ;;  %v11121_v27 = vld [vmem:[%s21141_s1 + $0xaf8] sm:$0xf0]  ;;  %v10940_v20 = vor.u32 %v13799_v50, %v10937_v54  ;;  %v13841_v41 = vld [vmem:[%s21141_s1 + $0xad4] sm:$0xf] }
 0x175   : > { %3863 = vmatpush.bf16.msra.mxu2 %v10924_v62  ;;  %v3552_v62 = vadd.f32 %v3551_v39, %v3538_v40  ;;  %v10892_v32 = vor.u32 %v13787_v37, %v10889_v48  ;;  %v10748_v40 = vor.u32 %v13751_v45, %v10745_v52  ;;  %v11249_v15 = vld [vmem:[%s21141_s1 + $0xbf8] sm:$0xf0]  ;;  %v11124_v48 = vor.u32 %v13845_v44, %v11121_v27  ;;  %v13821_v50 = vld [vmem:[%s21141_s1 + $0xa34] sm:$0xf] }
 0x176   : > { %3877 = vmatpush.bf16.msra.mxu3 %v10988_v19  ;;  %v10953_v19 = vld [vmem:[%s21141_s1 + $0x9a8] sm:$0xf0]  ;;  %v17148_v53 = vadd.f32 %v3605_v8, %v3592_v26  ;;  %v13843_v8 = vld [vmem:[%s21141_s1 + $0xae4] sm:$0xf]  ;;  %v11105_v46 = vld [vmem:[%s21141_s1 + $0xad8] sm:$0xf0] }
 0x177   : > { %3836 = vmatpush.bf16.msra.mxu0 %v10788_v22  ;;  %v3566_v13 = vadd.f32 %v3565_v28, %v3552_v62  ;;  %v13753_v22 = vld [vmem:[%s21141_s1 + $0x814] sm:$0xf]  ;;  %v10956_v2 = vor.u32 %v13803_v18, %v10953_v19  ;;  %v11049_v28 = vld [vmem:[%s21141_s1 + $0xa68] sm:$0xf0]  ;;  %v11108_v45 = vor.u32 %v13841_v41, %v11105_v46  ;;  %v11025_v54 = vld [vmem:[%s21141_s1 + $0xa38] sm:$0xf0] }
 0x178   : > { %3850 = vmatpush.bf16.msra.mxu1 %v10852_v14  ;;  %v10753_v14 = vld [vmem:[%s21141_s1 + $0x818] sm:$0xf0]  ;;  %v3946_v29 = vmax.f32 %v17148_v53, 0.0  ;;  %v11113_v19 = vld [vmem:[%s21141_s1 + $0xae8] sm:$0xf0] }
 0x179   : > { %3864 = vmatpush.bf16.msra.mxu2 %v10916_v38  ;;  %v3579_v38 = vpop.f32.mrf.mxu1  ;;  %v10756_v33 = vor.u32 %v13753_v22, %v10753_v14  ;;  %v11116_v14 = vor.u32 %v13843_v8, %v11113_v19  ;;  %v13857_v26 = vld [vmem:[%s21141_s1 + $0xb54] sm:$0xf]  ;;  %v11089_v58 = vld [vmem:[%s21141_s1 + $0xab8] sm:$0xf0] }
 0x17a   : > { %3878 = vmatpush.bf16.msra.mxu3 %v10980_v24  ;;  %v13801_v24 = vld [vmem:[%s21141_s1 + $0x994] sm:$0xf]  ;;  %v3580_v39 = vadd.f32 %v3579_v38, %v3566_v13  ;;  %v13875_v13 = vld [vmem:[%s21141_s1 + $0xbe4] sm:$0xf]  ;;  %v11041_v38 = vld [vmem:[%s21141_s1 + $0xa58] sm:$0xf0] }
 0x17b   : > { %3837 = vmatpush.bf16.msra.mxu0 %v10780_v43  ;;  %v10809_v43 = vld [vmem:[%s21141_s1 + $0x888] sm:$0xf0]  ;;  %v10948_v23 = vor.u32 %v13801_v24, %v10945_v34  ;;  %v11169_v24 = vld [vmem:[%s21141_s1 + $0xb58] sm:$0xf0]  ;;  %v13853_v60 = vld [vmem:[%s21141_s1 + $0xb34] sm:$0xf] }
 0x17c   : > { %3851 = vmatpush.bf16.msra.mxu1 %v10844_v31  ;;  %v3593_v31 = vpop.f32.mrf.mxu2  ;;  %v3607_v36 = vpop.f32.mrf.mxu3  ;;  %v10812_v63 = vor.u32 %v13767_v6, %v10809_v43  ;;  %v11233_v34 = vld [vmem:[%s21141_s1 + $0xbd8] sm:$0xf0]  ;;  %v11172_v52 = vor.u32 %v13857_v26, %v11169_v24  ;;  %v11161_v6 = vld [vmem:[%s21141_s1 + $0xb48] sm:$0xf0]  ;;  %v13871_v43 = vld [vmem:[%s21141_s1 + $0xbc4] sm:$0xf] }
 0x17d   : > { %3865 = vmatpush.bf16.msra.mxu2 %v10908_v47  ;;  %v10873_v47 = vld [vmem:[%s21141_s1 + $0x908] sm:$0xf0]  ;;  %v11153_v44 = vld [vmem:[%s21141_s1 + $0xb38] sm:$0xf0] }
 0x17e   : > { %3879 = vmatpush.bf16.msra.mxu3 %v10972_v35  ;;  %v3594_v35 = vadd.f32 %v3593_v31, %v3580_v39  ;;  %v13839_v39 = vld [vmem:[%s21141_s1 + $0xac4] sm:$0xf]  ;;  %v11217_v27 = vld [vmem:[%s21141_s1 + $0xbb8] sm:$0xf0]  ;;  %v11001_v24 = vld [vmem:[%s21141_s1 + $0xa08] sm:$0xf0] }
 0x17f   : > { %3838 = vmatpush.bf16.msra.mxu0 %v10772_v1  ;;  %v11185_v1 = vld [vmem:[%s21141_s1 + $0xb78] sm:$0xf0] }
 0x180   : > { %3852 = vmatpush.bf16.msra.mxu1 %v10836_v0  ;;  %v17168_v4 = vadd.f32 %v3607_v36, %v3594_v35  ;;  %v10876_v0 = vor.u32 %v13783_v30, %v10873_v47  ;;  %v11188_v62 = vor.u32 %v13861_v61, %v11185_v1  ;;  %v11225_v30 = vld [vmem:[%s21141_s1 + $0xbc8] sm:$0xf0]  ;;  %v13837_v35 = vld [vmem:[%s21141_s1 + $0xab4] sm:$0xf]  ;;  %v11028_v61 = vor.u32 %v13821_v50, %v11025_v54  ;;  %v11399_v50 = vld [vmem:[%s21143_s8 + $0x120] sm:$0xf] }
 0x181   : > { %3866 = vmatpush.bf16.msra.mxu2 %v10900_v3  ;;  %v13877_v3 = vld [vmem:[%s21141_s1 + $0xbf4] sm:$0xf]  ;;  %v11228_v36 = vor.u32 %v13871_v43, %v11225_v30  ;;  %v11092_v1 = vor.u32 %v13837_v35, %v11089_v58  ;;  %v13918_v54 = vld [vmem:[%s21143_s8 + $0x134] sm:$0xf0]  ;;  %v13915_v35 = vld [vmem:[%s21143_s8 + $0x124] sm:$0xf] }
 0x182   : > { %3880 = vmatpush.bf16.msra.mxu3 %v10964_v5  ;;  %v13827_v5 = vld [vmem:[%s21141_s1 + $0xa64] sm:$0xf]  ;;  %v3948_v37 = vmax.f32 %v17168_v4, 0.0  ;;  %v11252_v18 = vor.u32 %v13877_v3, %v11249_v15  ;;  %v11017_v3 = vld [vmem:[%s21141_s1 + $0xa28] sm:$0xf0]  ;;  %v11400_v58 = vor.u32 %v13918_v54, %v11399_v50 }
 0x183   : > { %3839 = vmatpush.bf16.msra.mxu0 %v10764_v9  ;;  %v13859_v9 = vld [vmem:[%s21141_s1 + $0xb64] sm:$0xf]  ;;  %v11052_v22 = vor.u32 %v13827_v5, %v11049_v28  ;;  %v11209_v28 = vld [vmem:[%s21141_s1 + $0xba8] sm:$0xf0]  ;;  %v13910_v53 = vld [vmem:[%s21143_s8 + $0xfc] sm:$0xf] }
 0x184   : > { %3853 = vmatpush.bf16.msra.mxu1 %v10828_v57  ;;  %v11177_v57 = vld [vmem:[%s21141_s1 + $0xb68] sm:$0xf0]  ;;  %v17200_v10 = vadd.f32 %v3948_v37, %v3946_v29  ;;  %v13835_v15 = vld [vmem:[%s21141_s1 + $0xaa4] sm:$0xf]  ;;  %v11385_v4 = vld [vmem:[%s21143_s8 + $0x110] sm:$0xf0] }
 0x185   : > { %3867 = vmatpush.bf16.msra.mxu2 %v10892_v32  ;;  %v11241_v32 = vld [vmem:[%s21141_s1 + $0xbe8] sm:$0xf0]  ;;  %v11180_v42 = vor.u32 %v13859_v9, %v11177_v57  ;;  %v13851_v5 = vld [vmem:[%s21141_s1 + $0xb24] sm:$0xf]  ;;  %v13817_v9 = vld [vmem:[%s21141_s1 + $0xa14] sm:$0xf] }
 0x186   : > { %3881 = vmatpush.bf16.msra.mxu3 %v10956_v2  ;;  %v13825_v2 = vld [vmem:[%s21141_s1 + $0xa54] sm:$0xf]  ;;  %v11244_v25 = vor.u32 %v13875_v13, %v11241_v32  ;;  %v11009_v57 = vld [vmem:[%s21141_s1 + $0xa18] sm:$0xf0]  ;;  %v13907_v50 = vld [vmem:[%s21143_s8 + $0xdc] sm:$0xf0] }
 0x187   : > { %3840 = vmatpush.bf16.msra.mxu0 %v10756_v33  ;;  %v11044_v33 = vor.u32 %v13825_v2, %v11041_v38  ;;  %v13833_v13 = vld [vmem:[%s21141_s1 + $0xa94] sm:$0xf]  ;;  %v11201_v38 = vld [vmem:[%s21141_s1 + $0xb98] sm:$0xf0]  ;;  %v11012_v41 = vor.u32 %v13817_v9, %v11009_v57  ;;  %v13904_v54 = vld [vmem:[%s21143_s8 + $0xcc] sm:$0xf] }
 0x188   : > { %3854 = vmatpush.bf16.msra.mxu1 %v10820_v17  ;;  %v11097_v17 = vld [vmem:[%s21141_s1 + $0xac8] sm:$0xf0]  ;;  %v13865_v2 = vld [vmem:[%s21141_s1 + $0xb94] sm:$0xf] }
 0x189   : > { %3868 = vmatpush.bf16.msra.mxu2 %v10884_v49  ;;  %v13855_v49 = vld [vmem:[%s21141_s1 + $0xb44] sm:$0xf]  ;;  %v11100_v31 = vor.u32 %v13839_v39, %v11097_v17  ;;  %v11423_v39 = vld [vmem:[%s21143_s8 + $0x150] sm:$0xf] }
 0x18a   : > { %3882 = vmatpush.bf16.msra.mxu3 %v10948_v23  ;;  %v11164_v47 = vor.u32 %v13855_v49, %v11161_v6  ;;  %v13921_v49 = vld [vmem:[%s21143_s8 + $0x154] sm:$0xf]  ;;  %v11425_v6 = vld [vmem:[%s21143_s8 + $0x168] sm:$0xf0] }
 0x18b   : > { %3841 = vmatpush.bf16.msra.mxu0 %v10748_v40  ;;  %v13869_v40 = vld [vmem:[%s21141_s1 + $0xbb4] sm:$0xf] }
 0x18c   : > { %3855 = vmatpush.bf16.msra.mxu1 %v10812_v63  ;;  %v11156_v63 = vor.u32 %v13853_v60, %v11153_v44  ;;  %v11375_v44 = vld [vmem:[%s21143_s8 + $0xf0] sm:$0xf] }
 0x18d   : > { %3869 = vmatpush.bf16.msra.mxu2 %v10876_v0  ;;  %v13819_v0 = vld [vmem:[%s21141_s1 + $0xa24] sm:$0xf] }
 0x18e   : > { %3883 = vmatpush.bf16.msra.mxu3 %v10940_v20  ;;  %3842 = vmatmul.bf16.vlgmr.msra.gmra.mxu0 %v15873_v51  ;;  %v13873_v51 = vld [vmem:[%s21141_s1 + $0xbd4] sm:$0xf]  ;;  %v11220_v20 = vor.u32 %v13869_v40, %v11217_v27  ;;  %v11020_v8 = vor.u32 %v13819_v0, %v11017_v3  ;;  %v13912_v40 = vld [vmem:[%s21143_s8 + $0x104] sm:$0xf0] }
 0x18f   : > { %3890 = vmatpush.bf16.msrb.mxu0 %v11060_v21  ;;  %3856 = vmatmul.bf16.vlgmr.msra.gmra.mxu1 %v15886_v56  ;;  %v11033_v56 = vld [vmem:[%s21141_s1 + $0xa48] sm:$0xf0]  ;;  %v13909_v27 = vld [vmem:[%s21143_s8 + $0xf4] sm:$0xf] }
 0x190   : > { %3904 = vmatpush.bf16.msrb.mxu1 %v11124_v48  ;;  %3870 = vmatmul.bf16.vlgmr.msra.gmra.mxu2 %v15884_v55  ;;  %v13823_v55 = vld [vmem:[%s21141_s1 + $0xa44] sm:$0xf]  ;;  %v11081_v21 = vld [vmem:[%s21141_s1 + $0xaa8] sm:$0xf0] }
 0x191   : > { %3918 = vmatpush.bf16.msrb.mxu2 %v11188_v62  ;;  %3884 = vmatmul.bf16.vlgmr.msra.gmra.mxu3 %v15894_v59  ;;  %v11236_v59 = vor.u32 %v13873_v51, %v11233_v34  ;;  %v11036_v23 = vor.u32 %v13823_v55, %v11033_v56  ;;  %v11145_v48 = vld [vmem:[%s21141_s1 + $0xb28] sm:$0xf0]  ;;  %v13867_v62 = vld [vmem:[%s21141_s1 + $0xba4] sm:$0xf] }
 0x192   : > { %3932 = vmatpush.bf16.msrb.mxu3 %v11252_v18  ;;  %v11084_v18 = vor.u32 %v13835_v15, %v11081_v21  ;;  %v11148_v19 = vor.u32 %v13851_v5, %v11145_v48  ;;  %v11212_v32 = vor.u32 %v13867_v62, %v11209_v28  ;;  %v13831_v51 = vld [vmem:[%s21141_s1 + $0xa84] sm:$0xf]  ;;  %v11065_v34 = vld [vmem:[%s21141_s1 + $0xa88] sm:$0xf0]  ;;  %v11327_v15 = vld [vmem:[%s21143_s8 + $0x90] sm:$0xf] }
 0x193   : > { %3891 = vmatpush.bf16.msrb.mxu0 %v11052_v22  ;;  %v11073_v22 = vld [vmem:[%s21141_s1 + $0xa98] sm:$0xf0]  ;;  %v13863_v55 = vld [vmem:[%s21141_s1 + $0xb84] sm:$0xf]  ;;  %v11193_v56 = vld [vmem:[%s21141_s1 + $0xb88] sm:$0xf0]  ;;  %v11068_v43 = vor.u32 %v13831_v51, %v11065_v34 }
 0x194   : > { %3905 = vmatpush.bf16.msrb.mxu1 %v11116_v14  ;;  %v13849_v14 = vld [vmem:[%s21141_s1 + $0xb14] sm:$0xf]  ;;  %v11076_v46 = vor.u32 %v13833_v13, %v11073_v22  ;;  %v11329_v5 = vld [vmem:[%s21143_s8 + $0xa8] sm:$0xf0]  ;;  %v11303_v28 = vld [vmem:[%s21143_s8 + $0x60] sm:$0xf] }
 0x195   : > { %3919 = vmatpush.bf16.msrb.mxu2 %v11180_v42  ;;  %v11137_v42 = vld [vmem:[%s21141_s1 + $0xb18] sm:$0xf0]  ;;  %v13897_v21 = vld [vmem:[%s21143_s8 + $0x94] sm:$0xf]  ;;  %v11279_v13 = vld [vmem:[%s21143_s8 + $0x30] sm:$0xf] }
 0x196   : > { %3933 = vmatpush.bf16.msrb.mxu3 %v11244_v25  ;;  %v13815_v25 = vld [vmem:[%s21141_s1 + $0xa04] sm:$0xf]  ;;  %v11140_v26 = vor.u32 %v13849_v14, %v11137_v42  ;;  %v11332_v62 = vor.u32 %v13897_v21, %v11329_v5  ;;  %v13885_v22 = vld [vmem:[%s21143_s8 + $0x34] sm:$0xf]  ;;  %v11281_v14 = vld [vmem:[%s21143_s8 + $0x48] sm:$0xf0] }
 0x197   : > { %3892 = vmatpush.bf16.msrb.mxu0 %v11044_v33  ;;  %v11204_v33 = vor.u32 %v13865_v2, %v11201_v38  ;;  %v11004_v17 = vor.u32 %v13815_v25, %v11001_v24  ;;  %v11284_v2 = vor.u32 %v13885_v22, %v11281_v14  ;;  %v11255_v38 = vld [vmem:[%s21143_s8] sm:$0xf]  ;;  %v13879_v25 = vld [vmem:[%s21143_s8 + $0x4] sm:$0xf]  ;;  %v13925_v24 = vld [vmem:[%s21143_s8 + $0x16c] sm:$0xf0] }
 0x198   : > { %3906 = vmatpush.bf16.msrb.mxu1 %v11108_v45  ;;  %v13847_v45 = vld [vmem:[%s21141_s1 + $0xb04] sm:$0xf]  ;;  %v13922_v51 = vld [vmem:[%s21143_s8 + $0x15c] sm:$0xf]  ;;  %v11433_v34 = vld [vmem:[%s21143_s8 + $0x170] sm:$0xf0] }
 0x199   : > { %3920 = vmatpush.bf16.msrb.mxu2 %v11172_v52  ;;  %v11129_v52 = vld [vmem:[%s21141_s1 + $0xb08] sm:$0xf0]  ;;  %v11287_v5 = vld [vmem:[%s21143_s8 + $0x38] sm:$0xf]  ;;  %v11265_v22 = vld [vmem:[%s21143_s8 + $0x20] sm:$0xf0] }
 0x19a   : > { %3934 = vmatpush.bf16.msrb.mxu3 %v11236_v59  ;;  %v13924_v59 = vld [vmem:[%s21143_s8 + $0x164] sm:$0xf0]  ;;  %v11132_v30 = vor.u32 %v13847_v45, %v11129_v52  ;;  %v11439_v14 = vld [vmem:[%s21143_s8 + $0x160] sm:$0xf] }
 0x19b   : > { %3893 = vmatpush.bf16.msrb.mxu0 %v11036_v23  ;;  %v11196_v23 = vor.u32 %v13863_v55, %v11193_v56  ;;  %v11436_v55 = vor.u32 %v13922_v51, %v11433_v34  ;;  %v11407_v56 = vld [vmem:[%s21143_s8 + $0x128] sm:$0xf]  ;;  %v11415_v34 = vld [vmem:[%s21143_s8 + $0x130] sm:$0xf] }
 0x19c   : > { %3907 = vmatpush.bf16.msrb.mxu1 %v11100_v31  ;;  %v11424_v31 = vor.u32 %v13924_v59, %v11423_v39  ;;  %v13919_v39 = vld [vmem:[%s21143_s8 + $0x13c] sm:$0xf0]  ;;  %v13916_v59 = vld [vmem:[%s21143_s8 + $0x12c] sm:$0xf] }
 0x19d   : > { %3921 = vmatpush.bf16.msrb.mxu2 %v11164_v47  ;;  %v11428_v47 = vor.u32 %v13921_v49, %v11425_v6  ;;  %v17484_v49 = vpack.c.bf16 %v3948_v37, %v3946_v29  ;;  %v11408_v6 = vor.u32 %v13919_v39, %v11407_v56  ;;  %v17500_v37 = vpop.f32.mrf.mxu0  ;;  %v11391_v39 = vld [vmem:[%s21143_s8 + $0x100] sm:$0xf] }
 0x19e   : > { %3935 = vmatpush.bf16.msrb.mxu3 %v11228_v36  ;;  %v11401_v36 = vld [vmem:[%s21143_s8 + $0x138] sm:$0xf0] }
 0x19f   : > { %3894 = vmatpush.bf16.msrb.mxu0 %v11028_v61  ;;  %v11404_v60 = vor.u32 %v13915_v35, %v11401_v36  ;;  %v11376_v61 = vor.u32 %v13912_v40, %v11375_v44  ;;  %v11361_v35 = vld [vmem:[%s21143_s8 + $0xe0] sm:$0xf0]  ;;  %v17514_v36 = vpop.f32.mrf.mxu1  ;;  %v11335_v44 = vld [vmem:[%s21143_s8 + $0x98] sm:$0xf]  ;;  %v13901_v40 = vld [vmem:[%s21143_s8 + $0xac] sm:$0xf0] }
 0x1a0   : > { %3908 = vmatpush.bf16.msrb.mxu1 %v11092_v1 }
 0x1a1   : > { %3922 = vmatpush.bf16.msrb.mxu2 %v11156_v63  ;;  %v13903_v63 = vld [vmem:[%s21143_s8 + $0xc4] sm:$0xf] }
 0x1a2   : > { %3936 = vmatpush.bf16.msrb.mxu3 %v11220_v20  ;;  %v13900_v20 = vld [vmem:[%s21143_s8 + $0xa4] sm:$0xf0] }
 0x1a3   : > { %3895 = vmatpush.bf16.msrb.mxu0 %v11020_v8  ;;  %v11328_v48 = vor.u32 %v13900_v20, %v11327_v15  ;;  %v13894_v8 = vld [vmem:[%s21143_s8 + $0x74] sm:$0xf0] }
 0x1a4   : > { %3909 = vmatpush.bf16.msrb.mxu1 %v11084_v18  ;;  %v13891_v18 = vld [vmem:[%s21143_s8 + $0x64] sm:$0xf]  ;;  %v11304_v9 = vor.u32 %v13894_v8, %v11303_v28  ;;  %v13886_v28 = vld [vmem:[%s21143_s8 + $0x3c] sm:$0xf]  ;;  %v11289_v8 = vld [vmem:[%s21143_s8 + $0x50] sm:$0xf0] }
 0x1a5   : > { %3923 = vmatpush.bf16.msrb.mxu2 %v11148_v19  ;;  %v11305_v19 = vld [vmem:[%s21143_s8 + $0x78] sm:$0xf0]  ;;  %v17544_v15 = vpop.f32.mrf.mxu0 }
 0x1a6   : > { %3937 = vmatpush.bf16.msrb.mxu3 %v11212_v32  ;;  %v11308_v57 = vor.u32 %v13891_v18, %v11305_v19  ;;  %v13888_v32 = vld [vmem:[%s21143_s8 + $0x44] sm:$0xf0]  ;;  %v11292_v19 = vor.u32 %v13886_v28, %v11289_v8  ;;  %v13902_v8 = vld [vmem:[%s21143_s8 + $0xb4] sm:$0xf0] }
 0x1a7   : > { %3896 = vmatpush.bf16.msrb.mxu0 %v11012_v41  ;;  %v11280_v42 = vor.u32 %v13888_v32, %v11279_v13  ;;  %v13882_v41 = vld [vmem:[%s21143_s8 + $0x14] sm:$0xf0]  ;;  %v13880_v13 = vld [vmem:[%s21143_s8 + $0xc] sm:$0xf] }
 0x1a8   : > { %3910 = vmatpush.bf16.msrb.mxu1 %v11076_v46  ;;  %v11257_v46 = vld [vmem:[%s21143_s8 + $0x18] sm:$0xf0] }
 0x1a9   : > { %3924 = vmatpush.bf16.msrb.mxu2 %v11140_v26  ;;  %v11431_v26 = vld [vmem:[%s21143_s8 + $0x158] sm:$0xf]  ;;  %v11260_v45 = vor.u32 %v13879_v25, %v11257_v46 }
 0x1aa   : > { %3938 = vmatpush.bf16.msrb.mxu3 %v11204_v33  ;;  %v11256_v33 = vor.u32 %v13882_v41, %v11255_v38  ;;  %v11432_v52 = vor.u32 %v13925_v24, %v11431_v26  ;;  %v13923_v38 = vld [vmem:[%s21143_s8 + $0x164] sm:$0xf]  ;;  %v11441_v41 = vld [vmem:[%s21143_s8 + $0x178] sm:$0xf0]  ;;  %v11268_v26 = vor.u32 %v13880_v13, %v11265_v22 }
 0x1ab   : > { %3897 = vmatpush.bf16.msrb.mxu0 %v11004_v17  ;;  %v11409_v17 = vld [vmem:[%s21143_s8 + $0x140] sm:$0xf0]  ;;  %v11444_v51 = vor.u32 %v13923_v38, %v11441_v41  ;;  %v11345_v13 = vld [vmem:[%s21143_s8 + $0xb8] sm:$0xf0]  ;;  %v11543_v38 = vld [vmem:[%s21143_s8 + $0x240] sm:$0xf] }
 0x1ac   : > { %3911 = vmatpush.bf16.msrb.mxu1 %v11068_v43  ;;  %v11412_v43 = vor.u32 %v13916_v59, %v11409_v17  ;;  %v11615_v59 = vld [vmem:[%s21143_s8 + $0x2d0] sm:$0xf]  ;;  %v13972_v17 = vld [vmem:[%s21143_s8 + $0x2e4] sm:$0xf0]  ;;  %v13954_v41 = vld [vmem:[%s21143_s8 + $0x254] sm:$0xf0] }
 0x1ad   : > { %3925 = vmatpush.bf16.msrb.mxu2 %v11132_v30  ;;  %v11383_v30 = vld [vmem:[%s21143_s8 + $0xf8] sm:$0xf]  ;;  %v17588_v46 = vpop.f32.mrf.mxu0 }
 0x1ae   : > { %3939 = vmatpush.bf16.msrb.mxu3 %v11196_v23  ;;  %3898 = vmatmul.bf16.vlgmr.msrb.gmra.mxu0 %v16085_v7  ;;  %v11377_v7 = vld [vmem:[%s21143_s8 + $0x108] sm:$0xf0]  ;;  %v13913_v23 = vld [vmem:[%s21143_s8 + $0x10c] sm:$0xf0] }
 0x1af   : > { %4528 = vmatpush.bf16.msra.mxu0 %v11424_v31  ;;  %3912 = vmatmul.bf16.vlgmr.msrb.gmra.mxu1 %v16098_v12  ;;  %v11380_v1 = vor.u32 %v13909_v27, %v11377_v7  ;;  %v11351_v12 = vld [vmem:[%s21143_s8 + $0xc0] sm:$0xf]  ;;  %v11384_v29 = vor.u32 %v13913_v23, %v11383_v30  ;;  %v11388_v31 = vor.u32 %v13910_v53, %v11385_v4  ;;  %v13898_v27 = vld [vmem:[%s21143_s8 + $0x9c] sm:$0xf]  ;;  %v11337_v7 = vld [vmem:[%s21143_s8 + $0xb0] sm:$0xf0] }
 0x1b0   : > { %3926 = vmatmul.bf16.vlgmr.msrb.gmra.mxu2 %v16096_v11  ;;  %v13906_v11 = vld [vmem:[%s21143_s8 + $0xd4] sm:$0xf0]  ;;  %v11616_v30 = vor.u32 %v13972_v17, %v11615_v59  ;;  %v13969_v23 = vld [vmem:[%s21143_s8 + $0x2d4] sm:$0xf]  ;;  %v11617_v53 = vld [vmem:[%s21143_s8 + $0x2e8] sm:$0xf0] }
 0x1b1   : > { %4556 = vmatpush.bf16.msra.mxu2 %v11428_v47  ;;  %3940 = vmatmul.bf16.vlgmr.msrb.gmra.mxu3 %v16106_v16  ;;  %v11353_v16 = vld [vmem:[%s21143_s8 + $0xd8] sm:$0xf0]  ;;  %v11352_v0 = vor.u32 %v13906_v11, %v11351_v12  ;;  %v11359_v47 = vld [vmem:[%s21143_s8 + $0xc8] sm:$0xf]  ;;  %v17530_v12 = vpop.f32.mrf.mxu3  ;;  %v11340_v11 = vor.u32 %v13898_v27, %v11337_v7  ;;  %v13911_v4 = vld [vmem:[%s21143_s8 + $0x104] sm:$0xf] }
 0x1b2   : > { %v11356_v3 = vor.u32 %v13903_v63, %v11353_v16  ;;  %v11311_v63 = vld [vmem:[%s21143_s8 + $0x68] sm:$0xf]  ;;  %v13895_v16 = vld [vmem:[%s21143_s8 + $0x7c] sm:$0xf0]  ;;  %4542 = vmatpush.bf16.msra.mxu1 %v11616_v30 }
 0x1b3   : > { %4529 = vmatpush.bf16.msra.mxu0 %v11400_v58  ;;  %v11360_v58 = vor.u32 %v13907_v50, %v11359_v47  ;;  %v11312_v20 = vor.u32 %v13895_v16, %v11311_v63  ;;  %v13908_v27 = vld [vmem:[%s21143_s8 + $0xe4] sm:$0xf0]  ;;  %v13905_v63 = vld [vmem:[%s21143_s8 + $0xd4] sm:$0xf]  ;;  %v11369_v16 = vld [vmem:[%s21143_s8 + $0xe8] sm:$0xf0] }
 0x1b4   : > { %v11372_v28 = vor.u32 %v13905_v63, %v11369_v16  ;;  %v13948_v30 = vld [vmem:[%s21143_s8 + $0x224] sm:$0xf0] }
 0x1b5   : > { %4557 = vmatpush.bf16.msra.mxu2 %v11404_v60  ;;  %v11364_v60 = vor.u32 %v13904_v54, %v11361_v35  ;;  %v11591_v35 = vld [vmem:[%s21143_s8 + $0x2a0] sm:$0xf] }
 0x1b7   : > { %4530 = vmatpush.bf16.msra.mxu0 %v11376_v61  ;;  %v17528_v61 = vpop.f32.mrf.mxu2 }
 0x1b9   : > { %4558 = vmatpush.bf16.msra.mxu2 %v11380_v1  ;;  %v11336_v1 = vor.u32 %v13901_v40, %v11335_v44  ;;  %v11367_v40 = vld [vmem:[%s21143_s8 + $0xd0] sm:$0xf] }
 0x1bb   : > { %4531 = vmatpush.bf16.msra.mxu0 %v11352_v0  ;;  %v13892_v0 = vld [vmem:[%s21143_s8 + $0x6c] sm:$0xf] }
 0x1bd   : > { %4559 = vmatpush.bf16.msra.mxu2 %v11356_v3  ;;  %v11313_v3 = vld [vmem:[%s21143_s8 + $0x80] sm:$0xf0] }
 0x1be   : > { %v11316_v21 = vor.u32 %v13892_v0, %v11313_v3  ;;  %v11368_v3 = vor.u32 %v13908_v27, %v11367_v40 }
 0x1bf   : > { %4532 = vmatpush.bf16.msra.mxu0 %v11328_v48  ;;  %v13889_v48 = vld [vmem:[%s21143_s8 + $0x4c] sm:$0xf0]  ;;  %v17569_v32 = vpop.f32.mrf.mxu2 }
 0x1c0   : > { %v11288_v18 = vor.u32 %v13889_v48, %v11287_v5  ;;  %v13960_v5 = vld [vmem:[%s21143_s8 + $0x284] sm:$0xf0] }
 0x1c1   : > { %4560 = vmatpush.bf16.msra.mxu2 %v11332_v62  ;;  %v17552_v62 = vpop.f32.mrf.mxu1 }
 0x1c2   : > { %v3636_v40 = vadd.f32 %v17552_v62, %v17544_v15  ;;  %v13884_v15 = vld [vmem:[%s21143_s8 + $0x24] sm:$0xf0]  ;;  %v13881_v62 = vld [vmem:[%s21143_s8 + $0x14] sm:$0xf] }
 0x1c3   : > { %4533 = vmatpush.bf16.msra.mxu0 %v11304_v9  ;;  %v11263_v9 = vld [vmem:[%s21143_s8 + $0x8] sm:$0xf] }
 0x1c5   : > { %4561 = vmatpush.bf16.msra.mxu2 %v11308_v57  ;;  %v13883_v57 = vld [vmem:[%s21143_s8 + $0x1c] sm:$0xf0] }
 0x1c6   : > { %v11264_v25 = vor.u32 %v13883_v57, %v11263_v9  ;;  %v11569_v9 = vld [vmem:[%s21143_s8 + $0x288] sm:$0xf0]  ;;  %v13899_v57 = vld [vmem:[%s21143_s8 + $0xa4] sm:$0xf] }
 0x1c7   : > { %4534 = vmatpush.bf16.msra.mxu0 %v11280_v42  ;;  %v13926_v42 = vld [vmem:[%s21143_s8 + $0x174] sm:$0xf0]  ;;  %v17629_v47 = vpop.f32.mrf.mxu2 }
 0x1c8   : > { %v11440_v24 = vor.u32 %v13926_v42, %v11439_v14  ;;  %v3634_v14 = vadd.f32 %v17514_v36, %v17500_v37  ;;  %v11348_v37 = vor.u32 %v13899_v57, %v11345_v13  ;;  %v11319_v36 = vld [vmem:[%s21143_s8 + $0x70] sm:$0xf]  ;;  %v11697_v57 = vld [vmem:[%s21145_s25 + $0x78] sm:$0xf0]  ;;  %v3650_v13 = vadd.f32 %v17569_v32, %v3636_v40  ;;  %v13933_v32 = vld [vmem:[%s21143_s8 + $0x1b4] sm:$0xf] }
 0x1c9   : > { %4562 = vmatpush.bf16.msra.mxu2 %v11284_v2  ;;  %v17580_v2 = vpop.f32.mrf.mxu3 }
 0x1ca   : > { %v3648_v59 = vadd.f32 %v17528_v61, %v3634_v14 }
 0x1cb   : > { %4535 = vmatpush.bf16.msra.mxu0 %v11256_v33  ;;  %v13920_v33 = vld [vmem:[%s21143_s8 + $0x144] sm:$0xf0] }
 0x1cc   : > { %v11416_v56 = vor.u32 %v13920_v33, %v11415_v34  ;;  %v11545_v34 = vld [vmem:[%s21143_s8 + $0x258] sm:$0xf0] }
 0x1cd   : > { %4563 = vmatpush.bf16.msra.mxu2 %v11260_v45  ;;  %v13917_v45 = vld [vmem:[%s21143_s8 + $0x134] sm:$0xf] }
 0x1ce   : > { %4536 = vmatmul.bf16.vlgmr.msra.gmra.mxu0 %v17484_v49 }
 0x1cf   : > { %4584 = vmatpush.bf16.msrb.mxu0 %v11432_v52  ;;  %v11417_v52 = vld [vmem:[%s21143_s8 + $0x148] sm:$0xf0] }
 0x1d0   : > { %4564 = vmatmul.bf16.vlgmr.msra.gmra.mxu2 %v17484_v49 }
 0x1d1   : > { %4612 = vmatpush.bf16.msrb.mxu2 %v11436_v55  ;;  %v17602_v55 = vpop.f32.mrf.mxu1  ;;  %v17632_v50 = vpop.f32.mrf.mxu3 }
 0x1d3   : > { %4585 = vmatpush.bf16.msrb.mxu0 %v11408_v6  ;;  %v11420_v6 = vor.u32 %v13917_v45, %v11417_v52  ;;  %v13893_v52 = vld [vmem:[%s21143_s8 + $0x74] sm:$0xf] }
 0x1d5   : > { %4613 = vmatpush.bf16.msrb.mxu2 %v11412_v43  ;;  %v13914_v43 = vld [vmem:[%s21143_s8 + $0x114] sm:$0xf0] }
 0x1d6   : > { %v11392_v54 = vor.u32 %v13914_v43, %v11391_v39  ;;  %v11519_v43 = vld [vmem:[%s21143_s8 + $0x210] sm:$0xf] }
 0x1d7   : > { %4586 = vmatpush.bf16.msrb.mxu0 %v11384_v29  ;;  %v11393_v29 = vld [vmem:[%s21143_s8 + $0x118] sm:$0xf0] }
 0x1d8   : > { %v11396_v44 = vor.u32 %v13911_v4, %v11393_v29  ;;  %v11520_v4 = vor.u32 %v13948_v30, %v11519_v43  ;;  %v13945_v29 = vld [vmem:[%s21143_s8 + $0x214] sm:$0xf]  ;;  %v11679_v43 = vld [vmem:[%s21145_s25 + $0x50] sm:$0xf]  ;;  %v11447_v30 = vld [vmem:[%s21143_s8 + $0x180] sm:$0xf] }
 0x1d9   : > { %4614 = vmatpush.bf16.msrb.mxu2 %v11388_v31  ;;  %v11620_v31 = vor.u32 %v13969_v23, %v11617_v53  ;;  %v17669_v48 = vpop.f32.mrf.mxu1  ;;  %v17708_v33 = vpop.f32.mrf.mxu3  ;;  %v13890_v53 = vld [vmem:[%s21143_s8 + $0x54] sm:$0xf0] }
 0x1db   : > { %4587 = vmatpush.bf16.msrb.mxu0 %v11360_v58  ;;  %4570 = vmatpush.bf16.msra.mxu3 %v11620_v31  ;;  %v13966_v58 = vld [vmem:[%s21143_s8 + $0x2b4] sm:$0xf0]  ;;  %v11521_v31 = vld [vmem:[%s21143_s8 + $0x228] sm:$0xf0] }
 0x1dc   : > { %v11592_v7 = vor.u32 %v13966_v58, %v11591_v35  ;;  %v11297_v35 = vld [vmem:[%s21143_s8 + $0x58] sm:$0xf0]  ;;  %v11524_v58 = vor.u32 %v13945_v29, %v11521_v31  ;;  %v13985_v29 = vld [vmem:[%s21145_s25 + $0x54] sm:$0xf] }
 0x1dd   : > { %4615 = vmatpush.bf16.msrb.mxu2 %v11364_v60  ;;  %v13963_v60 = vld [vmem:[%s21143_s8 + $0x2a4] sm:$0xf]  ;;  %v11681_v31 = vld [vmem:[%s21145_s25 + $0x58] sm:$0xf0] }
 0x1de   : > { %4543 = vmatpush.bf16.msra.mxu1 %v11592_v7  ;;  %v11495_v7 = vld [vmem:[%s21143_s8 + $0x1e0] sm:$0xf] }
 0x1df   : > { %4588 = vmatpush.bf16.msrb.mxu0 %v11336_v1  ;;  %v11593_v1 = vld [vmem:[%s21143_s8 + $0x2b8] sm:$0xf0] }
 0x1e0   : > { %v11596_v0 = vor.u32 %v13963_v60, %v11593_v1  ;;  %v3662_v60 = vadd.f32 %v17530_v12, %v3648_v59  ;;  %v13942_v1 = vld [vmem:[%s21143_s8 + $0x1f4] sm:$0xf0]  ;;  %v13939_v12 = vld [vmem:[%s21143_s8 + $0x1e4] sm:$0xf] }
 0x1e1   : > { %4616 = vmatpush.bf16.msrb.mxu2 %v11340_v11  ;;  %v17652_v11 = vpop.f32.mrf.mxu0  ;;  %v17728_v23 = vpop.f32.mrf.mxu1  ;;  %v13987_v59 = vld [vmem:[%s21145_s25 + $0x64] sm:$0xf] }
 0x1e2   : > { %4571 = vmatpush.bf16.msra.mxu3 %v11596_v0  ;;  %v11496_v0 = vor.u32 %v13942_v1, %v11495_v7  ;;  %v13970_v1 = vld [vmem:[%s21143_s8 + $0x2dc] sm:$0xf] }
 0x1e3   : > { %4589 = vmatpush.bf16.msrb.mxu0 %v11312_v20  ;;  %v11343_v20 = vld [vmem:[%s21143_s8 + $0xa0] sm:$0xf] }
 0x1e4   : > { %v11344_v42 = vor.u32 %v13902_v8, %v11343_v20  ;;  %v17771_v20 = vpop.f32.mrf.mxu3 }
 0x1e5   : > { %4617 = vmatpush.bf16.msrb.mxu2 %v11316_v21  ;;  %v11567_v21 = vld [vmem:[%s21143_s8 + $0x270] sm:$0xf] }
 0x1e7   : > { %4590 = vmatpush.bf16.msrb.mxu0 %v11288_v18  ;;  %v11568_v18 = vor.u32 %v13960_v5, %v11567_v21  ;;  %v11273_v21 = vld [vmem:[%s21143_s8 + $0x28] sm:$0xf0]  ;;  %v11695_v5 = vld [vmem:[%s21144_s5 + $0x70] sm:$0xf]  ;;  %s20265_s5 = sand.u32 1, %s14593_s26  }
 0x1e8   : > { %s21112_s1 = sshll.u32 %s20265_s5, 6 }
 0x1e9   : > { %4618 = vmatpush.bf16.msrb.mxu2 %v11292_v19  ;;  %v13957_v19 = vld [vmem:[%s21143_s8 + $0x274] sm:$0xf]  ;;  %4544 = vmatpush.bf16.msra.mxu1 %v11568_v18  ;;  %v17710_v45 = vpop.f32.mrf.mxu0  ;;  %v14603_v18 = vmov 16.0   ;;  %s20283_s2 = scalar_lea.vmem [#allocation2], %s21112_s1  ;;  %s20533_s1 = sshll.u32 %s15039_s4, 3 }
 0x1ea   : > { %v11572_v22 = vor.u32 %v13957_v19, %v11569_v9  ;;  %14460 = vrcp.f32 %v14603_v18  ;;  %v3676_v19 = vadd.f32 %v17588_v46, %v3662_v60  ;;  %v13989_v9 = vld [vmem:[%s21145_s25 + $0x74] sm:$0xf]  ;;  %v11471_v46 = vld [vmem:[%s21143_s8 + $0x1b0] sm:$0xf]  ;;  %s809_s30 = scalar_lea.vmem %s21087_s19, %s20533_s1  ;;  %s805_s27 = scalar_lea.vmem %s21086_s18, %s20533_s1 }
 0x1eb   : > { %4591 = vmatpush.bf16.msrb.mxu0 %v11264_v25  ;;  %v13951_v25 = vld [vmem:[%s21143_s8 + $0x244] sm:$0xf]  ;;  %v13973_v60 = vld [vmem:[%s21143_s8 + $0x2ec] sm:$0xf0] }
 0x1ec   : > { %4572 = vmatpush.bf16.msra.mxu3 %v11572_v22  ;;  %v11548_v39 = vor.u32 %v13951_v25, %v11545_v34 }
 0x1ed   : > { %4619 = vmatpush.bf16.msrb.mxu2 %v11268_v26  ;;  %v17697_v26 = vpop.f32.mrf.mxu2 }
 0x1ee   : > { %4592 = vmatmul.bf16.vlgmr.msrb.gmra.mxu0 %v17484_v49 }
 0x1ef   : > { %4640 = vmatpush.bf16.msra.mxu0 %v11440_v24  ;;  %v13896_v24 = vld [vmem:[%s21143_s8 + $0x84] sm:$0xf0] }
 0x1f0   : > { %4620 = vmatmul.bf16.vlgmr.msrb.gmra.mxu2 %v17484_v49  ;;  %v11320_v17 = vor.u32 %v13896_v24, %v11319_v36  ;;  %4573 = vmatpush.bf16.msra.mxu3 %v11548_v39  ;;  %v11700_v36 = vor.u32 %v13989_v9, %v11697_v57  ;;  %v11687_v24 = vld [vmem:[%s21145_s25 + $0x60] sm:$0xf]  ;;  %v17812_v39 = vpop.f32.mrf.mxu1  ;;  %v11684_v57 = vor.u32 %v13985_v29, %v11681_v31  ;;  %v11551_v29 = vld [vmem:[%s21143_s8 + $0x248] sm:$0xf] }
 0x1f1   : > { %4668 = vmatpush.bf16.msra.mxu2 %v11444_v51  ;;  %v11544_v51 = vor.u32 %v13954_v41, %v11543_v38  ;;  %v17790_v22 = vpop.f32.mrf.mxu0  ;;  %v11276_v38 = vor.u32 %v13881_v62, %v11273_v21  ;;  %v11601_v21 = vld [vmem:[%s21143_s8 + $0x2c0] sm:$0xf0]  ;;  %v13955_v31 = vld [vmem:[%s21143_s8 + $0x25c] sm:$0xf0] }
 0x1f3   : > { %4641 = vmatpush.bf16.msra.mxu0 %v11416_v56  ;;  %v11321_v56 = vld [vmem:[%s21143_s8 + $0x88] sm:$0xf0]  ;;  %4545 = vmatpush.bf16.msra.mxu1 %v11544_v51  ;;  %v13988_v51 = vld [vmem:[%s21145_s25 + $0x64] sm:$0xf0] }
 0x1f4   : > { %v11324_v61 = vor.u32 %v13893_v52, %v11321_v56  ;;  %4574 = vmatpush.bf16.msra.mxu3 %v11524_v58  ;;  %v4709_v52 = vrot.slane %v17200_v10, 4  ;;  %v3690_v56 = vadd.f32 %v17602_v55, %v3676_v19  ;;  %v13986_v55 = vld [vmem:[%s21145_s25 + $0x54] sm:$0xf0] }
 0x1f5   : > { %4669 = vmatpush.bf16.msra.mxu2 %v11420_v6  ;;  %v11295_v6 = vld [vmem:[%s21143_s8 + $0x40] sm:$0xf]  ;;  %v17760_v63 = vpop.f32.mrf.mxu2  ;;  %v11623_v58 = vld [vmem:[%s21143_s8 + $0x2d8] sm:$0xf]  ;;  %v11680_v18 = vor.u32 %v13986_v55, %v11679_v43 }
 0x1f6   : > { %v11296_v27 = vor.u32 %v13890_v53, %v11295_v6  ;;  %v3664_v6 = vadd.f32 %v17580_v2, %v3650_v13  ;;  %v13927_v2 = vld [vmem:[%s21143_s8 + $0x184] sm:$0xf]  ;;  %v17836_v53 = vpop.eup %14460  ;;  %v11624_v7 = vor.u32 %v13973_v60, %v11623_v58  ;;  %v13984_v13 = vld [vmem:[%s21145_s25 + $0x44] sm:$0xf0]  ;;  %v11655_v58 = vld [vmem:[%s21145_s25 + $0x20] sm:$0xf] }
 0x1f7   : > { %4642 = vmatpush.bf16.msra.mxu0 %v11392_v54  ;;  %v13887_v54 = vld [vmem:[%s21143_s8 + $0x44] sm:$0xf]  ;;  %4546 = vmatpush.bf16.msra.mxu1 %v11520_v4  ;;  %v11688_v4 = vor.u32 %v13988_v51, %v11687_v24  ;;  %v13958_v24 = vld [vmem:[%s21143_s8 + $0x27c] sm:$0xf]  ;;  %v13980_v60 = vld [vmem:[%s21145_s25 + $0x24] sm:$0xf0]  ;;  %vm4727_vm0 = vweird.f32 %v17836_v53 }
 0x1f8   : > { %v11300_v16 = vor.u32 %v13887_v54, %v11297_v35  ;;  %v11449_v35 = vld [vmem:[%s21143_s8 + $0x198] sm:$0xf0] }
 0x1f9   : > { %4670 = vmatpush.bf16.msra.mxu2 %v11396_v44  ;;  %v11271_v44 = vld [vmem:[%s21143_s8 + $0x10] sm:$0xf] }
 0x1fa   : > { %v11272_v14 = vor.u32 %v13884_v15, %v11271_v44  ;;  %v3678_v44 = vadd.f32 %v17652_v11, %v3664_v6  ;;  %v3704_v15 = vadd.f32 %v17629_v47, %v3690_v56  ;;  %v4710_v47 = vadd.f32 %v4709_v52, %v17200_v10  ;;  %v11671_v10 = vld [vmem:[%s21145_s25 + $0x40] sm:$0xf]  ;;  %v11577_v52 = vld [vmem:[%s21143_s8 + $0x290] sm:$0xf0] }
 0x1fb   : > { %4643 = vmatpush.bf16.msra.mxu0 %v11368_v3  ;;  %v11497_v3 = vld [vmem:[%s21143_s8 + $0x1f8] sm:$0xf0]  ;;  %4547 = vmatpush.bf16.msra.mxu1 %v11496_v0  ;;  %v13967_v0 = vld [vmem:[%s21143_s8 + $0x2bc] sm:$0xf0]  ;;  %v11580_v6 = vor.u32 %v13958_v24, %v11577_v52 }
 0x1fc   : > { %v11500_v8 = vor.u32 %v13939_v12, %v11497_v3  ;;  %v11625_v12 = vld [vmem:[%s21143_s8 + $0x2f0] sm:$0xf0]  ;;  %v13964_v3 = vld [vmem:[%s21143_s8 + $0x2ac] sm:$0xf]  ;;  %v3692_v9 = vadd.f32 %v17669_v48, %v3678_v44  ;;  %v13983_v48 = vld [vmem:[%s21145_s25 + $0x44] sm:$0xf]  ;;  %v11552_v44 = vor.u32 %v13955_v31, %v11551_v29 }
 0x1fd   : > { %4671 = vmatpush.bf16.msra.mxu2 %v11372_v28  ;;  %v13990_v28 = vld [vmem:[%s21145_s25 + $0x74] sm:$0xf0]  ;;  %v17864_v62 = vpop.f32.mrf.mxu2  ;;  %v11628_v11 = vor.u32 %v13970_v1, %v11625_v12 }
 0x1fe   : > { %4575 = vmatpush.bf16.msra.mxu3 %v11500_v8  ;;  %v11696_v41 = vor.u32 %v13990_v28, %v11695_v5  ;;  %v4723_v5 = vmul.f32 16.0, %v17836_v53  ;;  %v17878_v28 = vpop.f32.mrf.mxu3  ;;  %v17880_v8 = vpop.f32.mrf.mxu0 }
 0x1ff   : > { %4644 = vmatpush.bf16.msra.mxu0 %v11344_v42  ;;  %v13936_v42 = vld [vmem:[%s21143_s8 + $0x1c4] sm:$0xf0] }
 0x200   : > { %v11472_v25 = vor.u32 %v13936_v42, %v11471_v46  ;;  %v17891_v46 = vpop.f32.mrf.mxu1  ;;  %v11673_v42 = vld [vmem:[%s21145_s25 + $0x48] sm:$0xf0] }
 0x201   : > { %4672 = vmatpush.bf16.msra.mxu2 %v11348_v37  ;;  %v11473_v37 = vld [vmem:[%s21143_s8 + $0x1c8] sm:$0xf0]  ;;  %v11676_v51 = vor.u32 %v13983_v48, %v11673_v42 }
 0x202   : > { %v11476_v34 = vor.u32 %v13933_v32, %v11473_v37  ;;  %4548 = vmatpush.bf16.msra.mxu1 %v11472_v25  ;;  %v3706_v25 = vadd.f32 %v17697_v26, %v3692_v9  ;;  %v11672_v37 = vor.u32 %v13984_v13, %v11671_v10  ;;  %v11663_v26 = vld [vmem:[%s21145_s25 + $0x30] sm:$0xf]  ;;  %v11529_v9 = vld [vmem:[%s21143_s8 + $0x230] sm:$0xf0]  ;;  %v11649_v10 = vld [vmem:[%s21145_s25 + $0x18] sm:$0xf0] }
 0x203   : > { %4645 = vmatpush.bf16.msra.mxu0 %v11320_v17  ;;  %v11689_v17 = vld [vmem:[%s21145_s25 + $0x68] sm:$0xf0] }
 0x204   : > { %4576 = vmatpush.bf16.msra.mxu3 %v11476_v34  ;;  %v11692_v40 = vor.u32 %v13987_v59, %v11689_v17  ;;  %v13981_v59 = vld [vmem:[%s21145_s25 + $0x34] sm:$0xf]  ;;  %v11665_v17 = vld [vmem:[%s21145_s25 + $0x38] sm:$0xf0]  ;;  %v3720_v55 = vadd.f32 %v17708_v33, %v3706_v25  ;;  %v13952_v33 = vld [vmem:[%s21143_s8 + $0x24c] sm:$0xf] }
 0x205   : > { %4673 = vmatpush.bf16.msra.mxu2 %v11324_v61  ;;  %v13930_v61 = vld [vmem:[%s21143_s8 + $0x194] sm:$0xf0]  ;;  %v17919_v56 = vpop.f32.mrf.mxu2  ;;  %v13940_v25 = vld [vmem:[%s21143_s8 + $0x1ec] sm:$0xf] }
 0x206   : > { %v11448_v54 = vor.u32 %v13930_v61, %v11447_v30  ;;  %v17928_v30 = vpop.f32.mrf.mxu3 }
 0x207   : > { %4646 = vmatpush.bf16.msra.mxu0 %v11296_v27  ;;  %v11452_v27 = vor.u32 %v13927_v2, %v11449_v35  ;;  %v17942_v35 = vpop.f32.mrf.mxu0 }
 0x208   : > { %4549 = vmatpush.bf16.msra.mxu1 %v11448_v54  ;;  %v3734_v54 = vadd.f32 %v17790_v22, %v3720_v55  ;;  %v13937_v55 = vld [vmem:[%s21143_s8 + $0x1cc] sm:$0xf0] }
 0x209   : > { %4674 = vmatpush.bf16.msra.mxu2 %v11300_v16  ;;  %v11599_v16 = vld [vmem:[%s21143_s8 + $0x2a8] sm:$0xf]  ;;  %4577 = vmatpush.bf16.msra.mxu3 %v11452_v27  ;;  %v13979_v27 = vld [vmem:[%s21145_s25 + $0x24] sm:$0xf] }
 0x20a   : > { %v11600_v19 = vor.u32 %v13967_v0, %v11599_v16  ;;  %v13949_v0 = vld [vmem:[%s21143_s8 + $0x22c] sm:$0xf0] }
 0x20b   : > { %4647 = vmatpush.bf16.msra.mxu0 %v11272_v14  ;;  %v11604_v14 = vor.u32 %v13964_v3, %v11601_v21  ;;  %v13946_v3 = vld [vmem:[%s21143_s8 + $0x21c] sm:$0xf]  ;;  %v3748_v21 = vadd.f32 %v17812_v39, %v3734_v54  ;;  %v11455_v54 = vld [vmem:[%s21143_s8 + $0x188] sm:$0xf] }
 0x20c   : > { %4598 = vmatpush.bf16.msrb.mxu1 %v11624_v7  ;;  %v11657_v7 = vld [vmem:[%s21145_s25 + $0x28] sm:$0xf0]  ;;  %v11532_v13 = vor.u32 %v13946_v3, %v11529_v9 }
 0x20d   : > { %4675 = vmatpush.bf16.msra.mxu2 %v11276_v38  ;;  %4626 = vmatpush.bf16.msrb.mxu3 %v11628_v11  ;;  %v4711_v38 = vrot.slane %v4710_v47, 2  ;;  %v11656_v11 = vor.u32 %v13980_v60, %v11655_v58  ;;  %v3817_v42 = vpop.f32.mrf.mxu2 }
 0x20e   : > { %4648 = vmatmul.bf16.vlgmr.msra.gmra.mxu0 %v17484_v49 }
 0x20f   : > { %4925 = vmatpush.bf16.msrb.mxu0 %v11696_v41  ;;  %v4724_v41 = vsub.f32 1.0, %v4723_v5  ;;  %v4712_v43 = vadd.f32 %v4711_v38, %v4710_v47  ;;  %v11660_v47 = vor.u32 %v13979_v27, %v11657_v7  ;;  %v11647_v5 = vld [vmem:[%s21145_s25 + $0x10] sm:$0xf] }
 0x210   : > { %4676 = vmatmul.bf16.vlgmr.msra.gmra.mxu2 %v17484_v49  ;;  %v3718_v49 = vadd.f32 %v17632_v50, %v3704_v15  ;;  %4599 = vmatpush.bf16.msrb.mxu1 %v11600_v19  ;;  %v11575_v50 = vld [vmem:[%s21143_s8 + $0x278] sm:$0xf]  ;;  %v17961_v15 = vpop.f32.mrf.mxu1 }
 0x211   : > { %4951 = vmatpush.bf16.msrb.mxu2 %v11700_v36  ;;  %v13961_v36 = vld [vmem:[%s21143_s8 + $0x28c] sm:$0xf0]  ;;  %4627 = vmatpush.bf16.msrb.mxu3 %v11604_v14  ;;  %v4725_v61 = vmul.f32 %v17836_v53, %v4724_v41  ;;  %v4713_v12 = vrot.slane %v4712_v43, 1  ;;  %v3762_v14 = vadd.f32 %v17864_v62, %v3748_v21  ;;  %v13943_v41 = vld [vmem:[%s21143_s8 + $0x1fc] sm:$0xf0] }
 0x212   : > { %v3732_v32 = vadd.f32 %v17710_v45, %v3718_v49  ;;  %v13982_v45 = vld [vmem:[%s21145_s25 + $0x34] sm:$0xf0]  ;;  %v11576_v34 = vor.u32 %v13961_v36, %v11575_v50  ;;  %v11639_v50 = vld [vmem:[%s21145_s25] sm:$0xf]  ;;  %v13976_v36 = vld [vmem:[%s21145_s25 + $0x4] sm:$0xf0] }
 0x213   : > { %4926 = vmatpush.bf16.msrb.mxu0 %v11688_v4  ;;  %v11664_v4 = vor.u32 %v13982_v45, %v11663_v26  ;;  %v4726_v16 = vadd.f32 %v17836_v53, %v4725_v61  ;;  %v4714_v49 = vadd.f32 %v4713_v12, %v4712_v43  ;;  %v11641_v26 = vld [vmem:[%s21145_s25 + $0x8] sm:$0xf0]  ;;  %v11479_v43 = vld [vmem:[%s21143_s8 + $0x1b8] sm:$0xf] }
 0x214   : > { %v3746_v2 = vadd.f32 %v17728_v23, %v3732_v32  ;;  %4600 = vmatpush.bf16.msrb.mxu1 %v11576_v34  ;;  %v11668_v23 = vor.u32 %v13981_v59, %v11665_v17  ;;  %v3843_v32 = vpop.f32.mrf.mxu0  ;;  %v3776_v34 = vadd.f32 %v17878_v28, %v3762_v14  ;;  %v13934_v28 = vld [vmem:[%s21143_s8 + $0x1bc] sm:$0xf] }
 0x215   : > { %4952 = vmatpush.bf16.msrb.mxu2 %v11692_v40  ;;  %4628 = vmatpush.bf16.msrb.mxu3 %v11580_v6  ;;  %v11553_v40 = vld [vmem:[%s21143_s8 + $0x260] sm:$0xf0]  ;;  %v18002_v62 = vsel %vm4727_vm0, %v17836_v53, %v4726_v16  ;;  %v11640_v6 = vor.u32 %v13976_v36, %v11639_v50  ;;  %v13974_v50 = vld [vmem:[%s21143_s8 + $0x2f4] sm:$0xf0] }
 0x216   : > { %v3760_v22 = vadd.f32 %v17760_v63, %v3746_v2  ;;  %v11556_v1 = vor.u32 %v13952_v33, %v11553_v40  ;;  %v11527_v63 = vld [vmem:[%s21143_s8 + $0x218] sm:$0xf]  ;;  %v13975_v53 = vld [vmem:[%s21145_s25 + $0x4] sm:$0xf]  ;;  %v4729_v52 = vmul.f32 %v18002_v62, %v4714_v49  ;;  %v3790_v61 = vadd.f32 %v17942_v35, %v3776_v34  ;;  %v3871_v33 = vpop.f32.mrf.mxu2  ;;  %v13931_v35 = vld [vmem:[%s21143_s8 + $0x19c] sm:$0xf0] }
 0x217   : > { %4927 = vmatpush.bf16.msrb.mxu0 %v11680_v18  ;;  %v13978_v18 = vld [vmem:[%s21145_s25 + $0x14] sm:$0xf0]  ;;  %v11528_v19 = vor.u32 %v13949_v0, %v11527_v63  ;;  %v11480_v2 = vor.u32 %v13937_v55, %v11479_v43  ;;  %v11457_v40 = vld [vmem:[%s21143_s8 + $0x1a0] sm:$0xf0]  ;;  %v11607_v34 = vld [vmem:[%s21143_s8 + $0x2b0] sm:$0xf] }
 0x218   : > { %4601 = vmatpush.bf16.msrb.mxu1 %v11552_v44  ;;  %v3774_v39 = vadd.f32 %v17771_v20, %v3760_v22  ;;  %v11648_v38 = vor.u32 %v13978_v18, %v11647_v5  ;;  %v11503_v20 = vld [vmem:[%s21143_s8 + $0x1e8] sm:$0xf]  ;;  %v3857_v17 = vpop.f32.mrf.mxu1  ;;  %v3804_v58 = vadd.f32 %v17961_v15, %v3790_v61  ;;  %v11456_v44 = vor.u32 %v13931_v35, %v11455_v54  ;;  %v13971_v36 = vld [vmem:[%s21143_s8 + $0x2e4] sm:$0xf]  ;;  %v13962_v61 = vld [vmem:[%s21143_s8 + $0x294] sm:$0xf0] }
 0x219   : > { %4953 = vmatpush.bf16.msrb.mxu2 %v11684_v57  ;;  %4629 = vmatpush.bf16.msrb.mxu3 %v11556_v1  ;;  %v13977_v57 = vld [vmem:[%s21145_s25 + $0x14] sm:$0xf]  ;;  %v11504_v24 = vor.u32 %v13943_v41, %v11503_v20  ;;  %v11561_v35 = vld [vmem:[%s21143_s8 + $0x268] sm:$0xf0] }
 0x21a   : > { %v3788_v48 = vadd.f32 %v17880_v8, %v3774_v39  ;;  %v3831_v8 = vpop.f32.mrf.mxu3  ;;  %v3818_v7 = vadd.f32 %v3817_v42, %v3804_v58  ;;  %v13953_v54 = vld [vmem:[%s21143_s8 + $0x254] sm:$0xf] }
 0x21b   : > { %4928 = vmatpush.bf16.msrb.mxu0 %v11672_v37  ;;  %v11652_v37 = vor.u32 %v13977_v57, %v11649_v10  ;;  %v11564_v58 = vor.u32 %v13953_v54, %v11561_v35  ;;  %v11719_v35 = vld [vmem:[%s21145_s25 + $0xa0] sm:$0xf] }
 0x21c   : > { %4602 = vmatpush.bf16.msrb.mxu1 %v11528_v19  ;;  %v3802_v59 = vadd.f32 %v17891_v46, %v3788_v48  ;;  %v11644_v46 = vor.u32 %v13975_v53, %v11641_v26  ;;  %v3845_v1 = vpop.f32.mrf.mxu0  ;;  %v3832_v15 = vadd.f32 %v3831_v8, %v3818_v7  ;;  %v11511_v7 = vld [vmem:[%s21143_s8 + $0x1f0] sm:$0xf] }
 0x21d   : > { %4954 = vmatpush.bf16.msrb.mxu2 %v11676_v51  ;;  %4630 = vmatpush.bf16.msrb.mxu3 %v11532_v13  ;;  %v11505_v51 = vld [vmem:[%s21143_s8 + $0x200] sm:$0xf0] }
 0x21e   : > { %v11508_v45 = vor.u32 %v13940_v25, %v11505_v51  ;;  %v3816_v31 = vadd.f32 %v17919_v56, %v3802_v59  ;;  %v4731_v56 = vpack.c.bf16 %v4729_v52, %v4729_v52  ;;  %v3846_v63 = vadd.f32 %v3845_v1, %v3832_v15  ;;  %v3873_v0 = vpop.f32.mrf.mxu2  ;;  %v13968_v59 = vld [vmem:[%s21143_s8 + $0x2c4] sm:$0xf0] }
 0x21f   : > { %4929 = vmatpush.bf16.msrb.mxu0 %v11664_v4  ;;  %v11481_v4 = vld [vmem:[%s21143_s8 + $0x1d0] sm:$0xf0]  ;;  %v11608_v43 = vor.u32 %v13968_v59, %v11607_v34  ;;  %v13944_v1 = vld [vmem:[%s21143_s8 + $0x204] sm:$0xf0]  ;;  %v11735_v59 = vld [vmem:[%s21145_s25 + $0xc0] sm:$0xf] }
 0x220   : > { %4603 = vmatpush.bf16.msrb.mxu1 %v11504_v24  ;;  %v11484_v29 = vor.u32 %v13934_v28, %v11481_v4  ;;  %v3830_v27 = vadd.f32 %v17928_v30, %v3816_v31  ;;  %v3859_v16 = vpop.f32.mrf.mxu1  ;;  %v11633_v24 = vld [vmem:[%s21143_s8 + $0x2f8] sm:$0xf0]  ;;  %v11583_v28 = vld [vmem:[%s21143_s8 + $0x280] sm:$0xf]  ;;  %v11559_v31 = vld [vmem:[%s21143_s8 + $0x250] sm:$0xf]  ;;  %v11512_v15 = vor.u32 %v13944_v1, %v11511_v7 }
 0x221   : > { %4955 = vmatpush.bf16.msrb.mxu2 %v11668_v23  ;;  %4631 = vmatpush.bf16.msrb.mxu3 %v11508_v45  ;;  %v13928_v23 = vld [vmem:[%s21143_s8 + $0x18c] sm:$0xf]  ;;  %v3860_v5 = vadd.f32 %v3859_v16, %v3846_v63  ;;  %v11636_v45 = vor.u32 %v13971_v36, %v11633_v24  ;;  %v11584_v4 = vor.u32 %v13962_v61, %v11583_v28  ;;  %v11487_v63 = vld [vmem:[%s21143_s8 + $0x1c0] sm:$0xf]  ;;  %v11743_v36 = vld [vmem:[%s21145_s25 + $0xd0] sm:$0xf] }
 0x222   : > { %v3885_v60 = vpop.f32.mrf.mxu3  ;;  %v11460_v22 = vor.u32 %v13928_v23, %v11457_v40  ;;  %v3844_v12 = vadd.f32 %v3843_v32, %v3830_v27  ;;  %v11631_v32 = vld [vmem:[%s21143_s8 + $0x2e0] sm:$0xf]  ;;  %v11537_v40 = vld [vmem:[%s21143_s8 + $0x238] sm:$0xf0]  ;;  %v11513_v16 = vld [vmem:[%s21143_s8 + $0x208] sm:$0xf0] }
 0x223   : > { %4930 = vmatpush.bf16.msrb.mxu0 %v11656_v11  ;;  %v3874_v9 = vadd.f32 %v3873_v0, %v3860_v5  ;;  %v11632_v26 = vor.u32 %v13974_v50, %v11631_v32  ;;  %v13938_v0 = vld [vmem:[%s21143_s8 + $0x1d4] sm:$0xf0]  ;;  %v11727_v61 = vld [vmem:[%s21145_s25 + $0xb0] sm:$0xf]  ;;  %v13993_v1 = vld [vmem:[%s21145_s25 + $0x94] sm:$0xf] }
 0x224   : > { %4604 = vmatpush.bf16.msrb.mxu1 %v11480_v2  ;;  %v3858_v11 = vadd.f32 %v3857_v17, %v3844_v12  ;;  %v13965_v17 = vld [vmem:[%s21143_s8 + $0x2b4] sm:$0xf]  ;;  %v11585_v2 = vld [vmem:[%s21143_s8 + $0x298] sm:$0xf0]  ;;  %v14002_v24 = vld [vmem:[%s21145_s25 + $0xd4] sm:$0xf0] }
 0x225   : > { %4956 = vmatpush.bf16.msrb.mxu2 %v11660_v47  ;;  %4632 = vmatpush.bf16.msrb.mxu3 %v11484_v29  ;;  %v13941_v12 = vld [vmem:[%s21143_s8 + $0x1f4] sm:$0xf]  ;;  %v13994_v7 = vld [vmem:[%s21145_s25 + $0x94] sm:$0xf0] }
 0x226   : > { %v3872_v3 = vadd.f32 %v3871_v33, %v3858_v11  ;;  %v13956_v33 = vld [vmem:[%s21143_s8 + $0x264] sm:$0xf0]  ;;  %v11516_v11 = vor.u32 %v13941_v12, %v11513_v16  ;;  %v11713_v12 = vld [vmem:[%s21145_s25 + $0x98] sm:$0xf0] }
 0x227   : > { %4931 = vmatpush.bf16.msrb.mxu0 %v11648_v38  ;;  %v11560_v23 = vor.u32 %v13956_v33, %v11559_v31 }
 0x228   : > { %4605 = vmatpush.bf16.msrb.mxu1 %v11456_v44  ;;  %v3886_v19 = vadd.f32 %v3885_v60, %v3872_v3  ;;  %v11535_v60 = vld [vmem:[%s21143_s8 + $0x220] sm:$0xf]  ;;  %v13947_v44 = vld [vmem:[%s21143_s8 + $0x224] sm:$0xf] }
 0x229   : > { %4957 = vmatpush.bf16.msrb.mxu2 %v11652_v37  ;;  %4633 = vmatpush.bf16.msrb.mxu3 %v11460_v22  ;;  %v11540_v27 = vor.u32 %v13947_v44, %v11537_v40  ;;  %v13935_v3 = vld [vmem:[%s21143_s8 + $0x1c4] sm:$0xf] }
 0x22a   : > { %v3887_v21 = vpop.f32.mrf.mxu3 }
 0x22b   : > { %4932 = vmatpush.bf16.msrb.mxu0 %v11640_v6  ;;  %v3899_v47 = vpop.f32.mrf.mxu0  ;;  %v3888_v57 = vadd.f32 %v3887_v21, %v3874_v9  ;;  %v11609_v6 = vld [vmem:[%s21143_s8 + $0x2c8] sm:$0xf0]  ;;  %v11489_v21 = vld [vmem:[%s21143_s8 + $0x1d8] sm:$0xf0]  ;;  %v13929_v9 = vld [vmem:[%s21143_s8 + $0x194] sm:$0xf] }
 0x22c   : > { %v3913_v18 = vpop.f32.mrf.mxu1  ;;  %v3900_v30 = vadd.f32 %v3899_v47, %v3886_v19  ;;  %v11612_v55 = vor.u32 %v13965_v17, %v11609_v6  ;;  %v11488_v47 = vor.u32 %v13938_v0, %v11487_v63  ;;  %v11492_v5 = vor.u32 %v13935_v3, %v11489_v21  ;;  %v13932_v19 = vld [vmem:[%s21143_s8 + $0x1a4] sm:$0xf0]  ;;  %v13999_v6 = vld [vmem:[%s21145_s25 + $0xc4] sm:$0xf]  ;;  %v11703_v63 = vld [vmem:[%s21145_s25 + $0x80] sm:$0xf] }
 0x22d   : > { %4958 = vmatpush.bf16.msrb.mxu2 %v11644_v46  ;;  %v13959_v46 = vld [vmem:[%s21143_s8 + $0x284] sm:$0xf]  ;;  %v14000_v17 = vld [vmem:[%s21145_s25 + $0xc4] sm:$0xf0] }
 0x22e   : > { %4933 = vmatmul.bf16.vlgmr.msrb.gmra.mxu0 %v4731_v56  ;;  %v3914_v14 = vadd.f32 %v3913_v18, %v3900_v30  ;;  %v11588_v29 = vor.u32 %v13959_v46, %v11585_v2  ;;  %v11463_v18 = vld [vmem:[%s21143_s8 + $0x190] sm:$0xf]  ;;  %v11465_v30 = vld [vmem:[%s21143_s8 + $0x1a8] sm:$0xf0]  ;;  %v13998_v2 = vld [vmem:[%s21145_s25 + $0xb4] sm:$0xf0] }
 0x22f   : > { %v11728_v33 = vor.u32 %v13998_v2, %v11727_v61  ;;  %v13992_v3 = vld [vmem:[%s21145_s25 + $0x84] sm:$0xf0]  ;;  %v13991_v21 = vld [vmem:[%s21145_s25 + $0x84] sm:$0xf]  ;;  %v14114_v61 = vld [vmem:[%s21146_s7 + $0x54] sm:$0xf0] }
 0x230   : > { %4959 = vmatmul.bf16.vlgmr.msrb.gmra.mxu2 %v4731_v56  ;;  %v13950_v56 = vld [vmem:[%s21143_s8 + $0x234] sm:$0xf0]  ;;  %v14113_v2 = vld [vmem:[%s21146_s7 + $0x54] sm:$0xf]  ;;  %s20563_s8 = sshll.u32 %s15039_s4, 6 }
 0x231   : > { %v11536_v22 = vor.u32 %v13950_v56, %v11535_v60  ;;  %v11721_v60 = vld [vmem:[%s21145_s25 + $0xa8] sm:$0xf0]  ;;  %s20745_s21 = scalar_lea.vmem %s21090_s22, %s20563_s8  ;;  %s20787_s4 = scalar_lea.vmem %s21091_s23, %s20563_s8 }
 0x233   : > { %v3927_v39 = vpop.f32.mrf.mxu2  ;;  %v3901_v13 = vpop.f32.mrf.mxu0 }
 0x234   : > { %v3941_v10 = vpop.f32.mrf.mxu3  ;;  %v3902_v49 = vadd.f32 %v3901_v13, %v3888_v57  ;;  %v3928_v48 = vadd.f32 %v3927_v39, %v3914_v14  ;;  %v3915_v42 = vpop.f32.mrf.mxu1  ;;  %v11759_v39 = vld [vmem:[%s21145_s25 + $0xf0] sm:$0xf]  ;;  %v14006_v57 = vld [vmem:[%s21145_s25 + $0xf4] sm:$0xf0]  ;;  %v11761_v13 = vld [vmem:[%s21145_s25 + $0xf8] sm:$0xf0]  ;;  %v11464_v14 = vor.u32 %v13932_v19, %v11463_v18 }
 0x236   : > { %v3916_v38 = vadd.f32 %v3915_v42, %v3902_v49  ;;  %v18050_v41 = vadd.f32 %v3941_v10, %v3928_v48  ;;  %v14005_v10 = vld [vmem:[%s21145_s25 + $0xf4] sm:$0xf]  ;;  %v11468_v49 = vor.u32 %v13929_v9, %v11465_v30  ;;  %v11760_v42 = vor.u32 %v14006_v57, %v11759_v39 }
 0x238   : > { %v3947_v51 = vmax.f32 %v18050_v41, 0.0  ;;  %v11753_v41 = vld [vmem:[%s21145_s25 + $0xe8] sm:$0xf0] }
 0x23b   : > { %v3929_v20 = vpop.f32.mrf.mxu2 }
 0x23c   : > { %v3930_v25 = vadd.f32 %v3929_v20, %v3916_v38  ;;  %v3943_v8 = vpop.f32.mrf.mxu3  ;;  %v11764_v38 = vor.u32 %v14005_v10, %v11761_v13  ;;  %v11751_v20 = vld [vmem:[%s21145_s25 + $0xe0] sm:$0xf] }
 0x23e   : > { %v18055_v37 = vadd.f32 %v3943_v8, %v3930_v25  ;;  %v14004_v25 = vld [vmem:[%s21145_s25 + $0xe4] sm:$0xf0]  ;;  %v14003_v8 = vld [vmem:[%s21145_s25 + $0xe4] sm:$0xf] }
 0x23f   : > { %v11756_v50 = vor.u32 %v14003_v8, %v11753_v41  ;;  %v14117_v8 = vld [vmem:[%s21146_s7 + $0x74] sm:$0xf] }
 0x240   : > { %v3949_v53 = vmax.f32 %v18055_v37, 0.0  ;;  %v11752_v37 = vor.u32 %v14004_v25, %v11751_v20  ;;  %v11823_v20 = vld [vmem:[%s21146_s7 + $0x70] sm:$0xf]  ;;  %v14118_v25 = vld [vmem:[%s21146_s7 + $0x74] sm:$0xf0] }
 0x242   : > { %v18075_v52 = vpack.c.bf16 %v3949_v53, %v3947_v51  ;;  %v4715_v48 = vadd.f32 %v3949_v53, %v3947_v51  ;;  %v14001_v51 = vld [vmem:[%s21145_s25 + $0xd4] sm:$0xf]  ;;  %v11745_v53 = vld [vmem:[%s21145_s25 + $0xd8] sm:$0xf0] }
 0x243   : > { %v11748_v34 = vor.u32 %v14001_v51, %v11745_v53  ;;  %v14115_v51 = vld [vmem:[%s21146_s7 + $0x64] sm:$0xf] }
 0x244   : > { %4550 = vmatmul.bf16.vlgmr.msra.gmra.mxu1 %v18075_v52  ;;  %4578 = vmatmul.bf16.vlgmr.msra.gmra.mxu3 %v18075_v52  ;;  %v4716_v32 = vrot.slane %v4715_v48, 4 }
 0x245   : > { %4654 = vmatpush.bf16.msra.mxu1 %v11632_v26  ;;  %4682 = vmatpush.bf16.msra.mxu3 %v11636_v45  ;;  %v11744_v45 = vor.u32 %v14002_v24, %v11743_v36  ;;  %v11815_v36 = vld [vmem:[%s21146_s7 + $0x60] sm:$0xf]  ;;  %v14116_v24 = vld [vmem:[%s21146_s7 + $0x64] sm:$0xf0] }
 0x246   : > { %v4717_v26 = vadd.f32 %v4716_v32, %v4715_v48  ;;  %v11824_v32 = vor.u32 %v14118_v25, %v11823_v20  ;;  %v11816_v53 = vor.u32 %v14116_v24, %v11815_v36  ;;  %v11863_v20 = vld [vmem:[%s21146_s7 + $0xc0] sm:$0xf]  ;;  %v14128_v25 = vld [vmem:[%s21146_s7 + $0xc4] sm:$0xf0]  ;;  %v14107_v24 = vld [vmem:[%s21146_s7 + $0x24] sm:$0xf] }
 0x247   : > { %v14108_v36 = vld [vmem:[%s21146_s7 + $0x24] sm:$0xf0] }
 0x248   : > { %5275 = vmatpush.bf16.msra.mxu0 %v11824_v32  ;;  %v11865_v32 = vld [vmem:[%s21146_s7 + $0xc8] sm:$0xf0] }
 0x249   : > { %4655 = vmatpush.bf16.msra.mxu1 %v11608_v43  ;;  %4683 = vmatpush.bf16.msra.mxu3 %v11612_v55  ;;  %v4718_v43 = vrot.slane %v4717_v26, 2  ;;  %v11736_v55 = vor.u32 %v14000_v17, %v11735_v59  ;;  %v14134_v59 = vld [vmem:[%s21146_s7 + $0xf4] sm:$0xf0]  ;;  %v14133_v17 = vld [vmem:[%s21146_s7 + $0xf4] sm:$0xf] }
 0x24b   : > { %v18219_v46 = vpop.f32.mrf.mxu0  ;;  %v4719_v31 = vadd.f32 %v4718_v43, %v4717_v26  ;;  %v11817_v26 = vld [vmem:[%s21146_s7 + $0x68] sm:$0xf0] }
 0x24c   : > { %5276 = vmatpush.bf16.msra.mxu0 %v11816_v53  ;;  %v11785_v53 = vld [vmem:[%s21146_s7 + $0x28] sm:$0xf0] }
 0x24d   : > { %4656 = vmatpush.bf16.msra.mxu1 %v11584_v4  ;;  %4684 = vmatpush.bf16.msra.mxu3 %v11588_v29  ;;  %v13997_v4 = vld [vmem:[%s21145_s25 + $0xb4] sm:$0xf]  ;;  %v11729_v29 = vld [vmem:[%s21145_s25 + $0xb8] sm:$0xf0]  ;;  %v4720_v56 = vrot.slane %v4719_v31, 1 }
 0x24e   : > { %v11732_v54 = vor.u32 %v13997_v4, %v11729_v29  ;;  %v11809_v29 = vld [vmem:[%s21146_s7 + $0x58] sm:$0xf0] }
 0x24f   : > { %v4721_v0 = vadd.f32 %v4720_v56, %v4719_v31  ;;  %v11812_v31 = vor.u32 %v14113_v2, %v11809_v29  ;;  %v11799_v56 = vld [vmem:[%s21146_s7 + $0x40] sm:$0xf]  ;;  %v11777_v2 = vld [vmem:[%s21146_s7 + $0x18] sm:$0xf0] }
 0x250   : > { %v11847_v29 = vld [vmem:[%s21146_s7 + $0xa0] sm:$0xf] }
 0x251   : > { %4657 = vmatpush.bf16.msra.mxu1 %v11560_v23  ;;  %4685 = vmatpush.bf16.msra.mxu3 %v11564_v58  ;;  %v13996_v23 = vld [vmem:[%s21145_s25 + $0xa4] sm:$0xf0]  ;;  %v13995_v58 = vld [vmem:[%s21145_s25 + $0xa4] sm:$0xf]  ;;  %v4730_v19 = vmul.f32 %v18002_v62, %v4721_v0  ;;  %v11873_v0 = vld [vmem:[%s21146_s7 + $0xd8] sm:$0xf0] }
 0x252   : > { %v11720_v40 = vor.u32 %v13996_v23, %v11719_v35  ;;  %v14131_v35 = vld [vmem:[%s21146_s7 + $0xe4] sm:$0xf] }
 0x253   : > { %v18242_v44 = vpop.f32.mrf.mxu2  ;;  %v18256_v16 = vpop.f32.mrf.mxu0  ;;  %v4732_v39 = vpack.c.bf16 %v4730_v19, %v4730_v19  ;;  %v11793_v19 = vld [vmem:[%s21146_s7 + $0x38] sm:$0xf0] }
 0x254   : > { %4606 = vmatmul.bf16.vlgmr.msrb.gmra.mxu1 %v18075_v52  ;;  %4634 = vmatmul.bf16.vlgmr.msrb.gmra.mxu3 %v18075_v52 }
 0x255   : > { %4658 = vmatpush.bf16.msra.mxu1 %v11536_v22  ;;  %4686 = vmatpush.bf16.msra.mxu3 %v11540_v27  ;;  %v11724_v22 = vor.u32 %v13995_v58, %v11721_v60  ;;  %v11711_v27 = vld [vmem:[%s21145_s25 + $0x90] sm:$0xf]  ;;  %v11881_v58 = vld [vmem:[%s21146_s7 + $0xe8] sm:$0xf0] }
 0x256   : > { %v11884_v60 = vor.u32 %v14131_v35, %v11881_v58  ;;  %v11849_v35 = vld [vmem:[%s21146_s7 + $0xa8] sm:$0xf0] }
 0x259   : > { %4659 = vmatpush.bf16.msra.mxu1 %v11512_v15  ;;  %4687 = vmatpush.bf16.msra.mxu3 %v11516_v11  ;;  %v11712_v15 = vor.u32 %v13994_v7, %v11711_v27  ;;  %v11716_v11 = vor.u32 %v13993_v1, %v11713_v12  ;;  %v11801_v7 = vld [vmem:[%s21146_s7 + $0x48] sm:$0xf0]  ;;  %v11871_v12 = vld [vmem:[%s21146_s7 + $0xd0] sm:$0xf] }
 0x25b   : > { %v18271_v9 = vpop.f32.mrf.mxu2 }
 0x25d   : > { %4660 = vmatpush.bf16.msra.mxu1 %v11488_v47  ;;  %4688 = vmatpush.bf16.msra.mxu3 %v11492_v5  ;;  %v11705_v47 = vld [vmem:[%s21145_s25 + $0x88] sm:$0xf0]  ;;  %v11704_v5 = vor.u32 %v13992_v3, %v11703_v63 }
 0x25e   : > { %v11708_v18 = vor.u32 %v13991_v21, %v11705_v47  ;;  %v11791_v21 = vld [vmem:[%s21146_s7 + $0x30] sm:$0xf]  ;;  %v14110_v47 = vld [vmem:[%s21146_s7 + $0x34] sm:$0xf0] }
 0x261   : > { %4661 = vmatpush.bf16.msra.mxu1 %v11464_v14  ;;  %4689 = vmatpush.bf16.msra.mxu3 %v11468_v49 }
 0x264   : > { %4662 = vmatmul.bf16.vlgmr.msra.gmra.mxu1 %v18075_v52  ;;  %4690 = vmatmul.bf16.vlgmr.msra.gmra.mxu3 %v18075_v52  ;;  %v11737_v52 = vld [vmem:[%s21145_s25 + $0xc8] sm:$0xf0]  ;;  %s21151_s25 = sld [smem:[#allocation21_spill]] }
 0x265   : > { %4938 = vmatpush.bf16.msrb.mxu1 %v11760_v42  ;;  %4964 = vmatpush.bf16.msrb.mxu3 %v11764_v38  ;;  %v11740_v28 = vor.u32 %v13999_v6, %v11737_v52  ;;  %v11889_v52 = vld [vmem:[%s21146_s7 + $0xf8] sm:$0xf0] }
 0x269   : > { %4939 = vmatpush.bf16.msrb.mxu1 %v11752_v37  ;;  %4965 = vmatpush.bf16.msrb.mxu3 %v11756_v50  ;;  %v11825_v37 = vld [vmem:[%s21146_s7 + $0x78] sm:$0xf0] }
 0x26a   : > { %v11828_v50 = vor.u32 %v14117_v8, %v11825_v37  ;;  %v14127_v8 = vld [vmem:[%s21146_s7 + $0xc4] sm:$0xf] }
 0x26b   : > { %v18273_v30 = vpop.f32.mrf.mxu0  ;;  %v11868_v37 = vor.u32 %v14127_v8, %v11865_v32  ;;  %v14052_v32 = vld [vmem:[%s21147_s17 + $0x164] sm:$0xf0] }
 0x26c   : > { %5301 = vmatpush.bf16.msra.mxu2 %v11828_v50  ;;  %v11783_v50 = vld [vmem:[%s21146_s7 + $0x20] sm:$0xf] }
 0x26d   : > { %4940 = vmatpush.bf16.msrb.mxu1 %v11744_v45  ;;  %4966 = vmatpush.bf16.msrb.mxu3 %v11748_v34  ;;  %v11820_v45 = vor.u32 %v14115_v51, %v11817_v26  ;;  %v11887_v34 = vld [vmem:[%s21146_s7 + $0xf0] sm:$0xf]  ;;  %v11784_v51 = vor.u32 %v14108_v36, %v11783_v50  ;;  %v11788_v26 = vor.u32 %v14107_v24, %v11785_v53  ;;  %v14120_v36 = vld [vmem:[%s21146_s7 + $0x84] sm:$0xf0]  ;;  %v14119_v24 = vld [vmem:[%s21146_s7 + $0x84] sm:$0xf] }
 0x26e   : > { %v11888_v6 = vor.u32 %v14134_v59, %v11887_v34  ;;  %v14126_v34 = vld [vmem:[%s21146_s7 + $0xb4] sm:$0xf0]  ;;  %v14125_v59 = vld [vmem:[%s21146_s7 + $0xb4] sm:$0xf] }
 0x270   : > { %5302 = vmatpush.bf16.msra.mxu2 %v11820_v45  ;;  %v11855_v45 = vld [vmem:[%s21146_s7 + $0xb0] sm:$0xf] }
 0x271   : > { %4941 = vmatpush.bf16.msrb.mxu1 %v11736_v55  ;;  %4967 = vmatpush.bf16.msrb.mxu3 %v11740_v28  ;;  %v11892_v55 = vor.u32 %v14133_v17, %v11889_v52  ;;  %v11807_v28 = vld [vmem:[%s21146_s7 + $0x50] sm:$0xf]  ;;  %v11856_v17 = vor.u32 %v14126_v34, %v11855_v45  ;;  %v14038_v34 = vld [vmem:[%s21147_s17 + $0xf4] sm:$0xf0] }
 0x272   : > { %v11808_v4 = vor.u32 %v14114_v61, %v11807_v28  ;;  %v14105_v28 = vld [vmem:[%s21146_s7 + $0x14] sm:$0xf]  ;;  %v12015_v45 = vld [vmem:[%s21147_s17 + $0xf0] sm:$0xf] }
 0x273   : > { %v18275_v57 = vpop.f32.mrf.mxu2  ;;  %v18277_v10 = vpop.f32.mrf.mxu0 }
 0x274   : > { %5277 = vmatpush.bf16.msra.mxu0 %v11808_v4  ;;  %5303 = vmatpush.bf16.msra.mxu2 %v11812_v31  ;;  %v11780_v4 = vor.u32 %v14105_v28, %v11777_v2  ;;  %v14124_v31 = vld [vmem:[%s21146_s7 + $0xa4] sm:$0xf0]  ;;  %v14018_v28 = vld [vmem:[%s21147_s17 + $0x54] sm:$0xf0] }
 0x275   : > { %4942 = vmatpush.bf16.msrb.mxu1 %v11728_v33  ;;  %4968 = vmatpush.bf16.msrb.mxu3 %v11732_v54  ;;  %v11879_v33 = vld [vmem:[%s21146_s7 + $0xe0] sm:$0xf]  ;;  %v14132_v54 = vld [vmem:[%s21146_s7 + $0xe4] sm:$0xf0]  ;;  %v14050_v2 = vld [vmem:[%s21147_s17 + $0x154] sm:$0xf0] }
 0x276   : > { %v11880_v23 = vor.u32 %v14132_v54, %v11879_v33  ;;  %v14123_v33 = vld [vmem:[%s21146_s7 + $0xa4] sm:$0xf]  ;;  %v11848_v54 = vor.u32 %v14124_v31, %v11847_v29  ;;  %v12007_v31 = vld [vmem:[%s21147_s17 + $0xe0] sm:$0xf] }
 0x277   : > { %v11852_v58 = vor.u32 %v14123_v33, %v11849_v35  ;;  %v14036_v33 = vld [vmem:[%s21147_s17 + $0xe4] sm:$0xf0] }
 0x278   : > { %v12008_v35 = vor.u32 %v14036_v33, %v12007_v31 }
 0x279   : > { %4943 = vmatpush.bf16.msrb.mxu1 %v11720_v40  ;;  %4969 = vmatpush.bf16.msrb.mxu3 %v11724_v22  ;;  %v14112_v40 = vld [vmem:[%s21146_s7 + $0x44] sm:$0xf0]  ;;  %v14111_v22 = vld [vmem:[%s21146_s7 + $0x44] sm:$0xf] }
 0x27a   : > { %v11800_v27 = vor.u32 %v14112_v40, %v11799_v56  ;;  %v11804_v1 = vor.u32 %v14111_v22, %v11801_v7  ;;  %v14104_v56 = vld [vmem:[%s21146_s7 + $0x4] sm:$0xf0]  ;;  %v14103_v22 = vld [vmem:[%s21146_s7 + $0x4] sm:$0xf]  ;;  %v11951_v7 = vld [vmem:[%s21147_s17 + $0x70] sm:$0xf] }
 0x27b   : > { %v18279_v13 = vpop.f32.mrf.mxu2 }
 0x27c   : > { %5278 = vmatpush.bf16.msra.mxu0 %v11800_v27  ;;  %5304 = vmatpush.bf16.msra.mxu2 %v11804_v1  ;;  %v11769_v27 = vld [vmem:[%s21146_s7 + $0x8] sm:$0xf0] }
 0x27d   : > { %4944 = vmatpush.bf16.msrb.mxu1 %v11712_v15  ;;  %4970 = vmatpush.bf16.msrb.mxu3 %v11716_v11  ;;  %v14130_v15 = vld [vmem:[%s21146_s7 + $0xd4] sm:$0xf0]  ;;  %v14129_v11 = vld [vmem:[%s21146_s7 + $0xd4] sm:$0xf]  ;;  %v11772_v1 = vor.u32 %v14103_v22, %v11769_v27  ;;  %v12055_v22 = vld [vmem:[%s21147_s17 + $0x140] sm:$0xf] }
 0x27e   : > { %v11872_v63 = vor.u32 %v14130_v15, %v11871_v12  ;;  %v11876_v3 = vor.u32 %v14129_v11, %v11873_v0  ;;  %v14022_v12 = vld [vmem:[%s21147_s17 + $0x74] sm:$0xf0]  ;;  %v12079_v15 = vld [vmem:[%s21147_s17 + $0x170] sm:$0xf] }
 0x27f   : > { %v14054_v11 = vld [vmem:[%s21147_s17 + $0x174] sm:$0xf0] }
 0x280   : > { %v12080_v0 = vor.u32 %v14054_v11, %v12079_v15  ;;  %v14034_v15 = vld [vmem:[%s21147_s17 + $0xd4] sm:$0xf0]  ;;  %v12127_v11 = vld [vmem:[%s21147_s17 + $0x1d0] sm:$0xf] }
 0x281   : > { %4945 = vmatpush.bf16.msrb.mxu1 %v11704_v5  ;;  %4971 = vmatpush.bf16.msrb.mxu3 %v11708_v18  ;;  %v14109_v5 = vld [vmem:[%s21146_s7 + $0x34] sm:$0xf]  ;;  %v11792_v18 = vor.u32 %v14110_v47, %v11791_v21  ;;  %v14122_v21 = vld [vmem:[%s21146_s7 + $0x94] sm:$0xf0] }
 0x282   : > { %v14121_v47 = vld [vmem:[%s21146_s7 + $0x94] sm:$0xf] }
 0x283   : > { %5279 = vmatpush.bf16.msra.mxu0 %v11792_v18  ;;  %v11841_v18 = vld [vmem:[%s21146_s7 + $0x98] sm:$0xf0] }
 0x284   : > { %4946 = vmatmul.bf16.vlgmr.msrb.gmra.mxu1 %v4732_v39  ;;  %4972 = vmatmul.bf16.vlgmr.msrb.gmra.mxu3 %v4732_v39  ;;  %v11796_v39 = vor.u32 %v14109_v5, %v11793_v19  ;;  %v11844_v19 = vor.u32 %v14121_v47, %v11841_v18  ;;  %v12047_v18 = vld [vmem:[%s21147_s17 + $0x130] sm:$0xf] }
 0x285   : > { %5288 = vmatpush.bf16.msra.mxu1 %v11888_v6  ;;  %5314 = vmatpush.bf16.msra.mxu3 %v11892_v55  ;;  %v11857_v6 = vld [vmem:[%s21146_s7 + $0xb8] sm:$0xf0]  ;;  %v14106_v55 = vld [vmem:[%s21146_s7 + $0x14] sm:$0xf0] }
 0x286   : > { %5305 = vmatpush.bf16.msra.mxu2 %v11796_v39  ;;  %v11860_v52 = vor.u32 %v14125_v59, %v11857_v6  ;;  %v11943_v39 = vld [vmem:[%s21147_s17 + $0x60] sm:$0xf]  ;;  %v12016_v59 = vor.u32 %v14038_v34, %v12015_v45  ;;  %v14070_v6 = vld [vmem:[%s21147_s17 + $0x1f4] sm:$0xf0]  ;;  %v14044_v45 = vld [vmem:[%s21147_s17 + $0x124] sm:$0xf0] }
 0x287   : > { %5280 = vmatpush.bf16.msra.mxu0 %v11784_v51  ;;  %v11833_v51 = vld [vmem:[%s21146_s7 + $0x88] sm:$0xf0] }
 0x289   : > { %5289 = vmatpush.bf16.msra.mxu1 %v11880_v23  ;;  %5315 = vmatpush.bf16.msra.mxu3 %v11884_v60  ;;  %v11767_v60 = vld [vmem:[%s21146_s7] sm:$0xf] }
 0x28a   : > { %5306 = vmatpush.bf16.msra.mxu2 %v11788_v26  ;;  %v11768_v40 = vor.u32 %v14104_v56, %v11767_v60  ;;  %v11836_v26 = vor.u32 %v14119_v24, %v11833_v51  ;;  %v11927_v56 = vld [vmem:[%s21147_s17 + $0x40] sm:$0xf]  ;;  %v14012_v24 = vld [vmem:[%s21147_s17 + $0x24] sm:$0xf0] }
 0x28b   : > { %v18281_v14 = vpop.f32.mrf.mxu0 }
 0x28d   : > { %5290 = vmatpush.bf16.msra.mxu1 %v11872_v63  ;;  %5316 = vmatpush.bf16.msra.mxu3 %v11876_v3  ;;  %v11952_v63 = vor.u32 %v14022_v12, %v11951_v7  ;;  %v11839_v3 = vld [vmem:[%s21146_s7 + $0x90] sm:$0xf]  ;;  %v14048_v7 = vld [vmem:[%s21147_s17 + $0x144] sm:$0xf0] }
 0x28e   : > { %5307 = vmatpush.bf16.msra.mxu2 %v11780_v4  ;;  %v11840_v5 = vor.u32 %v14122_v21, %v11839_v3  ;;  %v11999_v12 = vld [vmem:[%s21147_s17 + $0xd0] sm:$0xf]  ;;  %v14066_v3 = vld [vmem:[%s21147_s17 + $0x1d4] sm:$0xf0] }
 0x28f   : > { %v11919_v21 = vld [vmem:[%s21147_s17 + $0x30] sm:$0xf]  ;;  %v12128_v47 = vor.u32 %v14066_v3, %v12127_v11 }
 0x291   : > { %5317 = vmatpush.bf16.msra.mxu3 %v11868_v37  ;;  %v11831_v37 = vld [vmem:[%s21146_s7 + $0x80] sm:$0xf] }
 0x292   : > { %5308 = vmatpush.bf16.msra.mxu2 %v11772_v1  ;;  %v11832_v53 = vor.u32 %v14120_v36, %v11831_v37  ;;  %v12056_v1 = vor.u32 %v14048_v7, %v12055_v22  ;;  %v11911_v36 = vld [vmem:[%s21147_s17 + $0x20] sm:$0xf]  ;;  %v14060_v22 = vld [vmem:[%s21147_s17 + $0x1a4] sm:$0xf0] }
 0x293   : > { %v18283_v49 = vpop.f32.mrf.mxu2  ;;  %v18285_v62 = vpop.f32.mrf.mxu0  ;;  %v11912_v34 = vor.u32 %v14012_v24, %v11911_v36  ;;  %v11895_v7 = vld [vmem:[%s21147_s17] sm:$0xf] }
 0x295   : > { %5318 = vmatpush.bf16.msra.mxu3 %v11860_v52  ;;  %v11935_v52 = vld [vmem:[%s21147_s17 + $0x50] sm:$0xf] }
 0x296   : > { %5837 = vmatpush.bf16.msrb.mxu2 %v12080_v0  ;;  %v11936_v4 = vor.u32 %v14018_v28, %v11935_v52  ;;  %v12000_v0 = vor.u32 %v14034_v15, %v11999_v12  ;;  %v12111_v52 = vld [vmem:[%s21147_s17 + $0x1b0] sm:$0xf]  ;;  %v14062_v28 = vld [vmem:[%s21147_s17 + $0x1b4] sm:$0xf0]  ;;  %v12023_v12 = vld [vmem:[%s21147_s17 + $0x100] sm:$0xf] }
 0x299   : > { %5319 = vmatpush.bf16.msra.mxu3 %v11852_v58  ;;  %v14068_v58 = vld [vmem:[%s21147_s17 + $0x1e4] sm:$0xf0] }
 0x29b   : > { %v18287_v48 = vpop.f32.mrf.mxu2 }
 0x29d   : > { %5320 = vmatpush.bf16.msra.mxu3 %v11844_v19  ;;  %v14046_v19 = vld [vmem:[%s21147_s17 + $0x134] sm:$0xf0] }
 0x2a1   : > { %5321 = vmatpush.bf16.msra.mxu3 %v11836_v26  ;;  %v12039_v26 = vld [vmem:[%s21147_s17 + $0x120] sm:$0xf] }
 0x2ab   : > { %v18289_v42 = vpop.f32.mrf.mxu0 }
 0x2b3   : > { %v18291_v38 = vpop.f32.mrf.mxu2  ;;  %v4936_v41 = vpop.f32.mrf.mxu0 }
 0x2b4   : > { %v11864_v41 = vor.u32 %v14128_v25, %v11863_v20  ;;  %v14020_v20 = vld [vmem:[%s21147_s17 + $0x64] sm:$0xf0]  ;;  %v12071_v25 = vld [vmem:[%s21147_s17 + $0x160] sm:$0xf] }
 0x2b5   : > { %v12072_v50 = vor.u32 %v14052_v32, %v12071_v25  ;;  %v11991_v25 = vld [vmem:[%s21147_s17 + $0xc0] sm:$0xf] }
 0x2b6   : > { %5291 = vmatpush.bf16.msra.mxu1 %v11864_v41  ;;  %v11944_v41 = vor.u32 %v14020_v20, %v11943_v39  ;;  %v12048_v20 = vor.u32 %v14046_v19, %v12047_v18  ;;  %v12119_v32 = vld [vmem:[%s21147_s17 + $0x1c0] sm:$0xf]  ;;  %v12095_v18 = vld [vmem:[%s21147_s17 + $0x190] sm:$0xf]  ;;  %v14058_v19 = vld [vmem:[%s21147_s17 + $0x194] sm:$0xf0] }
 0x2b7   : > { %5838 = vmatpush.bf16.msrb.mxu2 %v12072_v50  ;;  %v14064_v50 = vld [vmem:[%s21147_s17 + $0x1c4] sm:$0xf0] }
 0x2ba   : > { %5292 = vmatpush.bf16.msra.mxu1 %v11856_v17  ;;  %v12143_v17 = vld [vmem:[%s21147_s17 + $0x1f0] sm:$0xf] }
 0x2bb   : > { %v4962_v43 = vpop.f32.mrf.mxu2 }
 0x2bc   : > { %v11775_v43 = vld [vmem:[%s21146_s7 + $0x10] sm:$0xf] }
 0x2bd   : > { %v11776_v61 = vor.u32 %v14106_v55, %v11775_v43  ;;  %v12144_v55 = vor.u32 %v14070_v6, %v12143_v17  ;;  %v11983_v17 = vld [vmem:[%s21147_s17 + $0xb0] sm:$0xf]  ;;  %v14030_v6 = vld [vmem:[%s21147_s17 + $0xb4] sm:$0xf0] }
 0x2be   : > { %5293 = vmatpush.bf16.msra.mxu1 %v11848_v54  ;;  %v12135_v54 = vld [vmem:[%s21147_s17 + $0x1e0] sm:$0xf] }
 0x2bf   : > { %5281 = vmatpush.bf16.msra.mxu0 %v11776_v61  ;;  %v12063_v61 = vld [vmem:[%s21147_s17 + $0x150] sm:$0xf]  ;;  %5851 = vmatpush.bf16.msrb.mxu3 %v12144_v55  ;;  %v12136_v60 = vor.u32 %v14068_v58, %v12135_v54  ;;  %v11984_v55 = vor.u32 %v14030_v6, %v11983_v17  ;;  %v14042_v54 = vld [vmem:[%s21147_s17 + $0x114] sm:$0xf0]  ;;  %v11975_v58 = vld [vmem:[%s21147_s17 + $0xa0] sm:$0xf] }
 0x2c0   : > { %v12064_v29 = vor.u32 %v14050_v2, %v12063_v61  ;;  %v12112_v61 = vor.u32 %v14062_v28, %v12111_v52  ;;  %v11903_v2 = vld [vmem:[%s21147_s17 + $0x10] sm:$0xf]  ;;  %v14086_v6 = vld [vmem:[%s21147_s17 + $0x274] sm:$0xf0]  ;;  %v14021_v52 = vld [vmem:[%s21147_s17 + $0x74] sm:$0xf] }
 0x2c1   : > { %v18449_v23 = vpop.f32.mrf.mxu1 }
 0x2c2   : > { %5294 = vmatpush.bf16.msra.mxu1 %v11840_v5  ;;  %5839 = vmatpush.bf16.msrb.mxu2 %v12064_v29  ;;  %v14014_v5 = vld [vmem:[%s21147_s17 + $0x34] sm:$0xf0]  ;;  %v12031_v29 = vld [vmem:[%s21147_s17 + $0x110] sm:$0xf] }
 0x2c3   : > { %5282 = vmatpush.bf16.msra.mxu0 %v11768_v40  ;;  %v14016_v40 = vld [vmem:[%s21147_s17 + $0x44] sm:$0xf0]  ;;  %5852 = vmatpush.bf16.msrb.mxu3 %v12136_v60  ;;  %v11920_v39 = vor.u32 %v14014_v5, %v11919_v21  ;;  %v11967_v21 = vld [vmem:[%s21147_s17 + $0x90] sm:$0xf] }
 0x2c4   : > { %v11928_v27 = vor.u32 %v14016_v40, %v11927_v56  ;;  %v14028_v60 = vld [vmem:[%s21147_s17 + $0xa4] sm:$0xf0]  ;;  %v12103_v56 = vld [vmem:[%s21147_s17 + $0x1a0] sm:$0xf] }
 0x2c5   : > { %v11976_v40 = vor.u32 %v14028_v60, %v11975_v58  ;;  %v12271_v58 = vld [vmem:[%s21147_s17 + $0x2f0] sm:$0xf] }
 0x2c6   : > { %5295 = vmatpush.bf16.msra.mxu1 %v11832_v53  ;;  %5840 = vmatpush.bf16.msrb.mxu2 %v12056_v1  ;;  %v12120_v53 = vor.u32 %v14064_v50, %v12119_v32  ;;  %v14008_v1 = vld [vmem:[%s21147_s17 + $0x4] sm:$0xf0] }
 0x2c7   : > { %5809 = vmatpush.bf16.msrb.mxu0 %v11952_v63  ;;  %v18496_v8 = vpop.f32.mrf.mxu3  ;;  %5853 = vmatpush.bf16.msrb.mxu3 %v12128_v47  ;;  %v11896_v11 = vor.u32 %v14008_v1, %v11895_v7  ;;  %v14026_v47 = vld [vmem:[%s21147_s17 + $0x94] sm:$0xf0]  ;;  %v14056_v50 = vld [vmem:[%s21147_s17 + $0x184] sm:$0xf0] }
 0x2c8   : > { %v11968_v5 = vor.u32 %v14026_v47, %v11967_v21  ;;  %v4552_v21 = vadd.f32 %v18449_v23, %v18219_v46  ;;  %v12009_v46 = vld [vmem:[%s21147_s17 + $0xe8] sm:$0xf0] }
 0x2c9   : > { %v18528_v43 = vpop.f32.mrf.mxu1 }
 0x2ca   : > { %5823 = vmatpush.bf16.msrb.mxu1 %v12016_v59  ;;  %5841 = vmatpush.bf16.msrb.mxu2 %v12048_v20  ;;  %v12040_v59 = vor.u32 %v14044_v45, %v12039_v26 }
 0x2cb   : > { %5810 = vmatpush.bf16.msrb.mxu0 %v11944_v41  ;;  %v14032_v41 = vld [vmem:[%s21147_s17 + $0xc4] sm:$0xf0]  ;;  %5854 = vmatpush.bf16.msrb.mxu3 %v12120_v53 }
 0x2cc   : > { %v11992_v37 = vor.u32 %v14032_v41, %v11991_v25  ;;  %v11959_v25 = vld [vmem:[%s21147_s17 + $0x80] sm:$0xf]  ;;  %v14024_v41 = vld [vmem:[%s21147_s17 + $0x84] sm:$0xf0] }
 0x2cd   : > { %v11960_v32 = vor.u32 %v14024_v41, %v11959_v25  ;;  %v14100_v25 = vld [vmem:[%s21147_s17 + $0x2e4] sm:$0xf0]  ;;  %v14035_v41 = vld [vmem:[%s21147_s17 + $0xe4] sm:$0xf] }
 0x2ce   : > { %5824 = vmatpush.bf16.msrb.mxu1 %v12008_v35  ;;  %5842 = vmatpush.bf16.msrb.mxu2 %v12040_v59  ;;  %v12032_v35 = vor.u32 %v14042_v54, %v12031_v29  ;;  %v12207_v59 = vld [vmem:[%s21147_s17 + $0x270] sm:$0xf]  ;;  %v14084_v29 = vld [vmem:[%s21147_s17 + $0x264] sm:$0xf0]  ;;  %v11945_v54 = vld [vmem:[%s21147_s17 + $0x68] sm:$0xf0] }
 0x2cf   : > { %5811 = vmatpush.bf16.msrb.mxu0 %v11936_v4  ;;  %v18572_v63 = vpop.f32.mrf.mxu3  ;;  %v14010_v4 = vld [vmem:[%s21147_s17 + $0x14] sm:$0xf0]  ;;  %5855 = vmatpush.bf16.msrb.mxu3 %v12112_v61  ;;  %v12208_v61 = vor.u32 %v14086_v6, %v12207_v59  ;;  %v12255_v6 = vld [vmem:[%s21147_s17 + $0x2d0] sm:$0xf] }
 0x2d0   : > { %v11904_v33 = vor.u32 %v14010_v4, %v11903_v2  ;;  %v12199_v4 = vld [vmem:[%s21147_s17 + $0x260] sm:$0xf] }
 0x2d1   : > { %v18607_v51 = vpop.f32.mrf.mxu1  ;;  %v12200_v7 = vor.u32 %v14084_v29, %v12199_v4  ;;  %v12175_v4 = vld [vmem:[%s21147_s17 + $0x230] sm:$0xf]  ;;  %v14078_v29 = vld [vmem:[%s21147_s17 + $0x234] sm:$0xf0] }
 0x2d2   : > { %5825 = vmatpush.bf16.msrb.mxu1 %v12000_v0  ;;  %5843 = vmatpush.bf16.msrb.mxu2 %v12032_v35  ;;  %v14040_v0 = vld [vmem:[%s21147_s17 + $0x104] sm:$0xf0] }
 0x2d3   : > { %5812 = vmatpush.bf16.msrb.mxu0 %v11928_v27  ;;  %v12104_v27 = vor.u32 %v14060_v22, %v12103_v56  ;;  %v12024_v3 = vor.u32 %v14040_v0, %v12023_v12  ;;  %v14102_v56 = vld [vmem:[%s21147_s17 + $0x2f4] sm:$0xf0]  ;;  %v12017_v22 = vld [vmem:[%s21147_s17 + $0xf8] sm:$0xf0]  ;;  %v14017_v0 = vld [vmem:[%s21147_s17 + $0x54] sm:$0xf] }
 0x2d4   : > { %v14082_v12 = vld [vmem:[%s21147_s17 + $0x254] sm:$0xf0]  ;;  %v12272_v47 = vor.u32 %v14102_v56, %v12271_v58  ;;  %v4580_v56 = vadd.f32 %v18496_v8, %v18242_v44  ;;  %v12167_v44 = vld [vmem:[%s21147_s17 + $0x220] sm:$0xf] }
 0x2d5   : > { %5856 = vmatpush.bf16.msrb.mxu3 %v12104_v27 }
 0x2d6   : > { %5826 = vmatpush.bf16.msrb.mxu1 %v11992_v37  ;;  %5844 = vmatpush.bf16.msrb.mxu2 %v12024_v3  ;;  %v12087_v37 = vld [vmem:[%s21147_s17 + $0x180] sm:$0xf]  ;;  %v11937_v3 = vld [vmem:[%s21147_s17 + $0x58] sm:$0xf0] }
 0x2d7   : > { %5813 = vmatpush.bf16.msrb.mxu0 %v11920_v39  ;;  %v18636_v31 = vpop.f32.mrf.mxu3  ;;  %v12096_v39 = vor.u32 %v14058_v19, %v12095_v18  ;;  %v12088_v36 = vor.u32 %v14056_v50, %v12087_v37  ;;  %v12263_v18 = vld [vmem:[%s21147_s17 + $0x2e0] sm:$0xf]  ;;  %v4554_v19 = vadd.f32 %v18528_v43, %v18256_v16  ;;  %v11940_v16 = vor.u32 %v14017_v0, %v11937_v3  ;;  %v14080_v37 = vld [vmem:[%s21147_s17 + $0x244] sm:$0xf0]  ;;  %v14015_v50 = vld [vmem:[%s21147_s17 + $0x44] sm:$0xf] }
 0x2d8   : > { %v12183_v43 = vld [vmem:[%s21147_s17 + $0x240] sm:$0xf]  ;;  %v12264_v59 = vor.u32 %v14100_v25, %v12263_v18  ;;  %v11985_v18 = vld [vmem:[%s21147_s17 + $0xb8] sm:$0xf0] }
 0x2d9   : > { %v18662_v15 = vpop.f32.mrf.mxu1  ;;  %5857 = vmatpush.bf16.msrb.mxu3 %v12096_v39 }
 0x2da   : > { %5827 = vmatpush.bf16.msrb.mxu1 %v11984_v55  ;;  %v11953_v55 = vld [vmem:[%s21147_s17 + $0x78] sm:$0xf0]  ;;  %v4610_v23 = vadd.f32 %v18662_v15, %v18277_v10  ;;  %v11929_v10 = vld [vmem:[%s21147_s17 + $0x48] sm:$0xf0]  ;;  %v4696_v15 = vmax.f32 %v4552_v21, 0.0 }
 0x2db   : > { %5814 = vmatpush.bf16.msrb.mxu0 %v11912_v34  ;;  %v11956_v2 = vor.u32 %v14021_v52, %v11953_v55  ;;  %v14098_v52 = vld [vmem:[%s21147_s17 + $0x2d4] sm:$0xf0]  ;;  %v14033_v55 = vld [vmem:[%s21147_s17 + $0xd4] sm:$0xf]  ;;  %v12239_v21 = vld [vmem:[%s21147_s17 + $0x2b0] sm:$0xf] }
 0x2dd   : > { %5858 = vmatpush.bf16.msrb.mxu3 %v12088_v36  ;;  %v4608_v36 = vadd.f32 %v18607_v51, %v18273_v30  ;;  %v12001_v30 = vld [vmem:[%s21147_s17 + $0xd8] sm:$0xf0]  ;;  %v4702_v51 = vmax.f32 %v4554_v19, 0.0  ;;  %v4697_v19 = vmax.f32 %v4580_v56, 0.0 }
 0x2de   : > { %5828 = vmatpush.bf16.msrb.mxu1 %v11976_v40  ;;  %v14037_v40 = vld [vmem:[%s21147_s17 + $0xf4] sm:$0xf] }
 0x2df   : > { %5815 = vmatpush.bf16.msrb.mxu0 %v11904_v33  ;;  %v18679_v20 = vpop.f32.mrf.mxu3  ;;  %v14019_v33 = vld [vmem:[%s21147_s17 + $0x64] sm:$0xf]  ;;  %v18830_v8 = vpack.c.bf16 %v4702_v51, %v4696_v15  ;;  %v12081_v51 = vld [vmem:[%s21147_s17 + $0x178] sm:$0xf0] }
 0x2e0   : > { %v11948_v1 = vor.u32 %v14019_v33, %v11945_v54  ;;  %v14013_v33 = vld [vmem:[%s21147_s17 + $0x34] sm:$0xf]  ;;  %v11921_v54 = vld [vmem:[%s21147_s17 + $0x38] sm:$0xf0]  ;;  %v4638_v58 = vadd.f32 %v18679_v20, %v18279_v13  ;;  %v11993_v13 = vld [vmem:[%s21147_s17 + $0xc8] sm:$0xf0]  ;;  %v4636_v20 = vadd.f32 %v18636_v31, %v18275_v57 }
 0x2e1   : > { %v18693_v24 = vpop.f32.mrf.mxu1  ;;  %v14011_v57 = vld [vmem:[%s21147_s17 + $0x24] sm:$0xf]  ;;  %v11913_v31 = vld [vmem:[%s21147_s17 + $0x28] sm:$0xf0] }
 0x2e2   : > { %5829 = vmatpush.bf16.msrb.mxu1 %v11968_v5  ;;  %v12020_v5 = vor.u32 %v14037_v40, %v12017_v22  ;;  %v14096_v40 = vld [vmem:[%s21147_s17 + $0x2c4] sm:$0xf0]  ;;  %v14031_v22 = vld [vmem:[%s21147_s17 + $0xc4] sm:$0xf] }
 0x2e3   : > { %5816 = vmatpush.bf16.msrb.mxu0 %v11896_v11  ;;  %v11996_v3 = vor.u32 %v14031_v22, %v11993_v13  ;;  %v12073_v22 = vld [vmem:[%s21147_s17 + $0x168] sm:$0xf0]  ;;  %v14083_v13 = vld [vmem:[%s21147_s17 + $0x264] sm:$0xf] }
 0x2e6   : > { %5830 = vmatpush.bf16.msrb.mxu1 %v11960_v32 }
 0x2e7   : > { %v18695_v53 = vpop.f32.mrf.mxu3 }
 0x2e9   : > { %v18697_v26 = vpop.f32.mrf.mxu1 }
 0x2ef   : > { %v18699_v45 = vpop.f32.mrf.mxu3 }
 0x301   : > { %v4947_v34 = vpop.f32.mrf.mxu1 }
 0x302   : > { %v4948_v17 = vadd.f32 %v4947_v34, %v18289_v42 }
 0x304   : > { %v4977_v28 = vmax.f32 %v4948_v17, 0.0  ;;  %v12012_v17 = vor.u32 %v14035_v41, %v12009_v46  ;;  %v11916_v41 = vor.u32 %v14011_v57, %v11913_v31  ;;  %v12159_v46 = vld [vmem:[%s21147_s17 + $0x210] sm:$0xf]  ;;  %v4694_v57 = vadd.f32 %v18699_v45, %v18287_v48  ;;  %v14023_v31 = vld [vmem:[%s21147_s17 + $0x84] sm:$0xf] }
 0x305   : > { %v12145_v48 = vld [vmem:[%s21147_s17 + $0x1f8] sm:$0xf0]  ;;  %v14101_v45 = vld [vmem:[%s21147_s17 + $0x2f4] sm:$0xf] }
 0x306   : > { %v5081_v42 = vpack.c.bf16 %v4977_v28, %v4977_v28  ;;  %v4704_v28 = vmax.f32 %v4610_v23, 0.0  ;;  %v14074_v23 = vld [vmem:[%s21147_s17 + $0x214] sm:$0xf0] }
 0x307   : > { %v4973_v35 = vpop.f32.mrf.mxu3 }
 0x308   : > { %v4974_v60 = vadd.f32 %v4973_v35, %v18291_v38  ;;  %5283 = vmatmul.bf16.vlgmr.msra.gmra.mxu0 %v5081_v42  ;;  %5309 = vmatmul.bf16.vlgmr.msra.gmra.mxu2 %v5081_v42  ;;  %v12191_v38 = vld [vmem:[%s21147_s17 + $0x250] sm:$0xf]  ;;  %v4582_v42 = vadd.f32 %v18572_v63, %v18271_v9  ;;  %v4698_v35 = vmax.f32 %v4608_v36, 0.0  ;;  %v12004_v9 = vor.u32 %v14033_v55, %v12001_v30  ;;  %v12247_v63 = vld [vmem:[%s21147_s17 + $0x2c0] sm:$0xf] }
 0x309   : > { %5865 = vmatpush.bf16.msra.mxu0 %v12208_v61  ;;  %5893 = vmatpush.bf16.msra.mxu2 %v11956_v2  ;;  %v4949_v27 = vpop.f32.mrf.mxu1  ;;  %v12192_v32 = vor.u32 %v14082_v12, %v12191_v38  ;;  %v12184_v61 = vor.u32 %v14080_v37, %v12183_v43  ;;  %v11932_v2 = vor.u32 %v14015_v50, %v11929_v10  ;;  %v14076_v38 = vld [vmem:[%s21147_s17 + $0x224] sm:$0xf0]  ;;  %v12231_v50 = vld [vmem:[%s21147_s17 + $0x2a0] sm:$0xf]  ;;  %v14007_v30 = vld [vmem:[%s21147_s17 + $0x4] sm:$0xf] }
 0x30a   : > { %v4978_v11 = vmax.f32 %v4974_v60, 0.0  ;;  %v12256_v60 = vor.u32 %v14098_v52, %v12255_v6  ;;  %v12176_v27 = vor.u32 %v14078_v29, %v12175_v4  ;;  %v4703_v12 = vmax.f32 %v4582_v42, 0.0  ;;  %v12209_v4 = vld [vmem:[%s21147_s17 + $0x278] sm:$0xf0]  ;;  %v12223_v42 = vld [vmem:[%s21147_s17 + $0x290] sm:$0xf] }
 0x30b   : > { %v12248_v0 = vor.u32 %v14096_v40, %v12247_v63  ;;  %v12168_v25 = vor.u32 %v14076_v38, %v12167_v44  ;;  %v4664_v36 = vadd.f32 %v18693_v24, %v18281_v14  ;;  %v4666_v6 = vadd.f32 %v18697_v26, %v18285_v62  ;;  %v12151_v14 = vld [vmem:[%s21147_s17 + $0x200] sm:$0xf]  ;;  %v14072_v24 = vld [vmem:[%s21147_s17 + $0x204] sm:$0xf0]  ;;  %v11897_v62 = vld [vmem:[%s21147_s17 + $0x8] sm:$0xf0] }
 0x30c   : > { %v5082_v39 = vpack.c.bf16 %v4978_v11, %v4978_v11  ;;  %v4705_v11 = vmax.f32 %v4638_v58, 0.0  ;;  %v18872_v10 = vpack.c.bf16 %v4703_v12, %v4697_v19  ;;  %v12160_v52 = vor.u32 %v14074_v23, %v12159_v46  ;;  %v14053_v26 = vld [vmem:[%s21147_s17 + $0x174] sm:$0xf]  ;;  %v14090_v29 = vld [vmem:[%s21147_s17 + $0x294] sm:$0xf0] }
 0x30d   : > { %5866 = vmatpush.bf16.msra.mxu0 %v12200_v7  ;;  %5894 = vmatpush.bf16.msra.mxu2 %v11948_v1  ;;  %v11924_v7 = vor.u32 %v14013_v33, %v11921_v54  ;;  %v18832_v1 = vpack.c.bf16 %v4704_v28, %v4698_v35  ;;  %v14025_v33 = vld [vmem:[%s21147_s17 + $0x94] sm:$0xf]  ;;  %v11969_v54 = vld [vmem:[%s21147_s17 + $0x98] sm:$0xf0]  ;;  %v4700_v35 = vmax.f32 %v4664_v36, 0.0  ;;  %v4706_v58 = vmax.f32 %v4666_v6, 0.0 }
 0x30e   : > { %5296 = vmatmul.bf16.vlgmr.msra.gmra.mxu1 %v5082_v39  ;;  %5322 = vmatmul.bf16.vlgmr.msra.gmra.mxu3 %v5082_v39  ;;  %v4699_v39 = vmax.f32 %v4636_v20, 0.0  ;;  %v12084_v63 = vor.u32 %v14053_v26, %v12081_v51  ;;  %v14051_v40 = vld [vmem:[%s21147_s17 + $0x164] sm:$0xf]  ;;  %v12224_v20 = vor.u32 %v14090_v29, %v12223_v42  ;;  %v12215_v44 = vld [vmem:[%s21147_s17 + $0x280] sm:$0xf] }
 0x30f   : > { %5879 = vmatpush.bf16.msra.mxu1 %v12272_v47  ;;  %5907 = vmatpush.bf16.msra.mxu3 %v12020_v5  ;;  %v4975_v34 = vpop.f32.mrf.mxu3  ;;  %v14094_v47 = vld [vmem:[%s21147_s17 + $0x2b4] sm:$0xf0]  ;;  %v14029_v5 = vld [vmem:[%s21147_s17 + $0xb4] sm:$0xf]  ;;  %v14088_v38 = vld [vmem:[%s21147_s17 + $0x284] sm:$0xf0] }
 0x310   : > { %v12240_v43 = vor.u32 %v14094_v47, %v12239_v21  ;;  %v11988_v37 = vor.u32 %v14029_v5, %v11985_v18  ;;  %v18874_v15 = vpack.c.bf16 %v4705_v11, %v4699_v39  ;;  %v14092_v34 = vld [vmem:[%s21147_s17 + $0x2a4] sm:$0xf0]  ;;  %v11961_v12 = vld [vmem:[%s21147_s17 + $0x88] sm:$0xf0]  ;;  %v14069_v11 = vld [vmem:[%s21147_s17 + $0x1f4] sm:$0xf]  ;;  %v18967_v21 = vpack.c.bf16 %v4706_v58, %v4700_v35 }
 0x311   : > { %5867 = vmatpush.bf16.msra.mxu0 %v12192_v32  ;;  %5895 = vmatpush.bf16.msra.mxu2 %v11940_v16  ;;  %v14009_v32 = vld [vmem:[%s21147_s17 + $0x14] sm:$0xf]  ;;  %v11905_v16 = vld [vmem:[%s21147_s17 + $0x18] sm:$0xf0]  ;;  %v12232_v28 = vor.u32 %v14092_v34, %v12231_v50  ;;  %v12076_v47 = vor.u32 %v14051_v40, %v12073_v22  ;;  %v12216_v5 = vor.u32 %v14088_v38, %v12215_v44  ;;  %v14047_v34 = vld [vmem:[%s21147_s17 + $0x144] sm:$0xf] }
 0x312   : > { %v11908_v55 = vor.u32 %v14009_v32, %v11905_v16  ;;  %v11964_v18 = vor.u32 %v14023_v31, %v11961_v12  ;;  %v12065_v19 = vld [vmem:[%s21147_s17 + $0x158] sm:$0xf0]  ;;  %v14081_v39 = vld [vmem:[%s21147_s17 + $0x254] sm:$0xf]  ;;  %v12148_v46 = vor.u32 %v14069_v11, %v12145_v48  ;;  %v14067_v32 = vld [vmem:[%s21147_s17 + $0x1e4] sm:$0xf] }
 0x313   : > { %5880 = vmatpush.bf16.msra.mxu1 %v12264_v59  ;;  %5908 = vmatpush.bf16.msra.mxu3 %v12012_v17  ;;  %v14027_v59 = vld [vmem:[%s21147_s17 + $0xa4] sm:$0xf]  ;;  %v11977_v17 = vld [vmem:[%s21147_s17 + $0xa8] sm:$0xf0]  ;;  %v12257_v26 = vld [vmem:[%s21147_s17 + $0x2d8] sm:$0xf0] }
 0x314   : > { %v12137_v16 = vld [vmem:[%s21147_s17 + $0x1e8] sm:$0xf0]  ;;  %v12177_v42 = vld [vmem:[%s21147_s17 + $0x238] sm:$0xf0]  ;;  %v14095_v35 = vld [vmem:[%s21147_s17 + $0x2c4] sm:$0xf] }
 0x315   : > { %5868 = vmatpush.bf16.msra.mxu0 %v12184_v61  ;;  %5896 = vmatpush.bf16.msra.mxu2 %v11932_v2  ;;  %v11980_v61 = vor.u32 %v14027_v59, %v11977_v17  ;;  %v14085_v2 = vld [vmem:[%s21147_s17 + $0x274] sm:$0xf]  ;;  %v12057_v59 = vld [vmem:[%s21147_s17 + $0x148] sm:$0xf0]  ;;  %v14079_v17 = vld [vmem:[%s21147_s17 + $0x244] sm:$0xf] }
 0x316   : > { %v12212_v56 = vor.u32 %v14085_v2, %v12209_v4  ;;  %v12185_v6 = vld [vmem:[%s21147_s17 + $0x248] sm:$0xf0]  ;;  %v12060_v51 = vor.u32 %v14047_v34, %v12057_v59  ;;  %v12049_v2 = vld [vmem:[%s21147_s17 + $0x138] sm:$0xf0]  ;;  %v14077_v4 = vld [vmem:[%s21147_s17 + $0x234] sm:$0xf] }
 0x317   : > { %5881 = vmatpush.bf16.msra.mxu1 %v12256_v60  ;;  %5909 = vmatpush.bf16.msra.mxu3 %v12004_v9  ;;  %v12152_v60 = vor.u32 %v14072_v24, %v12151_v14  ;;  %v11900_v9 = vor.u32 %v14007_v30, %v11897_v62  ;;  %v14065_v14 = vld [vmem:[%s21147_s17 + $0x1d4] sm:$0xf]  ;;  %v12129_v30 = vld [vmem:[%s21147_s17 + $0x1d8] sm:$0xf0]  ;;  %v12249_v58 = vld [vmem:[%s21147_s17 + $0x2c8] sm:$0xf0] }
 0x318   : > { %5817 = vmatmul.bf16.vlgmr.msrb.gmra.mxu0 %v18830_v8  ;;  %5845 = vmatmul.bf16.vlgmr.msrb.gmra.mxu2 %v18832_v1  ;;  %v14097_v62 = vld [vmem:[%s21147_s17 + $0x2d4] sm:$0xf]  ;;  %v12132_v29 = vor.u32 %v14065_v14, %v12129_v30  ;;  %v14075_v40 = vld [vmem:[%s21147_s17 + $0x224] sm:$0xf]  ;;  %v12169_v22 = vld [vmem:[%s21147_s17 + $0x228] sm:$0xf0] }
 0x319   : > { %5869 = vmatpush.bf16.msra.mxu0 %v12176_v27  ;;  %5897 = vmatpush.bf16.msra.mxu2 %v11924_v7  ;;  %v11972_v27 = vor.u32 %v14025_v33, %v11969_v54  ;;  %v12201_v7 = vld [vmem:[%s21147_s17 + $0x268] sm:$0xf0]  ;;  %v12260_v33 = vor.u32 %v14097_v62, %v12257_v26  ;;  %v14093_v44 = vld [vmem:[%s21147_s17 + $0x2b4] sm:$0xf]  ;;  %v12241_v38 = vld [vmem:[%s21147_s17 + $0x2b8] sm:$0xf0]  ;;  %v12172_v31 = vor.u32 %v14075_v40, %v12169_v22 }
 0x31a   : > { %v12121_v54 = vld [vmem:[%s21147_s17 + $0x1c8] sm:$0xf0]  ;;  %v14041_v12 = vld [vmem:[%s21147_s17 + $0x114] sm:$0xf]  ;;  %v12033_v11 = vld [vmem:[%s21147_s17 + $0x118] sm:$0xf0] }
 0x31b   : > { %5882 = vmatpush.bf16.msra.mxu1 %v12248_v0  ;;  %5910 = vmatpush.bf16.msra.mxu3 %v11996_v3  ;;  %v4692_v0 = vadd.f32 %v18695_v53, %v18283_v49  ;;  %v12273_v3 = vld [vmem:[%s21147_s17 + $0x2f8] sm:$0xf0]  ;;  %v12204_v49 = vor.u32 %v14083_v13, %v12201_v7  ;;  %v14049_v53 = vld [vmem:[%s21147_s17 + $0x154] sm:$0xf]  ;;  %v12495_v30 = vld [vmem:[%s21148_s29 + $0x1b0] sm:$0xf] }
 0x31c   : > { %v12276_v23 = vor.u32 %v14101_v45, %v12273_v3  ;;  %v12113_v7 = vld [vmem:[%s21147_s17 + $0x1b8] sm:$0xf0]  ;;  %v12244_v3 = vor.u32 %v14093_v44, %v12241_v38  ;;  %v14089_v34 = vld [vmem:[%s21147_s17 + $0x294] sm:$0xf]  ;;  %v12425_v40 = vld [vmem:[%s21148_s29 + $0x144] sm:$0xf0] }
 0x31d   : > { %5870 = vmatpush.bf16.msra.mxu0 %v12168_v25  ;;  %5898 = vmatpush.bf16.msra.mxu2 %v11916_v41  ;;  %v12193_v25 = vld [vmem:[%s21147_s17 + $0x258] sm:$0xf0]  ;;  %v4707_v41 = vmax.f32 %v4694_v57, 0.0  ;;  %v4701_v50 = vmax.f32 %v4692_v0, 0.0  ;;  %v14073_v0 = vld [vmem:[%s21147_s17 + $0x214] sm:$0xf] }
 0x31e   : > { %5831 = vmatmul.bf16.vlgmr.msrb.gmra.mxu1 %v18872_v10  ;;  %5859 = vmatmul.bf16.vlgmr.msrb.gmra.mxu3 %v18874_v15  ;;  %v12196_v36 = vor.u32 %v14081_v39, %v12193_v25  ;;  %v12161_v48 = vld [vmem:[%s21147_s17 + $0x218] sm:$0xf0]  ;;  %v14039_v39 = vld [vmem:[%s21147_s17 + $0x104] sm:$0xf]  ;;  %v12025_v25 = vld [vmem:[%s21147_s17 + $0x108] sm:$0xf0] }
 0x31f   : > { %5883 = vmatpush.bf16.msra.mxu1 %v12240_v43  ;;  %5911 = vmatpush.bf16.msra.mxu3 %v11988_v37  ;;  %v14099_v43 = vld [vmem:[%s21147_s17 + $0x2e4] sm:$0xf]  ;;  %v12265_v37 = vld [vmem:[%s21147_s17 + $0x2e8] sm:$0xf0]  ;;  %v19010_v24 = vpack.c.bf16 %v4707_v41, %v4701_v50  ;;  %v14198_v50 = vld [vmem:[%s21148_s29 + $0x1fc] sm:$0xf] }
 0x320   : > { %v14071_v41 = vld [vmem:[%s21147_s17 + $0x204] sm:$0xf]  ;;  %v12225_v59 = vld [vmem:[%s21147_s17 + $0x298] sm:$0xf0]  ;;  %v12389_v44 = vld [vmem:[%s21148_s29 + $0xfc] sm:$0xf0] }
 0x321   : > { %5871 = vmatpush.bf16.msra.mxu0 %v12160_v52  ;;  %5899 = vmatpush.bf16.msra.mxu2 %v11908_v55  ;;  %v12140_v52 = vor.u32 %v14067_v32, %v12137_v16  ;;  %v12268_v55 = vor.u32 %v14099_v43, %v12265_v37  ;;  %v12531_v32 = vld [vmem:[%s21148_s29 + $0x1f8] sm:$0xf]  ;;  %v14202_v37 = vld [vmem:[%s21148_s29 + $0x218] sm:$0xf0]  ;;  %v12228_v26 = vor.u32 %v14089_v34, %v12225_v59 }
 0x322   : > { %v14190_v34 = vld [vmem:[%s21148_s29 + $0x1bc] sm:$0xf] }
 0x323   : > { %5884 = vmatpush.bf16.msra.mxu1 %v12232_v28  ;;  %5912 = vmatpush.bf16.msra.mxu3 %v11980_v61  ;;  %v12188_v28 = vor.u32 %v14079_v17, %v12185_v6  ;;  %v14045_v61 = vld [vmem:[%s21147_s17 + $0x134] sm:$0xf]  ;;  %v12028_v17 = vor.u32 %v14039_v39, %v12025_v25  ;;  %v14135_v39 = vld [vmem:[%s21148_s29 + $0x4] sm:$0xf] }
 0x325   : > { %5872 = vmatpush.bf16.msra.mxu0 %v12152_v60  ;;  %5900 = vmatpush.bf16.msra.mxu2 %v11900_v9  ;;  %v12052_v60 = vor.u32 %v14045_v61, %v12049_v2  ;;  %v12180_v9 = vor.u32 %v14077_v4, %v12177_v42  ;;  %v12497_v61 = vld [vmem:[%s21148_s29 + $0x1d4] sm:$0xf0]  ;;  %v12089_v2 = vld [vmem:[%s21147_s17 + $0x188] sm:$0xf0]  ;;  %v14087_v4 = vld [vmem:[%s21147_s17 + $0x284] sm:$0xf] }
 0x326   : > { %v12217_v42 = vld [vmem:[%s21147_s17 + $0x288] sm:$0xf0] }
 0x327   : > { %5885 = vmatpush.bf16.msra.mxu1 %v12224_v20  ;;  %5913 = vmatpush.bf16.msra.mxu3 %v11972_v27  ;;  %v12252_v20 = vor.u32 %v14095_v35, %v12249_v58  ;;  %v14061_v27 = vld [vmem:[%s21147_s17 + $0x1b4] sm:$0xf]  ;;  %v12459_v35 = vld [vmem:[%s21148_s29 + $0x168] sm:$0xf]  ;;  %v14184_v58 = vld [vmem:[%s21148_s29 + $0x188] sm:$0xf0] }
 0x328   : > { %5873 = vmatmul.bf16.vlgmr.msra.gmra.mxu0 %v18967_v21  ;;  %5901 = vmatmul.bf16.vlgmr.msra.gmra.mxu2 %v18830_v8  ;;  %v12068_v8 = vor.u32 %v14049_v53, %v12065_v19  ;;  %v12116_v45 = vor.u32 %v14061_v27, %v12113_v7  ;;  %v14091_v53 = vld [vmem:[%s21147_s17 + $0x2a4] sm:$0xf]  ;;  %v12164_v19 = vor.u32 %v14073_v0, %v12161_v48  ;;  %v14162_v27 = vld [vmem:[%s21148_s29 + $0xdc] sm:$0xf]  ;;  %v12353_v0 = vld [vmem:[%s21148_s29 + $0xb4] sm:$0xf0] }
 0x329   : > { %5921 = vmatpush.bf16.msrb.mxu0 %v12084_v63  ;;  %5949 = vmatpush.bf16.msrb.mxu2 %v12212_v56  ;;  %v14043_v63 = vld [vmem:[%s21147_s17 + $0x124] sm:$0xf]  ;;  %v12041_v56 = vld [vmem:[%s21147_s17 + $0x128] sm:$0xf0]  ;;  %v12392_v38 = vor.u32 %v14162_v27, %v12389_v44 }
 0x32a   : > { %v12044_v57 = vor.u32 %v14043_v63, %v12041_v56  ;;  %v14171_v63 = vld [vmem:[%s21148_s29 + $0x124] sm:$0xf] }
 0x32b   : > { %5886 = vmatpush.bf16.msra.mxu1 %v12216_v5  ;;  %5914 = vmatpush.bf16.msra.mxu3 %v11964_v18  ;;  %v12233_v5 = vld [vmem:[%s21147_s17 + $0x2a8] sm:$0xf0]  ;;  %v12036_v18 = vor.u32 %v14041_v12, %v12033_v11  ;;  %v12428_v22 = vor.u32 %v14171_v63, %v12425_v40  ;;  %v14153_v12 = vld [vmem:[%s21148_s29 + $0x94] sm:$0xf]  ;;  %v12747_v63 = vld [vmem:[%s21148_s29 + $0x3a8] sm:$0xf] }
 0x32c   : > { %v12236_v43 = vor.u32 %v14091_v53, %v12233_v5  ;;  %v12356_v48 = vor.u32 %v14153_v12, %v12353_v0  ;;  %v12317_v53 = vld [vmem:[%s21148_s29 + $0x6c] sm:$0xf0]  ;;  %v12711_v0 = vld [vmem:[%s21148_s29 + $0x360] sm:$0xf] }
 0x32d   : > { %5922 = vmatpush.bf16.msrb.mxu0 %v12076_v47  ;;  %5950 = vmatpush.bf16.msrb.mxu2 %v12204_v49  ;;  %v14059_v47 = vld [vmem:[%s21147_s17 + $0x1a4] sm:$0xf]  ;;  %v12105_v49 = vld [vmem:[%s21147_s17 + $0x1a8] sm:$0xf0] }
 0x32e   : > { %5887 = vmatmul.bf16.vlgmr.msra.gmra.mxu1 %v19010_v24  ;;  %5915 = vmatmul.bf16.vlgmr.msra.gmra.mxu3 %v18872_v10  ;;  %v14063_v10 = vld [vmem:[%s21147_s17 + $0x1c4] sm:$0xf]  ;;  %v12108_v16 = vor.u32 %v14059_v47, %v12105_v49  ;;  %v14144_v47 = vld [vmem:[%s21148_s29 + $0x4c] sm:$0xf] }
 0x32f   : > { %5935 = vmatpush.bf16.msrb.mxu1 %v12148_v46  ;;  %5963 = vmatpush.bf16.msrb.mxu3 %v12276_v23  ;;  %v12124_v13 = vor.u32 %v14063_v10, %v12121_v54  ;;  %v12153_v46 = vld [vmem:[%s21147_s17 + $0x208] sm:$0xf0]  ;;  %v14057_v23 = vld [vmem:[%s21147_s17 + $0x194] sm:$0xf]  ;;  %v12220_v54 = vor.u32 %v14087_v4, %v12217_v42  ;;  %v12320_v5 = vor.u32 %v14144_v47, %v12317_v53  ;;  %v12469_v4 = vld [vmem:[%s21148_s29 + $0x194] sm:$0xf0] }
 0x330   : > { %v12156_v6 = vor.u32 %v14071_v41, %v12153_v46  ;;  %v12281_v41 = vld [vmem:[%s21148_s29 + $0x24] sm:$0xf0]  ;;  %v12539_v46 = vld [vmem:[%s21148_s29 + $0x200] sm:$0xf]  ;;  %v12783_v42 = vld [vmem:[%s21148_s29 + $0x3f0] sm:$0xf] }
 0x331   : > { %5923 = vmatpush.bf16.msrb.mxu0 %v12068_v8  ;;  %5951 = vmatpush.bf16.msrb.mxu2 %v12196_v36  ;;  %v12533_v8 = vld [vmem:[%s21148_s29 + $0x21c] sm:$0xf0]  ;;  %v12097_v36 = vld [vmem:[%s21147_s17 + $0x198] sm:$0xf0]  ;;  %v12713_v53 = vld [vmem:[%s21148_s29 + $0x384] sm:$0xf0] }
 0x332   : > { %v12536_v14 = vor.u32 %v14198_v50, %v12533_v8  ;;  %v12100_v62 = vor.u32 %v14057_v23, %v12097_v36  ;;  %v14203_v23 = vld [vmem:[%s21148_s29 + $0x220] sm:$0xf0]  ;;  %v12503_v8 = vld [vmem:[%s21148_s29 + $0x1b8] sm:$0xf]  ;;  %v14194_v36 = vld [vmem:[%s21148_s29 + $0x1d8] sm:$0xf0] }
 0x333   : > { %5936 = vmatpush.bf16.msrb.mxu1 %v12140_v52  ;;  %5964 = vmatpush.bf16.msrb.mxu3 %v12268_v55  ;;  %v14055_v52 = vld [vmem:[%s21147_s17 + $0x184] sm:$0xf]  ;;  %v12532_v55 = vor.u32 %v14202_v37, %v12531_v32  ;;  %v12284_v32 = vor.u32 %v14135_v39, %v12281_v41  ;;  %v12541_v37 = vld [vmem:[%s21148_s29 + $0x224] sm:$0xf0]  ;;  %v12504_v59 = vor.u32 %v14194_v36, %v12503_v8  ;;  %v14154_v39 = vld [vmem:[%s21148_s29 + $0x9c] sm:$0xf] }
 0x334   : > { %v12092_v10 = vor.u32 %v14055_v52, %v12089_v2  ;;  %v14274_v52 = vld [vmem:[%s21148_s29 + $0x458] sm:$0xf0]  ;;  %v12361_v41 = vld [vmem:[%s21148_s29 + $0xbc] sm:$0xf0] }
 0x335   : > { %5924 = vmatpush.bf16.msrb.mxu0 %v12060_v51  ;;  %5952 = vmatpush.bf16.msrb.mxu2 %v12188_v28  ;;  %v14193_v51 = vld [vmem:[%s21148_s29 + $0x1d0] sm:$0xf0] }
 0x336   : > { %v14189_v28 = vld [vmem:[%s21148_s29 + $0x1b4] sm:$0xf] }
 0x337   : > { %5937 = vmatpush.bf16.msrb.mxu1 %v12132_v29  ;;  %5965 = vmatpush.bf16.msrb.mxu3 %v12260_v33  ;;  %v12496_v29 = vor.u32 %v14193_v51, %v12495_v30  ;;  %v12500_v33 = vor.u32 %v14189_v28, %v12497_v61  ;;  %v14270_v30 = vld [vmem:[%s21148_s29 + $0x43c] sm:$0xf]  ;;  %v12467_v51 = vld [vmem:[%s21148_s29 + $0x170] sm:$0xf]  ;;  %v14185_v28 = vld [vmem:[%s21148_s29 + $0x190] sm:$0xf0] }
 0x338   : > { %v14181_v61 = vld [vmem:[%s21148_s29 + $0x174] sm:$0xf]  ;;  %v12468_v2 = vor.u32 %v14185_v28, %v12467_v51  ;;  %v12641_v28 = vld [vmem:[%s21148_s29 + $0x2f4] sm:$0xf0] }
 0x339   : > { %5925 = vmatpush.bf16.msrb.mxu0 %v12052_v60  ;;  %5953 = vmatpush.bf16.msrb.mxu2 %v12180_v9  ;;  %v12461_v60 = vld [vmem:[%s21148_s29 + $0x18c] sm:$0xf0]  ;;  %v14175_v9 = vld [vmem:[%s21148_s29 + $0x140] sm:$0xf0]  ;;  %v14225_v51 = vld [vmem:[%s21148_s29 + $0x2d4] sm:$0xf] }
 0x33b   : > { %5938 = vmatpush.bf16.msrb.mxu1 %v12124_v13  ;;  %5966 = vmatpush.bf16.msrb.mxu3 %v12252_v20  ;;  %v12387_v13 = vld [vmem:[%s21148_s29 + $0xd8] sm:$0xf]  ;;  %v14166_v20 = vld [vmem:[%s21148_s29 + $0xf8] sm:$0xf0] }
 0x33c   : > { %v12388_v7 = vor.u32 %v14166_v20, %v12387_v13  ;;  %v14252_v13 = vld [vmem:[%s21148_s29 + $0x3ac] sm:$0xf]  ;;  %v12749_v20 = vld [vmem:[%s21148_s29 + $0x3cc] sm:$0xf0] }
 0x33d   : > { %5926 = vmatpush.bf16.msrb.mxu0 %v12044_v57  ;;  %5954 = vmatpush.bf16.msrb.mxu2 %v12172_v31  ;;  %v12351_v57 = vld [vmem:[%s21148_s29 + $0x90] sm:$0xf]  ;;  %v14157_v31 = vld [vmem:[%s21148_s29 + $0xb0] sm:$0xf0]  ;;  %v12752_v27 = vor.u32 %v14252_v13, %v12749_v20 }
 0x33e   : > { %v12352_v11 = vor.u32 %v14157_v31, %v12351_v57  ;;  %v14167_v57 = vld [vmem:[%s21148_s29 + $0x100] sm:$0xf0] }
 0x33f   : > { %5939 = vmatpush.bf16.msrb.mxu1 %v12116_v45  ;;  %5967 = vmatpush.bf16.msrb.mxu3 %v12244_v3  ;;  %v12315_v45 = vld [vmem:[%s21148_s29 + $0x48] sm:$0xf]  ;;  %v14148_v3 = vld [vmem:[%s21148_s29 + $0x68] sm:$0xf0]  ;;  %v14163_v31 = vld [vmem:[%s21148_s29 + $0xe4] sm:$0xf] }
 0x340   : > { %v12316_v49 = vor.u32 %v14148_v3, %v12315_v45 }
 0x341   : > { %5927 = vmatpush.bf16.msrb.mxu0 %v12036_v18  ;;  %5955 = vmatpush.bf16.msrb.mxu2 %v12164_v19  ;;  %v12279_v18 = vld [vmem:[%s21148_s29] sm:$0xf]  ;;  %v14139_v19 = vld [vmem:[%s21148_s29 + $0x20] sm:$0xf0] }
 0x342   : > { %v12280_v25 = vor.u32 %v14139_v19, %v12279_v18  ;;  %v12359_v18 = vld [vmem:[%s21148_s29 + $0x98] sm:$0xf]  ;;  %v14158_v19 = vld [vmem:[%s21148_s29 + $0xb8] sm:$0xf0] }
 0x343   : > { %5940 = vmatpush.bf16.msrb.mxu1 %v12108_v16  ;;  %5968 = vmatpush.bf16.msrb.mxu3 %v12236_v43  ;;  %v12540_v16 = vor.u32 %v14203_v23, %v12539_v46  ;;  %v14199_v43 = vld [vmem:[%s21148_s29 + $0x204] sm:$0xf]  ;;  %v12675_v46 = vld [vmem:[%s21148_s29 + $0x318] sm:$0xf]  ;;  %v14238_v23 = vld [vmem:[%s21148_s29 + $0x338] sm:$0xf0] }
 0x344   : > { %v12544_v50 = vor.u32 %v14199_v43, %v12541_v37  ;;  %v12676_v43 = vor.u32 %v14238_v23, %v12675_v46  ;;  %v14234_v37 = vld [vmem:[%s21148_s29 + $0x31c] sm:$0xf]  ;;  %v14257_v46 = vld [vmem:[%s21148_s29 + $0x3d0] sm:$0xf0] }
 0x345   : > { %5928 = vmatpush.bf16.msrb.mxu0 %v12028_v17  ;;  %5956 = vmatpush.bf16.msrb.mxu2 %v12156_v6  ;;  %v12505_v17 = vld [vmem:[%s21148_s29 + $0x1dc] sm:$0xf0]  ;;  %v12819_v6 = vld [vmem:[%s21148_s29 + $0x438] sm:$0xf]  ;;  %v14253_v23 = vld [vmem:[%s21148_s29 + $0x3b4] sm:$0xf] }
 0x347   : > { %5941 = vmatpush.bf16.msrb.mxu1 %v12100_v62  ;;  %5969 = vmatpush.bf16.msrb.mxu3 %v12228_v26  ;;  %v12821_v62 = vld [vmem:[%s21148_s29 + $0x45c] sm:$0xf0] }
 0x348   : > { %5929 = vmatmul.bf16.vlgmr.msrb.gmra.mxu0 %v18832_v1  ;;  %5957 = vmatmul.bf16.vlgmr.msrb.gmra.mxu2 %v18967_v21  ;;  %v14180_v1 = vld [vmem:[%s21148_s29 + $0x16c] sm:$0xf]  ;;  %v12460_v21 = vor.u32 %v14184_v58, %v12459_v35  ;;  %v12824_v26 = vor.u32 %v14270_v30, %v12821_v62  ;;  %v14261_v35 = vld [vmem:[%s21148_s29 + $0x3f4] sm:$0xf]  ;;  %v12785_v58 = vld [vmem:[%s21148_s29 + $0x414] sm:$0xf0] }
 0x349   : > { %6879 = vmatpush.bf16.msra.mxu0 %v12532_v55  ;;  %6907 = vmatpush.bf16.msra.mxu2 %v12536_v14  ;;  %v12508_v55 = vor.u32 %v14190_v34, %v12505_v17  ;;  %v12820_v14 = vor.u32 %v14274_v52, %v12819_v6  ;;  %v14149_v17 = vld [vmem:[%s21148_s29 + $0x70] sm:$0xf0] }
 0x34a   : > { %v14145_v6 = vld [vmem:[%s21148_s29 + $0x54] sm:$0xf] }
 0x34b   : > { %5942 = vmatpush.bf16.msrb.mxu1 %v12092_v10  ;;  %5970 = vmatpush.bf16.msrb.mxu3 %v12220_v54  ;;  %v12472_v10 = vor.u32 %v14181_v61, %v12469_v4  ;;  %v12287_v4 = vld [vmem:[%s21148_s29 + $0x8] sm:$0xf] }
 0x34d   : > { %6880 = vmatpush.bf16.msra.mxu0 %v12496_v29  ;;  %6908 = vmatpush.bf16.msra.mxu2 %v12500_v33  ;;  %v14265_v29 = vld [vmem:[%s21148_s29 + $0x410] sm:$0xf0] }
 0x34e   : > { %5943 = vmatmul.bf16.vlgmr.msrb.gmra.mxu1 %v18874_v15  ;;  %5971 = vmatmul.bf16.vlgmr.msrb.gmra.mxu3 %v19010_v24  ;;  %v12464_v15 = vor.u32 %v14180_v1, %v12461_v60  ;;  %v12423_v24 = vld [vmem:[%s21148_s29 + $0x120] sm:$0xf]  ;;  %v12784_v54 = vor.u32 %v14265_v29, %v12783_v42  ;;  %v12788_v1 = vor.u32 %v14261_v35, %v12785_v58  ;;  %v14176_v60 = vld [vmem:[%s21148_s29 + $0x148] sm:$0xf0]  ;;  %v12603_v35 = vld [vmem:[%s21148_s29 + $0x288] sm:$0xf] }
 0x34f   : > { %v12424_v56 = vor.u32 %v14175_v9, %v12423_v24  ;;  %6893 = vmatpush.bf16.msra.mxu1 %v12820_v14  ;;  %6921 = vmatpush.bf16.msra.mxu3 %v12824_v26  ;;  %v12433_v9 = vld [vmem:[%s21148_s29 + $0x14c] sm:$0xf0]  ;;  %v14229_v26 = vld [vmem:[%s21148_s29 + $0x2f0] sm:$0xf0]  ;;  %v14140_v42 = vld [vmem:[%s21148_s29 + $0x28] sm:$0xf0] }
 0x350   : > { %v12639_v14 = vld [vmem:[%s21148_s29 + $0x2d0] sm:$0xf]  ;;  %v14136_v29 = vld [vmem:[%s21148_s29 + $0xc] sm:$0xf] }
 0x351   : > { %6881 = vmatpush.bf16.msra.mxu0 %v12460_v21  ;;  %6909 = vmatpush.bf16.msra.mxu2 %v12464_v15  ;;  %v12431_v21 = vld [vmem:[%s21148_s29 + $0x128] sm:$0xf]  ;;  %v14172_v15 = vld [vmem:[%s21148_s29 + $0x12c] sm:$0xf]  ;;  %v12640_v61 = vor.u32 %v14229_v26, %v12639_v14 }
 0x352   : > { %v12432_v24 = vor.u32 %v14176_v60, %v12431_v21  ;;  %v12436_v40 = vor.u32 %v14172_v15, %v12433_v9  ;;  %v14220_v58 = vld [vmem:[%s21148_s29 + $0x2a8] sm:$0xf0] }
 0x353   : > { %6894 = vmatpush.bf16.msra.mxu1 %v12784_v54  ;;  %6922 = vmatpush.bf16.msra.mxu3 %v12788_v1  ;;  %v12289_v54 = vld [vmem:[%s21148_s29 + $0x2c] sm:$0xf0]  ;;  %v12604_v60 = vor.u32 %v14220_v58, %v12603_v35  ;;  %v14216_v15 = vld [vmem:[%s21148_s29 + $0x28c] sm:$0xf] }
 0x354   : > { %v12292_v21 = vor.u32 %v14136_v29, %v12289_v54  ;;  %v14235_v29 = vld [vmem:[%s21148_s29 + $0x324] sm:$0xf] }
 0x355   : > { %6882 = vmatpush.bf16.msra.mxu0 %v12424_v56  ;;  %6910 = vmatpush.bf16.msra.mxu2 %v12428_v22  ;;  %v14256_v56 = vld [vmem:[%s21148_s29 + $0x3c8] sm:$0xf0] }
 0x356   : > { %v12748_v22 = vor.u32 %v14256_v56, %v12747_v63  ;;  %v12567_v56 = vld [vmem:[%s21148_s29 + $0x240] sm:$0xf] }
 0x357   : > { %6923 = vmatpush.bf16.msra.mxu3 %v12752_v27  ;;  %v12569_v27 = vld [vmem:[%s21148_s29 + $0x264] sm:$0xf0] }
 0x358   : > { %6895 = vmatpush.bf16.msra.mxu1 %v12748_v22  ;;  %v14207_v22 = vld [vmem:[%s21148_s29 + $0x244] sm:$0xf] }
 0x359   : > { %6883 = vmatpush.bf16.msra.mxu0 %v12388_v7  ;;  %6911 = vmatpush.bf16.msra.mxu2 %v12392_v38  ;;  %v12395_v38 = vld [vmem:[%s21148_s29 + $0xe0] sm:$0xf] }
 0x35a   : > { %v12396_v12 = vor.u32 %v14167_v57, %v12395_v38  ;;  %v12572_v38 = vor.u32 %v14207_v22, %v12569_v27  ;;  %v12827_v57 = vld [vmem:[%s21148_s29 + $0x440] sm:$0xf]  ;;  %v12547_v22 = vld [vmem:[%s21148_s29 + $0x208] sm:$0xf]  ;;  %v14204_v27 = vld [vmem:[%s21148_s29 + $0x228] sm:$0xf0] }
 0x35d   : > { %6884 = vmatpush.bf16.msra.mxu0 %v12352_v11  ;;  %6912 = vmatpush.bf16.msra.mxu2 %v12356_v48  ;;  %v12397_v11 = vld [vmem:[%s21148_s29 + $0x104] sm:$0xf0]  ;;  %v14247_v48 = vld [vmem:[%s21148_s29 + $0x380] sm:$0xf0] }
 0x35e   : > { %v12400_v3 = vor.u32 %v14163_v31, %v12397_v11  ;;  %v12712_v47 = vor.u32 %v14247_v48, %v12711_v0  ;;  %v14275_v31 = vld [vmem:[%s21148_s29 + $0x460] sm:$0xf0]  ;;  %v12829_v11 = vld [vmem:[%s21148_s29 + $0x464] sm:$0xf0] }
 0x35f   : > { %v12828_v0 = vor.u32 %v14275_v31, %v12827_v57  ;;  %v12549_v57 = vld [vmem:[%s21148_s29 + $0x22c] sm:$0xf0] }
 0x360   : > { %6896 = vmatpush.bf16.msra.mxu1 %v12712_v47  ;;  %v14266_v47 = vld [vmem:[%s21148_s29 + $0x418] sm:$0xf0]  ;;  %v12611_v31 = vld [vmem:[%s21148_s29 + $0x290] sm:$0xf] }
 0x361   : > { %6885 = vmatpush.bf16.msra.mxu0 %v12316_v49  ;;  %6913 = vmatpush.bf16.msra.mxu2 %v12320_v5  ;;  %v14243_v49 = vld [vmem:[%s21148_s29 + $0x364] sm:$0xf] }
 0x362   : > { %v12716_v5 = vor.u32 %v14243_v49, %v12713_v53 }
 0x364   : > { %6924 = vmatpush.bf16.msra.mxu3 %v12716_v5  ;;  %6897 = vmatpush.bf16.msra.mxu1 %v12676_v43  ;;  %v14262_v5 = vld [vmem:[%s21148_s29 + $0x3fc] sm:$0xf] }
 0x365   : > { %6886 = vmatpush.bf16.msra.mxu0 %v12280_v25  ;;  %6914 = vmatpush.bf16.msra.mxu2 %v12284_v32  ;;  %v12360_v25 = vor.u32 %v14158_v19, %v12359_v18 }
 0x368   : > { %6898 = vmatpush.bf16.msra.mxu1 %v12640_v61  ;;  %v14239_v61 = vld [vmem:[%s21148_s29 + $0x340] sm:$0xf0] }
 0x369   : > { %6935 = vmatpush.bf16.msrb.mxu0 %v12540_v16  ;;  %6963 = vmatpush.bf16.msrb.mxu2 %v12544_v50  ;;  %v12364_v16 = vor.u32 %v14154_v39, %v12361_v41  ;;  %v12677_v50 = vld [vmem:[%s21148_s29 + $0x33c] sm:$0xf0]  ;;  %v12755_v41 = vld [vmem:[%s21148_s29 + $0x3b0] sm:$0xf] }
 0x36a   : > { %v12680_v8 = vor.u32 %v14234_v37, %v12677_v50  ;;  %v12756_v43 = vor.u32 %v14257_v46, %v12755_v41  ;;  %v12757_v37 = vld [vmem:[%s21148_s29 + $0x3d4] sm:$0xf0]  ;;  %v14212_v41 = vld [vmem:[%s21148_s29 + $0x268] sm:$0xf0] }
 0x36b   : > { %v12760_v50 = vor.u32 %v14253_v23, %v12757_v37  ;;  %v14208_v46 = vld [vmem:[%s21148_s29 + $0x24c] sm:$0xf] }
 0x36c   : > { %6925 = vmatpush.bf16.msra.mxu3 %v12680_v8  ;;  %6899 = vmatpush.bf16.msra.mxu1 %v12604_v60  ;;  %v14230_v60 = vld [vmem:[%s21148_s29 + $0x2f8] sm:$0xf0] }
 0x36d   : > { %6936 = vmatpush.bf16.msrb.mxu0 %v12504_v59  ;;  %6964 = vmatpush.bf16.msrb.mxu2 %v12508_v55  ;;  %v12323_v59 = vld [vmem:[%s21148_s29 + $0x50] sm:$0xf]  ;;  %v12325_v55 = vld [vmem:[%s21148_s29 + $0x74] sm:$0xf0] }
 0x36e   : > { %v12324_v52 = vor.u32 %v14149_v17, %v12323_v59  ;;  %v12328_v62 = vor.u32 %v14145_v6, %v12325_v55  ;;  %v14248_v59 = vld [vmem:[%s21148_s29 + $0x388] sm:$0xf0]  ;;  %v12721_v55 = vld [vmem:[%s21148_s29 + $0x38c] sm:$0xf0] }
 0x371   : > { %6937 = vmatpush.bf16.msrb.mxu0 %v12468_v2  ;;  %6965 = vmatpush.bf16.msrb.mxu2 %v12472_v10  ;;  %v12644_v2 = vor.u32 %v14225_v51, %v12641_v28  ;;  %v12288_v10 = vor.u32 %v14140_v42, %v12287_v4  ;;  %v12683_v28 = vld [vmem:[%s21148_s29 + $0x320] sm:$0xf] }
 0x372   : > { %v12684_v42 = vor.u32 %v14239_v61, %v12683_v28 }
 0x373   : > { %6926 = vmatpush.bf16.msra.mxu3 %v12644_v2 }
 0x375   : > { %6938 = vmatpush.bf16.msrb.mxu0 %v12432_v24  ;;  %6966 = vmatpush.bf16.msrb.mxu2 %v12436_v40  ;;  %v12605_v24 = vld [vmem:[%s21148_s29 + $0x2ac] sm:$0xf0]  ;;  %v14211_v40 = vld [vmem:[%s21148_s29 + $0x260] sm:$0xf0] }
 0x376   : > { %v12608_v9 = vor.u32 %v14216_v15, %v12605_v24  ;;  %v12568_v20 = vor.u32 %v14211_v40, %v12567_v56  ;;  %v12649_v56 = vld [vmem:[%s21148_s29 + $0x2fc] sm:$0xf0] }
 0x378   : > { %6927 = vmatpush.bf16.msra.mxu3 %v12608_v9  ;;  %6900 = vmatpush.bf16.msra.mxu1 %v12568_v20 }
 0x379   : > { %6939 = vmatpush.bf16.msrb.mxu0 %v12396_v12  ;;  %6967 = vmatpush.bf16.msrb.mxu2 %v12400_v3  ;;  %v14271_v12 = vld [vmem:[%s21148_s29 + $0x444] sm:$0xf]  ;;  %v12791_v3 = vld [vmem:[%s21148_s29 + $0x3f8] sm:$0xf] }
 0x37a   : > { %v12832_v48 = vor.u32 %v14271_v12, %v12829_v11  ;;  %v12792_v53 = vor.u32 %v14266_v47, %v12791_v3  ;;  %v14221_v12 = vld [vmem:[%s21148_s29 + $0x2b0] sm:$0xf0]  ;;  %v12613_v3 = vld [vmem:[%s21148_s29 + $0x2b4] sm:$0xf0] }
 0x37c   : > { %6928 = vmatpush.bf16.msra.mxu3 %v12572_v38  ;;  %6949 = vmatpush.bf16.msrb.mxu1 %v12828_v0  ;;  %v14200_v38 = vld [vmem:[%s21148_s29 + $0x20c] sm:$0xf] }
 0x37d   : > { %6940 = vmatpush.bf16.msrb.mxu0 %v12360_v25  ;;  %6968 = vmatpush.bf16.msrb.mxu2 %v12364_v16 }
 0x380   : > { %6977 = vmatpush.bf16.msrb.mxu3 %v12832_v48  ;;  %6950 = vmatpush.bf16.msrb.mxu1 %v12792_v53  ;;  %v12612_v48 = vor.u32 %v14221_v12, %v12611_v31  ;;  %v12552_v53 = vor.u32 %v14200_v38, %v12549_v57  ;;  %v14150_v57 = vld [vmem:[%s21148_s29 + $0x78] sm:$0xf0]  ;;  %v12333_v12 = vld [vmem:[%s21148_s29 + $0x7c] sm:$0xf0] }
 0x381   : > { %6941 = vmatpush.bf16.msrb.mxu0 %v12324_v52  ;;  %6969 = vmatpush.bf16.msrb.mxu2 %v12328_v62  ;;  %v14244_v52 = vld [vmem:[%s21148_s29 + $0x36c] sm:$0xf]  ;;  %v14146_v31 = vld [vmem:[%s21148_s29 + $0x5c] sm:$0xf] }
 0x384   : > { %6951 = vmatpush.bf16.msrb.mxu1 %v12756_v43 }
 0x385   : > { %v19285_v33 = vpop.f32.mrf.mxu0  ;;  %6942 = vmatpush.bf16.msrb.mxu0 %v12288_v10  ;;  %6970 = vmatpush.bf16.msrb.mxu2 %v12292_v21  ;;  %v12685_v10 = vld [vmem:[%s21148_s29 + $0x344] sm:$0xf0]  ;;  %v12647_v21 = vld [vmem:[%s21148_s29 + $0x2d8] sm:$0xf] }
 0x386   : > { %v12688_v35 = vor.u32 %v14235_v29, %v12685_v10  ;;  %v12648_v9 = vor.u32 %v14230_v60, %v12647_v21  ;;  %v14164_v29 = vld [vmem:[%s21148_s29 + $0xec] sm:$0xf]  ;;  %v14159_v60 = vld [vmem:[%s21148_s29 + $0xc0] sm:$0xf0] }
 0x38b   : > { %v19317_v7 = vpop.f32.mrf.mxu1  ;;  %v19319_v44 = vpop.f32.mrf.mxu2 }
 0x38d   : > { %v5286_v45 = vpop.f32.mrf.mxu0 }
 0x38e   : > { %v5298_v45 = vadd.f32 %v19317_v7, %v19285_v33  ;;  %v12793_v33 = vld [vmem:[%s21148_s29 + $0x41c] sm:$0xf0] }
 0x38f   : > { %v12796_v19 = vor.u32 %v14262_v5, %v12793_v33  ;;  %v12511_v5 = vld [vmem:[%s21148_s29 + $0x1c0] sm:$0xf] }
 0x390   : > { %v5327_v39 = vperm.slane %v5298_v45, 0  ;;  %v14217_v45 = vld [vmem:[%s21148_s29 + $0x294] sm:$0xf] }
 0x391   : > { %v19363_v32 = vpop.f32.mrf.mxu3  ;;  %6978 = vmatpush.bf16.msrb.mxu3 %v12796_v19  ;;  %v12616_v33 = vor.u32 %v14217_v45, %v12613_v3  ;;  %v14191_v19 = vld [vmem:[%s21148_s29 + $0x1c4] sm:$0xf] }
 0x392   : > { %v5324_v28 = vadd.f32 %v19363_v32, %v19319_v44  ;;  %v12405_v44 = vld [vmem:[%s21148_s29 + $0x10c] sm:$0xf0] }
 0x393   : > { %v5299_v36 = vpop.f32.mrf.mxu1  ;;  %v5312_v34 = vpop.f32.mrf.mxu2 }
 0x394   : > { %v12719_v34 = vld [vmem:[%s21148_s29 + $0x368] sm:$0xf]  ;;  %v5328_v10 = vperm.slane %v5324_v28, 0 }
 0x395   : > { %v19386_v30 = vpop.f32.mrf.mxu0  ;;  %6979 = vmatpush.bf16.msrb.mxu3 %v12760_v50  ;;  %v12720_v6 = vor.u32 %v14248_v59, %v12719_v34  ;;  %v14186_v34 = vld [vmem:[%s21148_s29 + $0x198] sm:$0xf0] }
 0x396   : > { %v5819_v16 = vadd.f32 %v19386_v30, %v5327_v39  ;;  %v12724_v30 = vor.u32 %v14244_v52, %v12721_v55  ;;  %v14182_v59 = vld [vmem:[%s21148_s29 + $0x17c] sm:$0xf]  ;;  %v12439_v55 = vld [vmem:[%s21148_s29 + $0x130] sm:$0xf] }
 0x397   : > { %6952 = vmatpush.bf16.msrb.mxu1 %v12720_v6 }
 0x399   : > { %v5325_v1 = vpop.f32.mrf.mxu3  ;;  %6980 = vmatpush.bf16.msrb.mxu3 %v12724_v30  ;;  %v14173_v30 = vld [vmem:[%s21148_s29 + $0x134] sm:$0xf] }
 0x39b   : > { %v5832_v63 = vpop.f32.mrf.mxu1  ;;  %v5846_v7 = vpop.f32.mrf.mxu2  ;;  %6953 = vmatpush.bf16.msrb.mxu1 %v12684_v42  ;;  %v14168_v42 = vld [vmem:[%s21148_s29 + $0x108] sm:$0xf0] }
 0x39c   : > { %v5833_v8 = vadd.f32 %v5832_v63, %v5819_v16  ;;  %v14226_v63 = vld [vmem:[%s21148_s29 + $0x2dc] sm:$0xf]  ;;  %v12577_v16 = vld [vmem:[%s21148_s29 + $0x26c] sm:$0xf0] }
 0x39d   : > { %v5820_v13 = vpop.f32.mrf.mxu0  ;;  %6981 = vmatpush.bf16.msrb.mxu3 %v12688_v35 }
 0x39e   : > { %v5821_v36 = vadd.f32 %v5820_v13, %v5327_v39  ;;  %v5847_v62 = vadd.f32 %v5846_v7, %v5833_v8  ;;  %v12652_v13 = vor.u32 %v14226_v63, %v12649_v56  ;;  %v12513_v39 = vld [vmem:[%s21148_s29 + $0x1e4] sm:$0xf0]  ;;  %v12475_v8 = vld [vmem:[%s21148_s29 + $0x178] sm:$0xf] }
 0x39f   : > { %6954 = vmatpush.bf16.msrb.mxu1 %v12648_v9  ;;  %v12516_v50 = vor.u32 %v14191_v19, %v12513_v39  ;;  %v12476_v6 = vor.u32 %v14186_v34, %v12475_v8  ;;  %v12555_v19 = vld [vmem:[%s21148_s29 + $0x210] sm:$0xf]  ;;  %v14205_v39 = vld [vmem:[%s21148_s29 + $0x230] sm:$0xf0]  ;;  %v12519_v34 = vld [vmem:[%s21148_s29 + $0x1c8] sm:$0xf] }
 0x3a0   : > { %v12556_v8 = vor.u32 %v14205_v39, %v12555_v19  ;;  %v12375_v19 = vld [vmem:[%s21148_s29 + $0xa8] sm:$0xf]  ;;  %v14160_v39 = vld [vmem:[%s21148_s29 + $0xc8] sm:$0xf0] }
 0x3a1   : > { %v5860_v18 = vpop.f32.mrf.mxu3  ;;  %6982 = vmatpush.bf16.msrb.mxu3 %v12652_v13 }
 0x3a2   : > { %v5861_v2 = vadd.f32 %v5860_v18, %v5847_v62  ;;  %v14195_v18 = vld [vmem:[%s21148_s29 + $0x1e0] sm:$0xf0]  ;;  %v12441_v62 = vld [vmem:[%s21148_s29 + $0x154] sm:$0xf0] }
 0x3a3   : > { %v5834_v49 = vpop.f32.mrf.mxu1  ;;  %v5848_v26 = vpop.f32.mrf.mxu2  ;;  %6955 = vmatpush.bf16.msrb.mxu1 %v12612_v48  ;;  %v12512_v37 = vor.u32 %v14195_v18, %v12511_v5  ;;  %v12297_v18 = vld [vmem:[%s21148_s29 + $0x34] sm:$0xf0] }
 0x3a4   : > { %v5835_v17 = vadd.f32 %v5834_v49, %v5821_v36  ;;  %v12548_v49 = vor.u32 %v14204_v27, %v12547_v22  ;;  %v12580_v36 = vor.u32 %v14208_v46, %v12577_v16 }
 0x3a5   : > { %v5874_v25 = vpop.f32.mrf.mxu0  ;;  %6983 = vmatpush.bf16.msrb.mxu3 %v12616_v33  ;;  %v14137_v33 = vld [vmem:[%s21148_s29 + $0x14] sm:$0xf] }
 0x3a6   : > { %v5849_v4 = vadd.f32 %v5848_v26, %v5835_v17  ;;  %v5875_v58 = vadd.f32 %v5874_v25, %v5861_v2  ;;  %v12575_v25 = vld [vmem:[%s21148_s29 + $0x248] sm:$0xf]  ;;  %v12477_v17 = vld [vmem:[%s21148_s29 + $0x19c] sm:$0xf0]  ;;  %v12444_v2 = vor.u32 %v14173_v30, %v12441_v62  ;;  %v14276_v30 = vld [vmem:[%s21148_s29 + $0x468] sm:$0xf0] }
 0x3a7   : > { %v12576_v23 = vor.u32 %v14212_v41, %v12575_v25  ;;  %v12480_v52 = vor.u32 %v14182_v59, %v12477_v17  ;;  %v14201_v25 = vld [vmem:[%s21148_s29 + $0x214] sm:$0xf]  ;;  %v12557_v41 = vld [vmem:[%s21148_s29 + $0x234] sm:$0xf0]  ;;  %v14196_v17 = vld [vmem:[%s21148_s29 + $0x1e8] sm:$0xf0] }
 0x3a8   : > { %v14272_v62 = vld [vmem:[%s21148_s29 + $0x44c] sm:$0xf] }
 0x3a9   : > { %v5862_v51 = vpop.f32.mrf.mxu3  ;;  %6956 = vmatpush.bf16.msrb.mxu1 %v12576_v23  ;;  %6984 = vmatpush.bf16.msrb.mxu3 %v12580_v36  ;;  %v12560_v36 = vor.u32 %v14201_v25, %v12557_v41  ;;  %v14156_v25 = vld [vmem:[%s21148_s29 + $0xac] sm:$0xf]  ;;  %v12377_v41 = vld [vmem:[%s21148_s29 + $0xcc] sm:$0xf0] }
 0x3aa   : > { %v5863_v1 = vadd.f32 %v5862_v51, %v5849_v4  ;;  %v12403_v4 = vld [vmem:[%s21148_s29 + $0xe8] sm:$0xf] }
 0x3ab   : > { %v5888_v14 = vpop.f32.mrf.mxu1  ;;  %v5902_v47 = vpop.f32.mrf.mxu2  ;;  %v12404_v35 = vor.u32 %v14168_v42, %v12403_v4  ;;  %v12483_v4 = vld [vmem:[%s21148_s29 + $0x180] sm:$0xf]  ;;  %v14187_v42 = vld [vmem:[%s21148_s29 + $0x1a0] sm:$0xf0] }
 0x3ac   : > { %v5889_v15 = vadd.f32 %v5888_v14, %v5875_v58  ;;  %v14177_v14 = vld [vmem:[%s21148_s29 + $0x150] sm:$0xf0]  ;;  %v12408_v58 = vor.u32 %v14164_v29, %v12405_v44  ;;  %v5903_v21 = vadd.f32 %v5902_v47, %v5328_v10  ;;  %v12336_v47 = vor.u32 %v14146_v31, %v12333_v12  ;;  %v14183_v29 = vld [vmem:[%s21148_s29 + $0x184] sm:$0xf]  ;;  %v12485_v44 = vld [vmem:[%s21148_s29 + $0x1a4] sm:$0xf0] }
 0x3ad   : > { %v5876_v54 = vpop.f32.mrf.mxu0  ;;  %v12440_v61 = vor.u32 %v14177_v14, %v12439_v55  ;;  %v12835_v14 = vld [vmem:[%s21148_s29 + $0x448] sm:$0xf]  ;;  %v12411_v12 = vld [vmem:[%s21148_s29 + $0xf0] sm:$0xf] }
 0x3ae   : > { %v5877_v24 = vadd.f32 %v5876_v54, %v5863_v1  ;;  %v5977_v11 = vmax.f32 %v5889_v15, 0.0  ;;  %v12367_v1 = vld [vmem:[%s21148_s29 + $0xa0] sm:$0xf]  ;;  %v14155_v15 = vld [vmem:[%s21148_s29 + $0xa4] sm:$0xf] }
 0x3af   : > { %v12368_v22 = vor.u32 %v14159_v60, %v12367_v1  ;;  %v14263_v1 = vld [vmem:[%s21148_s29 + $0x404] sm:$0xf]  ;;  %v12484_v60 = vor.u32 %v14187_v42, %v12483_v4  ;;  %v14138_v4 = vld [vmem:[%s21148_s29 + $0x1c] sm:$0xf]  ;;  %v12305_v42 = vld [vmem:[%s21148_s29 + $0x3c] sm:$0xf0] }
 0x3b1   : > { %v5916_v43 = vpop.f32.mrf.mxu3 }
 0x3b2   : > { %v5917_v63 = vadd.f32 %v5916_v43, %v5903_v21  ;;  %v12300_v43 = vor.u32 %v14137_v33, %v12297_v18  ;;  %v12801_v21 = vld [vmem:[%s21148_s29 + $0x424] sm:$0xf0] }
 0x3b3   : > { %v5890_v40 = vpop.f32.mrf.mxu1  ;;  %v5904_v26 = vpop.f32.mrf.mxu2 }
 0x3b4   : > { %v5891_v20 = vadd.f32 %v5890_v40, %v5877_v24  ;;  %v12369_v24 = vld [vmem:[%s21148_s29 + $0xc4] sm:$0xf0]  ;;  %v5905_v56 = vadd.f32 %v5904_v26, %v5328_v10  ;;  %v12837_v26 = vld [vmem:[%s21148_s29 + $0x46c] sm:$0xf0]  ;;  %v12836_v10 = vor.u32 %v14276_v30, %v12835_v14  ;;  %v12655_v14 = vld [vmem:[%s21148_s29 + $0x2e0] sm:$0xf] }
 0x3b5   : > { %v12372_v13 = vor.u32 %v14155_v15, %v12369_v24  ;;  %v12488_v15 = vor.u32 %v14183_v29, %v12485_v44  ;;  %v12447_v24 = vld [vmem:[%s21148_s29 + $0x138] sm:$0xf]  ;;  %v14231_v30 = vld [vmem:[%s21148_s29 + $0x300] sm:$0xf0] }
 0x3b6   : > { %v5979_v0 = vmax.f32 %v5891_v20, 0.0  ;;  %v12331_v20 = vld [vmem:[%s21148_s29 + $0x58] sm:$0xf]  ;;  %v12656_v29 = vor.u32 %v14231_v30, %v12655_v14 }
 0x3b7   : > { %v12332_v3 = vor.u32 %v14150_v57, %v12331_v20  ;;  %v14258_v20 = vld [vmem:[%s21148_s29 + $0x3d8] sm:$0xf0] }
 0x3b8   : > { %v19535_v7 = vpack.c.bf16 %v5979_v0, %v5977_v11 }
 0x3b9   : > { %v5918_v32 = vpop.f32.mrf.mxu3 }
 0x3ba   : > { %6887 = vmatmul.bf16.vlgmr.msra.gmra.mxu0 %v19535_v7  ;;  %6915 = vmatmul.bf16.vlgmr.msra.gmra.mxu2 %v19535_v7  ;;  %v5919_v27 = vadd.f32 %v5918_v32, %v5905_v56  ;;  %v12449_v56 = vld [vmem:[%s21148_s29 + $0x15c] sm:$0xf0] }
 0x3bb   : > { %6991 = vmatpush.bf16.msra.mxu0 %v12548_v49  ;;  %7019 = vmatpush.bf16.msra.mxu2 %v12552_v53  ;;  %v12295_v49 = vld [vmem:[%s21148_s29 + $0x10] sm:$0xf]  ;;  %v14141_v53 = vld [vmem:[%s21148_s29 + $0x30] sm:$0xf0] }
 0x3bc   : > { %v12296_v16 = vor.u32 %v14141_v53, %v12295_v49  ;;  %v14249_v49 = vld [vmem:[%s21148_s29 + $0x390] sm:$0xf0] }
 0x3bd   : > { %v14245_v53 = vld [vmem:[%s21148_s29 + $0x374] sm:$0xf] }
 0x3bf   : > { %6992 = vmatpush.bf16.msra.mxu0 %v12512_v37  ;;  %7020 = vmatpush.bf16.msra.mxu2 %v12516_v50 }
 0x3c3   : > { %6993 = vmatpush.bf16.msra.mxu0 %v12476_v6  ;;  %7021 = vmatpush.bf16.msra.mxu2 %v12480_v52  ;;  %v14192_v6 = vld [vmem:[%s21148_s29 + $0x1cc] sm:$0xf]  ;;  %v12521_v52 = vld [vmem:[%s21148_s29 + $0x1ec] sm:$0xf0] }
 0x3c5   : > { %v5930_v51 = vpop.f32.mrf.mxu0 }
 0x3c6   : > { %v5931_v38 = vadd.f32 %v5930_v51, %v5917_v63  ;;  %v14174_v63 = vld [vmem:[%s21148_s29 + $0x13c] sm:$0xf] }
 0x3c7   : > { %6994 = vmatpush.bf16.msra.mxu0 %v12440_v61  ;;  %7022 = vmatpush.bf16.msra.mxu2 %v12444_v2  ;;  %v12520_v61 = vor.u32 %v14196_v17, %v12519_v34  ;;  %v12524_v2 = vor.u32 %v14192_v6, %v12521_v52  ;;  %v12452_v31 = vor.u32 %v14174_v63, %v12449_v56  ;;  %v12339_v34 = vld [vmem:[%s21148_s29 + $0x60] sm:$0xf]  ;;  %v14147_v17 = vld [vmem:[%s21148_s29 + $0x64] sm:$0xf]  ;;  %v12341_v6 = vld [vmem:[%s21148_s29 + $0x84] sm:$0xf0] }
 0x3ca   : > { %6943 = vmatmul.bf16.vlgmr.msrb.gmra.mxu0 %v19535_v7  ;;  %6971 = vmatmul.bf16.vlgmr.msrb.gmra.mxu2 %v19535_v7 }
 0x3cb   : > { %v5944_v54 = vpop.f32.mrf.mxu1  ;;  %v5958_v9 = vpop.f32.mrf.mxu2  ;;  %6995 = vmatpush.bf16.msra.mxu0 %v12404_v35  ;;  %7023 = vmatpush.bf16.msra.mxu2 %v12408_v58  ;;  %v12799_v35 = vld [vmem:[%s21148_s29 + $0x400] sm:$0xf]  ;;  %v14267_v58 = vld [vmem:[%s21148_s29 + $0x420] sm:$0xf0] }
 0x3cc   : > { %v5945_v0 = vadd.f32 %v5944_v54, %v5931_v38  ;;  %v12840_v54 = vor.u32 %v14272_v62, %v12837_v26  ;;  %v12765_v38 = vld [vmem:[%s21148_s29 + $0x3dc] sm:$0xf0]  ;;  %v14227_v62 = vld [vmem:[%s21148_s29 + $0x2e4] sm:$0xf]  ;;  %v12657_v26 = vld [vmem:[%s21148_s29 + $0x304] sm:$0xf0] }
 0x3cd   : > { %v5932_v40 = vpop.f32.mrf.mxu0  ;;  %v12660_v44 = vor.u32 %v14227_v62, %v12657_v26  ;;  %v12383_v26 = vld [vmem:[%s21148_s29 + $0xb0] sm:$0xf] }
 0x3ce   : > { %v5933_v48 = vadd.f32 %v5932_v40, %v5919_v27  ;;  %v5959_v46 = vadd.f32 %v5958_v9, %v5945_v0  ;;  %v14178_v9 = vld [vmem:[%s21148_s29 + $0x158] sm:$0xf0]  ;;  %v12800_v40 = vor.u32 %v14267_v58, %v12799_v35  ;;  %v14165_v0 = vld [vmem:[%s21148_s29 + $0xf4] sm:$0xf] }
 0x3cf   : > { %6996 = vmatpush.bf16.msra.mxu0 %v12368_v22  ;;  %7024 = vmatpush.bf16.msra.mxu2 %v12372_v13  ;;  %v12804_v22 = vor.u32 %v14263_v1, %v12801_v21  ;;  %v12763_v13 = vld [vmem:[%s21148_s29 + $0x3b8] sm:$0xf]  ;;  %v14254_v27 = vld [vmem:[%s21148_s29 + $0x3bc] sm:$0xf]  ;;  %v12448_v57 = vor.u32 %v14178_v9, %v12447_v24  ;;  %v12621_v21 = vld [vmem:[%s21148_s29 + $0x2bc] sm:$0xf0] }
 0x3d0   : > { %v14206_v35 = vld [vmem:[%s21148_s29 + $0x238] sm:$0xf0]  ;;  %v12583_v9 = vld [vmem:[%s21148_s29 + $0x250] sm:$0xf] }
 0x3d1   : > { %v5972_v11 = vpop.f32.mrf.mxu3  ;;  %v14222_v58 = vld [vmem:[%s21148_s29 + $0x2b8] sm:$0xf0] }
 0x3d2   : > { %v5973_v37 = vadd.f32 %v5972_v11, %v5959_v46  ;;  %v14169_v11 = vld [vmem:[%s21148_s29 + $0x110] sm:$0xf0]  ;;  %v14218_v1 = vld [vmem:[%s21148_s29 + $0x29c] sm:$0xf] }
 0x3d3   : > { %v5946_v45 = vpop.f32.mrf.mxu1  ;;  %v5960_v23 = vpop.f32.mrf.mxu2  ;;  %6997 = vmatpush.bf16.msra.mxu0 %v12332_v3  ;;  %7025 = vmatpush.bf16.msra.mxu2 %v12336_v47  ;;  %v12768_v3 = vor.u32 %v14254_v27, %v12765_v38  ;;  %v12727_v47 = vld [vmem:[%s21148_s29 + $0x370] sm:$0xf]  ;;  %v12412_v33 = vor.u32 %v14169_v11, %v12411_v12  ;;  %v12624_v56 = vor.u32 %v14218_v1, %v12621_v21  ;;  %v12585_v27 = vld [vmem:[%s21148_s29 + $0x274] sm:$0xf0]  ;;  %v14228_v1 = vld [vmem:[%s21148_s29 + $0x2ec] sm:$0xf] }
 0x3d4   : > { %v5947_v5 = vadd.f32 %v5946_v45, %v5933_v48  ;;  %v5978_v51 = vmax.f32 %v5973_v37, 0.0  ;;  %v12413_v48 = vld [vmem:[%s21148_s29 + $0x114] sm:$0xf0]  ;;  %v12764_v45 = vor.u32 %v14258_v20, %v12763_v13  ;;  %v12728_v46 = vor.u32 %v14249_v49, %v12727_v47  ;;  %v14236_v37 = vld [vmem:[%s21148_s29 + $0x32c] sm:$0xf] }
 0x3d5   : > { %v12416_v18 = vor.u32 %v14165_v0, %v12413_v48  ;;  %v14197_v13 = vld [vmem:[%s21148_s29 + $0x1f0] sm:$0xf0]  ;;  %v12843_v38 = vld [vmem:[%s21148_s29 + $0x450] sm:$0xf]  ;;  %v12845_v12 = vld [vmem:[%s21148_s29 + $0x474] sm:$0xf0] }
 0x3d6   : > { %v5961_v50 = vadd.f32 %v5960_v23, %v5947_v5  ;;  %v12729_v5 = vld [vmem:[%s21148_s29 + $0x394] sm:$0xf0]  ;;  %v14209_v20 = vld [vmem:[%s21148_s29 + $0x254] sm:$0xf]  ;;  %v12491_v47 = vld [vmem:[%s21148_s29 + $0x188] sm:$0xf] }
 0x3d7   : > { %6998 = vmatpush.bf16.msra.mxu0 %v12296_v16  ;;  %7026 = vmatpush.bf16.msra.mxu2 %v12300_v43  ;;  %v12732_v23 = vor.u32 %v14245_v53, %v12729_v5  ;;  %v12691_v16 = vld [vmem:[%s21148_s29 + $0x328] sm:$0xf]  ;;  %v14240_v43 = vld [vmem:[%s21148_s29 + $0x348] sm:$0xf0]  ;;  %v12588_v48 = vor.u32 %v14209_v20, %v12585_v27  ;;  %v12665_v21 = vld [vmem:[%s21148_s29 + $0x30c] sm:$0xf0] }
 0x3d8   : > { %v12692_v52 = vor.u32 %v14240_v43, %v12691_v16  ;;  %v14188_v49 = vld [vmem:[%s21148_s29 + $0x1a8] sm:$0xf0]  ;;  %v12807_v53 = vld [vmem:[%s21148_s29 + $0x408] sm:$0xf]  ;;  %v14259_v16 = vld [vmem:[%s21148_s29 + $0x3e0] sm:$0xf0] }
 0x3d9   : > { %v5974_v59 = vpop.f32.mrf.mxu3  ;;  %v14268_v5 = vld [vmem:[%s21148_s29 + $0x428] sm:$0xf0]  ;;  %v14255_v43 = vld [vmem:[%s21148_s29 + $0x3c4] sm:$0xf] }
 0x3da   : > { %v5975_v55 = vadd.f32 %v5974_v59, %v5961_v50  ;;  %6999 = vmatmul.bf16.vlgmr.msra.gmra.mxu0 %v19535_v7  ;;  %7027 = vmatmul.bf16.vlgmr.msra.gmra.mxu2 %v19535_v7  ;;  %v12693_v50 = vld [vmem:[%s21148_s29 + $0x34c] sm:$0xf0]  ;;  %v14151_v59 = vld [vmem:[%s21148_s29 + $0x80] sm:$0xf0] }
 0x3db   : > { %7047 = vmatpush.bf16.msrb.mxu0 %v12556_v8  ;;  %7075 = vmatpush.bf16.msrb.mxu2 %v12560_v36  ;;  %v12376_v8 = vor.u32 %v14160_v39, %v12375_v19  ;;  %v12380_v36 = vor.u32 %v14156_v25, %v12377_v41  ;;  %v12492_v19 = vor.u32 %v14188_v49, %v12491_v47  ;;  %v12455_v41 = vld [vmem:[%s21148_s29 + $0x140] sm:$0xf]  ;;  %v12815_v49 = vld [vmem:[%s21148_s29 + $0x410] sm:$0xf] }
 0x3dc   : > { %v5980_v28 = vmax.f32 %v5975_v55, 0.0  ;;  %v12696_v55 = vor.u32 %v14236_v37, %v12693_v50  ;;  %v12808_v39 = vor.u32 %v14268_v5, %v12807_v53  ;;  %v12773_v37 = vld [vmem:[%s21148_s29 + $0x3e4] sm:$0xf0]  ;;  %v14269_v53 = vld [vmem:[%s21148_s29 + $0x430] sm:$0xf0] }
 0x3dd   : > { %v12816_v5 = vor.u32 %v14269_v53, %v12815_v49 }
 0x3de   : > { %v19684_v32 = vpack.c.bf16 %v5980_v28, %v5978_v51  ;;  %v12340_v51 = vor.u32 %v14151_v59, %v12339_v34  ;;  %v12344_v28 = vor.u32 %v14147_v17, %v12341_v6  ;;  %v12419_v34 = vld [vmem:[%s21148_s29 + $0xf8] sm:$0xf]  ;;  %v14170_v59 = vld [vmem:[%s21148_s29 + $0x118] sm:$0xf0] }
 0x3df   : > { %7048 = vmatpush.bf16.msrb.mxu0 %v12520_v61  ;;  %7076 = vmatpush.bf16.msrb.mxu2 %v12524_v2  ;;  %v12303_v61 = vld [vmem:[%s21148_s29 + $0x18] sm:$0xf]  ;;  %v14142_v2 = vld [vmem:[%s21148_s29 + $0x38] sm:$0xf0]  ;;  %v12420_v14 = vor.u32 %v14170_v59, %v12419_v34  ;;  %v12599_v34 = vld [vmem:[%s21148_s29 + $0x260] sm:$0xf] }
 0x3e0   : > { %6901 = vmatmul.bf16.vlgmr.msra.gmra.mxu1 %v19684_v32  ;;  %6929 = vmatmul.bf16.vlgmr.msra.gmra.mxu3 %v19684_v32  ;;  %v12735_v17 = vld [vmem:[%s21148_s29 + $0x378] sm:$0xf]  ;;  %v14250_v6 = vld [vmem:[%s21148_s29 + $0x398] sm:$0xf0]  ;;  %v14215_v59 = vld [vmem:[%s21148_s29 + $0x280] sm:$0xf0] }
 0x3e1   : > { %7005 = vmatpush.bf16.msra.mxu1 %v12836_v10  ;;  %7033 = vmatpush.bf16.msra.mxu3 %v12840_v54  ;;  %v12619_v10 = vld [vmem:[%s21148_s29 + $0x298] sm:$0xf]  ;;  %v12736_v30 = vor.u32 %v14250_v6, %v12735_v17  ;;  %v12600_v17 = vor.u32 %v14215_v59, %v12599_v34 }
 0x3e2   : > { %v12563_v54 = vld [vmem:[%s21148_s29 + $0x218] sm:$0xf]  ;;  %v12620_v63 = vor.u32 %v14222_v58, %v12619_v10  ;;  %v12347_v10 = vld [vmem:[%s21148_s29 + $0x68] sm:$0xf]  ;;  %v14232_v58 = vld [vmem:[%s21148_s29 + $0x308] sm:$0xf0] }
 0x3e3   : > { %7049 = vmatpush.bf16.msrb.mxu0 %v12484_v60  ;;  %7077 = vmatpush.bf16.msrb.mxu2 %v12488_v15  ;;  %v12304_v60 = vor.u32 %v14142_v2, %v12303_v61  ;;  %v12308_v15 = vor.u32 %v14138_v4, %v12305_v42  ;;  %v12564_v24 = vor.u32 %v14206_v35, %v12563_v54  ;;  %v14241_v61 = vld [vmem:[%s21148_s29 + $0x350] sm:$0xf0]  ;;  %v12701_v4 = vld [vmem:[%s21148_s29 + $0x354] sm:$0xf0]  ;;  %v14152_v54 = vld [vmem:[%s21148_s29 + $0x88] sm:$0xf0] }
 0x3e4   : > { %v14237_v2 = vld [vmem:[%s21148_s29 + $0x334] sm:$0xf]  ;;  %v12663_v35 = vld [vmem:[%s21148_s29 + $0x2e8] sm:$0xf] }
 0x3e5   : > { %7006 = vmatpush.bf16.msra.mxu1 %v12800_v40  ;;  %7034 = vmatpush.bf16.msra.mxu3 %v12804_v22  ;;  %v14213_v40 = vld [vmem:[%s21148_s29 + $0x270] sm:$0xf0]  ;;  %v12527_v22 = vld [vmem:[%s21148_s29 + $0x1d0] sm:$0xf] }
 0x3e6   : > { %v12528_v11 = vor.u32 %v14197_v13, %v12527_v22  ;;  %v12584_v0 = vor.u32 %v14213_v40, %v12583_v9  ;;  %v12311_v9 = vld [vmem:[%s21148_s29 + $0x20] sm:$0xf]  ;;  %v14223_v40 = vld [vmem:[%s21148_s29 + $0x2c0] sm:$0xf0]  ;;  %v12629_v13 = vld [vmem:[%s21148_s29 + $0x2c4] sm:$0xf0] }
 0x3e7   : > { %7050 = vmatpush.bf16.msrb.mxu0 %v12448_v57  ;;  %7078 = vmatpush.bf16.msrb.mxu2 %v12452_v31  ;;  %v14277_v57 = vld [vmem:[%s21148_s29 + $0x470] sm:$0xf0]  ;;  %v14219_v22 = vld [vmem:[%s21148_s29 + $0x2a4] sm:$0xf] }
 0x3e8   : > { %v14273_v31 = vld [vmem:[%s21148_s29 + $0x454] sm:$0xf] }
 0x3e9   : > { %7007 = vmatpush.bf16.msra.mxu1 %v12764_v45  ;;  %7035 = vmatpush.bf16.msra.mxu3 %v12768_v3  ;;  %v12844_v45 = vor.u32 %v14277_v57, %v12843_v38  ;;  %v12848_v3 = vor.u32 %v14273_v31, %v12845_v12  ;;  %v12632_v38 = vor.u32 %v14219_v22, %v12629_v13  ;;  %v12591_v57 = vld [vmem:[%s21148_s29 + $0x258] sm:$0xf]  ;;  %v14214_v31 = vld [vmem:[%s21148_s29 + $0x278] sm:$0xf0] }
 0x3ea   : > { %v14210_v12 = vld [vmem:[%s21148_s29 + $0x25c] sm:$0xf] }
 0x3eb   : > { %7051 = vmatpush.bf16.msrb.mxu0 %v12412_v33  ;;  %7079 = vmatpush.bf16.msrb.mxu2 %v12416_v18  ;;  %v14264_v33 = vld [vmem:[%s21148_s29 + $0x40c] sm:$0xf]  ;;  %v12809_v18 = vld [vmem:[%s21148_s29 + $0x42c] sm:$0xf0] }
 0x3ec   : > { %v12812_v25 = vor.u32 %v14264_v33, %v12809_v18  ;;  %v12779_v33 = vld [vmem:[%s21148_s29 + $0x3c8] sm:$0xf] }
 0x3ed   : > { %7008 = vmatpush.bf16.msra.mxu1 %v12728_v46  ;;  %7036 = vmatpush.bf16.msra.mxu3 %v12732_v23  ;;  %v14179_v46 = vld [vmem:[%s21148_s29 + $0x160] sm:$0xf0]  ;;  %v12771_v23 = vld [vmem:[%s21148_s29 + $0x3c0] sm:$0xf] }
 0x3ee   : > { %v12456_v50 = vor.u32 %v14179_v46, %v12455_v41  ;;  %v12707_v41 = vld [vmem:[%s21148_s29 + $0x338] sm:$0xf]  ;;  %v14242_v46 = vld [vmem:[%s21148_s29 + $0x358] sm:$0xf0] }
 0x3ef   : > { %7052 = vmatpush.bf16.msrb.mxu0 %v12376_v8  ;;  %7080 = vmatpush.bf16.msrb.mxu2 %v12380_v36  ;;  %v12772_v8 = vor.u32 %v14259_v16, %v12771_v23  ;;  %v12776_v36 = vor.u32 %v14255_v43, %v12773_v37  ;;  %v12708_v23 = vor.u32 %v14242_v46, %v12707_v41  ;;  %v12671_v16 = vld [vmem:[%s21148_s29 + $0x2f0] sm:$0xf]  ;;  %v14233_v43 = vld [vmem:[%s21148_s29 + $0x310] sm:$0xf0] }
 0x3f0   : > { %6957 = vmatmul.bf16.vlgmr.msrb.gmra.mxu1 %v19684_v32  ;;  %6985 = vmatmul.bf16.vlgmr.msrb.gmra.mxu3 %v19684_v32  ;;  %v12672_v37 = vor.u32 %v14233_v43, %v12671_v16 }
 0x3f1   : > { %7009 = vmatpush.bf16.msra.mxu1 %v12692_v52  ;;  %7037 = vmatpush.bf16.msra.mxu3 %v12696_v55  ;;  %v14246_v52 = vld [vmem:[%s21148_s29 + $0x37c] sm:$0xf]  ;;  %v12737_v55 = vld [vmem:[%s21148_s29 + $0x39c] sm:$0xf0] }
 0x3f2   : > { %v12740_v62 = vor.u32 %v14246_v52, %v12737_v55 }
 0x3f3   : > { %7053 = vmatpush.bf16.msrb.mxu0 %v12340_v51  ;;  %7081 = vmatpush.bf16.msrb.mxu2 %v12344_v28  ;;  %v14161_v51 = vld [vmem:[%s21148_s29 + $0xd0] sm:$0xf0]  ;;  %v12699_v28 = vld [vmem:[%s21148_s29 + $0x330] sm:$0xf] }
 0x3f4   : > { %v12384_v42 = vor.u32 %v14161_v51, %v12383_v26 }
 0x3f5   : > { %7010 = vmatpush.bf16.msra.mxu1 %v12656_v29  ;;  %7038 = vmatpush.bf16.msra.mxu3 %v12660_v44  ;;  %v12700_v29 = vor.u32 %v14241_v61, %v12699_v28  ;;  %v12704_v44 = vor.u32 %v14237_v2, %v12701_v4 }
 0x3f7   : > { %7054 = vmatpush.bf16.msrb.mxu0 %v12304_v60  ;;  %7082 = vmatpush.bf16.msrb.mxu2 %v12308_v15  ;;  %v12348_v60 = vor.u32 %v14152_v54, %v12347_v10  ;;  %v12664_v15 = vor.u32 %v14232_v58, %v12663_v35 }
 0x3f9   : > { %7011 = vmatpush.bf16.msra.mxu1 %v12620_v63  ;;  %7039 = vmatpush.bf16.msra.mxu3 %v12624_v56  ;;  %v14143_v63 = vld [vmem:[%s21148_s29 + $0x40] sm:$0xf0]  ;;  %v12627_v56 = vld [vmem:[%s21148_s29 + $0x2a0] sm:$0xf] }
 0x3fa   : > { %7055 = vmatmul.bf16.vlgmr.msrb.gmra.mxu0 %v19535_v7  ;;  %7083 = vmatmul.bf16.vlgmr.msrb.gmra.mxu2 %v19535_v7  ;;  %v12312_v20 = vor.u32 %v14143_v63, %v12311_v9  ;;  %v12628_v27 = vor.u32 %v14223_v40, %v12627_v56  ;;  %v14279_v9 = vld [vmem:[%s21149_s0] sm:$0xff] }
 0x3fb   : > { %7103 = vmatpush.bf16.msra.mxu0 %v12564_v24  ;;  %v12668_v24 = vor.u32 %v14228_v1, %v12665_v21 }
 0x3fd   : > { %7012 = vmatpush.bf16.msra.mxu1 %v12584_v0  ;;  %7040 = vmatpush.bf16.msra.mxu3 %v12588_v48  ;;  %v12851_v0 = vld [vmem:[%s21148_s29 + $0x458] sm:$0xf]  ;;  %v14278_v48 = vld [vmem:[%s21148_s29 + $0x478] sm:$0xf0] }
 0x3fe   : > { %v12852_v47 = vor.u32 %v14278_v48, %v12851_v0 }
 0x3ff   : > { %7104 = vmatpush.bf16.msra.mxu0 %v12528_v11  ;;  %v12593_v11 = vld [vmem:[%s21148_s29 + $0x27c] sm:$0xf0] }
 0x400   : > { %7013 = vmatmul.bf16.vlgmr.msra.gmra.mxu1 %v19684_v32  ;;  %7041 = vmatmul.bf16.vlgmr.msra.gmra.mxu3 %v19684_v32 }
 0x401   : > { %7061 = vmatpush.bf16.msrb.mxu1 %v12844_v45  ;;  %7089 = vmatpush.bf16.msrb.mxu3 %v12848_v3  ;;  %v12592_v45 = vor.u32 %v14214_v31, %v12591_v57  ;;  %v12596_v3 = vor.u32 %v14210_v12, %v12593_v11 }
 0x403   : > { %7105 = vmatpush.bf16.msra.mxu0 %v12492_v19  ;;  %v12743_v19 = vld [vmem:[%s21148_s29 + $0x380] sm:$0xf] }
 0x405   : > { %7062 = vmatpush.bf16.msrb.mxu1 %v12808_v39  ;;  %7090 = vmatpush.bf16.msrb.mxu3 %v12812_v25  ;;  %v14251_v39 = vld [vmem:[%s21148_s29 + $0x3a0] sm:$0xf0] }
 0x406   : > { %v12744_v25 = vor.u32 %v14251_v39, %v12743_v19  ;;  %v14291_v19 = vld [vmem:[%s21149_s0 + $0x60] sm:$0xff] }
 0x407   : > { %7106 = vmatpush.bf16.msra.mxu0 %v12456_v50  ;;  %v12635_v50 = vld [vmem:[%s21148_s29 + $0x2a8] sm:$0xf] }
 0x409   : > { %7063 = vmatpush.bf16.msrb.mxu1 %v12772_v8  ;;  %7091 = vmatpush.bf16.msrb.mxu3 %v12776_v36  ;;  %v14224_v8 = vld [vmem:[%s21148_s29 + $0x2c8] sm:$0xf0] }
 0x40a   : > { %v12636_v36 = vor.u32 %v14224_v8, %v12635_v50 }
 0x40b   : > { %7107 = vmatpush.bf16.msra.mxu0 %v12420_v14 }
 0x40d   : > { %7064 = vmatpush.bf16.msrb.mxu1 %v12736_v30  ;;  %7092 = vmatpush.bf16.msrb.mxu3 %v12740_v62 }
 0x40f   : > { %7108 = vmatpush.bf16.msra.mxu0 %v12384_v42 }
 0x411   : > { %7065 = vmatpush.bf16.msrb.mxu1 %v12700_v29  ;;  %7093 = vmatpush.bf16.msrb.mxu3 %v12704_v44 }
 0x413   : > { %7109 = vmatpush.bf16.msra.mxu0 %v12348_v60 }
 0x415   : > { %7066 = vmatpush.bf16.msrb.mxu1 %v12664_v15  ;;  %7094 = vmatpush.bf16.msrb.mxu3 %v12668_v24  ;;  %v14283_v24 = vld [vmem:[%s21149_s0 + $0x20] sm:$0xff] }
 0x417   : > { %7110 = vmatpush.bf16.msra.mxu0 %v12312_v20 }
 0x419   : > { %7067 = vmatpush.bf16.msrb.mxu1 %v12628_v27  ;;  %7095 = vmatpush.bf16.msrb.mxu3 %v12632_v38 }
 0x41a   : > { %7111 = vmatmul.bf16.vlgmr.msra.gmra.mxu0 %v19535_v7  ;;  %v14260_v7 = vld [vmem:[%s21148_s29 + $0x3e8] sm:$0xf0] }
 0x41b   : > { %v12780_v18 = vor.u32 %v14260_v7, %v12779_v33  ;;  %v14284_v33 = vld [vmem:[%s21149_s0 + $0x28] sm:$0xff] }
 0x41c   : > { %v14280_v7 = vld [vmem:[%s21149_s0 + $0x8] sm:$0xff] }
 0x41d   : > { %7068 = vmatpush.bf16.msrb.mxu1 %v12592_v45  ;;  %7096 = vmatpush.bf16.msrb.mxu3 %v12596_v3 }
 0x420   : > { %7069 = vmatmul.bf16.vlgmr.msrb.gmra.mxu1 %v19684_v32  ;;  %7097 = vmatmul.bf16.vlgmr.msrb.gmra.mxu3 %v19684_v32 }
 0x421   : > { %7117 = vmatpush.bf16.msra.mxu1 %v12852_v47 }
 0x425   : > { %7118 = vmatpush.bf16.msra.mxu1 %v12816_v5 }
 0x429   : > { %7119 = vmatpush.bf16.msra.mxu1 %v12780_v18  ;;  %v14287_v18 = vld [vmem:[%s21149_s0 + $0x40] sm:$0xff] }
 0x42d   : > { %7120 = vmatpush.bf16.msra.mxu1 %v12744_v25 }
 0x431   : > { %7121 = vmatpush.bf16.msra.mxu1 %v12708_v23 }
 0x435   : > { %7122 = vmatpush.bf16.msra.mxu1 %v12672_v37 }
 0x437   : > { %v6888_v6 = vpop.f32.mrf.mxu0 }
 0x439   : > { %7123 = vmatpush.bf16.msra.mxu1 %v12636_v36 }
 0x43d   : > { %7124 = vmatpush.bf16.msra.mxu1 %v12600_v17  ;;  %v6916_v52 = vpop.f32.mrf.mxu2 }
 0x43f   : > { %v6890_v14 = vpop.f32.mrf.mxu0 }
 0x440   : > { %7125 = vmatmul.bf16.vlgmr.msra.gmra.mxu1 %v19684_v32 }
 0x445   : > { %v6918_v30 = vpop.f32.mrf.mxu2 }
 0x447   : > { %v6944_v2 = vpop.f32.mrf.mxu0 }
 0x44d   : > { %v6972_v44 = vpop.f32.mrf.mxu2 }
 0x44f   : > { %v6946_v56 = vpop.f32.mrf.mxu0 }
 0x455   : > { %v6974_v40 = vpop.f32.mrf.mxu2 }
 0x457   : > { %v7000_v11 = vpop.f32.mrf.mxu0 }
 0x45d   : > { %v6902_v55 = vpop.f32.mrf.mxu1  ;;  %v7028_v47 = vpop.f32.mrf.mxu2 }
 0x45e   : > { %v6903_v28 = vadd.f32 %v6902_v55, %v6888_v6  ;;  %v14285_v55 = vld [vmem:[%s21149_s0 + $0x30] sm:$0xff] }
 0x45f   : > { %v7002_v41 = vpop.f32.mrf.mxu0 }
 0x463   : > { %v6930_v62 = vpop.f32.mrf.mxu3 }
 0x464   : > { %v6931_v51 = vadd.f32 %v6930_v62, %v6916_v52  ;;  %v14292_v62 = vld [vmem:[%s21149_s0 + $0x68] sm:$0xff] }
 0x465   : > { %v6904_v26 = vpop.f32.mrf.mxu1  ;;  %v7030_v23 = vpop.f32.mrf.mxu2 }
 0x466   : > { %v7131_v4 = vpack.c.bf16 %v6931_v51, %v6903_v28  ;;  %v6905_v42 = vadd.f32 %v6904_v26, %v6890_v14  ;;  %v14281_v14 = vld [vmem:[%s21149_s0 + $0x10] sm:$0xff] }
 0x468   : > { %v7180_v35 = vunpack.c.h.b16 %v7131_v4  ;;  %v7246_v58 = vunpack.c.l.b16 %v7131_v4  ;;  %v14282_v4 = vld [vmem:[%s21149_s0 + $0x18] sm:$0xff] }
 0x46b   : > { %v6932_v61 = vpop.f32.mrf.mxu3 }
 0x46c   : > { %v6933_v29 = vadd.f32 %v6932_v61, %v6918_v30  ;;  %v14288_v30 = vld [vmem:[%s21149_s0 + $0x48] sm:$0xff] }
 0x46d   : > { %v6958_v10 = vpop.f32.mrf.mxu1 }
 0x46e   : > { %v7136_v54 = vpack.c.bf16 %v6933_v29, %v6905_v42  ;;  %v6959_v13 = vadd.f32 %v6958_v10, %v6944_v2  ;;  %v14286_v2 = vld [vmem:[%s21149_s0 + $0x38] sm:$0xff]  ;;  %v14289_v42 = vld [vmem:[%s21149_s0 + $0x50] sm:$0xff] }
 0x46f   : > { %v14293_v29 = vld [vmem:[%s21149_s0 + $0x70] sm:$0xff] }
 0x470   : > { %v7181_v32 = vunpack.c.h.b16 %v7136_v54  ;;  %v7247_v1 = vunpack.c.l.b16 %v7136_v54 }
 0x472   : > { %v7182_v21 = vpack.c.b16 %v7181_v32, %v7180_v35  ;;  %v7248_v60 = vpack.c.b16 %v7247_v1, %v7246_v58 }
 0x473   : > { %v6986_v15 = vpop.f32.mrf.mxu3 }
 0x474   : > { %7204 = vmatpush.bf16.msra.mxu2 %v7182_v21  ;;  %7269 = vmatpush.bf16.msra.mxu3 %v7248_v60  ;;  %v6987_v22 = vadd.f32 %v6986_v15, %v6972_v44 }
 0x475   : > { %v6960_v63 = vpop.f32.mrf.mxu1 }
 0x476   : > { %v7132_v27 = vpack.c.bf16 %v6987_v22, %v6959_v13  ;;  %v6961_v38 = vadd.f32 %v6960_v63, %v6946_v56  ;;  %v14295_v13 = vld [vmem:[%s21149_s0 + $0x80] sm:$0xff] }
 0x477   : > { %12877 = vmatmul.msk.bf16.vlgmr.msra.gmra.mxu2 %vm7184_vm1, %v14283_v24  ;;  %12897 = vmatmul.msk.bf16.vlgmr.msra.gmra.mxu3 %vm7184_vm1, %v14279_v9  ;;  %v7056_v51 = vpop.f32.mrf.mxu0 }
 0x478   : > { %v7322_v0 = vunpack.c.l.b16 %v7132_v27  ;;  %v7404_v48 = vunpack.c.h.b16 %v7132_v27  ;;  %v14290_v27 = vld [vmem:[%s21149_s0 + $0x58] sm:$0xff] }
 0x47b   : > { %v6988_v20 = vpop.f32.mrf.mxu3 }
 0x47c   : > { %v6989_v57 = vadd.f32 %v6988_v20, %v6974_v40  ;;  %v14299_v20 = vld [vmem:[%s21149_s0 + $0xa0] sm:$0xff] }
 0x47d   : > { %v7014_v12 = vpop.f32.mrf.mxu1  ;;  %v7084_v28 = vpop.f32.mrf.mxu2 }
 0x47e   : > { %v7137_v31 = vpack.c.bf16 %v6989_v57, %v6961_v38  ;;  %v7015_v46 = vadd.f32 %v7014_v12, %v7000_v11  ;;  %v14294_v38 = vld [vmem:[%s21149_s0 + $0x78] sm:$0xff] }
 0x47f   : > { %v7058_v54 = vpop.f32.mrf.mxu0 }
 0x480   : > { %v7323_v45 = vunpack.c.l.b16 %v7137_v31  ;;  %v7405_v3 = vunpack.c.h.b16 %v7137_v31 }
 0x482   : > { %v7324_v49 = vpack.c.b16 %v7323_v45, %v7322_v0  ;;  %v7406_v53 = vpack.c.b16 %v7405_v3, %v7404_v48 }
 0x483   : > { %v7042_v5 = vpop.f32.mrf.mxu3 }
 0x484   : > { %7345 = vmatpush.bf16.msrb.mxu0 %v7324_v49  ;;  %7427 = vmatpush.bf16.msrb.mxu1 %v7406_v53  ;;  %v7043_v39 = vadd.f32 %v7042_v5, %v7028_v47  ;;  %v14296_v47 = vld [vmem:[%s21149_s0 + $0x88] sm:$0xff] }
 0x485   : > { %v7016_v25 = vpop.f32.mrf.mxu1  ;;  %v7086_v58 = vpop.f32.mrf.mxu2  ;;  %v14300_v49 = vld [vmem:[%s21149_s0 + $0xa8] sm:$0xff] }
 0x486   : > { %v7133_v43 = vpack.c.bf16 %v7043_v39, %v7015_v46  ;;  %v7017_v37 = vadd.f32 %v7016_v25, %v7002_v41  ;;  %v14301_v39 = vld [vmem:[%s21149_s0 + $0xb0] sm:$0xff]  ;;  %v14304_v25 = vld [vmem:[%s21149_s0 + $0xc8] sm:$0xff]  ;;  %v14298_v46 = vld [vmem:[%s21149_s0 + $0x98] sm:$0xff] }
 0x487   : > { %12878 = vmatmul.msk.bf16.gmra.mxu2 %vm7184_vm1, %v14284_v33  ;;  %12898 = vmatmul.msk.bf16.gmra.mxu3 %vm7184_vm1, %v14280_v7  ;;  %v14303_v33 = vld [vmem:[%s21149_s0 + $0xc0] sm:$0xff]  ;;  %v14308_v41 = vld [vmem:[%s21149_s0 + $0xe8] sm:$0xff] }
 0x488   : > { %12925 = vmatmul.msk.bf16.vlgmr.msrb.gmra.mxu0 %vm7184_vm1, %v14287_v18  ;;  %12953 = vmatmul.msk.bf16.vlgmr.msrb.gmra.mxu1 %vm7184_vm1, %v14291_v19  ;;  %v7488_v36 = vunpack.c.l.b16 %v7133_v43  ;;  %v7570_v34 = vunpack.c.h.b16 %v7133_v43  ;;  %v14307_v7 = vld [vmem:[%s21149_s0 + $0xe0] sm:$0xff]  ;;  %v14297_v19 = vld [vmem:[%s21149_s0 + $0x90] sm:$0xff] }
 0x489   : > { %v14309_v43 = vld [vmem:[%s21149_s0 + $0xf0] sm:$0xff] }
 0x48b   : > { %v7044_v16 = vpop.f32.mrf.mxu3 }
 0x48c   : > { %v7045_v50 = vadd.f32 %v7044_v16, %v7030_v23  ;;  %v14302_v23 = vld [vmem:[%s21149_s0 + $0xb8] sm:$0xff]  ;;  %v14305_v16 = vld [vmem:[%s21149_s0 + $0xd0] sm:$0xff] }
 0x48e   : > { %v7138_v8 = vpack.c.bf16 %v7045_v50, %v7017_v37  ;;  %v14311_v37 = vld [vmem:[%s21149_s0 + $0x100] sm:$0xff]  ;;  %v14306_v50 = vld [vmem:[%s21149_s0 + $0xd8] sm:$0xff] }
 0x490   : > { %v7489_v59 = vunpack.c.l.b16 %v7138_v8  ;;  %v7571_v17 = vunpack.c.h.b16 %v7138_v8  ;;  %v14310_v8 = vld [vmem:[%s21149_s0 + $0xf8] sm:$0xff] }
 0x492   : > { %v7490_v6 = vpack.c.b16 %v7489_v59, %v7488_v36  ;;  %v7572_v52 = vpack.c.b16 %v7571_v17, %v7570_v34  ;;  %v14312_v59 = vld [vmem:[%s21149_s0 + $0x108] sm:$0xff] }
 0x494   : > { %7511 = vmatpush.bf16.msrb.mxu2 %v7490_v6  ;;  %7593 = vmatpush.bf16.msrb.mxu3 %v7572_v52 }
 0x497   : > { %12879 = vmatmul.msk.bf16.gmra.mxu2 %vm7184_vm1, %v14285_v55  ;;  %12899 = vmatmul.msk.bf16.gmra.mxu3 %vm7184_vm1, %v14281_v14  ;;  %v7112_v57 = vpop.f32.mrf.mxu0  ;;  %v14313_v55 = vld [vmem:[%s21149_s0 + $0x110] sm:$0xff] }
 0x498   : > { %12926 = vmatmul.msk.bf16.gmra.mxu0 %vm7184_vm1, %v14288_v30  ;;  %12954 = vmatmul.msk.bf16.gmra.mxu1 %vm7184_vm1, %v14292_v62 }
 0x49d   : > { %v7070_v26 = vpop.f32.mrf.mxu1 }
 0x49e   : > { %v7071_v35 = vadd.f32 %v7070_v26, %v7056_v51 }
 0x49f   : > { %v7114_v11 = vpop.f32.mrf.mxu0 }
 0x4a3   : > { %v7098_v61 = vpop.f32.mrf.mxu3 }
 0x4a4   : > { %v7099_v44 = vadd.f32 %v7098_v61, %v7084_v28 }
 0x4a5   : > { %v7072_v10 = vpop.f32.mrf.mxu1 }
 0x4a6   : > { %v7134_v1 = vpack.c.bf16 %v7099_v44, %v7071_v35  ;;  %v7073_v21 = vadd.f32 %v7072_v10, %v7058_v54 }
 0x4a7   : > { %12880 = vmatmul.msk.bf16.gmra.mxu2 %vm7184_vm1, %v14286_v2  ;;  %12900 = vmatmul.msk.bf16.gmra.mxu3 %vm7184_vm1, %v14282_v4  ;;  %v14314_v2 = vld [vmem:[%s21149_s0 + $0x118] sm:$0xff] }
 0x4a8   : > { %12927 = vmatmul.msk.bf16.gmra.mxu0 %vm7184_vm1, %v14289_v42  ;;  %12955 = vmatmul.msk.bf16.gmra.mxu1 %vm7184_vm1, %v14293_v29  ;;  %v7654_v24 = vunpack.c.l.b16 %v7134_v1  ;;  %v7736_v9 = vunpack.c.h.b16 %v7134_v1 }
 0x4ab   : > { %v7100_v32 = vpop.f32.mrf.mxu3 }
 0x4ac   : > { %v7101_v60 = vadd.f32 %v7100_v32, %v7086_v58 }
 0x4ae   : > { %v7139_v15 = vpack.c.bf16 %v7101_v60, %v7073_v21 }
 0x4b0   : > { %v7655_v63 = vunpack.c.l.b16 %v7139_v15  ;;  %v7737_v56 = vunpack.c.h.b16 %v7139_v15 }
 0x4b2   : > { %v7656_v40 = vpack.c.b16 %v7655_v63, %v7654_v24  ;;  %v7738_v22 = vpack.c.b16 %v7737_v56, %v7736_v9 }
 0x4b4   : > { %7677 = vmatpush.bf16.msra.mxu0 %v7656_v40  ;;  %7759 = vmatpush.bf16.msra.mxu1 %v7738_v22  ;;  %v14322_v40 = vld [vmem:[%s21150_s11 + $0x38] sm:$0xff] }
 0x4b7   : > { %12981 = vmatmul.msk.bf16.vlgmr.msrb.gmra.mxu2 %vm7184_vm1, %v14295_v13  ;;  %13009 = vmatmul.msk.bf16.vlgmr.msrb.gmra.mxu3 %vm7184_vm1, %v14299_v20  ;;  %v14321_v13 = vld [vmem:[%s21150_s11 + $0x30] sm:$0xff] }
 0x4b8   : > { %12928 = vmatmul.msk.bf16.gmra.mxu0 %vm7184_vm1, %v14290_v27  ;;  %12956 = vmatmul.msk.bf16.gmra.mxu1 %vm7184_vm1, %v14294_v38  ;;  %v14320_v38 = vld [vmem:[%s21150_s11 + $0x28] sm:$0xff] }
 0x4b9   : > { %8062 = vmatpush.bf16.msrb.mxu0 %v14322_v40 }
 0x4bd   : > { %v7126_v31 = vpop.f32.mrf.mxu1  ;;  %8063 = vmatpush.bf16.msrb.mxu0 %v14321_v13 }
 0x4be   : > { %v7127_v12 = vadd.f32 %v7126_v31, %v7112_v57  ;;  %v14319_v31 = vld [vmem:[%s21150_s11 + $0x20] sm:$0xff] }
 0x4c0   : > { %v7135_v48 = vpack.c.bf16 %v7127_v12, %v7127_v12 }
 0x4c1   : > { %8064 = vmatpush.bf16.msrb.mxu0 %v14320_v38 }
 0x4c2   : > { %v7820_v53 = vunpack.c.l.b16 %v7135_v48  ;;  %v14318_v48 = vld [vmem:[%s21150_s11 + $0x18] sm:$0xff] }
 0x4c5   : > { %v7128_v0 = vpop.f32.mrf.mxu1  ;;  %8065 = vmatpush.bf16.msrb.mxu0 %v14319_v31 }
 0x4c6   : > { %v7129_v45 = vadd.f32 %v7128_v0, %v7114_v11 }
 0x4c7   : > { %12982 = vmatmul.msk.bf16.gmra.mxu2 %vm7184_vm1, %v14296_v47  ;;  %13010 = vmatmul.msk.bf16.gmra.mxu3 %vm7184_vm1, %v14300_v49 }
 0x4c8   : > { %v7140_v3 = vpack.c.bf16 %v7129_v45, %v7129_v45  ;;  %13037 = vmatmul.msk.bf16.vlgmr.msra.gmra.mxu0 %vm7184_vm1, %v14303_v33  ;;  %13065 = vmatmul.msk.bf16.vlgmr.msra.gmra.mxu1 %vm7184_vm1, %v14307_v7  ;;  %v14315_v7 = vld [vmem:[%s21150_s11] sm:$0xff] }
 0x4c9   : > { %8066 = vmatpush.bf16.msrb.mxu0 %v14318_v48 }
 0x4ca   : > { %v7821_v5 = vunpack.c.l.b16 %v7140_v3  ;;  %v14317_v3 = vld [vmem:[%s21150_s11 + $0x10] sm:$0xff] }
 0x4cc   : > { %v7822_v18 = vpack.c.b16 %v7821_v5, %v7820_v53  ;;  %v14316_v53 = vld [vmem:[%s21150_s11 + $0x8] sm:$0xff]  ;;  %s796_s11 = scalar_lea.vmem %s21084_s16, %s20533_s1  ;;  %s21170_s1 = sld [smem:[#allocation30_spill]] }
 0x4cd   : > { %8067 = vmatpush.bf16.msrb.mxu0 %v14317_v3 }
 0x4ce   : > { %7843 = vmatpush.bf16.msra.mxu2 %v7822_v18 }
 0x4d1   : > { %8068 = vmatpush.bf16.msrb.mxu0 %v14316_v53 }
 0x4d2   : > { %s14527_s6 = scalar_lea.hbm %s21170_s1, 128 }
 0x4d5   : > { %8069 = vmatpush.bf16.msrb.mxu0 %v14315_v7 }
 0x4d7   : > { %12983 = vmatmul.msk.bf16.gmra.mxu2 %vm7184_vm1, %v14297_v19  ;;  %13011 = vmatmul.msk.bf16.gmra.mxu3 %vm7184_vm1, %v14301_v39 }
 0x4d8   : > { %13038 = vmatmul.msk.bf16.gmra.mxu0 %vm7184_vm1, %v14304_v25  ;;  %13066 = vmatmul.msk.bf16.gmra.mxu1 %vm7184_vm1, %v14308_v41 }
 0x4e7   : > { %12984 = vmatmul.msk.bf16.gmra.mxu2 %vm7184_vm1, %v14298_v46  ;;  %13012 = vmatmul.msk.bf16.gmra.mxu3 %vm7184_vm1, %v14302_v23 }
 0x4e8   : > { %13039 = vmatmul.msk.bf16.gmra.mxu0 %vm7184_vm1, %v14305_v16  ;;  %13067 = vmatmul.msk.bf16.gmra.mxu1 %vm7184_vm1, %v14309_v43 }
 0x4f7   : > { %13093 = vmatmul.msk.bf16.vlgmr.msra.gmra.mxu2 %vm7184_vm1, %v14311_v37 }
 0x4f8   : > { %13040 = vmatmul.msk.bf16.gmra.mxu0 %vm7184_vm1, %v14306_v50  ;;  %13068 = vmatmul.msk.bf16.gmra.mxu1 %vm7184_vm1, %v14310_v8 }
 0x4fa   : > { %v7206_v36 = vpop.f32.mrf.mxu2  ;;  %v7271_v52 = vpop.f32.mrf.mxu3 }
 0x4fb   : > { %v7272_v33 = vadd.f32 %v7271_v52, %v7206_v36 }
 0x502   : > { %v20168_v34 = vpop.f32.mrf.mxu2  ;;  %v7273_v26 = vpop.f32.mrf.mxu3 }
 0x503   : > { %v7274_v23 = vadd.f32 %v7273_v26, %v20168_v34  ;;  %v20271_v34 = vld [vmem:[%s21151_s25] ss:$0 sm:$0xff] }
 0x505   : > { %v7347_v14 = vpop.f32.mrf.mxu0  ;;  %v7429_v30 = vpop.f32.mrf.mxu1 }
 0x506   : > { %v7367_v19 = vadd.f32 %v7347_v14, %v7272_v33 }
 0x507   : > { %13094 = vmatmul.msk.bf16.gmra.mxu2 %vm7184_vm1, %v14312_v59 }
 0x508   : > { %v7449_v41 = vadd.f32 %v7429_v30, %v7367_v19 }
 0x50a   : > { %v20174_v17 = vpop.f32.mrf.mxu2  ;;  %v7276_v4 = vpop.f32.mrf.mxu3 }
 0x50d   : > { %v7349_v51 = vpop.f32.mrf.mxu0  ;;  %v7431_v28 = vpop.f32.mrf.mxu1 }
 0x50e   : > { %v7368_v43 = vadd.f32 %v7349_v51, %v7274_v23 }
 0x510   : > { %v7450_v36 = vadd.f32 %v7431_v28, %v7368_v43 }
 0x512   : > { %v20176_v6 = vpop.f32.mrf.mxu2  ;;  %v20196_v10 = vpop.f32.mrf.mxu3 }
 0x515   : > { %v20190_v42 = vpop.f32.mrf.mxu0  ;;  %v20194_v44 = vpop.f32.mrf.mxu1 }
 0x517   : > { %13095 = vmatmul.msk.bf16.gmra.mxu2 %vm7184_vm1, %v14313_v55  ;;  %v7277_v55 = vadd.f32 %v7276_v4, %v20174_v17 }
 0x519   : > { %v7369_v30 = vadd.f32 %v20190_v42, %v7277_v55  ;;  %v7279_v42 = vadd.f32 %v20196_v10, %v20176_v6 }
 0x51a   : > { %v20182_v62 = vpop.f32.mrf.mxu2  ;;  %v20204_v1 = vpop.f32.mrf.mxu3 }
 0x51b   : > { %v7451_v17 = vadd.f32 %v20194_v44, %v7369_v30 }
 0x51d   : > { %v20198_v54 = vpop.f32.mrf.mxu0  ;;  %v20202_v58 = vpop.f32.mrf.mxu1 }
 0x51e   : > { %v7370_v48 = vadd.f32 %v20198_v54, %v7279_v42  ;;  %v7282_v54 = vadd.f32 %v20204_v1, %v20182_v62 }
 0x520   : > { %v7452_v6 = vadd.f32 %v20202_v58, %v7370_v48 }
 0x522   : > { %v20184_v61 = vpop.f32.mrf.mxu2  ;;  %v20210_v24 = vpop.f32.mrf.mxu3 }
 0x523   : > { %v7284_v43 = vadd.f32 %v20210_v24, %v20184_v61 }
 0x525   : > { %v20206_v21 = vpop.f32.mrf.mxu0  ;;  %v20208_v60 = vpop.f32.mrf.mxu1 }
 0x526   : > { %v7371_v19 = vadd.f32 %v20206_v21, %v7282_v54 }
 0x527   : > { %13096 = vmatmul.msk.bf16.gmra.mxu2 %vm7184_vm1, %v14314_v2 }
 0x528   : > { %v7453_v1 = vadd.f32 %v20208_v60, %v7371_v19 }
 0x52a   : > { %v20192_v29 = vpop.f32.mrf.mxu2  ;;  %v20219_v22 = vpop.f32.mrf.mxu3 }
 0x52d   : > { %v20212_v9 = vpop.f32.mrf.mxu0  ;;  %v20214_v63 = vpop.f32.mrf.mxu1 }
 0x532   : > { %v20200_v35 = vpop.f32.mrf.mxu2  ;;  %v20236_v12 = vpop.f32.mrf.mxu3 }
 0x535   : > { %v20224_v20 = vpop.f32.mrf.mxu0  ;;  %v20231_v57 = vpop.f32.mrf.mxu1 }
 0x53a   : > { %v7513_v32 = vpop.f32.mrf.mxu2  ;;  %v7595_v47 = vpop.f32.mrf.mxu3 }
 0x53b   : > { %v7533_v16 = vadd.f32 %v7513_v32, %v7449_v41 }
 0x53d   : > { %v20238_v11 = vpop.f32.mrf.mxu0  ;;  %v20245_v45 = vpop.f32.mrf.mxu1  ;;  %v7615_v8 = vadd.f32 %v7595_v47, %v7533_v16 }
 0x542   : > { %v7515_v15 = vpop.f32.mrf.mxu2  ;;  %v7597_v25 = vpop.f32.mrf.mxu3 }
 0x543   : > { %v7534_v14 = vadd.f32 %v7515_v15, %v7450_v36 }
 0x545   : > { %v7679_v5 = vpop.f32.mrf.mxu0  ;;  %v7761_v18 = vpop.f32.mrf.mxu1  ;;  %v7616_v51 = vadd.f32 %v7597_v25, %v7534_v14 }
 0x546   : > { %v7699_v59 = vadd.f32 %v7679_v5, %v7615_v8 }
 0x548   : > { %v7781_v40 = vadd.f32 %v7761_v18, %v7699_v59  ;;  %v7372_v59 = vadd.f32 %v20212_v9, %v7284_v43  ;;  %v7906_v43 = vld [vmem:[%s21152_s10] sm:$0x3f] }
 0x54a   : > { %v7518_v56 = vpop.f32.mrf.mxu2  ;;  %v7600_v52 = vpop.f32.mrf.mxu3  ;;  %v7454_v30 = vadd.f32 %v20214_v63, %v7372_v59 }
 0x54b   : > { %v7535_v13 = vadd.f32 %v7518_v56, %v7451_v17 }
 0x54d   : > { %v7681_v46 = vpop.f32.mrf.mxu0  ;;  %v7763_v37 = vpop.f32.mrf.mxu1  ;;  %v7617_v53 = vadd.f32 %v7600_v52, %v7535_v13 }
 0x54e   : > { %v7700_v4 = vadd.f32 %v7681_v46, %v7616_v51 }
 0x550   : > { %v7782_v3 = vadd.f32 %v7763_v37, %v7700_v4 }
 0x552   : > { %v20226_v27 = vpop.f32.mrf.mxu2  ;;  %v7602_v31 = vpop.f32.mrf.mxu3 }
 0x553   : > { %v7536_v7 = vadd.f32 %v20226_v27, %v7452_v6 }
 0x555   : > { %v7684_v2 = vpop.f32.mrf.mxu0  ;;  %v7766_v32 = vpop.f32.mrf.mxu1  ;;  %v7618_v23 = vadd.f32 %v7602_v31, %v7536_v7 }
 0x556   : > { %v7701_v10 = vadd.f32 %v7684_v2, %v7617_v53 }
 0x558   : > { %v7783_v25 = vadd.f32 %v7766_v32, %v7701_v10 }
 0x55a   : > { %v20240_v0 = vpop.f32.mrf.mxu2  ;;  %v7605_v58 = vpop.f32.mrf.mxu3 }
 0x55b   : > { %v7537_v37 = vadd.f32 %v20240_v0, %v7453_v1  ;;  %v7287_v0 = vadd.f32 %v20219_v22, %v20192_v29 }
 0x55d   : > { %v7686_v44 = vpop.f32.mrf.mxu0  ;;  %v7768_v33 = vpop.f32.mrf.mxu1  ;;  %v7619_v14 = vadd.f32 %v7605_v58, %v7537_v37  ;;  %v7373_v51 = vadd.f32 %v20224_v20, %v7287_v0  ;;  %v7289_v20 = vadd.f32 %v20236_v12, %v20200_v35  ;;  %v14604_v37 = vmov 0  }
 0x55e   : > { %v7702_v27 = vadd.f32 %v7686_v44, %v7618_v23  ;;  %14456 = vset.pattern.permute.xlu0 %v14604_v37  ;;  %14457 = vset.pattern.permute.xlu1 %v14604_v37  ;;  %v14323_v37 = vld [vmem:[%s21155_s13] sm:$0xff] }
 0x55f   : > { %v7455_v29 = vadd.f32 %v20231_v57, %v7373_v51  ;;  %7909 = vperm.xlu0 %14456, %v7906_v43   ;;  %v14367_v43 = vld [vmem:[%s21155_s13 + $0x160] sm:$0xff] }
 0x560   : > { %v7784_v52 = vadd.f32 %v7768_v33, %v7702_v27 }
 0x562   : > { %v20250_v49 = vpop.f32.mrf.mxu2  ;;  %v7607_v2 = vpop.f32.mrf.mxu3 }
 0x565   : > { %v7689_v62 = vpop.f32.mrf.mxu0  ;;  %v7771_v36 = vpop.f32.mrf.mxu1 }
 0x56a   : > { %v20258_v39 = vpop.f32.mrf.mxu2  ;;  %v7610_v42 = vpop.f32.mrf.mxu3 }
 0x56b   : > { %v7539_v13 = vadd.f32 %v20258_v39, %v7455_v29  ;;  %v14354_v29 = vld [vmem:[%s21155_s13 + $0xf8] sm:$0xff] }
 0x56c   : > { %8534 = vmatpush.bf16.msrb.mxu2 %v14354_v29  ;;  %v14363_v29 = vld [vmem:[%s21155_s13 + $0x140] sm:$0xff] }
 0x56d   : > { %v7691_v24 = vpop.f32.mrf.mxu0  ;;  %v7773_v63 = vpop.f32.mrf.mxu1  ;;  %v7621_v53 = vadd.f32 %v7610_v42, %v7539_v13  ;;  %v14353_v42 = vld [vmem:[%s21155_s13 + $0xf0] sm:$0xff] }
 0x570   : > { %8535 = vmatpush.bf16.msrb.mxu2 %v14353_v42  ;;  %v14341_v42 = vld [vmem:[%s21155_s13 + $0x90] sm:$0xff] }
 0x572   : > { %v20261_v50 = vpop.f32.mrf.mxu2  ;;  %v7612_v39 = vpop.f32.mrf.mxu3 }
 0x575   : > { %v7694_v48 = vpop.f32.mrf.mxu0  ;;  %v7776_v57 = vpop.f32.mrf.mxu1 }
 0x576   : > { %v7705_v10 = vadd.f32 %v7694_v48, %v7621_v53  ;;  %v14328_v48 = vld [vmem:[%s21155_s13 + $0x28] sm:$0xff] }
 0x578   : > { %v7787_v33 = vadd.f32 %v7776_v57, %v7705_v10  ;;  %v14335_v57 = vld [vmem:[%s21155_s13 + $0x60] sm:$0xff] }
 0x57a   : > { %v7845_v26 = vpop.f32.mrf.mxu2 }
 0x57b   : > { %v7865_v28 = vadd.f32 %v7845_v26, %v7781_v40  ;;  %v7703_v40 = vadd.f32 %v7689_v62, %v7619_v14  ;;  %v7538_v26 = vadd.f32 %v20250_v49, %v7454_v30 }
 0x57d   : > { %v7877_v15 = vadd.f32 %v20271_v34, %v7865_v28  ;;  %v7785_v28 = vadd.f32 %v7771_v36, %v7703_v40  ;;  %v7620_v4 = vadd.f32 %v7607_v2, %v7538_v26 }
 0x57f   : > { %v20278_v38 = vmax.f32 %v7877_v15, 0.0  ;;  %v7704_v22 = vadd.f32 %v7691_v24, %v7620_v4  ;;  %v14329_v4 = vld [vmem:[%s21155_s13 + $0x30] sm:$0xff] }
 0x581   : > { %7897 = vst [vmem:[%s20283_s2] sm:$0xff] %v20278_v38  ;;  %v7786_v44 = vadd.f32 %v7773_v63, %v7704_v22  ;;  %v14370_v22 = vld [vmem:[%s21155_s13 + $0x178] sm:$0xff] }
 0x582   : > { %v7847_v47 = vpop.f32.mrf.mxu2  ;;  %8560 = vmatpush.bf16.msra.mxu0 %v14370_v22  ;;  %v14342_v22 = vld [vmem:[%s21155_s13 + $0x98] sm:$0xff] }
 0x583   : > { %v7866_v5 = vadd.f32 %v7847_v47, %v7782_v3  ;;  %v7374_v3 = vadd.f32 %v20238_v11, %v7289_v20  ;;  %v7696_v11 = vpop.f32.mrf.mxu0  ;;  %v14369_v20 = vld [vmem:[%s21155_s13 + $0x170] sm:$0xff] }
 0x585   : > { %v7878_v56 = vadd.f32 %v20271_v34, %v7866_v5  ;;  %v7456_v6 = vadd.f32 %v20245_v45, %v7374_v3  ;;  %v14336_v3 = vld [vmem:[%s21155_s13 + $0x68] sm:$0xff] }
 0x586   : > { %8561 = vmatpush.bf16.msra.mxu0 %v14369_v20  ;;  %v14357_v20 = vld [vmem:[%s21155_s13 + $0x110] sm:$0xff] }
 0x587   : > { %v20292_v18 = vmax.f32 %v7878_v56, 0.0  ;;  %v7540_v35 = vadd.f32 %v20261_v50, %v7456_v6 }
 0x589   : > { %v20297_v41 = vpack.c.bf16 %v20292_v18, %v20278_v38  ;;  %7898 = vst [vmem:[%s20283_s2 + $0x8] sm:$0xff] %v20292_v18  ;;  %v7622_v19 = vadd.f32 %v7612_v39, %v7540_v35  ;;  %v14334_v35 = vld [vmem:[%s21155_s13 + $0x58] sm:$0xff] }
 0x58a   : > { %v7850_v46 = vpop.f32.mrf.mxu2 }
 0x58b   : > { %v7867_v16 = vadd.f32 %v7850_v46, %v7783_v25  ;;  %8070 = vmatmul.bf16.vlgmr.msrb.gmra.mxu0 %v20297_v41  ;;  %v7706_v58 = vadd.f32 %v7696_v11, %v7622_v19  ;;  %v7778_v46 = vpop.f32.mrf.mxu1 }
 0x58d   : > { %v7879_v21 = vadd.f32 %v20271_v34, %v7867_v16  ;;  %v7788_v16 = vadd.f32 %v7778_v46, %v7706_v58  ;;  %v14605_v58 = vmov 0.0  }
 0x58f   : > { %v20307_v8 = vmax.f32 %v7879_v21, 0.0 }
 0x591   : > { %7899 = vst [vmem:[%s20283_s2 + $0x10] sm:$0xff] %v20307_v8 }
 0x592   : > { %v7852_v55 = vpop.f32.mrf.mxu2 }
 0x593   : > { %v7868_v60 = vadd.f32 %v7852_v55, %v7784_v52 }
 0x595   : > { %v7880_v61 = vadd.f32 %v20271_v34, %v7868_v60 }
 0x597   : > { %v20317_v9 = vmax.f32 %v7880_v61, 0.0 }
 0x599   : > { %7900 = vst [vmem:[%s20283_s2 + $0x18] sm:$0xff] %v20317_v9  ;;  %v7894_v32 = vpack.c.bf16 %v20317_v9, %v20307_v8 }
 0x59a   : > { %v7855_v17 = vpop.f32.mrf.mxu2 }
 0x59b   : > { %v7869_v15 = vadd.f32 %v7855_v17, %v7785_v28  ;;  %8075 = vmatmul.bf16.gmra.mxu0 %v7894_v32  ;;  %v14330_v28 = vld [vmem:[%s21155_s13 + $0x38] sm:$0xff] }
 0x59c   : > { %8495 = vmatpush.bf16.msrb.mxu1 %v14330_v28  ;;  %v14348_v28 = vld [vmem:[%s21155_s13 + $0xc8] sm:$0xff] }
 0x59d   : > { %v7881_v49 = vadd.f32 %v20271_v34, %v7869_v15  ;;  %v14337_v15 = vld [vmem:[%s21155_s13 + $0x70] sm:$0xff] }
 0x59f   : > { %v7889_v31 = vmax.f32 %v7881_v49, 0.0 }
 0x5a0   : > { %8496 = vmatpush.bf16.msrb.mxu1 %v14329_v4  ;;  %v14347_v4 = vld [vmem:[%s21155_s13 + $0xc0] sm:$0xff] }
 0x5a1   : > { %7901 = vst [vmem:[%s20283_s2 + $0x20] sm:$0xff] %v7889_v31 }
 0x5a2   : > { %v7857_v47 = vpop.f32.mrf.mxu2 }
 0x5a3   : > { %v7870_v5 = vadd.f32 %v7857_v47, %v7786_v44  ;;  %v7925_v44 = vlaneseq }
 0x5a4   : > { %8497 = vmatpush.bf16.msrb.mxu1 %v14328_v48  ;;  %v14356_v48 = vld [vmem:[%s21155_s13 + $0x108] sm:$0xff] }
 0x5a5   : > { %v7882_v56 = vadd.f32 %v20271_v34, %v7870_v5  ;;  %v14327_v5 = vld [vmem:[%s21155_s13 + $0x20] sm:$0xff]  ;;  %v20416_v6 = vshrl.u32 %v7925_v44, 7 }
 0x5a6   : > { %v14339_v44 = vld [vmem:[%s21155_s13 + $0x80] sm:$0xff] }
 0x5a7   : > { %v7890_v12 = vmax.f32 %v7882_v56, 0.0  ;;  %v14326_v56 = vld [vmem:[%s21155_s13 + $0x18] sm:$0xff]  ;;  %vm8092_vm10 = vcmp.eq.s32.totalorder %v20416_v6, 0  ;;  %vm8095_vm12 = vcmp.eq.s32.totalorder %v20416_v6, 1  ;;  %vm8101_vm14 = vcmp.eq.s32.totalorder %v20416_v6, 3 }
 0x5a8   : > { %8498 = vmatpush.bf16.msrb.mxu1 %v14327_v5  ;;  %vm8093_vm0 = vmpackc.low %vm8092_vm10, %vm8092_vm10  ;;  %vm8107_vm1 = vcmp.eq.s32.totalorder %v20416_v6, 5 }
 0x5a9   : > { %7902 = vst [vmem:[%s20283_s2 + $0x28] sm:$0xff] %v7890_v12  ;;  %v7895_v54 = vpack.c.bf16 %v7890_v12, %v7889_v31 }
 0x5aa   : > { %v7860_v7 = vpop.f32.mrf.mxu2 }
 0x5ab   : > { %v7871_v25 = vadd.f32 %v7860_v7, %v7787_v33  ;;  %8080 = vmatmul.bf16.gmra.mxu0 %v7895_v54 }
 0x5ac   : > { %8499 = vmatpush.bf16.msrb.mxu1 %v14326_v56 }
 0x5ad   : > { %v7883_v45 = vadd.f32 %v20271_v34, %v7871_v25 }
 0x5af   : > { %v7891_v23 = vmax.f32 %v7883_v45, 0.0 }
 0x5b1   : > { %7903 = vst [vmem:[%s20283_s2 + $0x30] sm:$0xff] %v7891_v23 }
 0x5b2   : > { %v7862_v50 = vpop.f32.mrf.mxu2 }
 0x5b3   : > { %v7872_v62 = vadd.f32 %v7862_v50, %v7788_v16  ;;  %v14333_v16 = vld [vmem:[%s21155_s13 + $0x50] sm:$0xff]  ;;  %v14352_v50 = vld [vmem:[%s21155_s13 + $0xe8] sm:$0xff] }
 0x5b4   : > { %8536 = vmatpush.bf16.msrb.mxu2 %v14352_v50 }
 0x5b5   : > { %v7884_v1 = vadd.f32 %v20271_v34, %v7872_v62  ;;  %v7905_v34 = vld [vmem:[%s21153_s9] sm:$0x7]  ;;  %v14368_v62 = vld [vmem:[%s21155_s13 + $0x168] sm:$0xff] }
 0x5b6   : > { %8562 = vmatpush.bf16.msra.mxu0 %v14368_v62 }
 0x5b7   : > { %v7892_v27 = vmax.f32 %v7884_v1, 0.0  ;;  %v14324_v1 = vld [vmem:[%s21155_s13 + $0x8] sm:$0xff] }
 0x5b9   : > { %7904 = vst [vmem:[%s20283_s2 + $0x38] sm:$0xff] %v7892_v27  ;;  %v7896_v21 = vpack.c.bf16 %v7892_v27, %v7891_v23 }
 0x5ba   : > { %8563 = vmatpush.bf16.msra.mxu0 %v14367_v43 }
 0x5bb   : > { %7916 = vmatpush.bf16.xpose.msra.mxu3 %v7896_v21  ;;  %8085 = vmatmul.bf16.gmra.mxu0 %v7896_v21  ;;  %v14351_v21 = vld [vmem:[%s21155_s13 + $0xe0] sm:$0xff] }
 0x5bc   : > { %8537 = vmatpush.bf16.msrb.mxu2 %v14351_v21 }
 0x5c3   : > { %7917 = vmatpush.bf16.xpose.msra.mxu3 %v7895_v54 }
 0x5cb   : > { %7918 = vmatpush.bf16.xpose.msra.mxu3 %v7894_v32  ;;  %v14338_v32 = vld [vmem:[%s21155_s13 + $0x78] sm:$0xff] }
 0x5d1   : > { %v7910_v26 = vpop.permute.xlu0 %7909 }
 0x5d3   : > { %7919 = vmatpush.bf16.xpose.msra.mxu3 %v20297_v41  ;;  %v20353_v41 = vld [vmem:[%s21154_s12] ss:$0 sm:$0xff] }
 0x5da   : > { %7920 = vmatmul.bf16.vlgmr.msra.gmra.mxu3 %v7905_v34  ;;  %v14331_v34 = vld [vmem:[%s21155_s13 + $0x40] sm:$0xff] }
 0x5db   : > { %7965 = vmatpush.msrb.mxu3 %v7892_v27  ;;  %v14332_v27 = vld [vmem:[%s21155_s13 + $0x48] sm:$0xff] }
 0x5dd   : > { %7966 = vmatpush.msrb.mxu3 %v7891_v23  ;;  %v14325_v23 = vld [vmem:[%s21155_s13 + $0x10] sm:$0xff] }
 0x5de   : > { %8500 = vmatpush.bf16.msrb.mxu1 %v14325_v23 }
 0x5df   : > { %7967 = vmatpush.msrb.mxu3 %v7890_v12 }
 0x5e1   : > { %7968 = vmatpush.msrb.mxu3 %v7889_v31 }
 0x5e2   : > { %8501 = vmatpush.bf16.msrb.mxu1 %v14324_v1 }
 0x5e3   : > { %7969 = vmatpush.msrb.mxu3 %v20317_v9 }
 0x5e5   : > { %7970 = vmatpush.msrb.mxu3 %v20307_v8 }
 0x5e6   : > { %8502 = vmatpush.bf16.msrb.mxu1 %v14323_v37 }
 0x5e7   : > { %7971 = vmatpush.msrb.mxu3 %v20292_v18 }
 0x5e9   : > { %7972 = vmatpush.msrb.mxu3 %v20278_v38 }
 0x5eb   : > { %8508 = vmatpush.bf16.msra.mxu3 %v14338_v32  ;;  %v14360_v32 = vld [vmem:[%s21155_s13 + $0x128] sm:$0xff] }
 0x5ef   : > { %8509 = vmatpush.bf16.msra.mxu3 %v14337_v15  ;;  %v14359_v15 = vld [vmem:[%s21155_s13 + $0x120] sm:$0xff] }
 0x5f3   : > { %8510 = vmatpush.bf16.msra.mxu3 %v14336_v3 }
 0x5f7   : > { %8511 = vmatpush.bf16.msra.mxu3 %v14335_v57 }
 0x5fb   : > { %8512 = vmatpush.bf16.msra.mxu3 %v14334_v35 }
 0x5ff   : > { %8513 = vmatpush.bf16.msra.mxu3 %v14333_v16 }
 0x603   : > { %8514 = vmatpush.bf16.msra.mxu3 %v14332_v27 }
 0x607   : > { %8515 = vmatpush.bf16.msra.mxu3 %v14331_v34 }
 0x608   : > { %v8071_v36 = vpop.f32.mrf.mxu0 }
 0x609   : > { %v20356_v52 = vadd.f32 %v20353_v41, %v8071_v36  ;;  %v14346_v36 = vld [vmem:[%s21155_s13 + $0xb8] sm:$0xff] }
 0x60a   : > { %8521 = vmatpush.bf16.msra.mxu1 %v14346_v36  ;;  %v8206_v36 = vld [vmem:[%s21156_s14] sm:$0x3f] }
 0x610   : > { %v8073_v59 = vpop.f32.mrf.mxu0 }
 0x611   : > { %v20359_v55 = vadd.f32 %v20353_v41, %v8073_v59  ;;  %v14350_v59 = vld [vmem:[%s21155_s13 + $0xd8] sm:$0xff] }
 0x612   : > { %8538 = vmatpush.bf16.msrb.mxu2 %v14350_v59 }
 0x613   : > { %v8574_v8 = vpack.c.bf16 %v20359_v55, %v20356_v52 }
 0x618   : > { %v8076_v14 = vpop.f32.mrf.mxu0 }
 0x619   : > { %v20364_v38 = vadd.f32 %v20353_v41, %v8076_v14  ;;  %v14362_v14 = vld [vmem:[%s21155_s13 + $0x138] sm:$0xff] }
 0x620   : > { %v8078_v18 = vpop.f32.mrf.mxu0 }
 0x621   : > { %v20367_v60 = vadd.f32 %v20353_v41, %v8078_v18  ;;  %v14366_v18 = vld [vmem:[%s21155_s13 + $0x158] sm:$0xff] }
 0x622   : > { %8564 = vmatpush.bf16.msra.mxu0 %v14366_v18 }
 0x623   : > { %v8575_v2 = vpack.c.bf16 %v20367_v60, %v20364_v38 }
 0x628   : > { %v8081_v30 = vpop.f32.mrf.mxu0 }
 0x629   : > { %v20372_v61 = vadd.f32 %v20353_v41, %v8081_v30  ;;  %v14345_v30 = vld [vmem:[%s21155_s13 + $0xb0] sm:$0xff] }
 0x62a   : > { %8522 = vmatpush.bf16.msra.mxu1 %v14345_v30 }
 0x630   : > { %v8083_v40 = vpop.f32.mrf.mxu0 }
 0x631   : > { %v20375_v24 = vadd.f32 %v20353_v41, %v8083_v40  ;;  %v14349_v40 = vld [vmem:[%s21155_s13 + $0xd0] sm:$0xff] }
 0x632   : > { %8539 = vmatpush.bf16.msrb.mxu2 %v14349_v40 }
 0x633   : > { %v8576_v0 = vpack.c.bf16 %v20375_v24, %v20372_v61 }
 0x636   : > { %8540 = vmatpush.bf16.msrb.mxu2 %v14348_v28 }
 0x638   : > { %v8086_v50 = vpop.f32.mrf.mxu0 }
 0x63a   : > { %8541 = vmatpush.bf16.msrb.mxu2 %v14347_v4 }
 0x640   : > { %v8088_v62 = vpop.f32.mrf.mxu0 }
 0x641   : > { %v8089_v4 = vadd.f32 %v20353_v41, %v8088_v62 }
 0x65d   : > { %v7921_v9 = vpop.f32.mrf.mxu3 }
 0x65e   : > { %v7922_v51 = vadd.f32 %v7921_v9, %v7910_v26  ;;  %v14361_v26 = vld [vmem:[%s21155_s13 + $0x130] sm:$0xff] }
 0x65f   : > { %v14365_v9 = vld [vmem:[%s21155_s13 + $0x150] sm:$0xff] }
 0x660   : > { %v7928_v63 = vsel %vm7927_vm2, %v7922_v51, -inf  ;;  %8565 = vmatpush.bf16.msra.mxu0 %v14365_v9 }
 0x661   : > { %v7929_v17 = vrot.slane %v7928_v63, 4 }
 0x663   : > { %v7930_v49 = vmax.f32 %v7928_v63, %v7929_v17  ;;  %v14364_v63 = vld [vmem:[%s21155_s13 + $0x148] sm:$0xff]  ;;  %v14343_v17 = vld [vmem:[%s21155_s13 + $0xa0] sm:$0xff] }
 0x664   : > { %8566 = vmatpush.bf16.msra.mxu0 %v14364_v63 }
 0x665   : > { %v7931_v13 = vrot.slane %v7930_v49, 2  ;;  %v7923_v31 = vpop.f32.mrf.mxu3 }
 0x667   : > { %v7932_v47 = vmax.f32 %v7930_v49, %v7931_v13  ;;  %v14358_v49 = vld [vmem:[%s21155_s13 + $0x118] sm:$0xff]  ;;  %v14340_v13 = vld [vmem:[%s21155_s13 + $0x88] sm:$0xff] }
 0x668   : > { %8567 = vmatpush.bf16.msra.mxu0 %v14363_v29 }
 0x669   : > { %v7933_v53 = vrot.slane %v7932_v47, 1 }
 0x66b   : > { %v7934_v10 = vmax.f32 %v7932_v47, %v7933_v53  ;;  %v14355_v47 = vld [vmem:[%s21155_s13 + $0x100] sm:$0xff] }
 0x66d   : > { %vm7935_vm3 = vcmp.eq.f32.partialorder %v7922_v51, %v7934_v10  ;;  %v14344_v51 = vld [vmem:[%s21155_s13 + $0xa8] sm:$0xff] }
 0x66e   : > { %v7936_v12 = vsel %vm7935_vm3, %v20416_v6, 6  ;;  %8523 = vmatpush.bf16.msra.mxu1 %v14344_v51  ;;  %vm8096_vm3 = vmpackc.low %vm8095_vm12, %vm8095_vm12 }
 0x66f   : > { %v7937_v39 = vsel %vm7927_vm2, %v7936_v12, 2147483647 }
 0x670   : > { %v7938_v33 = vrot.slane %v7937_v39, 4 }
 0x672   : > { %vm7939_vm4 = vcmp.lt.s32.totalorder %v7937_v39, %v7938_v33  ;;  %8524 = vmatpush.bf16.msra.mxu1 %v14343_v17 }
 0x673   : > { %v7940_v54 = vsel %vm7939_vm4, %v7937_v39, %v7938_v33  ;;  %vm8102_vm4 = vmpackc.low %vm8101_vm14, %vm8101_vm14 }
 0x674   : > { %v7941_v11 = vrot.slane %v7940_v54, 2 }
 0x676   : > { %vm7942_vm5 = vcmp.lt.s32.totalorder %v7940_v54, %v7941_v11  ;;  %8525 = vmatpush.bf16.msra.mxu1 %v14342_v22 }
 0x677   : > { %v7943_v7 = vsel %vm7942_vm5, %v7940_v54, %v7941_v11  ;;  %vm8108_vm5 = vmpackc.low %vm8107_vm1, %vm8107_vm1 }
 0x678   : > { %v7944_v19 = vrot.slane %v7943_v7, 1 }
 0x67a   : > { %vm7945_vm6 = vcmp.lt.s32.totalorder %v7943_v7, %v7944_v19  ;;  %8526 = vmatpush.bf16.msra.mxu1 %v14341_v42 }
 0x67b   : > { %v7946_v25 = vsel %vm7945_vm6, %v7943_v7, %v7944_v19  ;;  %vm8098_vm6 = vcmp.eq.s32.totalorder %v20416_v6, 2 }
 0x67c   : > { %vm7947_vm8 = vcmp.eq.s32.totalorder %v20416_v6, %v7946_v25 }
 0x67d   : > { %v13097_v45 = vsel %vm7947_vm8, 1.0, %v14605_v58  ;;  %vm8104_vm8 = vcmp.eq.s32.totalorder %v20416_v6, 4 }
 0x67e   : > { %v7950_v46 = vsel %vm7927_vm2, %v13097_v45, 0.0  ;;  %13098 = vmatmul.msk.f32.vlgmr.msrb.gmra.mxu3 %vm7953_vm7, %v13097_v45  ;;  %8527 = vmatpush.bf16.msra.mxu1 %v14340_v13  ;;  %vm8105_vm10 = vmpackc.low %vm8104_vm8, %vm8104_vm8 }
 0x67f   : > { %7951 = vadd.xlane.f32.xlu0 %v7950_v46  ;;  %8547 = vmatpush.bf16.msrb.mxu3 %v14362_v14 }
 0x682   : > { %8528 = vmatpush.bf16.msra.mxu1 %v14339_v44 }
 0x683   : > { %8548 = vmatpush.bf16.msrb.mxu3 %v14361_v26 }
 0x687   : > { %8549 = vmatpush.bf16.msrb.mxu3 %v14360_v32 }
 0x68b   : > { %8550 = vmatpush.bf16.msrb.mxu3 %v14359_v15  ;;  %v8087_v15 = vadd.f32 %v20353_v41, %v8086_v50 }
 0x68d   : > { %v8577_v29 = vpack.c.bf16 %v8089_v4, %v8087_v15 }
 0x68f   : > { %8551 = vmatpush.bf16.msrb.mxu3 %v14358_v49 }
 0x693   : > { %8552 = vmatpush.bf16.msrb.mxu3 %v14357_v20 }
 0x697   : > { %8553 = vmatpush.bf16.msrb.mxu3 %v14356_v48 }
 0x69b   : > { %8554 = vmatpush.bf16.msrb.mxu3 %v14355_v47 }
 0x6f2   : > { %v7952_v31 = vpop.xlane.xlu0 %7951 }
 0x6f3   : > { %v7977_v3 = vadd.f32 1e-05, %v7952_v31 }
 0x6f5   : > { %14462 = vrcp.f32 %v7977_v3  ;;  %v7989_v10 = vand.u32 2147483648, %v7977_v3  ;;  %v7987_v35 = vand.u32 2147483647, %v7977_v3  ;;  %vm7983_vm11 = vweird.f32 %v7977_v3 }
 0x6f7   : > { %v7990_v39 = vor.u32 1.1754944e-38, %v7989_v10  ;;  %vm7988_vm15 = vcmp.eq.f32.partialorder %v7987_v35, 8.507059e+37 }
 0x6fb   : > { %v14463_v53 = vpop.eup %14462 }
 0x6fc   : > { %v7979_v5 = vmul.f32 %v14463_v53, %v7977_v3  ;;  %vm7984_vm9 = vweird.f32 %v14463_v53 }
 0x6fd   : > { %vm7985_vm13 = vmor %vm7983_vm11, %vm7984_vm9  ;;  %vm8608_vm11 = vcmask 48128  }
 0x6fe   : > { %v7980_v57 = vsub.f32 1.0, %v7979_v5  ;;  %vm8099_vm9 = vmpackc.low %vm8098_vm6, %vm8098_vm6 }
 0x700   : > { %v7981_v56 = vmul.f32 %v14463_v53, %v7980_v57 }
 0x701   : > { %v7974_v54 = vpop.f32.mrf.mxu3 }
 0x702   : > { %v7982_v12 = vadd.f32 %v14463_v53, %v7981_v56 }
 0x704   : > { %v7986_v33 = vsel %vm7985_vm13, %v14463_v53, %v7982_v12 }
 0x705   : > { %v7991_v11 = vsel %vm7988_vm15, %v7990_v39, %v7986_v33 }
 0x706   : > { %v7992_v7 = vmul.f32 %v7991_v11, %v7974_v54 }
 0x708   : > { %7993 = vst [vmem:[%s809_s30] sm:$0x3f] %v7992_v7  ;;  %v8091_v19 = vpack.c.bf16 %v7992_v7, %v7992_v7  ;;  %s824_s30 = scalar_lea.vmem %s21092_s24, %s20563_s8 }
 0x70a   : > { %v8094_v25 = vsel %vm8093_vm0, %v8091_v19, 0  ;;  %v8097_v58 = vsel %vm8096_vm3, %v8091_v19, 0  ;;  %v8103_v45 = vsel %vm8102_vm4, %v8091_v19, 0  ;;  %v8109_v46 = vsel %vm8108_vm5, %v8091_v19, 0 }
 0x70b   : > { %8503 = vmatmul.bf16.vlgmr.msrb.gmra.mxu1 %v8094_v25  ;;  %8516 = vmatmul.bf16.vlgmr.msra.gmra.mxu3 %v8097_v58  ;;  %v8100_v23 = vsel %vm8099_vm9, %v8091_v19, 0  ;;  %v8106_v16 = vsel %vm8105_vm10, %v8091_v19, 0 }
 0x70c   : > { %8542 = vmatmul.bf16.vlgmr.msrb.gmra.mxu2 %v8103_v45  ;;  %8568 = vmatmul.bf16.vlgmr.msra.gmra.mxu0 %v8109_v46 }
 0x71b   : > { %8529 = vmatmul.bf16.vlgmr.msra.gmra.mxu1 %v8100_v23  ;;  %8555 = vmatmul.bf16.vlgmr.msrb.gmra.mxu3 %v8106_v16 }
 0x788   : > { %v8504_v1 = vpop.f32.mrf.mxu1 }
 0x789   : > { %v8569_v27 = vpop.f32.mrf.mxu0  ;;  %v8505_v6 = vadd.f32 %v8504_v1, %v8206_v36 }
 0x78e   : > { %v8517_v21 = vpop.f32.mrf.mxu3 }
 0x78f   : > { %v8543_v43 = vpop.f32.mrf.mxu2  ;;  %v8518_v14 = vadd.f32 %v8517_v21, %v8505_v6 }
 0x790   : > { %v8506_v37 = vpop.f32.mrf.mxu1 }
 0x791   : > { %v8571_v34 = vpop.f32.mrf.mxu0 }
 0x796   : > { %v8519_v59 = vpop.f32.mrf.mxu3 }
 0x797   : > { %v8545_v18 = vpop.f32.mrf.mxu2 }
 0x798   : > { %v8530_v30 = vpop.f32.mrf.mxu1 }
 0x799   : > { %v8531_v40 = vadd.f32 %v8530_v30, %v8518_v14 }
 0x79b   : > { %v8544_v26 = vadd.f32 %v8543_v43, %v8531_v40 }
 0x79e   : > { %v8556_v9 = vpop.f32.mrf.mxu3 }
 0x79f   : > { %v8557_v51 = vadd.f32 %v8556_v9, %v8544_v26 }
 0x7a0   : > { %v8532_v28 = vpop.f32.mrf.mxu1 }
 0x7a1   : > { %v8570_v32 = vadd.f32 %v8569_v27, %v8557_v51 }
 0x7a3   : > { %8573 = vst [vmem:[%s805_s27] sm:$0x3f] %v8570_v32  ;;  %v8578_v63 = vpack.c.bf16 %v8570_v32, %v8570_v32  ;;  %s21169_s27 = sshll.u32 %s20265_s5, 6 }
 0x7a4   : > { %s20752_s7 = scalar_lea.vmem [#allocation4], %s21169_s27 }
 0x7a5   : > { %8586 = vmatpush.bf16.xpose.msrb.mxu1 %v8578_v63 }
 0x7a6   : > { %v8558_v17 = vpop.f32.mrf.mxu3 }
 0x7ac   : > { %8587 = vmatmul.bf16.vlgmr.msrb.gmra.mxu1 %v8574_v8 }
 0x7bc   : > { %8592 = vmatmul.bf16.gmra.mxu1 %v8575_v2 }
 0x7cc   : > { %8597 = vmatmul.bf16.gmra.mxu1 %v8576_v0 }
 0x7dc   : > { %8602 = vmatmul.bf16.gmra.mxu1 %v8577_v29 }
 0x829   : > { %v8588_v52 = vpop.f32.mrf.mxu1 }
 0x82a   : > { %8609 = vst.msk [vmem:[%s824_s30] sm:$0xff] %vm8608_vm11, %v8588_v52  ;;  %v8617_v57 = vmul.f32 0.16666667, %v8588_v52 }
 0x82c   : > { %v8625_v10 = vsel %vm8608_vm11, %v8617_v57, -inf }
 0x831   : > { %v8590_v55 = vpop.f32.mrf.mxu1 }
 0x832   : > { %8610 = vst.msk [vmem:[%s824_s30 + $0x8] sm:$0xff] %vm8608_vm11, %v8590_v55  ;;  %v8618_v31 = vmul.f32 0.16666667, %v8590_v55 }
 0x834   : > { %v8628_v44 = vsel %vm8608_vm11, %v8618_v31, -inf }
 0x839   : > { %v8593_v8 = vpop.f32.mrf.mxu1 }
 0x83a   : > { %8611 = vst.msk [vmem:[%s824_s30 + $0x10] sm:$0xff] %vm8608_vm11, %v8593_v8  ;;  %v8619_v53 = vmul.f32 0.16666667, %v8593_v8 }
 0x83c   : > { %v8631_v5 = vsel %vm8608_vm11, %v8619_v53, -inf }
 0x841   : > { %v8595_v41 = vpop.f32.mrf.mxu1 }
 0x842   : > { %8612 = vst.msk [vmem:[%s824_s30 + $0x18] sm:$0xff] %vm8608_vm11, %v8595_v41  ;;  %v8620_v22 = vmul.f32 0.16666667, %v8595_v41 }
 0x844   : > { %v8634_v20 = vsel %vm8608_vm11, %v8620_v22, -inf }
 0x849   : > { %v8598_v38 = vpop.f32.mrf.mxu1 }
 0x84a   : > { %8613 = vst.msk [vmem:[%s824_s30 + $0x20] sm:$0xff] %vm8608_vm11, %v8598_v38  ;;  %v8621_v60 = vmul.f32 0.16666667, %v8598_v38 }
 0x84c   : > { %v8637_v2 = vsel %vm8608_vm11, %v8621_v60, -inf }
 0x84d   : > { %8638 = vmax.xlane.f32.xlu2 %v8637_v2 }
 0x851   : > { %v8600_v61 = vpop.f32.mrf.mxu1 }
 0x852   : > { %8614 = vst.msk [vmem:[%s824_s30 + $0x28] sm:$0xff] %vm8608_vm11, %v8600_v61  ;;  %v8622_v24 = vmul.f32 0.16666667, %v8600_v61 }
 0x854   : > { %v8640_v0 = vsel %vm8608_vm11, %v8622_v24, -inf }
 0x855   : > { %8641 = vmax.xlane.f32.xlu2 %v8640_v0 }
 0x859   : > { %v8603_v49 = vpop.f32.mrf.mxu1 }
 0x85a   : > { %8615 = vst.msk [vmem:[%s824_s30 + $0x30] sm:$0xff] %vm8608_vm11, %v8603_v49  ;;  %v8623_v42 = vmul.f32 0.16666667, %v8603_v49 }
 0x85c   : > { %v8643_v13 = vsel %vm8608_vm11, %v8623_v42, -inf }
 0x85d   : > { %8635 = vmax.xlane.f32.xlu2 %v8634_v20  ;;  %8644 = vmax.xlane.f32.xlu1 %v8643_v13 }
 0x861   : > { %v8605_v48 = vpop.f32.mrf.mxu1 }
 0x862   : > { %8616 = vst.msk [vmem:[%s824_s30 + $0x38] sm:$0xff] %vm8608_vm11, %v8605_v48  ;;  %v8624_v3 = vmul.f32 0.16666667, %v8605_v48  ;;  %s9306_s30 = scalar_lea.hbm %s21170_s1, %s14403_s20 }
 0x864   : > { %v8646_v47 = vsel %vm8608_vm11, %v8624_v3, -inf }
 0x865   : > { %8629 = vmax.xlane.f32.xlu2 %v8628_v44  ;;  %8647 = vmax.xlane.f32.xlu1 %v8646_v47 }
 0x86d   : > { %8632 = vmax.xlane.f32.xlu1 %v8631_v5 }
 0x875   : > { %8626 = vmax.xlane.f32.xlu1 %v8625_v10 }
 0x8c0   : > { %v8639_v56 = vpop.xlane.xlu2 %8638 }
 0x8c1   : > { %v8653_v54 = vsub.f32 %v8621_v60, %v8639_v56 }
 0x8c3   : > { %v8665_v7 = vmul.f32 1.442695, %v8653_v54 }
 0x8c8   : > { %v8642_v35 = vpop.xlane.xlu2 %8641 }
 0x8c9   : > { %v8654_v46 = vsub.f32 %v8622_v24, %v8642_v35 }
 0x8cb   : > { %v8667_v16 = vmul.f32 1.442695, %v8654_v46 }
 0x8d0   : > { %v8645_v12 = vpop.xlane.xlu1 %8644  ;;  %v8636_v11 = vpop.xlane.xlu2 %8635 }
 0x8d1   : > { %v8655_v39 = vsub.f32 %v8623_v42, %v8645_v12  ;;  %v8652_v21 = vsub.f32 %v8620_v22, %v8636_v11 }
 0x8d3   : > { %v8669_v33 = vmul.f32 1.442695, %v8655_v39  ;;  %v8663_v59 = vmul.f32 1.442695, %v8652_v21 }
 0x8d5   : > { %14464 = vpow2.f32 %v8669_v33 }
 0x8d6   : > { %14466 = vpow2.f32 %v8665_v7 }
 0x8d8   : > { %v8648_v19 = vpop.xlane.xlu1 %8647  ;;  %v8630_v62 = vpop.xlane.xlu2 %8629 }
 0x8d9   : > { %v8656_v25 = vsub.f32 %v8624_v3, %v8648_v19  ;;  %v8650_v34 = vsub.f32 %v8618_v31, %v8630_v62 }
 0x8db   : > { %v8671_v58 = vmul.f32 1.442695, %v8656_v25  ;;  %v20585_v45 = vpop.eup %14464  ;;  %v8659_v14 = vmul.f32 1.442695, %v8650_v34 }
 0x8dc   : > { %v8691_v23 = vsel %vm8608_vm11, %v20585_v45, 0.0  ;;  %v20589_v27 = vpop.eup %14466 }
 0x8dd   : > { %14468 = vpow2.f32 %v8671_v58  ;;  %8692 = vadd.xlane.f32.xlu1 %v8691_v23  ;;  %v8685_v36 = vsel %vm8608_vm11, %v20589_v27, 0.0 }
 0x8de   : > { %14470 = vpow2.f32 %v8667_v16 }
 0x8e0   : > { %v8633_v50 = vpop.xlane.xlu1 %8632 }
 0x8e1   : > { %v8651_v1 = vsub.f32 %v8619_v53, %v8633_v50 }
 0x8e3   : > { %v8661_v43 = vmul.f32 1.442695, %v8651_v1  ;;  %v20591_v37 = vpop.eup %14468 }
 0x8e4   : > { %v8694_v6 = vsel %vm8608_vm11, %v20591_v37, 0.0  ;;  %v20597_v40 = vpop.eup %14470 }
 0x8e5   : > { %14472 = vpow2.f32 %v8661_v43  ;;  %8686 = vadd.xlane.f32.xlu1 %v8685_v36  ;;  %8695 = vadd.xlane.f32.xlu2 %v8694_v6  ;;  %v8688_v28 = vsel %vm8608_vm11, %v20597_v40, 0.0 }
 0x8e6   : > { %14474 = vpow2.f32 %v8663_v59 }
 0x8e7   : > { %14476 = vpow2.f32 %v8659_v14 }
 0x8e8   : > { %v8627_v18 = vpop.xlane.xlu1 %8626 }
 0x8e9   : > { %v8649_v30 = vsub.f32 %v8617_v57, %v8627_v18 }
 0x8eb   : > { %v20599_v26 = vpop.eup %14472  ;;  %v8657_v9 = vmul.f32 1.442695, %v8649_v30 }
 0x8ec   : > { %v8679_v51 = vsel %vm8608_vm11, %v20599_v26, 0.0  ;;  %v20605_v32 = vpop.eup %14474 }
 0x8ed   : > { %14478 = vpow2.f32 %v8657_v9  ;;  %8689 = vadd.xlane.f32.xlu2 %v8688_v28  ;;  %8680 = vadd.xlane.f32.xlu1 %v8679_v51  ;;  %v20607_v63 = vpop.eup %14476  ;;  %v8682_v15 = vsel %vm8608_vm11, %v20605_v32, 0.0 }
 0x8ee   : > { %v8676_v29 = vsel %vm8608_vm11, %v20607_v63, 0.0 }
 0x8f3   : > { %v20609_v17 = vpop.eup %14478 }
 0x8f4   : > { %v8673_v4 = vsel %vm8608_vm11, %v20609_v17, 0.0 }
 0x8f5   : > { %8674 = vadd.xlane.f32.xlu0 %v8673_v4  ;;  %8683 = vadd.xlane.f32.xlu2 %v8682_v15 }
 0x8f6   : > { %8677 = vadd.xlane.f32.xlu1 %v8676_v29 }
 0x950   : > { %v8693_v52 = vpop.xlane.xlu1 %8692 }
 0x951   : > { %14480 = vrcp.f32 %v8693_v52  ;;  %v8796_v2 = vand.u32 2147483647, %v8693_v52  ;;  %v8798_v24 = vand.u32 2147483648, %v8693_v52  ;;  %vm8792_vm13 = vweird.f32 %v8693_v52 }
 0x953   : > { %vm8797_vm15 = vcmp.eq.f32.partialorder %v8796_v2, 8.507059e+37  ;;  %v8799_v3 = vor.u32 1.1754944e-38, %v8798_v24 }
 0x957   : > { %v14481_v55 = vpop.eup %14480 }
 0x958   : > { %v8788_v8 = vmul.f32 %v14481_v55, %v8693_v52  ;;  %v8696_v41 = vpop.xlane.xlu2 %8695  ;;  %v8687_v38 = vpop.xlane.xlu1 %8686  ;;  %vm8793_vm12 = vweird.f32 %v14481_v55 }
 0x959   : > { %14482 = vrcp.f32 %v8696_v41  ;;  %vm20617_vm14 = vmor %vm8792_vm13, %vm8793_vm12  ;;  %v8811_v44 = vand.u32 2147483647, %v8696_v41  ;;  %v8813_v53 = vand.u32 2147483648, %v8696_v41  ;;  %v8766_v5 = vand.u32 2147483647, %v8687_v38 }
 0x95a   : > { %v8789_v60 = vsub.f32 1.0, %v8788_v8  ;;  %14484 = vrcp.f32 %v8687_v38  ;;  %v8768_v56 = vand.u32 2147483648, %v8687_v38  ;;  %vm8807_vm0 = vweird.f32 %v8696_v41 }
 0x95b   : > { %vm8762_vm1 = vweird.f32 %v8687_v38  ;;  %vm20634_vm4 = vcmp.eq.f32.partialorder %v8811_v44, 8.507059e+37  ;;  %v8814_v7 = vor.u32 1.1754944e-38, %v8813_v53  ;;  %vm20638_vm6 = vcmp.eq.f32.partialorder %v8766_v5, 8.507059e+37 }
 0x95c   : > { %v8790_v61 = vmul.f32 %v14481_v55, %v8789_v60  ;;  %v8769_v58 = vor.u32 1.1754944e-38, %v8768_v56 }
 0x95e   : > { %v8791_v0 = vadd.f32 %v14481_v55, %v8790_v61 }
 0x95f   : > { %v14483_v22 = vpop.eup %14482 }
 0x960   : > { %v14485_v42 = vpop.eup %14484  ;;  %v8803_v20 = vmul.f32 %v14483_v22, %v8696_v41  ;;  %v20621_v13 = vpop.xlane.xlu2 %8689  ;;  %v8795_v48 = vsel %vm20617_vm14, %v14481_v55, %v8791_v0  ;;  %vm8808_vm3 = vweird.f32 %v14483_v22 }
 0x961   : > { %v20623_v31 = vpop.xlane.xlu1 %8680  ;;  %v8758_v47 = vmul.f32 %v14485_v42, %v8687_v38  ;;  %14486 = vrcp.f32 %v20621_v13  ;;  %v8800_v10 = vsel %vm8797_vm15, %v8799_v3, %v8795_v48  ;;  %vm8763_vm5 = vweird.f32 %v14485_v42  ;;  %vm20647_vm10 = vmor %vm8807_vm0, %vm8808_vm3 }
 0x962   : > { %v8804_v57 = vsub.f32 1.0, %v8803_v20  ;;  %14488 = vrcp.f32 %v20623_v31  ;;  %v20630_v12 = vmul.f32 %v20585_v45, %v8800_v10  ;;  %vm8777_vm8 = vweird.f32 %v20621_v13  ;;  %vm8764_vm12 = vmor %vm8762_vm1, %vm8763_vm5 }
 0x963   : > { %v8759_v35 = vsub.f32 1.0, %v8758_v47  ;;  %vm8732_vm9 = vweird.f32 %v20623_v31  ;;  %v8781_v50 = vand.u32 2147483647, %v20621_v13  ;;  %v8783_v36 = vand.u32 2147483648, %v20621_v13 }
 0x964   : > { %v8805_v39 = vmul.f32 %v14483_v22, %v8804_v57  ;;  %v8835_v54 = vsel %vm8608_vm11, %v20630_v12, -inf  ;;  %v8736_v59 = vand.u32 2147483647, %v20623_v31  ;;  %v8738_v14 = vand.u32 2147483648, %v20623_v31 }
 0x965   : > { %v8760_v33 = vmul.f32 %v14485_v42, %v8759_v35  ;;  %8836 = vmax.xlane.f32.xlu2 %v8835_v54  ;;  %vm20675_vm13 = vcmp.eq.f32.partialorder %v8781_v50, 8.507059e+37  ;;  %v8784_v55 = vor.u32 1.1754944e-38, %v8783_v36  ;;  %v8859_v15 = vsel %vm8608_vm11, %v20630_v12, 0.0  ;;  %v14498_v12 = vld [vmem:[%s20283_s2 + $0x30] sm:$0xff] }
 0x966   : > { %v8806_v19 = vadd.f32 %v14483_v22, %v8805_v39  ;;  %vm20684_vm0 = vcmp.eq.f32.partialorder %v8736_v59, 8.507059e+37  ;;  %v8739_v2 = vor.u32 1.1754944e-38, %v8738_v14 }
 0x967   : > { %v14487_v45 = vpop.eup %14486  ;;  %v8761_v16 = vadd.f32 %v14485_v42, %v8760_v33 }
 0x968   : > { %v20644_v46 = vpop.xlane.xlu0 %8674  ;;  %v14489_v62 = vpop.eup %14488  ;;  %v8773_v1 = vmul.f32 %v14487_v45, %v20621_v13  ;;  %v8810_v34 = vsel %vm20647_vm10, %v14483_v22, %v8806_v19  ;;  %vm8778_vm14 = vweird.f32 %v14487_v45 }
 0x969   : > { %v20653_v21 = vpop.xlane.xlu2 %8683  ;;  %14490 = vrcp.f32 %v20644_v46  ;;  %v20656_v43 = vpop.xlane.xlu1 %8677  ;;  %v8728_v6 = vmul.f32 %v14489_v62, %v20623_v31  ;;  %v8815_v30 = vsel %vm20634_vm4, %v8814_v7, %v8810_v34  ;;  %v8765_v9 = vsel %vm8764_vm12, %v14485_v42, %v8761_v16  ;;  %vm8779_vm3 = vmor %vm8777_vm8, %vm8778_vm14 }
 0x96a   : > { %14492 = vrcp.f32 %v20653_v21  ;;  %v8774_v18 = vsub.f32 1.0, %v8773_v1  ;;  %v20671_v28 = vmul.f32 %v20591_v37, %v8815_v30  ;;  %v8770_v4 = vsel %vm20638_vm6, %v8769_v58, %v8765_v9 }
 0x96b   : > { %14494 = vrcp.f32 %v20656_v43  ;;  %v8729_v51 = vsub.f32 1.0, %v8728_v6  ;;  %v20680_v52 = vmul.f32 %v20589_v27, %v8770_v4  ;;  %vm8733_vm15 = vweird.f32 %v14489_v62 }
 0x96c   : > { %v8775_v29 = vmul.f32 %v14487_v45, %v8774_v18  ;;  %v8838_v41 = vsel %vm8608_vm11, %v20671_v28, -inf  ;;  %vm8702_vm1 = vweird.f32 %v20644_v46  ;;  %v8706_v22 = vand.u32 2147483647, %v20644_v46  ;;  %vm8734_vm4 = vmor %vm8732_vm9, %vm8733_vm15 }
 0x96d   : > { %v8730_v8 = vmul.f32 %v14489_v62, %v8729_v51  ;;  %8839 = vmax.xlane.f32.xlu0 %v8838_v41  ;;  %v8829_v60 = vsel %vm8608_vm11, %v20680_v52, -inf  ;;  %v8708_v49 = vand.u32 2147483648, %v20644_v46  ;;  %v8751_v3 = vand.u32 2147483647, %v20653_v21  ;;  %v14499_v41 = vld [vmem:[%s20283_s2 + $0x38] sm:$0xff] }
 0x96e   : > { %v8776_v27 = vadd.f32 %v14487_v45, %v8775_v29  ;;  %8830 = vmax.xlane.f32.xlu1 %v8829_v60  ;;  %v8753_v44 = vand.u32 2147483648, %v20653_v21  ;;  %v8723_v11 = vand.u32 2147483648, %v20656_v43  ;;  %v8721_v25 = vand.u32 2147483647, %v20656_v43 }
 0x96f   : > { %v14491_v38 = vpop.eup %14490  ;;  %v8731_v0 = vadd.f32 %v14489_v62, %v8730_v8  ;;  %vm8747_vm9 = vweird.f32 %v20653_v21  ;;  %vm8717_vm10 = vweird.f32 %v20656_v43  ;;  %vm8752_vm15 = vcmp.eq.f32.partialorder %v8751_v3, 8.507059e+37 }
 0x970   : > { %v14493_v61 = vpop.eup %14492  ;;  %v8698_v24 = vmul.f32 %v14491_v38, %v20644_v46  ;;  %v8780_v48 = vsel %vm8779_vm3, %v14487_v45, %v8776_v27  ;;  %vm8703_vm5 = vweird.f32 %v14491_v38  ;;  %v8754_v23 = vor.u32 1.1754944e-38, %v8753_v44  ;;  %v14500_v27 = vld [vmem:[%s20283_s2 + $0x20] sm:$0xff] }
 0x971   : > { %v14495_v42 = vpop.eup %14494  ;;  %v8743_v20 = vmul.f32 %v14493_v61, %v20653_v21  ;;  %v8785_v53 = vsel %vm20675_vm13, %v8784_v55, %v8780_v48  ;;  %v8735_v5 = vsel %vm8734_vm4, %v14489_v62, %v8731_v0  ;;  %vm8748_vm6 = vweird.f32 %v14493_v61  ;;  %vm8704_vm12 = vmor %vm8702_vm1, %vm8703_vm5 }
 0x972   : > { %v8699_v47 = vsub.f32 1.0, %v8698_v24  ;;  %v8713_v13 = vmul.f32 %v14495_v42, %v20656_v43  ;;  %v8786_v10 = vmul.f32 %v20597_v40, %v8785_v53  ;;  %v8740_v56 = vsel %vm20684_vm0, %v8739_v2, %v8735_v5  ;;  %vm8749_vm14 = vmor %vm8747_vm9, %vm8748_vm6  ;;  %v14503_v5 = vld [vmem:[%s20283_s2] sm:$0xff] }
 0x973   : > { %v8744_v57 = vsub.f32 1.0, %v8743_v20  ;;  %v8741_v39 = vmul.f32 %v20599_v26, %v8740_v56  ;;  %vm8718_vm8 = vweird.f32 %v14495_v42  ;;  %v8709_v26 = vor.u32 1.1754944e-38, %v8708_v49  ;;  %v14502_v20 = vld [vmem:[%s20283_s2 + $0x10] sm:$0xff]  ;;  %v14504_v56 = vld [vmem:[%s20283_s2 + $0x18] sm:$0xff] }
 0x974   : > { %v8700_v31 = vmul.f32 %v14491_v38, %v8699_v47  ;;  %v8714_v35 = vsub.f32 1.0, %v8713_v13  ;;  %v8832_v54 = vsel %vm8608_vm11, %v8786_v10, -inf  ;;  %vm8707_vm13 = vcmp.eq.f32.partialorder %v8706_v22, 8.507059e+37  ;;  %vm8719_vm0 = vmor %vm8717_vm10, %vm8718_vm8  ;;  %v14501_v22 = vld [vmem:[%s20283_s2 + $0x28] sm:$0xff] }
 0x975   : > { %v8745_v33 = vmul.f32 %v14493_v61, %v8744_v57  ;;  %8833 = vmax.xlane.f32.xlu2 %v8832_v54  ;;  %v8823_v19 = vsel %vm8608_vm11, %v8741_v39, -inf  ;;  %v8724_v1 = vor.u32 1.1754944e-38, %v8723_v11  ;;  %vm8722_vm3 = vcmp.eq.f32.partialorder %v8721_v25, 8.507059e+37 }
 0x976   : > { %v8715_v7 = vmul.f32 %v14495_v42, %v8714_v35  ;;  %v8701_v40 = vadd.f32 %v14491_v38, %v8700_v31  ;;  %8824 = vmax.xlane.f32.xlu0 %v8823_v19  ;;  %v8853_v51 = vsel %vm8608_vm11, %v20680_v52, 0.0  ;;  %v8856_v4 = vsel %vm8608_vm11, %v8786_v10, 0.0  ;;  %v14505_v35 = vld [vmem:[%s20283_s2 + $0x8] sm:$0xff] }
 0x977   : > { %v8746_v58 = vadd.f32 %v14493_v61, %v8745_v33  ;;  %v8862_v29 = vsel %vm8608_vm11, %v20671_v28, 0.0  ;;  %vm8880_vm1 = vcmask 7168   ;;  %v14606_v28 = vmov 6.0  }
 0x978   : > { %v8705_v45 = vsel %vm8704_vm12, %v14491_v38, %v8701_v40  ;;  %v8716_v16 = vadd.f32 %v14495_v42, %v8715_v7  ;;  %14496 = vrcp.f32 %v14606_v28  ;;  %v13359_v28 = vld [vmem:[%s21083_s15 + $0x60] sm:$0xf0] }
 0x979   : > { %v8710_v50 = vsel %vm8707_vm13, %v8709_v26, %v8705_v45  ;;  %v8750_v62 = vsel %vm8749_vm14, %v14493_v61, %v8746_v58 }
 0x97a   : > { %v8711_v21 = vmul.f32 %v20609_v17, %v8710_v50  ;;  %v8755_v43 = vsel %vm8752_vm15, %v8754_v23, %v8750_v62  ;;  %v8720_v34 = vsel %vm8719_vm0, %v14495_v42, %v8716_v16  ;;  %v14506_v50 = vld [vmem:[%s21153_s9] sm:$0x7]  ;;  %s9263_s9 = scalar_lea.sflag [#allocation3], %s20265_s5 }
 0x97b   : > { %v8756_v46 = vmul.f32 %v20605_v32, %v8755_v43  ;;  %v8725_v36 = vsel %vm8722_vm3, %v8724_v1, %v8720_v34  ;;  %v8847_v32 = vsel %vm8608_vm11, %v8741_v39, 0.0 }
 0x97c   : > { %v8817_v6 = vsel %vm8608_vm11, %v8711_v21, -inf  ;;  %v8726_v59 = vmul.f32 %v20607_v63, %v8725_v36  ;;  %v8841_v30 = vsel %vm8608_vm11, %v8711_v21, 0.0  ;;  %v8917_v63 = vld [vmem:[%s21152_s10] sm:$0x3f] }
 0x97d   : > { %v8826_v14 = vsel %vm8608_vm11, %v8756_v46, -inf  ;;  %8818 = vmax.xlane.f32.xlu2 %v8817_v6  ;;  %v8850_v9 = vsel %vm8608_vm11, %v8756_v46, 0.0  ;;  %v13421_v36 = vld [vmem:[%s21083_s15 + $0xc0] sm:$0xf] }
 0x97e   : > { %8827 = vmax.xlane.f32.xlu1 %v8826_v14  ;;  %v8820_v18 = vsel %vm8608_vm11, %v8726_v59, -inf  ;;  %v8844_v17 = vsel %vm8608_vm11, %v8726_v59, 0.0  ;;  %v14497_v60 = vpop.eup %14496  ;;  %v14399_v6 = vld [vmem:[%s21083_s15 + $0xdc] sm:$0xf0]  ;;  %v14395_v59 = vld [vmem:[%s21083_s15 + $0xc4] sm:$0xf] }
 0x97f   : > { %8821 = vmax.xlane.f32.xlu0 %v8820_v18  ;;  %v8866_v24 = vmul.f32 6.0, %v14497_v60  ;;  %vm8870_vm11 = vweird.f32 %v14497_v60  ;;  %v13422_v14 = vor.u32 %v14399_v6, %v13421_v36  ;;  %v13423_v18 = vld [vmem:[%s21083_s15 + $0xe0] sm:$0xf0]  ;;  %v13341_v36 = vld [vmem:[%s21083_s15 + $0x10] sm:$0xf] }
 0x980   : > { %v14377_v6 = vld [vmem:[%s21083_s15 + $0x2c] sm:$0xf0] }
 0x981   : > { %v8867_v3 = vsub.f32 1.0, %v8866_v24  ;;  %9137 = vmatpush.bf16.msra.mxu3 %v13422_v14 }
 0x983   : > { %v8868_v47 = vmul.f32 %v14497_v60, %v8867_v3  ;;  %v14396_v3 = vld [vmem:[%s21083_s15 + $0xcc] sm:$0xf] }
 0x985   : > { %8842 = vadd.xlane.f32.xlu2 %v8841_v30  ;;  %v8869_v33 = vadd.f32 %v14497_v60, %v8868_v47  ;;  %v13389_v30 = vld [vmem:[%s21083_s15 + $0x80] sm:$0xf]  ;;  %v13437_v47 = vld [vmem:[%s21083_s15 + $0xd0] sm:$0xf] }
 0x987   : > { %8845 = vadd.xlane.f32.xlu0 %v8844_v17  ;;  %v8871_v11 = vsel %vm8870_vm11, %v14497_v60, %v8869_v33  ;;  %v14391_v17 = vld [vmem:[%s21083_s15 + $0x9c] sm:$0xf0] }
 0x98d   : > { %8848 = vadd.xlane.f32.xlu2 %v8847_v32  ;;  %v13426_v32 = vor.u32 %v14395_v59, %v13423_v18  ;;  %v13342_v18 = vor.u32 %v14377_v6, %v13341_v36 }
 0x98f   : > { %8851 = vadd.xlane.f32.xlu0 %v8850_v9  ;;  %v14387_v9 = vld [vmem:[%s21083_s15 + $0x84] sm:$0xf]  ;;  %9150 = vmatpush.bf16.msrb.mxu0 %v13426_v32 }
 0x995   : > { %8854 = vadd.xlane.f32.xlu2 %v8853_v51  ;;  %v13390_v51 = vor.u32 %v14391_v17, %v13389_v30  ;;  %v14381_v30 = vld [vmem:[%s21083_s15 + $0x54] sm:$0xf] }
 0x996   : > { %v13375_v17 = vld [vmem:[%s21083_s15 + $0x70] sm:$0xf0] }
 0x997   : > { %8857 = vadd.xlane.f32.xlu0 %v8856_v4  ;;  %8920 = vperm.xlu1 %14457, %v8917_v63   ;;  %v13391_v63 = vld [vmem:[%s21083_s15 + $0xa0] sm:$0xf0]  ;;  %v13357_v4 = vld [vmem:[%s21083_s15 + $0x40] sm:$0xf]  ;;  %v13378_v32 = vor.u32 %v14381_v30, %v13375_v17 }
 0x998   : > { %9138 = vmatpush.bf16.msra.mxu3 %v13390_v51 }
 0x99d   : > { %8860 = vadd.xlane.f32.xlu2 %v8859_v15  ;;  %v13394_v15 = vor.u32 %v14387_v9, %v13391_v63  ;;  %v14373_v9 = vld [vmem:[%s21083_s15 + $0x14] sm:$0xf] }
 0x99e   : > { %v13343_v63 = vld [vmem:[%s21083_s15 + $0x30] sm:$0xf0] }
 0x99f   : > { %9151 = vmatpush.bf16.msrb.mxu0 %v13394_v15  ;;  %v13346_v51 = vor.u32 %v14373_v9, %v13343_v63  ;;  %v14402_v15 = vld [vmem:[%s21083_s15 + $0xf4] sm:$0xf0] }
 0x9c1   : > { %8863 = vadd.xlane.f32.xlu1 %v8862_v29  ;;  %v14383_v29 = vld [vmem:[%s21083_s15 + $0x5c] sm:$0xf0] }
 0x9d8   : > { %v8837_v52 = vpop.xlane.xlu2 %8836 }
 0x9d9   : > { %8887 = vst.msk [vmem:[%s20745_s21 + $0x30] sm:$0xff] %vm8880_vm1, %v8837_v52  ;;  %v8903_v55 = vmul.f32 %v14498_v12, %v8837_v52  ;;  %v13429_v52 = vld [vmem:[%s21083_s15 + $0xc8] sm:$0xf] }
 0x9da   : > { %v14400_v12 = vld [vmem:[%s21083_s15 + $0xe4] sm:$0xf0] }
 0x9db   : > { %8911 = vst [vmem:[%s20752_s7 + $0x30] sm:$0xff] %v8903_v55 }
 0x9e0   : > { %v8840_v8 = vpop.xlane.xlu0 %8839 }
 0x9e1   : > { %8888 = vst.msk [vmem:[%s20745_s21 + $0x38] sm:$0xff] %vm8880_vm1, %v8840_v8  ;;  %v8904_v37 = vmul.f32 %v14499_v41, %v8840_v8  ;;  %v8831_v38 = vpop.xlane.xlu1 %8830  ;;  %v13430_v8 = vor.u32 %v14400_v12, %v13429_v52  ;;  %v13358_v41 = vor.u32 %v14383_v29, %v13357_v4  ;;  %v13445_v4 = vld [vmem:[%s21083_s15 + $0xd8] sm:$0xf]  ;;  %v14398_v52 = vld [vmem:[%s21083_s15 + $0xdc] sm:$0xf] }
 0x9e2   : > { %8885 = vst.msk [vmem:[%s20745_s21 + $0x20] sm:$0xff] %vm8880_vm1, %v8831_v38  ;;  %v8901_v2 = vmul.f32 %v14500_v27, %v8831_v38  ;;  %v13447_v12 = vld [vmem:[%s21083_s15 + $0xf8] sm:$0xf0] }
 0x9e3   : > { %8912 = vst [vmem:[%s20752_s7 + $0x38] sm:$0xff] %v8904_v37  ;;  %v8916_v61 = vpack.c.bf16 %v8904_v37, %v8903_v55  ;;  %v14379_v55 = vld [vmem:[%s21083_s15 + $0x44] sm:$0xf]  ;;  %9139 = vmatpush.bf16.msra.mxu3 %v13358_v41  ;;  %v13450_v41 = vor.u32 %v14398_v52, %v13447_v12 }
 0x9e4   : > { %8909 = vst [vmem:[%s20752_s7 + $0x20] sm:$0xff] %v8901_v2  ;;  %v13362_v37 = vor.u32 %v14379_v55, %v13359_v28  ;;  %v13446_v28 = vor.u32 %v14402_v15, %v13445_v4 }
 0x9e5   : > { %8927 = vmatpush.bf16.xpose.msra.mxu2 %v8916_v61  ;;  %v14392_v61 = vld [vmem:[%s21083_s15 + $0xa4] sm:$0xf0] }
 0x9e6   : > { %9152 = vmatpush.bf16.msrb.mxu0 %v13362_v37  ;;  %v13413_v37 = vld [vmem:[%s21083_s15 + $0x98] sm:$0xf] }
 0x9e8   : > { %v8834_v0 = vpop.xlane.xlu2 %8833 }
 0x9e9   : > { %8886 = vst.msk [vmem:[%s20745_s21 + $0x28] sm:$0xff] %vm8880_vm1, %v8834_v0  ;;  %v8902_v49 = vmul.f32 %v14501_v22, %v8834_v0  ;;  %v8825_v42 = vpop.xlane.xlu0 %8824  ;;  %v13325_v0 = vld [vmem:[%s21083_s15] sm:$0xf] }
 0x9ea   : > { %8883 = vst.msk [vmem:[%s20745_s21 + $0x10] sm:$0xff] %vm8880_vm1, %v8825_v42  ;;  %v8899_v48 = vmul.f32 %v14502_v20, %v8825_v42  ;;  %v14375_v22 = vld [vmem:[%s21083_s15 + $0x1c] sm:$0xf0]  ;;  %v13327_v20 = vld [vmem:[%s21083_s15 + $0x20] sm:$0xf0] }
 0x9eb   : > { %8910 = vst [vmem:[%s20752_s7 + $0x28] sm:$0xff] %v8902_v49  ;;  %v8915_v44 = vpack.c.bf16 %v8902_v49, %v8901_v2  ;;  %v13397_v2 = vld [vmem:[%s21083_s15 + $0x88] sm:$0xf]  ;;  %v14371_v49 = vld [vmem:[%s21083_s15 + $0x4] sm:$0xf]  ;;  %v13326_v42 = vor.u32 %v14375_v22, %v13325_v0 }
 0x9ec   : > { %8907 = vst [vmem:[%s20752_s7 + $0x10] sm:$0xff] %v8899_v48  ;;  %v13398_v24 = vor.u32 %v14392_v61, %v13397_v2  ;;  %v14386_v0 = vld [vmem:[%s21083_s15 + $0x74] sm:$0xf0]  ;;  %v14382_v22 = vld [vmem:[%s21083_s15 + $0x5c] sm:$0xf] }
 0x9ed   : > { %8928 = vmatpush.bf16.xpose.msra.mxu2 %v8915_v44  ;;  %v13431_v44 = vld [vmem:[%s21083_s15 + $0xe8] sm:$0xf0]  ;;  %9140 = vmatpush.bf16.msra.mxu3 %v13326_v42 }
 0x9f0   : > { %v8819_v13 = vpop.xlane.xlu2 %8818 }
 0x9f1   : > { %v8828_v53 = vpop.xlane.xlu1 %8827  ;;  %8881 = vst.msk [vmem:[%s20745_s21] sm:$0xff] %vm8880_vm1, %v8819_v13  ;;  %v8897_v57 = vmul.f32 %v14503_v5, %v8819_v13  ;;  %v13434_v13 = vor.u32 %v14396_v3, %v13431_v44  ;;  %v13365_v5 = vld [vmem:[%s21083_s15 + $0x48] sm:$0xf]  ;;  %v13349_v3 = vld [vmem:[%s21083_s15 + $0x18] sm:$0xf] }
 0x9f2   : > { %v8822_v10 = vpop.xlane.xlu0 %8821  ;;  %v8900_v31 = vmul.f32 %v14504_v56, %v8828_v53  ;;  %8884 = vst.msk [vmem:[%s20745_s21 + $0x18] sm:$0xff] %vm8880_vm1, %v8828_v53  ;;  %v14401_v53 = vld [vmem:[%s21083_s15 + $0xec] sm:$0xf0]  ;;  %v14378_v44 = vld [vmem:[%s21083_s15 + $0x34] sm:$0xf0] }
 0x9f3   : > { %8882 = vst.msk [vmem:[%s20745_s21 + $0x8] sm:$0xff] %vm8880_vm1, %v8822_v10  ;;  %v8898_v39 = vmul.f32 %v14505_v35, %v8822_v10  ;;  %v13438_v10 = vor.u32 %v14401_v53, %v13437_v47  ;;  %v13399_v35 = vld [vmem:[%s21083_s15 + $0xa8] sm:$0xf0]  ;;  %9176 = vmatpush.bf16.msrb.mxu3 %v13434_v13  ;;  %v14374_v47 = vld [vmem:[%s21083_s15 + $0x1c] sm:$0xf]  ;;  %v13350_v53 = vor.u32 %v14378_v44, %v13349_v3  ;;  %s9307_s21 = sshll.u32 %s20283_s2, 4  ;;  %s9308_s21 = int_to_ptr.vmem [resolvable:$true] %s9307_s21 }
 0x9f4   : > { %8905 = vst [vmem:[%s20752_s7] sm:$0xff] %v8897_v57  ;;  %v8914_v54 = vpack.c.bf16 %v8900_v31, %v8899_v48  ;;  %v13330_v48 = vor.u32 %v14371_v49, %v13327_v20  ;;  %v13383_v49 = vld [vmem:[%s21083_s15 + $0x78] sm:$0xf0] }
 0x9f5   : > { %8906 = vst [vmem:[%s20752_s7 + $0x8] sm:$0xff] %v8898_v39  ;;  %v8913_v26 = vpack.c.bf16 %v8898_v39, %v8897_v57  ;;  %v14384_v57 = vld [vmem:[%s21083_s15 + $0x64] sm:$0xf0]  ;;  %v13405_v39 = vld [vmem:[%s21083_s15 + $0x90] sm:$0xf] }
 0x9f6   : > { %8908 = vst [vmem:[%s20752_s7 + $0x18] sm:$0xff] %v8900_v31  ;;  %8929 = vmatpush.bf16.xpose.msra.mxu2 %v8914_v54  ;;  %9153 = vmatpush.bf16.msrb.mxu0 %v13330_v48  ;;  %v13366_v56 = vor.u32 %v14384_v57, %v13365_v5  ;;  %v14388_v31 = vld [vmem:[%s21083_s15 + $0x8c] sm:$0xf]  ;;  %v14393_v54 = vld [vmem:[%s21083_s15 + $0xac] sm:$0xf0]  ;;  %v13386_v48 = vor.u32 %v14382_v22, %v13383_v49 }
 0x9f7   : > { %v13402_v33 = vor.u32 %v14388_v31, %v13399_v35  ;;  %v13351_v13 = vld [vmem:[%s21083_s15 + $0x38] sm:$0xf0] }
 0x9f8   : > { %v8843_v7 = vpop.xlane.xlu2 %8842  ;;  %v13354_v5 = vor.u32 %v14374_v47, %v13351_v13 }
 0x9f9   : > { %v8872_v19 = vmul.f32 %v8871_v11, %v8843_v7  ;;  %v14376_v7 = vld [vmem:[%s21083_s15 + $0x24] sm:$0xf0]  ;;  %9177 = vmatpush.bf16.msrb.mxu3 %v13402_v33 }
 0x9fa   : > { %v8846_v40 = vpop.xlane.xlu0 %8845  ;;  %9189 = vmatpush.bf16.msra.mxu0 %v13438_v10 }
 0x9fb   : > { %v8873_v25 = vmul.f32 %v8871_v11, %v8846_v40  ;;  %8889 = vst.msk [vmem:[%s20787_s4] sm:$0xff] %vm8880_vm1, %v8872_v19  ;;  %v13406_v19 = vor.u32 %v14393_v54, %v13405_v39 }
 0x9fd   : > { %8890 = vst.msk [vmem:[%s20787_s4 + $0x8] sm:$0xff] %vm8880_vm1, %v8873_v25  ;;  %v14380_v25 = vld [vmem:[%s21083_s15 + $0x4c] sm:$0xf] }
 0x9fe   : > { %8930 = vmatpush.bf16.xpose.msra.mxu2 %v8913_v26  ;;  %v13367_v26 = vld [vmem:[%s21083_s15 + $0x68] sm:$0xf0]  ;;  %9190 = vmatpush.bf16.msra.mxu0 %v13406_v19 }
 0xa00   : > { %v8849_v58 = vpop.xlane.xlu2 %8848 }
 0xa01   : > { %v8874_v45 = vmul.f32 %v8871_v11, %v8849_v58  ;;  %v13373_v58 = vld [vmem:[%s21083_s15 + $0x50] sm:$0xf] }
 0xa02   : > { %v8852_v23 = vpop.xlane.xlu0 %8851 }
 0xa03   : > { %v8875_v16 = vmul.f32 %v8871_v11, %v8852_v23  ;;  %8891 = vst.msk [vmem:[%s20787_s4 + $0x10] sm:$0xff] %vm8880_vm1, %v8874_v45  ;;  %v14385_v45 = vld [vmem:[%s21083_s15 + $0x6c] sm:$0xf0]  ;;  %v14397_v23 = vld [vmem:[%s21083_s15 + $0xd4] sm:$0xf] }
 0xa05   : > { %8892 = vst.msk [vmem:[%s20787_s4 + $0x18] sm:$0xff] %vm8880_vm1, %v8875_v16  ;;  %8931 = vmatmul.bf16.vlgmr.msra.gmra.mxu2 %v14506_v50  ;;  %v13439_v16 = vld [vmem:[%s21083_s15 + $0xf0] sm:$0xf0] }
 0xa06   : > { %9163 = vmatpush.bf16.msrb.mxu2 %v13430_v8  ;;  %v13442_v50 = vor.u32 %v14397_v23, %v13439_v16 }
 0xa08   : > { %v8855_v62 = vpop.xlane.xlu2 %8854 }
 0xa09   : > { %v8876_v1 = vmul.f32 %v8871_v11, %v8855_v62  ;;  %v20848_v38 = vpop.permute.xlu1 %8920  ;;  %v13370_v62 = vor.u32 %v14380_v25, %v13367_v26 }
 0xa0a   : > { %v8858_v21 = vpop.xlane.xlu0 %8857  ;;  %9164 = vmatpush.bf16.msrb.mxu2 %v13398_v24  ;;  %v13381_v24 = vld [vmem:[%s21083_s15 + $0x58] sm:$0xf] }
 0xa0b   : > { %v8877_v43 = vmul.f32 %v8871_v11, %v8858_v21  ;;  %8893 = vst.msk [vmem:[%s20787_s4 + $0x20] sm:$0xff] %vm8880_vm1, %v8876_v1  ;;  %v14389_v1 = vld [vmem:[%s21083_s15 + $0x94] sm:$0xf]  ;;  %9178 = vmatpush.bf16.msrb.mxu3 %v13370_v62  ;;  %v13382_v20 = vor.u32 %v14386_v0, %v13381_v24 }
 0xa0c   : > { %v13407_v21 = vld [vmem:[%s21083_s15 + $0xb0] sm:$0xf0] }
 0xa0d   : > { %8894 = vst.msk [vmem:[%s20787_s4 + $0x28] sm:$0xff] %vm8880_vm1, %v8877_v43  ;;  %v13374_v43 = vor.u32 %v14385_v45, %v13373_v58  ;;  %v13410_v59 = vor.u32 %v14389_v1, %v13407_v21 }
 0xa0e   : > { %9165 = vmatpush.bf16.msrb.mxu2 %v13366_v56 }
 0xa0f   : > { %9191 = vmatpush.bf16.msra.mxu0 %v13374_v43 }
 0xa10   : > { %v8861_v34 = vpop.xlane.xlu2 %8860 }
 0xa11   : > { %v8878_v46 = vmul.f32 %v8871_v11, %v8861_v34  ;;  %v14372_v34 = vld [vmem:[%s21083_s15 + $0xc] sm:$0xf] }
 0xa13   : > { %8895 = vst.msk [vmem:[%s20787_s4 + $0x30] sm:$0xff] %vm8880_vm1, %v8878_v46  ;;  %v13335_v46 = vld [vmem:[%s21083_s15 + $0x28] sm:$0xf0]  ;;  %9192 = vmatpush.bf16.msra.mxu0 %v13342_v18 }
 0xa14   : > { %v13338_v14 = vor.u32 %v14372_v34, %v13335_v46 }
 0xa16   : > { %9179 = vmatpush.bf16.msrb.mxu3 %v13338_v14 }
 0xa34   : > { %v8864_v60 = vpop.xlane.xlu1 %8863 }
 0xa35   : > { %v8879_v27 = vmul.f32 %v8871_v11, %v8864_v60  ;;  %v13333_v11 = vld [vmem:[%s21083_s15 + $0x8] sm:$0xf]  ;;  %v14394_v60 = vld [vmem:[%s21083_s15 + $0xb4] sm:$0xf0] }
 0xa36   : > { %v13334_v40 = vor.u32 %v14376_v7, %v13333_v11  ;;  %v13414_v2 = vor.u32 %v14394_v60, %v13413_v37 }
 0xa37   : > { %8896 = vst.msk [vmem:[%s20787_s4 + $0x38] sm:$0xff] %vm8880_vm1, %v8879_v27  ;;  %v14390_v27 = vld [vmem:[%s21083_s15 + $0x9c] sm:$0xf]  ;;  %s9309_s4 = sshll.u32 %s9306_s30, 4  ;;  %s9310_s4 = int_to_ptr.hbm [resolvable:$true] %s9309_s4 }
 0xa38   : > { %9166 = vmatpush.bf16.msrb.mxu2 %v13334_v40  ;;  %s14521_s0 = sshra.s32 %s9310_s4, 4  ;;  %s14522_s0 = int_to_ptr.hbm [resolvable:$true] %s14521_s0 }
 0xa39   : > { %s14523_s10 = scalar_lea.hbm %s14522_s0, 64  ;;  %p14528_p0 = scmp.lt.s32.totalorder %s14522_s0, %s21170_s1 }
 0xa3a   : > { %p14524_p11 = scmp.ne.s32.totalorder %s14522_s0, %s14523_s10  ;;  %p14529_p1 = scmp.lt.s32.totalorder %s14527_s6, %s14523_s10 }
 0xa3c   : > { %9202 = vmatpush.bf16.msra.mxu2 %v13442_v50  ;;  %p14525_p12 = pnand %p14524_p11, %p14772_p5  ;;  %p14530_p2 = por %p14529_p1, %p14528_p0 }
 0xa3e   : > { %p14526_p13 = pneg %p14525_p12 }
 0xa40   : > { %9203 = vmatpush.bf16.msra.mxu2 %v13410_v59  ;;  %p14531_p3 = pnand %p14530_p2, %p14526_p13 }
 0xa44   : > { %9204 = vmatpush.bf16.msra.mxu2 %v13378_v32 }
 0xa48   : > { %9205 = vmatpush.bf16.msra.mxu2 %v13346_v51 }
 0xa88   : > { %v8932_v29 = vpop.f32.mrf.mxu2 }
 0xa89   : > { %v8933_v55 = vadd.f32 %v8932_v29, %v20848_v38  ;;  %v13415_v38 = vld [vmem:[%s21083_s15 + $0xb8] sm:$0xf0] }
 0xa8a   : > { %v13418_v61 = vor.u32 %v14390_v27, %v13415_v38 }
 0xa8b   : > { %8936 = vst.msk [vmem:[%s796_s11] sm:$0x3f] %vm7927_vm2, %v8933_v55  ;;  %v8937_v8 = vpack.c.bf16 %v8933_v55, %v8933_v55 }
 0xa8d   : > { %13451 = vmatmul.msk.bf16.vlgmr.msra.gmra.mxu3 %vm7953_vm7, %v8937_v8  ;;  %13452 = vmatmul.msk.bf16.vlgmr.msrb.gmra.mxu0 %vm7953_vm7, %v8937_v8 }
 0xa8e   : > { %13453 = vmatmul.msk.bf16.vlgmr.msrb.gmra.mxu2 %vm7953_vm7, %v8937_v8  ;;  %9215 = vmatpush.bf16.msra.mxu3 %v13446_v28 }
 0xa8f   : > { %9228 = vmatpush.bf16.msrb.mxu0 %v13450_v41 }
 0xa90   : > { %v8934_v42 = vpop.f32.mrf.mxu2 }
 0xa92   : > { %9216 = vmatpush.bf16.msra.mxu3 %v13414_v2 }
 0xa93   : > { %9229 = vmatpush.bf16.msrb.mxu0 %v13418_v61 }
 0xa96   : > { %9217 = vmatpush.bf16.msra.mxu3 %v13382_v20 }
 0xa97   : > { %9230 = vmatpush.bf16.msrb.mxu0 %v13386_v48 }
 0xa9a   : > { %9218 = vmatpush.bf16.msra.mxu3 %v13350_v53 }
 0xa9b   : > { %9231 = vmatpush.bf16.msrb.mxu0 %v13354_v5 }
 0xa9d   : > { %13454 = vmatmul.msk.bf16.vlgmr.msrb.gmra.mxu3 %vm7953_vm7, %v8937_v8  ;;  %13455 = vmatmul.msk.bf16.vlgmr.msra.gmra.mxu0 %vm7953_vm7, %v8937_v8 }
 0xa9e   : > { %13456 = vmatmul.msk.bf16.vlgmr.msra.gmra.mxu2 %vm7953_vm7, %v8937_v8 }
 0xaad   : > { %13457 = vmatmul.msk.bf16.vlgmr.msra.gmra.mxu3 %vm7953_vm7, %v8937_v8  ;;  %13458 = vmatmul.msk.bf16.vlgmr.msrb.gmra.mxu0 %vm7953_vm7, %v8937_v8 }
 0xaae   : > { %14534 = shalt.err (!%p14531_p3)
}
 0xaaf   : > { %s14607_s27 = smov 128   ;;  %s14608_s28 = smov 8  }
 0xab0   : > { %14406 = dma.vmem_to_hbm [thread:$0]  (%p14772_p5), %s9308_s21, 1024, %s9310_s4, %s9263_s9, %s14607_s27, %s14607_s27, %s14608_s28  }
 0xab1   : > { %s21171_s11 = sld [smem:[#allocation31_spill]]  ;;  %s9324_s14 = sshll.u32 %s20752_s7, 4  ;;  %s9325_s14 = int_to_ptr.vmem [resolvable:$true] %s9324_s14 }
 0xab2   : > { %s9268_s0 = scalar_lea.sflag [#allocation5], %s20265_s5 }
 0xab7   : > { %s9323_s12 = scalar_lea.hbm %s21171_s11, %s14403_s20  ;;  %s14555_s21 = scalar_lea.hbm %s21171_s11, 128 }
 0xab8   : > { %s9326_s2 = sshll.u32 %s9323_s12, 4  ;;  %s9327_s2 = int_to_ptr.hbm [resolvable:$true] %s9326_s2 }
 0xab9   : > { %s14549_s10 = sshra.s32 %s9327_s2, 4  ;;  %s14550_s10 = int_to_ptr.hbm [resolvable:$true] %s14549_s10 }
 0xaba   : > { %s14551_s6 = scalar_lea.hbm %s14550_s10, 64  ;;  %p14556_p9 = scmp.lt.s32.totalorder %s14550_s10, %s21171_s11 }
 0xabb   : > { %p14552_p4 = scmp.ne.s32.totalorder %s14550_s10, %s14551_s6  ;;  %p14557_p10 = scmp.lt.s32.totalorder %s14555_s21, %s14551_s6 }
 0xabd   : > { %p14553_p7 = pnand %p14552_p4, %p14772_p5  ;;  %p14558_p11 = por %p14557_p10, %p14556_p9 }
 0xabf   : > { %p14554_p8 = pneg %p14553_p7 }
 0xac1   : > { %p14559_p12 = pnand %p14558_p11, %p14554_p8 }
 0xac3   : > { %14562 = shalt.err (!%p14559_p12)
}
 0xac4   : > { %14407 = dma.vmem_to_hbm [thread:$0]  (%p14772_p5), %s9325_s14, 1024, %s9327_s2, %s9268_s0, %s14607_s27, %s14607_s27, %s14608_s28  }
 0xac5   : > { %s21172_s7 = sld [smem:[#allocation29_spill]] }
 0xacb   : > { %s801_s20 = scalar_lea.vmem %s21172_s7, %s20563_s8 }
 0xb0a   : > { %v9155_v57 = vpop.f32.mrf.mxu0 }
 0xb0b   : > { %9238 = vst [vmem:[%s801_s20 + $0x8] sm:$0x3f] %v9155_v57 }
 0xb10   : > { %v9142_v10 = vpop.f32.mrf.mxu3 }
 0xb11   : > { %9237 = vst [vmem:[%s801_s20] sm:$0x3f] %v9142_v10  ;;  %v9168_v56 = vpop.f32.mrf.mxu2 }
 0xb12   : > { %v9157_v31 = vpop.f32.mrf.mxu0  ;;  %9239 = vst [vmem:[%s801_s20 + $0x10] sm:$0x3f] %v9168_v56 }
 0xb18   : > { %v9144_v35 = vpop.f32.mrf.mxu3 }
 0xb19   : > { %v9170_v39 = vpop.f32.mrf.mxu2 }
 0xb1a   : > { %v9194_v33 = vpop.f32.mrf.mxu0 }
 0xb1b   : > { %9241 = vst [vmem:[%s801_s20 + $0x20] sm:$0x3f] %v9194_v33 }
 0xb20   : > { %v9181_v54 = vpop.f32.mrf.mxu3 }
 0xb21   : > { %9240 = vst [vmem:[%s801_s20 + $0x18] sm:$0x3f] %v9181_v54  ;;  %v9207_v11 = vpop.f32.mrf.mxu2 }
 0xb22   : > { %v9196_v7 = vpop.f32.mrf.mxu0  ;;  %9242 = vst [vmem:[%s801_s20 + $0x28] sm:$0x3f] %v9207_v11 }
 0xb28   : > { %v9183_v19 = vpop.f32.mrf.mxu3 }
 0xb29   : > { %v9209_v40 = vpop.f32.mrf.mxu2 }
 0xb2a   : > { %v9233_v25 = vpop.f32.mrf.mxu0 }
 0xb2b   : > { %9244 = vst [vmem:[%s801_s20 + $0x38] sm:$0x3f] %v9233_v25 }
 0xb30   : > { %v9220_v26 = vpop.f32.mrf.mxu3 }
 0xb31   : > { %9243 = vst [vmem:[%s801_s20 + $0x30] sm:$0x3f] %v9220_v26 }
 0xb32   : > { %v9235_v58 = vpop.f32.mrf.mxu0 }
 0xb38   : > { %v9222_v45 = vpop.f32.mrf.mxu3 }
 0xb39 PF: > { %s21173_s14 = sld [smem:[#allocation10_spill]] }
 0xb3a   : > { %s21174_s3 = sld [smem:[#allocation8_spill]] }
 0xb3f   : > { %p14417_p5 = scmp.ge.s32.totalorder %s21173_s14, 2 }
 0xb40   : > { %s9379_s1 = sand.u32 1, %s21174_s3  }
 0xb41   : > { %p14411_p13 = pnand %p14417_p5, %p14776_p6  ;;  %s9380_s27 = scalar_lea.sflag [#allocation3], %s9379_s1 }
 0xb43   : > { %p14412_p0 = pneg %p14411_p13 }
 0xb45   : > { %14580 = dma.done.wait (%p14412_p0), %s9380_s27, 1024  }
 0xb46   : > { %14582 = vsyncadd (%p14412_p0), %s9380_s27, 4294966272  ;;  %s9390_s28 = scalar_lea.sflag [#allocation5], %s9379_s1 }
 0xb47   : > { %14584 = dma.done.wait (%p14412_p0), %s9390_s28, 1024  }
 0xb48   : > { %14586 = vsyncadd (%p14412_p0), %s9390_s28, 4294966272  ;;  %s21176_s28 = sld [smem:[#allocation11_spill]]  ;;  %s21179_s5 = smov %s14593_s26 }
 0xb49   : > { %s21177_s30 = sld [smem:[#allocation9_spill]] }
 0xb4a   : > { %s21178_s27 = sld [smem:[#allocation12_spill]] }
 0xb4e   : > { %p38_p1 = scmp.ge.s32.totalorder %s21176_s28, 4  }
 0xb4f   : > { %s21180_s26 = smov %s21177_s30 }
 0xb50   :  { %40 = sbr.rel (!%p38_p1) target bundleno = 24 (0x18), region = 228 }
 0xb55   :  { %9420 = vsyncpa [#allocation3], 1 }
 0xb56   :  { %9422 = vsyncpa [#allocation3 + $0x1], 1 }
 0xb57   :  { %9423 = vsyncpa [#allocation5], 1 }
 0xb58   :  { %9425 = vsyncpa [#allocation5 + $0x1], 1 }

</bundles_post_ra>
